<compile_context>
chip_gen: v7x
topology: tpu7x:2x2x1
jax: 0.10.0
libtpu: 0.0.40
codegen_flags: <defaults>
</compile_context>

<pallas_src>
import functools

import jax
import jax.numpy as jnp
from jax import lax
from jax.experimental import pallas as pl
from jax.experimental.pallas import tpu as pltpu

EPS = 1e-5
_LANES = 128


def _round_up(x, m):
    return (x + m - 1) // m * m


# --------------------------------------------------------------------------------------
# Generation-aware VMEM budget
# --------------------------------------------------------------------------------------
def _tpu_vmem_capacity_bytes():
    try:
        return int(pltpu.get_tpu_info().vmem_capacity_bytes)
    except Exception:
        return 64 * 1024 * 1024          # conservative (v7x) fallback


_VMEM_CAP = _tpu_vmem_capacity_bytes()
_VMEM_LIMIT = int(_VMEM_CAP * 3 // 4)    # ~48 MiB on v7x, ~96 MiB on v5e/v6e
_STEP_BUDGET = max(_VMEM_CAP // 5, 4 * 1024 * 1024)   # resident bytes per grid step


def _pick_row_tile(H, W, ci, co, in_bytes, budget):
    """Largest divisor of H whose per-step working set fits the budget."""
    per_row = W * (2 * ci * in_bytes     # x main block (double buffered)
                   + ci * 2              # bf16 xpad row
                   + 2 * co * 2          # bf16 out block (double buffered)
                   + 2 * co * 4          # f32 accumulator (+ squared temp)
                   + ci * 2              # window / patch column temp
                   + co * 2)             # conv1 im2col patch row (K padded to 128)
    fixed = (4 * (W + 2) * ci * max(in_bytes, 2)   # halo rows + xpad border
             + 2 * 9 * ci * co * 2                 # resident bf16 weights (dbuf)
             + (2 << 20))                          # scale/shift + misc headroom
    th = int(max(1, min(H, (budget - fixed) // max(per_row, 1))))
    while H % th:
        th -= 1
    return th


# --------------------------------------------------------------------------------------
# Kernels
# --------------------------------------------------------------------------------------
def _conv3x3_kernel(*refs, fused: bool, flat_k: bool):
    """3x3 'same' conv of one (TH, W) row tile of one batch sample on the MXU.

    fused:  apply a per-channel affine + ReLU (BatchNorm with precomputed scale/shift)
            to the *input* while filling the haloed VMEM tile (used for conv2).
    flat_k: small-Cin path (conv1): im2col with K = 9*Cin padded to 128 and a single
            aligned matmul.  Otherwise: 9 accumulating per-tap matmuls (no patch).

    Also emits per-tile per-channel (sum, sum^2) of the f32 conv output so the wrapper
    can form the global training-mode BatchNorm statistics of the NEXT normalization.
    """
    x_ref, top_ref, bot_ref = refs[0:3]
    idx = 3
    if fused:
        scale_ref, shift_ref = refs[3:5]
        idx = 5
    w_ref = refs[idx]
    out_ref, stats_ref = refs[idx + 1:idx + 3]
    xpad_ref = refs[idx + 3]
    patch_ref = refs[idx + 4] if flat_k else None

    TH, W, Ci = x_ref.shape
    Wp = W + 2
    Co = out_ref.shape[-1]
    M = TH * W
    cdt = xpad_ref.dtype                                   # bf16 compute operands

    def transform(v):
        # Fused BN1 + ReLU (f32 math) + cast to the bf16 matmul operand dtype.
        if fused:
            v = jnp.maximum(v.astype(jnp.float32) * scale_ref[0] + shift_ref[0], 0.0)
        return v.astype(cdt)

    # ---- build the haloed tile in VMEM; only the thin border is zeroed ----
    zcol = jnp.zeros((TH + 2, 1, Ci), cdt)
    xpad_ref[:, 0:1, :] = zcol                             # left zero column
    xpad_ref[:, Wp - 1:Wp, :] = zcol                       # right zero column
    xpad_ref[1:TH + 1, 1:W + 1, :] = transform(x_ref[...])             # interior rows
    xpad_ref[0:1, 1:W + 1, :] = transform(top_ref[...])                # top halo row
    xpad_ref[TH + 1:TH + 2, 1:W + 1, :] = transform(bot_ref[...])      # bottom halo row

    zrow = jnp.zeros((1, Wp, Ci), cdt)

    @pl.when(pl.program_id(1) == 0)                        # image top boundary
    def _():
        xpad_ref[0:1, :, :] = zrow

    @pl.when(pl.program_id(1) == pl.num_programs(1) - 1)   # image bottom boundary
    def _():
        xpad_ref[TH + 1:TH + 2, :, :] = zrow

    # ---- 3x3 conv on the MXU, f32 accumulation ----
    def window(t):
        kh, kw = divmod(t, 3)
        return xpad_ref[kh:kh + TH, kw:kw + W, :].reshape(M, Ci)

    if flat_k:
        # conv1-style: K = 9*Ci real columns inside a 128-wide patch, one aligned matmul.
        K = 9 * Ci
        Kp = w_ref.shape[0]
        if Kp > K:
            patch_ref[:, K:] = jnp.zeros((M, Kp - K), cdt)
        for t in range(9):
            patch_ref[:, t * Ci:(t + 1) * Ci] = window(t)
        acc = jnp.dot(patch_ref[...], w_ref[...], preferred_element_type=jnp.float32)
    else:
        # conv2-style: 9 accumulating per-tap matmuls, no im2col patch scratch.
        acc = jnp.zeros((M, Co), jnp.float32)
        for t in range(9):
            acc = acc + jnp.dot(window(t), w_ref[t],
                                preferred_element_type=jnp.float32)

    out_ref[...] = acc.reshape(TH, W, Co).astype(out_ref.dtype)        # bf16 intermediate

    # Per-tile per-channel (sum, sum^2) from the f32 accumulator (before the bf16
    # downcast).  axis-0 reduction is done on the MXU, which has slack here.
    ones = jnp.ones((1, M), jnp.float32)
    stats_ref[0:1, :] = jnp.dot(ones, acc, preferred_element_type=jnp.float32)
    stats_ref[1:2, :] = jnp.dot(ones, acc * acc, preferred_element_type=jnp.float32)


def _bn_relu_kernel(x_ref, scale_ref, shift_ref, out_ref):
    out_ref[...] = jnp.maximum(
        x_ref[...].astype(jnp.float32) * scale_ref[0] + shift_ref[0], 0.0)


# --------------------------------------------------------------------------------------
# pallas_call wrappers
# --------------------------------------------------------------------------------------
def _conv3x3(x, w, scale=None, shift=None):
    """x: (N,H,W,Ci); w: (128,Cpo) bf16 (flat-K conv1) or (9,Ci,Cpo) bf16 (per-tap)."""
    N, H, W, Ci = x.shape
    fused = scale is not None
    flat_k = (w.ndim == 2)
    Cpo = w.shape[-1]
    in_bytes = jnp.dtype(x.dtype).itemsize

    TH = _pick_row_tile(H, W, Ci, Cpo, in_bytes, _STEP_BUDGET)
    n_th = H // TH
    M = TH * W

    # Main rows of the tile + clamped 1-row halos above/below (boundary rows are
    # re-zeroed in the kernel), all read straight from the un-padded HBM array.
    in_specs = [
        pl.BlockSpec((None, TH, W, Ci), lambda n, j: (n, j, 0, 0)),
        pl.BlockSpec((None, 1, W, Ci),
                     lambda n, j: (n, jnp.maximum(j * TH - 1, 0), 0, 0)),
        pl.BlockSpec((None, 1, W, Ci),
                     lambda n, j: (n, jnp.minimum((j + 1) * TH, H - 1), 0, 0)),
    ]
    args = [x, x, x]
    if fused:
        in_specs += [pl.BlockSpec((1, Cpo), lambda n, j: (0, 0)),
                     pl.BlockSpec((1, Cpo), lambda n, j: (0, 0))]
        args += [scale, shift]
    in_specs.append(pl.BlockSpec(w.shape, lambda n, j: (0,) * w.ndim))  # resident weights
    args.append(w)

    scratch = [pltpu.VMEM((TH + 2, W + 2, Ci), jnp.bfloat16)]           # haloed bf16 tile
    if flat_k:
        scratch.append(pltpu.VMEM((M, w.shape[0]), jnp.bfloat16))       # small im2col patch

    return pl.pallas_call(
        functools.partial(_conv3x3_kernel, fused=fused, flat_k=flat_k),
        grid=(N, n_th),
        in_specs=in_specs,
        out_specs=(pl.BlockSpec((None, TH, W, Cpo), lambda n, j: (n, j, 0, 0)),
                   pl.BlockSpec((None, None, 2, Cpo), lambda n, j: (n, j, 0, 0))),
        out_shape=(jax.ShapeDtypeStruct((N, H, W, Cpo), jnp.bfloat16),   # bf16 intermediate
                   jax.ShapeDtypeStruct((N, n_th, 2, Cpo), jnp.float32)),
        scratch_shapes=scratch,
        compiler_params=pltpu.CompilerParams(
            dimension_semantics=("parallel", "parallel"),
            vmem_limit_bytes=_VMEM_LIMIT),
    )(*args)


_BN_ROWS = 1024   # >=512 rows/step hits the HBM-roofline sweet spot


def _bn_relu(x2d, scale, shift):
    """Flat row-blocked BN+ReLU: x2d (T, C) bf16 -> (T, C) f32."""
    T, C = x2d.shape
    R = min(_BN_ROWS, _round_up(T, 8))
    return pl.pallas_call(
        _bn_relu_kernel,
        grid=(pl.cdiv(T, R),),
        in_specs=[pl.BlockSpec((R, C), lambda i: (i, 0)),
                  pl.BlockSpec((1, C), lambda i: (0, 0)),
                  pl.BlockSpec((1, C), lambda i: (0, 0))],
        out_specs=pl.BlockSpec((R, C), lambda i: (i, 0)),
        out_shape=jax.ShapeDtypeStruct((T, C), jnp.float32),
        compiler_params=pltpu.CompilerParams(
            dimension_semantics=("parallel",),
            vmem_limit_bytes=_VMEM_LIMIT),
    )(x2d, scale, shift)


# --------------------------------------------------------------------------------------
# JAX glue (tiny per-channel math) + public forward
# --------------------------------------------------------------------------------------
def _bn_affine(stats, gamma_p, beta_p, count):
    """Per-channel scale/shift for training-mode BN from (N, n_tiles, 2, C) partial sums."""
    s = jnp.sum(stats, axis=(0, 1))                        # (2, C)
    mean = s[0] / count
    var = jnp.maximum(s[1] / count - mean * mean, 0.0)     # biased variance
    scale = gamma_p * lax.rsqrt(var + EPS)
    shift = beta_p - mean * scale
    return scale[None, :], shift[None, :]


def _pad_last_to(a, c):
    pad = c - a.shape[-1]
    if pad == 0:
        return a
    return jnp.pad(a, [(0, 0)] * (a.ndim - 1) + [(0, pad)])


def _prep_conv_weight(w, cpi, cpo):
    """(3,3,ci,co) HWIO -> bf16 MXU operand; small-Cin convs get a K-padded 2-D layout."""
    ci, co = w.shape[2], w.shape[3]
    w = jnp.pad(w, ((0, 0), (0, 0), (0, cpi - ci), (0, cpo - co))).astype(jnp.bfloat16)
    k = 9 * cpi
    if k <= _LANES:
        # Pad the im2col K dimension (9*Cin) up to one full lane group instead of
        # padding Cin to 128 (avoids ~9x wasted MXU K-work for conv1).
        return jnp.pad(w.reshape(k, cpo), ((0, _LANES - k), (0, 0)))
    return w.reshape(9, cpi, cpo)                          # per-tap operands for conv2


@jax.jit
def inconv_forward(x_nchw, params):
    """inconv.forward — NCHW float32 in/out, training-mode BatchNorm (batch statistics)."""
    x = jnp.transpose(x_nchw, (0, 2, 3, 1)).astype(jnp.float32)        # NCHW -> NHWC
    N, H, W, Cin = x.shape
    Cout = params["w1"].shape[-1]
    Cpo = _round_up(Cout, _LANES)
    count = float(N * H * W)

    w1 = _prep_conv_weight(params["w1"], Cin, Cpo)
    w2 = _prep_conv_weight(params["w2"], Cpo, Cpo)
    g1 = _pad_last_to(params["g1"].reshape(-1), Cpo)
    be1 = _pad_last_to(params["beta1"].reshape(-1), Cpo)
    g2 = _pad_last_to(params["g2"].reshape(-1), Cpo)
    be2 = _pad_last_to(params["beta2"].reshape(-1), Cpo)
    # NOTE: conv biases b1/b2 are intentionally dropped in the kernel path — training-mode
    # BN subtracts the per-channel batch mean right after each conv, so a constant
    # per-channel bias cancels exactly.  (Would be WRONG for eval-mode running-stats BN.)

    conv1, stats1 = _conv3x3(x, w1)                        # conv1 (bf16) + partial stats
    scale1, shift1 = _bn_affine(stats1, g1, be1, count)    # tiny per-channel glue
    conv2, stats2 = _conv3x3(conv1, w2, scale1, shift1)    # BN1+ReLU fused into conv2 fill
    scale2, shift2 = _bn_affine(stats2, g2, be2, count)
    y = _bn_relu(conv2.reshape(N * H * W, Cpo), scale2, shift2)        # BN2 + ReLU (f32)
    y = y.reshape(N, H, W, Cpo)[..., :Cout]

    return jnp.transpose(y, (0, 3, 1, 2))                  # NHWC -> NCHW


# --------------------------------------------------------------------------------------
# Parameters, pure-JAX reference, self-test
# --------------------------------------------------------------------------------------
def init_inconv_params(key, in_channels, out_channels):
    """Deterministic synthetic init matching the shapes of inconv(in_channels, out_channels)."""
    ks = jax.random.split(key, 8)
    w1 = 0.1 * jax.random.normal(ks[0], (3, 3, in_channels, out_channels), jnp.float32)
    b1 = 0.05 * jax.random.normal(ks[1], (1, out_channels), jnp.float32)
    g1 = 1.0 + 0.1 * jax.random.normal(ks[2], (1, out_channels), jnp.float32)
    be1 = 0.1 * jax.random.normal(ks[3], (1, out_channels), jnp.float32)
    w2 = 0.1 * jax.random.normal(ks[4], (3, 3, out_channels, out_channels), jnp.float32)
    b2 = 0.05 * jax.random.normal(ks[5], (1, out_channels), jnp.float32)
    g2 = 1.0 + 0.1 * jax.random.normal(ks[6], (1, out_channels), jnp.float32)
    be2 = 0.1 * jax.random.normal(ks[7], (1, out_channels), jnp.float32)
    return dict(w1=w1, b1=b1, g1=g1, beta1=be1, w2=w2, b2=b2, g2=g2, beta2=be2)


def _reference_forward(x_nchw, p):
    """Pure-JAX f32 reference (XLA conv, includes the conv biases)."""
    def conv(x, w, b):
        y = lax.conv_general_dilated(x, w, (1, 1), ((1, 1), (1, 1)),
                                     dimension_numbers=("NHWC", "HWIO", "NHWC"))
        return y + b.reshape(1, 1, 1, -1)

    def bn_relu(y, g, be):
        mean = jnp.mean(y, axis=(0, 1, 2), keepdims=True)
        var = jnp.mean((y - mean) ** 2, axis=(0, 1, 2), keepdims=True)
        z = (y - mean) * lax.rsqrt(var + EPS) * g.reshape(1, 1, 1, -1) + be.reshape(1, 1, 1, -1)
        return jnp.maximum(z, 0.0)

    x = jnp.transpose(x_nchw, (0, 2, 3, 1)).astype(jnp.float32)
    y = bn_relu(conv(x, p["w1"], p["b1"]), p["g1"], p["beta1"])
    y = bn_relu(conv(y, p["w2"], p["b2"]), p["g2"], p["beta2"])
    return jnp.transpose(y, (0, 3, 1, 2))


if __name__ == "__main__":
    key = jax.random.PRNGKey(0)
    k_x, k_p = jax.random.split(key)

    N, Cin, H, W = 2, 4, 16, 16
    Cout = 8

    x = jax.random.normal(k_x, (N, Cin, H, W), jnp.float32)            # NCHW, like PyTorch
    params = init_inconv_params(k_p, Cin, Cout)

    out = jax.block_until_ready(inconv_forward(x, params))
    assert out.shape == (N, Cout, H, W), out.shape

    ref = jax.block_until_ready(_reference_forward(x, params))
    max_err = float(jnp.max(jnp.abs(out - ref)))
    # bf16 MXU operands + bf16-stored intermediates (f32 accumulation, f32 BN statistics
    # and f32 BN/ReLU math) -> small element-wise deviation vs. the pure-f32 reference.
    assert jnp.allclose(out, ref, atol=5e-2, rtol=5e-2), max_err

    print("KERNEL_OK")
</pallas_src>

<mosaic_0001>
module attributes {stable_mosaic.version = 11 : i64} {
  func.func @_conv3x3_kernel(%arg0: i32, %arg1: i32, %arg2: memref<1x16x16x4xf32, #tpu.memory_space<vmem>>, %arg3: memref<1x1x16x4xf32, #tpu.memory_space<vmem>>, %arg4: memref<1x1x16x4xf32, #tpu.memory_space<vmem>>, %arg5: memref<128x128xbf16, #tpu.memory_space<vmem>>, %arg6: memref<1x16x16x128xbf16, #tpu.memory_space<vmem>>, %arg7: memref<1x1x2x128xf32, #tpu.memory_space<vmem>>, %arg8: memref<18x18x4xbf16, #tpu.memory_space<vmem>>, %arg9: memref<256x128xbf16, #tpu.memory_space<vmem>>) attributes {dimension_semantics = [#tpu.dimension_semantics<parallel>, #tpu.dimension_semantics<parallel>], iteration_bounds = array<i64: 2, 1>, scalar_prefetch = 0 : i64, scratch_operands = 2 : i64, tpu.core_type = #tpu.core_type<tc>, window_params = [{transform_indices = @transform_0, window_bounds = array<i64: 1, 16, 16, 4>}, {transform_indices = @transform_1, window_bounds = array<i64: 1, 1, 16, 4>}, {transform_indices = @transform_2, window_bounds = array<i64: 1, 1, 16, 4>}, {pipeline_mode = #tpu.pipeline_mode<synchronous>, transform_indices = @transform_3, window_bounds = array<i64: 128, 128>}, {transform_indices = @transform_4, window_bounds = array<i64: 1, 16, 16, 128>}, {transform_indices = @transform_5, window_bounds = array<i64: 1, 1, 2, 128>}]} {
    %cst = arith.constant 0.000000e+00 : bf16
    %0 = vector.broadcast %cst : bf16 to vector<18x1x4xbf16>
    %c0 = arith.constant 0 : index
    %c0_0 = arith.constant 0 : index
    %c0_1 = arith.constant 0 : index
    %1 = vector.load %arg8[%c0, %c0_0, %c0_1] : memref<18x18x4xbf16, #tpu.memory_space<vmem>>, vector<18x1x4xbf16>
    tpu.vector_store %arg8[%c0, %c0_0, %c0_1], %0 {strides = array<i32>} : memref<18x18x4xbf16, #tpu.memory_space<vmem>>, vector<18x1x4xbf16>,
    %c0_2 = arith.constant 0 : index
    %c17 = arith.constant 17 : index
    %c0_3 = arith.constant 0 : index
    %2 = vector.load %arg8[%c0_2, %c17, %c0_3] : memref<18x18x4xbf16, #tpu.memory_space<vmem>>, vector<18x1x4xbf16>
    tpu.vector_store %arg8[%c0_2, %c17, %c0_3], %0 {strides = array<i32>} : memref<18x18x4xbf16, #tpu.memory_space<vmem>>, vector<18x1x4xbf16>,
    %c0_4 = arith.constant 0 : index
    %c0_5 = arith.constant 0 : index
    %c0_6 = arith.constant 0 : index
    %c0_7 = arith.constant 0 : index
    %3 = vector.load %arg2[%c0_4, %c0_5, %c0_6, %c0_7] : memref<1x16x16x4xf32, #tpu.memory_space<vmem>>, vector<1x16x16x4xf32>
    %4 = vector.shape_cast %3 : vector<1x16x16x4xf32> to vector<16x16x4xf32>
    %5 = arith.truncf %4 : vector<16x16x4xf32> to vector<16x16x4xbf16>
    %c1 = arith.constant 1 : index
    %c1_8 = arith.constant 1 : index
    %c0_9 = arith.constant 0 : index
    %6 = vector.load %arg8[%c1, %c1_8, %c0_9] : memref<18x18x4xbf16, #tpu.memory_space<vmem>>, vector<16x16x4xbf16>
    tpu.vector_store %arg8[%c1, %c1_8, %c0_9], %5 {strides = array<i32>} : memref<18x18x4xbf16, #tpu.memory_space<vmem>>, vector<16x16x4xbf16>,
    %c0_10 = arith.constant 0 : index
    %c0_11 = arith.constant 0 : index
    %c0_12 = arith.constant 0 : index
    %c0_13 = arith.constant 0 : index
    %7 = vector.load %arg3[%c0_10, %c0_11, %c0_12, %c0_13] : memref<1x1x16x4xf32, #tpu.memory_space<vmem>>, vector<1x1x16x4xf32>
    %8 = vector.shape_cast %7 : vector<1x1x16x4xf32> to vector<1x16x4xf32>
    %9 = arith.truncf %8 : vector<1x16x4xf32> to vector<1x16x4xbf16>
    %c0_14 = arith.constant 0 : index
    %c1_15 = arith.constant 1 : index
    %c0_16 = arith.constant 0 : index
    %10 = vector.load %arg8[%c0_14, %c1_15, %c0_16] : memref<18x18x4xbf16, #tpu.memory_space<vmem>>, vector<1x16x4xbf16>
    tpu.vector_store %arg8[%c0_14, %c1_15, %c0_16], %9 {strides = array<i32>} : memref<18x18x4xbf16, #tpu.memory_space<vmem>>, vector<1x16x4xbf16>,
    %c0_17 = arith.constant 0 : index
    %c0_18 = arith.constant 0 : index
    %c0_19 = arith.constant 0 : index
    %c0_20 = arith.constant 0 : index
    %11 = vector.load %arg4[%c0_17, %c0_18, %c0_19, %c0_20] : memref<1x1x16x4xf32, #tpu.memory_space<vmem>>, vector<1x1x16x4xf32>
    %12 = vector.shape_cast %11 : vector<1x1x16x4xf32> to vector<1x16x4xf32>
    %13 = arith.truncf %12 : vector<1x16x4xf32> to vector<1x16x4xbf16>
    %c17_21 = arith.constant 17 : index
    %c1_22 = arith.constant 1 : index
    %c0_23 = arith.constant 0 : index
    %14 = vector.load %arg8[%c17_21, %c1_22, %c0_23] : memref<18x18x4xbf16, #tpu.memory_space<vmem>>, vector<1x16x4xbf16>
    tpu.vector_store %arg8[%c17_21, %c1_22, %c0_23], %13 {strides = array<i32>} : memref<18x18x4xbf16, #tpu.memory_space<vmem>>, vector<1x16x4xbf16>,
    %cst_24 = arith.constant 0.000000e+00 : bf16
    %15 = vector.broadcast %cst_24 : bf16 to vector<1x18x4xbf16>
    %c0_i32 = arith.constant 0 : i32
    %16 = arith.cmpi eq, %arg1, %c0_i32 : i32
    %17 = arith.extui %16 : i1 to i32
    %c0_i32_25 = arith.constant 0 : i32
    %18 = arith.cmpi ne, %17, %c0_i32_25 : i32
    scf.if %18 {
      %c0_86 = arith.constant 0 : index
      %c0_87 = arith.constant 0 : index
      %c0_88 = arith.constant 0 : index
      %69 = vector.load %arg8[%c0_86, %c0_87, %c0_88] : memref<18x18x4xbf16, #tpu.memory_space<vmem>>, vector<1x18x4xbf16>
      tpu.vector_store %arg8[%c0_86, %c0_87, %c0_88], %15 {strides = array<i32>} : memref<18x18x4xbf16, #tpu.memory_space<vmem>>, vector<1x18x4xbf16>,
    } else {
    }
    %c0_i32_26 = arith.constant 0 : i32
    %19 = arith.cmpi eq, %arg1, %c0_i32_26 : i32
    %20 = arith.extui %19 : i1 to i32
    %c0_i32_27 = arith.constant 0 : i32
    %21 = arith.cmpi ne, %20, %c0_i32_27 : i32
    scf.if %21 {
      %c17_86 = arith.constant 17 : index
      %c0_87 = arith.constant 0 : index
      %c0_88 = arith.constant 0 : index
      %69 = vector.load %arg8[%c17_86, %c0_87, %c0_88] : memref<18x18x4xbf16, #tpu.memory_space<vmem>>, vector<1x18x4xbf16>
      tpu.vector_store %arg8[%c17_86, %c0_87, %c0_88], %15 {strides = array<i32>} : memref<18x18x4xbf16, #tpu.memory_space<vmem>>, vector<1x18x4xbf16>,
    } else {
    }
    %cst_28 = arith.constant 0.000000e+00 : bf16
    %22 = vector.broadcast %cst_28 : bf16 to vector<256x92xbf16>
    %c0_29 = arith.constant 0 : index
    %c36 = arith.constant 36 : index
    %23 = vector.load %arg9[%c0_29, %c36] : memref<256x128xbf16, #tpu.memory_space<vmem>>, vector<256x92xbf16>
    tpu.vector_store %arg9[%c0_29, %c36], %22 {strides = array<i32>} : memref<256x128xbf16, #tpu.memory_space<vmem>>, vector<256x92xbf16>,
    %c0_30 = arith.constant 0 : index
    %c0_31 = arith.constant 0 : index
    %c0_32 = arith.constant 0 : index
    %24 = vector.load %arg8[%c0_30, %c0_31, %c0_32] : memref<18x18x4xbf16, #tpu.memory_space<vmem>>, vector<16x16x4xbf16>
    %25 = vector.shape_cast %24 : vector<16x16x4xbf16> to vector<256x4xbf16>
    %c0_33 = arith.constant 0 : index
    %c0_34 = arith.constant 0 : index
    %26 = vector.load %arg9[%c0_33, %c0_34] : memref<256x128xbf16, #tpu.memory_space<vmem>>, vector<256x4xbf16>
    tpu.vector_store %arg9[%c0_33, %c0_34], %25 {strides = array<i32>} : memref<256x128xbf16, #tpu.memory_space<vmem>>, vector<256x4xbf16>,
    %c0_35 = arith.constant 0 : index
    %c1_36 = arith.constant 1 : index
    %c0_37 = arith.constant 0 : index
    %27 = vector.load %arg8[%c0_35, %c1_36, %c0_37] : memref<18x18x4xbf16, #tpu.memory_space<vmem>>, vector<16x16x4xbf16>
    %28 = vector.shape_cast %27 : vector<16x16x4xbf16> to vector<256x4xbf16>
    %c0_38 = arith.constant 0 : index
    %c4 = arith.constant 4 : index
    %29 = vector.load %arg9[%c0_38, %c4] : memref<256x128xbf16, #tpu.memory_space<vmem>>, vector<256x4xbf16>
    tpu.vector_store %arg9[%c0_38, %c4], %28 {strides = array<i32>} : memref<256x128xbf16, #tpu.memory_space<vmem>>, vector<256x4xbf16>,
    %c0_39 = arith.constant 0 : index
    %c2 = arith.constant 2 : index
    %c0_40 = arith.constant 0 : index
    %30 = vector.load %arg8[%c0_39, %c2, %c0_40] : memref<18x18x4xbf16, #tpu.memory_space<vmem>>, vector<16x16x4xbf16>
    %31 = vector.shape_cast %30 : vector<16x16x4xbf16> to vector<256x4xbf16>
    %c0_41 = arith.constant 0 : index
    %c8 = arith.constant 8 : index
    %32 = vector.load %arg9[%c0_41, %c8] : memref<256x128xbf16, #tpu.memory_space<vmem>>, vector<256x4xbf16>
    tpu.vector_store %arg9[%c0_41, %c8], %31 {strides = array<i32>} : memref<256x128xbf16, #tpu.memory_space<vmem>>, vector<256x4xbf16>,
    %c1_42 = arith.constant 1 : index
    %c0_43 = arith.constant 0 : index
    %c0_44 = arith.constant 0 : index
    %33 = vector.load %arg8[%c1_42, %c0_43, %c0_44] : memref<18x18x4xbf16, #tpu.memory_space<vmem>>, vector<16x16x4xbf16>
    %34 = vector.shape_cast %33 : vector<16x16x4xbf16> to vector<256x4xbf16>
    %c0_45 = arith.constant 0 : index
    %c12 = arith.constant 12 : index
    %35 = vector.load %arg9[%c0_45, %c12] : memref<256x128xbf16, #tpu.memory_space<vmem>>, vector<256x4xbf16>
    tpu.vector_store %arg9[%c0_45, %c12], %34 {strides = array<i32>} : memref<256x128xbf16, #tpu.memory_space<vmem>>, vector<256x4xbf16>,
    %c1_46 = arith.constant 1 : index
    %c1_47 = arith.constant 1 : index
    %c0_48 = arith.constant 0 : index
    %36 = vector.load %arg8[%c1_46, %c1_47, %c0_48] : memref<18x18x4xbf16, #tpu.memory_space<vmem>>, vector<16x16x4xbf16>
    %37 = vector.shape_cast %36 : vector<16x16x4xbf16> to vector<256x4xbf16>
    %c0_49 = arith.constant 0 : index
    %c16 = arith.constant 16 : index
    %38 = vector.load %arg9[%c0_49, %c16] : memref<256x128xbf16, #tpu.memory_space<vmem>>, vector<256x4xbf16>
    tpu.vector_store %arg9[%c0_49, %c16], %37 {strides = array<i32>} : memref<256x128xbf16, #tpu.memory_space<vmem>>, vector<256x4xbf16>,
    %c1_50 = arith.constant 1 : index
    %c2_51 = arith.constant 2 : index
    %c0_52 = arith.constant 0 : index
    %39 = vector.load %arg8[%c1_50, %c2_51, %c0_52] : memref<18x18x4xbf16, #tpu.memory_space<vmem>>, vector<16x16x4xbf16>
    %40 = vector.shape_cast %39 : vector<16x16x4xbf16> to vector<256x4xbf16>
    %c0_53 = arith.constant 0 : index
    %c20 = arith.constant 20 : index
    %41 = vector.load %arg9[%c0_53, %c20] : memref<256x128xbf16, #tpu.memory_space<vmem>>, vector<256x4xbf16>
    tpu.vector_store %arg9[%c0_53, %c20], %40 {strides = array<i32>} : memref<256x128xbf16, #tpu.memory_space<vmem>>, vector<256x4xbf16>,
    %c2_54 = arith.constant 2 : index
    %c0_55 = arith.constant 0 : index
    %c0_56 = arith.constant 0 : index
    %42 = vector.load %arg8[%c2_54, %c0_55, %c0_56] : memref<18x18x4xbf16, #tpu.memory_space<vmem>>, vector<16x16x4xbf16>
    %43 = vector.shape_cast %42 : vector<16x16x4xbf16> to vector<256x4xbf16>
    %c0_57 = arith.constant 0 : index
    %c24 = arith.constant 24 : index
    %44 = vector.load %arg9[%c0_57, %c24] : memref<256x128xbf16, #tpu.memory_space<vmem>>, vector<256x4xbf16>
    tpu.vector_store %arg9[%c0_57, %c24], %43 {strides = array<i32>} : memref<256x128xbf16, #tpu.memory_space<vmem>>, vector<256x4xbf16>,
    %c2_58 = arith.constant 2 : index
    %c1_59 = arith.constant 1 : index
    %c0_60 = arith.constant 0 : index
    %45 = vector.load %arg8[%c2_58, %c1_59, %c0_60] : memref<18x18x4xbf16, #tpu.memory_space<vmem>>, vector<16x16x4xbf16>
    %46 = vector.shape_cast %45 : vector<16x16x4xbf16> to vector<256x4xbf16>
    %c0_61 = arith.constant 0 : index
    %c28 = arith.constant 28 : index
    %47 = vector.load %arg9[%c0_61, %c28] : memref<256x128xbf16, #tpu.memory_space<vmem>>, vector<256x4xbf16>
    tpu.vector_store %arg9[%c0_61, %c28], %46 {strides = array<i32>} : memref<256x128xbf16, #tpu.memory_space<vmem>>, vector<256x4xbf16>,
    %c2_62 = arith.constant 2 : index
    %c2_63 = arith.constant 2 : index
    %c0_64 = arith.constant 0 : index
    %48 = vector.load %arg8[%c2_62, %c2_63, %c0_64] : memref<18x18x4xbf16, #tpu.memory_space<vmem>>, vector<16x16x4xbf16>
    %49 = vector.shape_cast %48 : vector<16x16x4xbf16> to vector<256x4xbf16>
    %c0_65 = arith.constant 0 : index
    %c32 = arith.constant 32 : index
    %50 = vector.load %arg9[%c0_65, %c32] : memref<256x128xbf16, #tpu.memory_space<vmem>>, vector<256x4xbf16>
    tpu.vector_store %arg9[%c0_65, %c32], %49 {strides = array<i32>} : memref<256x128xbf16, #tpu.memory_space<vmem>>, vector<256x4xbf16>,
    %c0_66 = arith.constant 0 : index
    %c0_67 = arith.constant 0 : index
    %51 = vector.load %arg9[%c0_66, %c0_67] : memref<256x128xbf16, #tpu.memory_space<vmem>>, vector<256x128xbf16>
    %c0_68 = arith.constant 0 : index
    %c0_69 = arith.constant 0 : index
    %52 = vector.load %arg5[%c0_68, %c0_69] : memref<128x128xbf16, #tpu.memory_space<vmem>>, vector<128x128xbf16>
    %cst_70 = arith.constant dense<0.000000e+00> : vector<256x128xf32>
    %53 = tpu.matmul %51, %52, %cst_70 {dimension_numbers = #tpu.dot_dimension_numbers<[1], [0], [0], [1], [0, 0, 1, 1], [], []>} : vector<256x128xbf16>, vector<128x128xbf16>, vector<256x128xf32> -> vector<256x128xf32>
    %54 = vector.shape_cast %53 : vector<256x128xf32> to vector<16x16x128xf32>
    %55 = arith.truncf %54 : vector<16x16x128xf32> to vector<16x16x128xbf16>
    %c0_71 = arith.constant 0 : index
    %c0_72 = arith.constant 0 : index
    %c0_73 = arith.constant 0 : index
    %c0_74 = arith.constant 0 : index
    %56 = vector.load %arg6[%c0_71, %c0_72, %c0_73, %c0_74] : memref<1x16x16x128xbf16, #tpu.memory_space<vmem>>, vector<1x16x16x128xbf16>
    %57 = vector.shape_cast %56 : vector<1x16x16x128xbf16> to vector<16x16x128xbf16>
    %58 = vector.shape_cast %55 : vector<16x16x128xbf16> to vector<1x16x16x128xbf16>
    tpu.vector_store %arg6[%c0_71, %c0_72, %c0_73, %c0_74], %58 {strides = array<i32>} : memref<1x16x16x128xbf16, #tpu.memory_space<vmem>>, vector<1x16x16x128xbf16>,
    %cst_75 = arith.constant 1.000000e+00 : f32
    %59 = vector.broadcast %cst_75 : f32 to vector<1x256xf32>
    %cst_76 = arith.constant dense<0.000000e+00> : vector<1x128xf32>
    %60 = tpu.matmul %59, %53, %cst_76 {dimension_numbers = #tpu.dot_dimension_numbers<[1], [0], [0], [1], [0, 0, 1, 1], [], []>} : vector<1x256xf32>, vector<256x128xf32>, vector<1x128xf32> -> vector<1x128xf32>
    %c0_77 = arith.constant 0 : index
    %c0_78 = arith.constant 0 : index
    %c0_79 = arith.constant 0 : index
    %c0_80 = arith.constant 0 : index
    %61 = vector.load %arg7[%c0_77, %c0_78, %c0_79, %c0_80] : memref<1x1x2x128xf32, #tpu.memory_space<vmem>>, vector<1x1x1x128xf32>
    %62 = vector.shape_cast %61 : vector<1x1x1x128xf32> to vector<1x128xf32>
    %63 = vector.shape_cast %60 : vector<1x128xf32> to vector<1x1x1x128xf32>
    tpu.vector_store %arg7[%c0_77, %c0_78, %c0_79, %c0_80], %63 {strides = array<i32>} : memref<1x1x2x128xf32, #tpu.memory_space<vmem>>, vector<1x1x1x128xf32>,
    %64 = arith.mulf %53, %53 : vector<256x128xf32>
    %cst_81 = arith.constant dense<0.000000e+00> : vector<1x128xf32>
    %65 = tpu.matmul %59, %64, %cst_81 {dimension_numbers = #tpu.dot_dimension_numbers<[1], [0], [0], [1], [0, 0, 1, 1], [], []>} : vector<1x256xf32>, vector<256x128xf32>, vector<1x128xf32> -> vector<1x128xf32>
    %c0_82 = arith.constant 0 : index
    %c0_83 = arith.constant 0 : index
    %c1_84 = arith.constant 1 : index
    %c0_85 = arith.constant 0 : index
    %66 = vector.load %arg7[%c0_82, %c0_83, %c1_84, %c0_85] : memref<1x1x2x128xf32, #tpu.memory_space<vmem>>, vector<1x1x1x128xf32>
    %67 = vector.shape_cast %66 : vector<1x1x1x128xf32> to vector<1x128xf32>
    %68 = vector.shape_cast %65 : vector<1x128xf32> to vector<1x1x1x128xf32>
    tpu.vector_store %arg7[%c0_82, %c0_83, %c1_84, %c0_85], %68 {strides = array<i32>} : memref<1x1x2x128xf32, #tpu.memory_space<vmem>>, vector<1x1x1x128xf32>,
    return
  }
  func.func @transform_0(%arg0: i32, %arg1: i32) -> (i32, i32, i32, i32) {
    %c0_i32 = arith.constant 0 : i32
    %c0_i32_0 = arith.constant 0 : i32
    %c0_i32_1 = arith.constant 0 : i32
    return %arg0, %arg1, %c0_i32, %c0_i32_0 : i32, i32, i32, i32
  }
  func.func @transform_1(%arg0: i32, %arg1: i32) -> (i32, i32, i32, i32) {
    %c16_i32 = arith.constant 16 : i32
    %0 = arith.muli %arg1, %c16_i32 : i32
    %c1_i32 = arith.constant 1 : i32
    %1 = arith.subi %0, %c1_i32 : i32
    %c0_i32 = arith.constant 0 : i32
    %2 = arith.maxsi %1, %c0_i32 : i32
    %c0_i32_0 = arith.constant 0 : i32
    %c0_i32_1 = arith.constant 0 : i32
    %c0_i32_2 = arith.constant 0 : i32
    return %arg0, %2, %c0_i32_0, %c0_i32_1 : i32, i32, i32, i32
  }
  func.func @transform_2(%arg0: i32, %arg1: i32) -> (i32, i32, i32, i32) {
    %c1_i32 = arith.constant 1 : i32
    %0 = arith.addi %arg1, %c1_i32 : i32
    %c16_i32 = arith.constant 16 : i32
    %1 = arith.muli %0, %c16_i32 : i32
    %c15_i32 = arith.constant 15 : i32
    %2 = arith.minsi %1, %c15_i32 : i32
    %c0_i32 = arith.constant 0 : i32
    %c0_i32_0 = arith.constant 0 : i32
    %c0_i32_1 = arith.constant 0 : i32
    return %arg0, %2, %c0_i32, %c0_i32_0 : i32, i32, i32, i32
  }
  func.func @transform_3(%arg0: i32, %arg1: i32) -> (i32, i32) {
    %c0_i32 = arith.constant 0 : i32
    %c0_i32_0 = arith.constant 0 : i32
    %c0_i32_1 = arith.constant 0 : i32
    return %c0_i32, %c0_i32_0 : i32, i32
  }
  func.func @transform_4(%arg0: i32, %arg1: i32) -> (i32, i32, i32, i32) {
    %c0_i32 = arith.constant 0 : i32
    %c0_i32_0 = arith.constant 0 : i32
    %c0_i32_1 = arith.constant 0 : i32
    return %arg0, %arg1, %c0_i32, %c0_i32_0 : i32, i32, i32, i32
  }
  func.func @transform_5(%arg0: i32, %arg1: i32) -> (i32, i32, i32, i32) {
    %c0_i32 = arith.constant 0 : i32
    %c0_i32_0 = arith.constant 0 : i32
    %c0_i32_1 = arith.constant 0 : i32
    return %arg0, %arg1, %c0_i32, %c0_i32_0 : i32, i32, i32, i32
  }
}

module attributes {stable_mosaic.version = 11 : i64} {
  func.func @_conv3x3_kernel(%arg0: i32, %arg1: i32, %arg2: memref<1x16x16x128xbf16, #tpu.memory_space<vmem>>, %arg3: memref<1x1x16x128xbf16, #tpu.memory_space<vmem>>, %arg4: memref<1x1x16x128xbf16, #tpu.memory_space<vmem>>, %arg5: memref<1x128xf32, #tpu.memory_space<vmem>>, %arg6: memref<1x128xf32, #tpu.memory_space<vmem>>, %arg7: memref<9x128x128xbf16, #tpu.memory_space<vmem>>, %arg8: memref<1x16x16x128xbf16, #tpu.memory_space<vmem>>, %arg9: memref<1x1x2x128xf32, #tpu.memory_space<vmem>>, %arg10: memref<18x18x128xbf16, #tpu.memory_space<vmem>>) attributes {dimension_semantics = [#tpu.dimension_semantics<parallel>, #tpu.dimension_semantics<parallel>], iteration_bounds = array<i64: 2, 1>, scalar_prefetch = 0 : i64, scratch_operands = 1 : i64, tpu.core_type = #tpu.core_type<tc>, window_params = [{transform_indices = @transform_0, window_bounds = array<i64: 1, 16, 16, 128>}, {transform_indices = @transform_1, window_bounds = array<i64: 1, 1, 16, 128>}, {transform_indices = @transform_2, window_bounds = array<i64: 1, 1, 16, 128>}, {pipeline_mode = #tpu.pipeline_mode<synchronous>, transform_indices = @transform_3, window_bounds = array<i64: 1, 128>}, {pipeline_mode = #tpu.pipeline_mode<synchronous>, transform_indices = @transform_4, window_bounds = array<i64: 1, 128>}, {pipeline_mode = #tpu.pipeline_mode<synchronous>, transform_indices = @transform_5, window_bounds = array<i64: 9, 128, 128>}, {transform_indices = @transform_6, window_bounds = array<i64: 1, 16, 16, 128>}, {transform_indices = @transform_7, window_bounds = array<i64: 1, 1, 2, 128>}]} {
    %cst = arith.constant 0.000000e+00 : bf16
    %0 = vector.broadcast %cst : bf16 to vector<18x1x128xbf16>
    %c0 = arith.constant 0 : index
    %c0_0 = arith.constant 0 : index
    %c0_1 = arith.constant 0 : index
    %1 = vector.load %arg10[%c0, %c0_0, %c0_1] : memref<18x18x128xbf16, #tpu.memory_space<vmem>>, vector<18x1x128xbf16>
    tpu.vector_store %arg10[%c0, %c0_0, %c0_1], %0 {strides = array<i32>} : memref<18x18x128xbf16, #tpu.memory_space<vmem>>, vector<18x1x128xbf16>,
    %c0_2 = arith.constant 0 : index
    %c17 = arith.constant 17 : index
    %c0_3 = arith.constant 0 : index
    %2 = vector.load %arg10[%c0_2, %c17, %c0_3] : memref<18x18x128xbf16, #tpu.memory_space<vmem>>, vector<18x1x128xbf16>
    tpu.vector_store %arg10[%c0_2, %c17, %c0_3], %0 {strides = array<i32>} : memref<18x18x128xbf16, #tpu.memory_space<vmem>>, vector<18x1x128xbf16>,
    %c0_4 = arith.constant 0 : index
    %c0_5 = arith.constant 0 : index
    %c0_6 = arith.constant 0 : index
    %c0_7 = arith.constant 0 : index
    %3 = vector.load %arg2[%c0_4, %c0_5, %c0_6, %c0_7] : memref<1x16x16x128xbf16, #tpu.memory_space<vmem>>, vector<1x16x16x128xbf16>
    %4 = vector.shape_cast %3 : vector<1x16x16x128xbf16> to vector<16x16x128xbf16>
    %5 = arith.extf %4 : vector<16x16x128xbf16> to vector<16x16x128xf32>
    %c0_8 = arith.constant 0 : index
    %c0_9 = arith.constant 0 : index
    %6 = vector.load %arg5[%c0_8, %c0_9] : memref<1x128xf32, #tpu.memory_space<vmem>>, vector<1x128xf32>
    %7 = vector.shape_cast %6 : vector<1x128xf32> to vector<128xf32>
    %8 = vector.shape_cast %7 : vector<128xf32> to vector<1x1x128xf32>
    %9 = vector.broadcast %8 : vector<1x1x128xf32> to vector<16x16x128xf32>
    %10 = arith.mulf %5, %9 : vector<16x16x128xf32>
    %c0_10 = arith.constant 0 : index
    %c0_11 = arith.constant 0 : index
    %11 = vector.load %arg6[%c0_10, %c0_11] : memref<1x128xf32, #tpu.memory_space<vmem>>, vector<1x128xf32>
    %12 = vector.shape_cast %11 : vector<1x128xf32> to vector<128xf32>
    %13 = vector.shape_cast %12 : vector<128xf32> to vector<1x1x128xf32>
    %14 = vector.broadcast %13 : vector<1x1x128xf32> to vector<16x16x128xf32>
    %15 = arith.addf %10, %14 : vector<16x16x128xf32>
    %cst_12 = arith.constant 0.000000e+00 : f32
    %16 = vector.broadcast %cst_12 : f32 to vector<16x16x128xf32>
    %17 = arith.maximumf %15, %16 : vector<16x16x128xf32>
    %18 = arith.truncf %17 : vector<16x16x128xf32> to vector<16x16x128xbf16>
    %c1 = arith.constant 1 : index
    %c1_13 = arith.constant 1 : index
    %c0_14 = arith.constant 0 : index
    %19 = vector.load %arg10[%c1, %c1_13, %c0_14] : memref<18x18x128xbf16, #tpu.memory_space<vmem>>, vector<16x16x128xbf16>
    tpu.vector_store %arg10[%c1, %c1_13, %c0_14], %18 {strides = array<i32>} : memref<18x18x128xbf16, #tpu.memory_space<vmem>>, vector<16x16x128xbf16>,
    %c0_15 = arith.constant 0 : index
    %c0_16 = arith.constant 0 : index
    %c0_17 = arith.constant 0 : index
    %c0_18 = arith.constant 0 : index
    %20 = vector.load %arg3[%c0_15, %c0_16, %c0_17, %c0_18] : memref<1x1x16x128xbf16, #tpu.memory_space<vmem>>, vector<1x1x16x128xbf16>
    %21 = vector.shape_cast %20 : vector<1x1x16x128xbf16> to vector<1x16x128xbf16>
    %22 = arith.extf %21 : vector<1x16x128xbf16> to vector<1x16x128xf32>
    %c0_19 = arith.constant 0 : index
    %c0_20 = arith.constant 0 : index
    %23 = vector.load %arg5[%c0_19, %c0_20] : memref<1x128xf32, #tpu.memory_space<vmem>>, vector<1x128xf32>
    %24 = vector.shape_cast %23 : vector<1x128xf32> to vector<128xf32>
    %25 = vector.shape_cast %24 : vector<128xf32> to vector<1x1x128xf32>
    %26 = vector.broadcast %25 : vector<1x1x128xf32> to vector<1x16x128xf32>
    %27 = arith.mulf %22, %26 : vector<1x16x128xf32>
    %c0_21 = arith.constant 0 : index
    %c0_22 = arith.constant 0 : index
    %28 = vector.load %arg6[%c0_21, %c0_22] : memref<1x128xf32, #tpu.memory_space<vmem>>, vector<1x128xf32>
    %29 = vector.shape_cast %28 : vector<1x128xf32> to vector<128xf32>
    %30 = vector.shape_cast %29 : vector<128xf32> to vector<1x1x128xf32>
    %31 = vector.broadcast %30 : vector<1x1x128xf32> to vector<1x16x128xf32>
    %32 = arith.addf %27, %31 : vector<1x16x128xf32>
    %cst_23 = arith.constant 0.000000e+00 : f32
    %33 = vector.broadcast %cst_23 : f32 to vector<1x16x128xf32>
    %34 = arith.maximumf %32, %33 : vector<1x16x128xf32>
    %35 = arith.truncf %34 : vector<1x16x128xf32> to vector<1x16x128xbf16>
    %c0_24 = arith.constant 0 : index
    %c1_25 = arith.constant 1 : index
    %c0_26 = arith.constant 0 : index
    %36 = vector.load %arg10[%c0_24, %c1_25, %c0_26] : memref<18x18x128xbf16, #tpu.memory_space<vmem>>, vector<1x16x128xbf16>
    tpu.vector_store %arg10[%c0_24, %c1_25, %c0_26], %35 {strides = array<i32>} : memref<18x18x128xbf16, #tpu.memory_space<vmem>>, vector<1x16x128xbf16>,
    %c0_27 = arith.constant 0 : index
    %c0_28 = arith.constant 0 : index
    %c0_29 = arith.constant 0 : index
    %c0_30 = arith.constant 0 : index
    %37 = vector.load %arg4[%c0_27, %c0_28, %c0_29, %c0_30] : memref<1x1x16x128xbf16, #tpu.memory_space<vmem>>, vector<1x1x16x128xbf16>
    %38 = vector.shape_cast %37 : vector<1x1x16x128xbf16> to vector<1x16x128xbf16>
    %39 = arith.extf %38 : vector<1x16x128xbf16> to vector<1x16x128xf32>
    %c0_31 = arith.constant 0 : index
    %c0_32 = arith.constant 0 : index
    %40 = vector.load %arg5[%c0_31, %c0_32] : memref<1x128xf32, #tpu.memory_space<vmem>>, vector<1x128xf32>
    %41 = vector.shape_cast %40 : vector<1x128xf32> to vector<128xf32>
    %42 = vector.shape_cast %41 : vector<128xf32> to vector<1x1x128xf32>
    %43 = vector.broadcast %42 : vector<1x1x128xf32> to vector<1x16x128xf32>
    %44 = arith.mulf %39, %43 : vector<1x16x128xf32>
    %c0_33 = arith.constant 0 : index
    %c0_34 = arith.constant 0 : index
    %45 = vector.load %arg6[%c0_33, %c0_34] : memref<1x128xf32, #tpu.memory_space<vmem>>, vector<1x128xf32>
    %46 = vector.shape_cast %45 : vector<1x128xf32> to vector<128xf32>
    %47 = vector.shape_cast %46 : vector<128xf32> to vector<1x1x128xf32>
    %48 = vector.broadcast %47 : vector<1x1x128xf32> to vector<1x16x128xf32>
    %49 = arith.addf %44, %48 : vector<1x16x128xf32>
    %cst_35 = arith.constant 0.000000e+00 : f32
    %50 = vector.broadcast %cst_35 : f32 to vector<1x16x128xf32>
    %51 = arith.maximumf %49, %50 : vector<1x16x128xf32>
    %52 = arith.truncf %51 : vector<1x16x128xf32> to vector<1x16x128xbf16>
    %c17_36 = arith.constant 17 : index
    %c1_37 = arith.constant 1 : index
    %c0_38 = arith.constant 0 : index
    %53 = vector.load %arg10[%c17_36, %c1_37, %c0_38] : memref<18x18x128xbf16, #tpu.memory_space<vmem>>, vector<1x16x128xbf16>
    tpu.vector_store %arg10[%c17_36, %c1_37, %c0_38], %52 {strides = array<i32>} : memref<18x18x128xbf16, #tpu.memory_space<vmem>>, vector<1x16x128xbf16>,
    %cst_39 = arith.constant 0.000000e+00 : bf16
    %54 = vector.broadcast %cst_39 : bf16 to vector<1x18x128xbf16>
    %c0_i32 = arith.constant 0 : i32
    %55 = arith.cmpi eq, %arg1, %c0_i32 : i32
    %56 = arith.extui %55 : i1 to i32
    %c0_i32_40 = arith.constant 0 : i32
    %57 = arith.cmpi ne, %56, %c0_i32_40 : i32
    scf.if %57 {
      %c0_115 = arith.constant 0 : index
      %c0_116 = arith.constant 0 : index
      %c0_117 = arith.constant 0 : index
      %131 = vector.load %arg10[%c0_115, %c0_116, %c0_117] : memref<18x18x128xbf16, #tpu.memory_space<vmem>>, vector<1x18x128xbf16>
      tpu.vector_store %arg10[%c0_115, %c0_116, %c0_117], %54 {strides = array<i32>} : memref<18x18x128xbf16, #tpu.memory_space<vmem>>, vector<1x18x128xbf16>,
    } else {
    }
    %c0_i32_41 = arith.constant 0 : i32
    %58 = arith.cmpi eq, %arg1, %c0_i32_41 : i32
    %59 = arith.extui %58 : i1 to i32
    %c0_i32_42 = arith.constant 0 : i32
    %60 = arith.cmpi ne, %59, %c0_i32_42 : i32
    scf.if %60 {
      %c17_115 = arith.constant 17 : index
      %c0_116 = arith.constant 0 : index
      %c0_117 = arith.constant 0 : index
      %131 = vector.load %arg10[%c17_115, %c0_116, %c0_117] : memref<18x18x128xbf16, #tpu.memory_space<vmem>>, vector<1x18x128xbf16>
      tpu.vector_store %arg10[%c17_115, %c0_116, %c0_117], %54 {strides = array<i32>} : memref<18x18x128xbf16, #tpu.memory_space<vmem>>, vector<1x18x128xbf16>,
    } else {
    }
    %cst_43 = arith.constant 0.000000e+00 : f32
    %61 = vector.broadcast %cst_43 : f32 to vector<256x128xf32>
    %c0_44 = arith.constant 0 : index
    %c0_45 = arith.constant 0 : index
    %c0_46 = arith.constant 0 : index
    %62 = vector.load %arg10[%c0_44, %c0_45, %c0_46] : memref<18x18x128xbf16, #tpu.memory_space<vmem>>, vector<16x16x128xbf16>
    %63 = vector.shape_cast %62 : vector<16x16x128xbf16> to vector<256x128xbf16>
    %c0_47 = arith.constant 0 : index
    %c0_48 = arith.constant 0 : index
    %c0_49 = arith.constant 0 : index
    %64 = vector.load %arg7[%c0_47, %c0_48, %c0_49] : memref<9x128x128xbf16, #tpu.memory_space<vmem>>, vector<1x128x128xbf16>
    %65 = vector.shape_cast %64 : vector<1x128x128xbf16> to vector<128x128xbf16>
    %cst_50 = arith.constant dense<0.000000e+00> : vector<256x128xf32>
    %66 = tpu.matmul %63, %65, %cst_50 {dimension_numbers = #tpu.dot_dimension_numbers<[1], [0], [0], [1], [0, 0, 1, 1], [], []>} : vector<256x128xbf16>, vector<128x128xbf16>, vector<256x128xf32> -> vector<256x128xf32>
    %67 = arith.addf %61, %66 : vector<256x128xf32>
    %c0_51 = arith.constant 0 : index
    %c1_52 = arith.constant 1 : index
    %c0_53 = arith.constant 0 : index
    %68 = vector.load %arg10[%c0_51, %c1_52, %c0_53] : memref<18x18x128xbf16, #tpu.memory_space<vmem>>, vector<16x16x128xbf16>
    %69 = vector.shape_cast %68 : vector<16x16x128xbf16> to vector<256x128xbf16>
    %c1_54 = arith.constant 1 : index
    %c0_55 = arith.constant 0 : index
    %c0_56 = arith.constant 0 : index
    %70 = vector.load %arg7[%c1_54, %c0_55, %c0_56] : memref<9x128x128xbf16, #tpu.memory_space<vmem>>, vector<1x128x128xbf16>
    %71 = vector.shape_cast %70 : vector<1x128x128xbf16> to vector<128x128xbf16>
    %cst_57 = arith.constant dense<0.000000e+00> : vector<256x128xf32>
    %72 = tpu.matmul %69, %71, %cst_57 {dimension_numbers = #tpu.dot_dimension_numbers<[1], [0], [0], [1], [0, 0, 1, 1], [], []>} : vector<256x128xbf16>, vector<128x128xbf16>, vector<256x128xf32> -> vector<256x128xf32>
    %73 = arith.addf %67, %72 : vector<256x128xf32>
    %c0_58 = arith.constant 0 : index
    %c2 = arith.constant 2 : index
    %c0_59 = arith.constant 0 : index
    %74 = vector.load %arg10[%c0_58, %c2, %c0_59] : memref<18x18x128xbf16, #tpu.memory_space<vmem>>, vector<16x16x128xbf16>
    %75 = vector.shape_cast %74 : vector<16x16x128xbf16> to vector<256x128xbf16>
    %c2_60 = arith.constant 2 : index
    %c0_61 = arith.constant 0 : index
    %c0_62 = arith.constant 0 : index
    %76 = vector.load %arg7[%c2_60, %c0_61, %c0_62] : memref<9x128x128xbf16, #tpu.memory_space<vmem>>, vector<1x128x128xbf16>
    %77 = vector.shape_cast %76 : vector<1x128x128xbf16> to vector<128x128xbf16>
    %cst_63 = arith.constant dense<0.000000e+00> : vector<256x128xf32>
    %78 = tpu.matmul %75, %77, %cst_63 {dimension_numbers = #tpu.dot_dimension_numbers<[1], [0], [0], [1], [0, 0, 1, 1], [], []>} : vector<256x128xbf16>, vector<128x128xbf16>, vector<256x128xf32> -> vector<256x128xf32>
    %79 = arith.addf %73, %78 : vector<256x128xf32>
    %c1_64 = arith.constant 1 : index
    %c0_65 = arith.constant 0 : index
    %c0_66 = arith.constant 0 : index
    %80 = vector.load %arg10[%c1_64, %c0_65, %c0_66] : memref<18x18x128xbf16, #tpu.memory_space<vmem>>, vector<16x16x128xbf16>
    %81 = vector.shape_cast %80 : vector<16x16x128xbf16> to vector<256x128xbf16>
    %c3 = arith.constant 3 : index
    %c0_67 = arith.constant 0 : index
    %c0_68 = arith.constant 0 : index
    %82 = vector.load %arg7[%c3, %c0_67, %c0_68] : memref<9x128x128xbf16, #tpu.memory_space<vmem>>, vector<1x128x128xbf16>
    %83 = vector.shape_cast %82 : vector<1x128x128xbf16> to vector<128x128xbf16>
    %cst_69 = arith.constant dense<0.000000e+00> : vector<256x128xf32>
    %84 = tpu.matmul %81, %83, %cst_69 {dimension_numbers = #tpu.dot_dimension_numbers<[1], [0], [0], [1], [0, 0, 1, 1], [], []>} : vector<256x128xbf16>, vector<128x128xbf16>, vector<256x128xf32> -> vector<256x128xf32>
    %85 = arith.addf %79, %84 : vector<256x128xf32>
    %c1_70 = arith.constant 1 : index
    %c1_71 = arith.constant 1 : index
    %c0_72 = arith.constant 0 : index
    %86 = vector.load %arg10[%c1_70, %c1_71, %c0_72] : memref<18x18x128xbf16, #tpu.memory_space<vmem>>, vector<16x16x128xbf16>
    %87 = vector.shape_cast %86 : vector<16x16x128xbf16> to vector<256x128xbf16>
    %c4 = arith.constant 4 : index
    %c0_73 = arith.constant 0 : index
    %c0_74 = arith.constant 0 : index
    %88 = vector.load %arg7[%c4, %c0_73, %c0_74] : memref<9x128x128xbf16, #tpu.memory_space<vmem>>, vector<1x128x128xbf16>
    %89 = vector.shape_cast %88 : vector<1x128x128xbf16> to vector<128x128xbf16>
    %cst_75 = arith.constant dense<0.000000e+00> : vector<256x128xf32>
    %90 = tpu.matmul %87, %89, %cst_75 {dimension_numbers = #tpu.dot_dimension_numbers<[1], [0], [0], [1], [0, 0, 1, 1], [], []>} : vector<256x128xbf16>, vector<128x128xbf16>, vector<256x128xf32> -> vector<256x128xf32>
    %91 = arith.addf %85, %90 : vector<256x128xf32>
    %c1_76 = arith.constant 1 : index
    %c2_77 = arith.constant 2 : index
    %c0_78 = arith.constant 0 : index
    %92 = vector.load %arg10[%c1_76, %c2_77, %c0_78] : memref<18x18x128xbf16, #tpu.memory_space<vmem>>, vector<16x16x128xbf16>
    %93 = vector.shape_cast %92 : vector<16x16x128xbf16> to vector<256x128xbf16>
    %c5 = arith.constant 5 : index
    %c0_79 = arith.constant 0 : index
    %c0_80 = arith.constant 0 : index
    %94 = vector.load %arg7[%c5, %c0_79, %c0_80] : memref<9x128x128xbf16, #tpu.memory_space<vmem>>, vector<1x128x128xbf16>
    %95 = vector.shape_cast %94 : vector<1x128x128xbf16> to vector<128x128xbf16>
    %cst_81 = arith.constant dense<0.000000e+00> : vector<256x128xf32>
    %96 = tpu.matmul %93, %95, %cst_81 {dimension_numbers = #tpu.dot_dimension_numbers<[1], [0], [0], [1], [0, 0, 1, 1], [], []>} : vector<256x128xbf16>, vector<128x128xbf16>, vector<256x128xf32> -> vector<256x128xf32>
    %97 = arith.addf %91, %96 : vector<256x128xf32>
    %c2_82 = arith.constant 2 : index
    %c0_83 = arith.constant 0 : index
    %c0_84 = arith.constant 0 : index
    %98 = vector.load %arg10[%c2_82, %c0_83, %c0_84] : memref<18x18x128xbf16, #tpu.memory_space<vmem>>, vector<16x16x128xbf16>
    %99 = vector.shape_cast %98 : vector<16x16x128xbf16> to vector<256x128xbf16>
    %c6 = arith.constant 6 : index
    %c0_85 = arith.constant 0 : index
    %c0_86 = arith.constant 0 : index
    %100 = vector.load %arg7[%c6, %c0_85, %c0_86] : memref<9x128x128xbf16, #tpu.memory_space<vmem>>, vector<1x128x128xbf16>
    %101 = vector.shape_cast %100 : vector<1x128x128xbf16> to vector<128x128xbf16>
    %cst_87 = arith.constant dense<0.000000e+00> : vector<256x128xf32>
    %102 = tpu.matmul %99, %101, %cst_87 {dimension_numbers = #tpu.dot_dimension_numbers<[1], [0], [0], [1], [0, 0, 1, 1], [], []>} : vector<256x128xbf16>, vector<128x128xbf16>, vector<256x128xf32> -> vector<256x128xf32>
    %103 = arith.addf %97, %102 : vector<256x128xf32>
    %c2_88 = arith.constant 2 : index
    %c1_89 = arith.constant 1 : index
    %c0_90 = arith.constant 0 : index
    %104 = vector.load %arg10[%c2_88, %c1_89, %c0_90] : memref<18x18x128xbf16, #tpu.memory_space<vmem>>, vector<16x16x128xbf16>
    %105 = vector.shape_cast %104 : vector<16x16x128xbf16> to vector<256x128xbf16>
    %c7 = arith.constant 7 : index
    %c0_91 = arith.constant 0 : index
    %c0_92 = arith.constant 0 : index
    %106 = vector.load %arg7[%c7, %c0_91, %c0_92] : memref<9x128x128xbf16, #tpu.memory_space<vmem>>, vector<1x128x128xbf16>
    %107 = vector.shape_cast %106 : vector<1x128x128xbf16> to vector<128x128xbf16>
    %cst_93 = arith.constant dense<0.000000e+00> : vector<256x128xf32>
    %108 = tpu.matmul %105, %107, %cst_93 {dimension_numbers = #tpu.dot_dimension_numbers<[1], [0], [0], [1], [0, 0, 1, 1], [], []>} : vector<256x128xbf16>, vector<128x128xbf16>, vector<256x128xf32> -> vector<256x128xf32>
    %109 = arith.addf %103, %108 : vector<256x128xf32>
    %c2_94 = arith.constant 2 : index
    %c2_95 = arith.constant 2 : index
    %c0_96 = arith.constant 0 : index
    %110 = vector.load %arg10[%c2_94, %c2_95, %c0_96] : memref<18x18x128xbf16, #tpu.memory_space<vmem>>, vector<16x16x128xbf16>
    %111 = vector.shape_cast %110 : vector<16x16x128xbf16> to vector<256x128xbf16>
    %c8 = arith.constant 8 : index
    %c0_97 = arith.constant 0 : index
    %c0_98 = arith.constant 0 : index
    %112 = vector.load %arg7[%c8, %c0_97, %c0_98] : memref<9x128x128xbf16, #tpu.memory_space<vmem>>, vector<1x128x128xbf16>
    %113 = vector.shape_cast %112 : vector<1x128x128xbf16> to vector<128x128xbf16>
    %cst_99 = arith.constant dense<0.000000e+00> : vector<256x128xf32>
    %114 = tpu.matmul %111, %113, %cst_99 {dimension_numbers = #tpu.dot_dimension_numbers<[1], [0], [0], [1], [0, 0, 1, 1], [], []>} : vector<256x128xbf16>, vector<128x128xbf16>, vector<256x128xf32> -> vector<256x128xf32>
    %115 = arith.addf %109, %114 : vector<256x128xf32>
    %116 = vector.shape_cast %115 : vector<256x128xf32> to vector<16x16x128xf32>
    %117 = arith.truncf %116 : vector<16x16x128xf32> to vector<16x16x128xbf16>
    %c0_100 = arith.constant 0 : index
    %c0_101 = arith.constant 0 : index
    %c0_102 = arith.constant 0 : index
    %c0_103 = arith.constant 0 : index
    %118 = vector.load %arg8[%c0_100, %c0_101, %c0_102, %c0_103] : memref<1x16x16x128xbf16, #tpu.memory_space<vmem>>, vector<1x16x16x128xbf16>
    %119 = vector.shape_cast %118 : vector<1x16x16x128xbf16> to vector<16x16x128xbf16>
    %120 = vector.shape_cast %117 : vector<16x16x128xbf16> to vector<1x16x16x128xbf16>
    tpu.vector_store %arg8[%c0_100, %c0_101, %c0_102, %c0_103], %120 {strides = array<i32>} : memref<1x16x16x128xbf16, #tpu.memory_space<vmem>>, vector<1x16x16x128xbf16>,
    %cst_104 = arith.constant 1.000000e+00 : f32
    %121 = vector.broadcast %cst_104 : f32 to vector<1x256xf32>
    %cst_105 = arith.constant dense<0.000000e+00> : vector<1x128xf32>
    %122 = tpu.matmul %121, %115, %cst_105 {dimension_numbers = #tpu.dot_dimension_numbers<[1], [0], [0], [1], [0, 0, 1, 1], [], []>} : vector<1x256xf32>, vector<256x128xf32>, vector<1x128xf32> -> vector<1x128xf32>
    %c0_106 = arith.constant 0 : index
    %c0_107 = arith.constant 0 : index
    %c0_108 = arith.constant 0 : index
    %c0_109 = arith.constant 0 : index
    %123 = vector.load %arg9[%c0_106, %c0_107, %c0_108, %c0_109] : memref<1x1x2x128xf32, #tpu.memory_space<vmem>>, vector<1x1x1x128xf32>
    %124 = vector.shape_cast %123 : vector<1x1x1x128xf32> to vector<1x128xf32>
    %125 = vector.shape_cast %122 : vector<1x128xf32> to vector<1x1x1x128xf32>
    tpu.vector_store %arg9[%c0_106, %c0_107, %c0_108, %c0_109], %125 {strides = array<i32>} : memref<1x1x2x128xf32, #tpu.memory_space<vmem>>, vector<1x1x1x128xf32>,
    %126 = arith.mulf %115, %115 : vector<256x128xf32>
    %cst_110 = arith.constant dense<0.000000e+00> : vector<1x128xf32>
    %127 = tpu.matmul %121, %126, %cst_110 {dimension_numbers = #tpu.dot_dimension_numbers<[1], [0], [0], [1], [0, 0, 1, 1], [], []>} : vector<1x256xf32>, vector<256x128xf32>, vector<1x128xf32> -> vector<1x128xf32>
    %c0_111 = arith.constant 0 : index
    %c0_112 = arith.constant 0 : index
    %c1_113 = arith.constant 1 : index
    %c0_114 = arith.constant 0 : index
    %128 = vector.load %arg9[%c0_111, %c0_112, %c1_113, %c0_114] : memref<1x1x2x128xf32, #tpu.memory_space<vmem>>, vector<1x1x1x128xf32>
    %129 = vector.shape_cast %128 : vector<1x1x1x128xf32> to vector<1x128xf32>
    %130 = vector.shape_cast %127 : vector<1x128xf32> to vector<1x1x1x128xf32>
    tpu.vector_store %arg9[%c0_111, %c0_112, %c1_113, %c0_114], %130 {strides = array<i32>} : memref<1x1x2x128xf32, #tpu.memory_space<vmem>>, vector<1x1x1x128xf32>,
    return
  }
  func.func @transform_0(%arg0: i32, %arg1: i32) -> (i32, i32, i32, i32) {
    %c0_i32 = arith.constant 0 : i32
    %c0_i32_0 = arith.constant 0 : i32
    %c0_i32_1 = arith.constant 0 : i32
    return %arg0, %arg1, %c0_i32, %c0_i32_0 : i32, i32, i32, i32
  }
  func.func @transform_1(%arg0: i32, %arg1: i32) -> (i32, i32, i32, i32) {
    %c16_i32 = arith.constant 16 : i32
    %0 = arith.muli %arg1, %c16_i32 : i32
    %c1_i32 = arith.constant 1 : i32
    %1 = arith.subi %0, %c1_i32 : i32
    %c0_i32 = arith.constant 0 : i32
    %2 = arith.maxsi %1, %c0_i32 : i32
    %c0_i32_0 = arith.constant 0 : i32
    %c0_i32_1 = arith.constant 0 : i32
    %c0_i32_2 = arith.constant 0 : i32
    return %arg0, %2, %c0_i32_0, %c0_i32_1 : i32, i32, i32, i32
  }
  func.func @transform_2(%arg0: i32, %arg1: i32) -> (i32, i32, i32, i32) {
    %c1_i32 = arith.constant 1 : i32
    %0 = arith.addi %arg1, %c1_i32 : i32
    %c16_i32 = arith.constant 16 : i32
    %1 = arith.muli %0, %c16_i32 : i32
    %c15_i32 = arith.constant 15 : i32
    %2 = arith.minsi %1, %c15_i32 : i32
    %c0_i32 = arith.constant 0 : i32
    %c0_i32_0 = arith.constant 0 : i32
    %c0_i32_1 = arith.constant 0 : i32
    return %arg0, %2, %c0_i32, %c0_i32_0 : i32, i32, i32, i32
  }
  func.func @transform_3(%arg0: i32, %arg1: i32) -> (i32, i32) {
    %c0_i32 = arith.constant 0 : i32
    %c0_i32_0 = arith.constant 0 : i32
    %c0_i32_1 = arith.constant 0 : i32
    return %c0_i32, %c0_i32_0 : i32, i32
  }
  func.func @transform_4(%arg0: i32, %arg1: i32) -> (i32, i32) {
    %c0_i32 = arith.constant 0 : i32
    %c0_i32_0 = arith.constant 0 : i32
    %c0_i32_1 = arith.constant 0 : i32
    return %c0_i32, %c0_i32_0 : i32, i32
  }
  func.func @transform_5(%arg0: i32, %arg1: i32) -> (i32, i32, i32) {
    %c0_i32 = arith.constant 0 : i32
    %c0_i32_0 = arith.constant 0 : i32
    %c0_i32_1 = arith.constant 0 : i32
    %c0_i32_2 = arith.constant 0 : i32
    return %c0_i32, %c0_i32_0, %c0_i32_1 : i32, i32, i32
  }
  func.func @transform_6(%arg0: i32, %arg1: i32) -> (i32, i32, i32, i32) {
    %c0_i32 = arith.constant 0 : i32
    %c0_i32_0 = arith.constant 0 : i32
    %c0_i32_1 = arith.constant 0 : i32
    return %arg0, %arg1, %c0_i32, %c0_i32_0 : i32, i32, i32, i32
  }
  func.func @transform_7(%arg0: i32, %arg1: i32) -> (i32, i32, i32, i32) {
    %c0_i32 = arith.constant 0 : i32
    %c0_i32_0 = arith.constant 0 : i32
    %c0_i32_1 = arith.constant 0 : i32
    return %arg0, %arg1, %c0_i32, %c0_i32_0 : i32, i32, i32, i32
  }
}

module attributes {stable_mosaic.version = 11 : i64} {
  func.func @_bn_relu_kernel(%arg0: i32, %arg1: memref<512x128xbf16, #tpu.memory_space<vmem>>, %arg2: memref<1x128xf32, #tpu.memory_space<vmem>>, %arg3: memref<1x128xf32, #tpu.memory_space<vmem>>, %arg4: memref<512x128xf32, #tpu.memory_space<vmem>>) attributes {dimension_semantics = [#tpu.dimension_semantics<parallel>], iteration_bounds = array<i64: 1>, scalar_prefetch = 0 : i64, scratch_operands = 0 : i64, tpu.core_type = #tpu.core_type<tc>, window_params = [{transform_indices = @transform_0, window_bounds = array<i64: 512, 128>}, {pipeline_mode = #tpu.pipeline_mode<synchronous>, transform_indices = @transform_1, window_bounds = array<i64: 1, 128>}, {pipeline_mode = #tpu.pipeline_mode<synchronous>, transform_indices = @transform_2, window_bounds = array<i64: 1, 128>}, {transform_indices = @transform_3, window_bounds = array<i64: 512, 128>}]} {
    %c0 = arith.constant 0 : index
    %c0_0 = arith.constant 0 : index
    %0 = vector.load %arg1[%c0, %c0_0] : memref<512x128xbf16, #tpu.memory_space<vmem>>, vector<512x128xbf16>
    %1 = arith.extf %0 : vector<512x128xbf16> to vector<512x128xf32>
    %c0_1 = arith.constant 0 : index
    %c0_2 = arith.constant 0 : index
    %2 = vector.load %arg2[%c0_1, %c0_2] : memref<1x128xf32, #tpu.memory_space<vmem>>, vector<1x128xf32>
    %3 = vector.shape_cast %2 : vector<1x128xf32> to vector<128xf32>
    %4 = vector.shape_cast %3 : vector<128xf32> to vector<1x128xf32>
    %5 = vector.broadcast %4 : vector<1x128xf32> to vector<512x128xf32>
    %6 = arith.mulf %1, %5 : vector<512x128xf32>
    %c0_3 = arith.constant 0 : index
    %c0_4 = arith.constant 0 : index
    %7 = vector.load %arg3[%c0_3, %c0_4] : memref<1x128xf32, #tpu.memory_space<vmem>>, vector<1x128xf32>
    %8 = vector.shape_cast %7 : vector<1x128xf32> to vector<128xf32>
    %9 = vector.shape_cast %8 : vector<128xf32> to vector<1x128xf32>
    %10 = vector.broadcast %9 : vector<1x128xf32> to vector<512x128xf32>
    %11 = arith.addf %6, %10 : vector<512x128xf32>
    %cst = arith.constant 0.000000e+00 : f32
    %12 = vector.broadcast %cst : f32 to vector<512x128xf32>
    %13 = arith.maximumf %11, %12 : vector<512x128xf32>
    %c0_5 = arith.constant 0 : index
    %c0_6 = arith.constant 0 : index
    %14 = vector.load %arg4[%c0_5, %c0_6] : memref<512x128xf32, #tpu.memory_space<vmem>>, vector<512x128xf32>
    tpu.vector_store %arg4[%c0_5, %c0_6], %13 {strides = array<i32>} : memref<512x128xf32, #tpu.memory_space<vmem>>, vector<512x128xf32>,
    return
  }
  func.func @transform_0(%arg0: i32) -> (i32, i32) {
    %c0_i32 = arith.constant 0 : i32
    %c0_i32_0 = arith.constant 0 : i32
    return %arg0, %c0_i32 : i32, i32
  }
  func.func @transform_1(%arg0: i32) -> (i32, i32) {
    %c0_i32 = arith.constant 0 : i32
    %c0_i32_0 = arith.constant 0 : i32
    %c0_i32_1 = arith.constant 0 : i32
    return %c0_i32, %c0_i32_0 : i32, i32
  }
  func.func @transform_2(%arg0: i32) -> (i32, i32) {
    %c0_i32 = arith.constant 0 : i32
    %c0_i32_0 = arith.constant 0 : i32
    %c0_i32_1 = arith.constant 0 : i32
    return %c0_i32, %c0_i32_0 : i32, i32
  }
  func.func @transform_3(%arg0: i32) -> (i32, i32) {
    %c0_i32 = arith.constant 0 : i32
    %c0_i32_0 = arith.constant 0 : i32
    return %arg0, %c0_i32 : i32, i32
  }
}

</mosaic_0001>

<bundles_post_ra>
// kernel: inconv_forward.5
= control target key start
LH: loop header
LB: loop body
LE: loop exit
PB: predicated region body
PF: predicated region fallthrough
CT: control target
= control target key end

     0   :  { %s1023_s0 = inlined_call_operand.vmem [shape: bf16[512,128], index: 0, kind: input, shape index: {}]   ;;  %s1024_s1 = inlined_call_operand.vmem [shape: f32[1,128], index: 1, kind: input, shape index: {}]   ;;  %s1025_s2 = inlined_call_operand.vmem [shape: f32[1,128], index: 2, kind: input, shape index: {}]   ;;  %s1026_s3 = inlined_call_operand.vmem [shape: f32[512,128], index: 3, kind: output, shape index: {}]  }
   0x1   :  { %v419_v0 = vld [vmem:[%s1023_s0] sm:$0xff]   ;;  %v546_v4 = vld [vmem:[%s1023_s0 + $0x8] sm:$0xff]   ;;  %v547_v5 = vld [vmem:[%s1023_s0 + $0x10] sm:$0xff]  }
   0x2   :  { %v603_v1 = vld [vmem:[%s1024_s1] ss:$0 sm:$0xff]  ;;  %v420_v2 = vunpack.c.l.bf16 %v419_v0  ;;  %v421_v3 = vunpack.c.h.bf16 %v419_v0  ;;  %v548_v6 = vld [vmem:[%s1023_s0 + $0x18] sm:$0xff]   ;;  %v424_v8 = vunpack.c.l.bf16 %v546_v4  ;;  %v425_v9 = vunpack.c.h.bf16 %v546_v4  ;;  %v550_v33 = vld [vmem:[%s1023_s0 + $0x28] sm:$0xff]  }
   0x3   :  { %v617_v7 = vld [vmem:[%s1025_s2] ss:$0 sm:$0xff]  ;;  %v428_v10 = vunpack.c.l.bf16 %v547_v5  ;;  %v429_v11 = vunpack.c.h.bf16 %v547_v5  ;;  %v432_v14 = vunpack.c.l.bf16 %v548_v6  ;;  %v433_v15 = vunpack.c.h.bf16 %v548_v6  ;;  %v551_v34 = vld [vmem:[%s1023_s0 + $0x30] sm:$0xff]   ;;  %v552_v39 = vld [vmem:[%s1023_s0 + $0x38] sm:$0xff]  }
   0x4   :  { %v149_v12 = vmul.f32 %v420_v2, %v603_v1  ;;  %v150_v13 = vmul.f32 %v421_v3, %v603_v1  ;;  %v151_v16 = vmul.f32 %v424_v8, %v603_v1  ;;  %v152_v17 = vmul.f32 %v425_v9, %v603_v1  ;;  %v549_v28 = vld [vmem:[%s1023_s0 + $0x20] sm:$0xff]   ;;  %v554_v6 = vld [vmem:[%s1023_s0 + $0x48] sm:$0xff]   ;;  %v555_v8 = vld [vmem:[%s1023_s0 + $0x50] sm:$0xff]  }
   0x5   :  { %v153_v18 = vmul.f32 %v428_v10, %v603_v1  ;;  %v154_v19 = vmul.f32 %v429_v11, %v603_v1  ;;  %v155_v22 = vmul.f32 %v432_v14, %v603_v1  ;;  %v156_v23 = vmul.f32 %v433_v15, %v603_v1  ;;  %v553_v0 = vld [vmem:[%s1023_s0 + $0x40] sm:$0xff]  }
   0x6   :  { %v220_v20 = vadd.f32 %v617_v7, %v149_v12  ;;  %v221_v21 = vadd.f32 %v617_v7, %v150_v13  ;;  %v222_v24 = vadd.f32 %v617_v7, %v151_v16  ;;  %v223_v25 = vadd.f32 %v617_v7, %v152_v17  ;;  %v556_v13 = vld [vmem:[%s1023_s0 + $0x58] sm:$0xff]  }
   0x7   :  { %v224_v26 = vadd.f32 %v617_v7, %v153_v18  ;;  %v225_v27 = vadd.f32 %v617_v7, %v154_v19  ;;  %v226_v31 = vadd.f32 %v617_v7, %v155_v22  ;;  %v227_v32 = vadd.f32 %v617_v7, %v156_v23 }
   0x8   :  { %v284_v29 = vmax.f32 %v220_v20, 0.0  ;;  %v285_v30 = vmax.f32 %v221_v21, 0.0  ;;  %v286_v35 = vmax.f32 %v222_v24, 0.0  ;;  %v287_v36 = vmax.f32 %v223_v25, 0.0 }
   0x9   :  { %v288_v37 = vmax.f32 %v224_v26, 0.0  ;;  %v289_v38 = vmax.f32 %v225_v27, 0.0  ;;  %v290_v40 = vmax.f32 %v226_v31, 0.0  ;;  %v291_v41 = vmax.f32 %v227_v32, 0.0 }
   0xa   :  { %348 = vst [vmem:[%s1026_s3] sm:$0xff] %v284_v29  ;;  %349 = vst [vmem:[%s1026_s3 + $0x8] sm:$0xff] %v285_v30  ;;  %v436_v42 = vunpack.c.l.bf16 %v549_v28  ;;  %v437_v43 = vunpack.c.h.bf16 %v549_v28  ;;  %v440_v44 = vunpack.c.l.bf16 %v550_v33  ;;  %v441_v45 = vunpack.c.h.bf16 %v550_v33 }
   0xb   :  { %350 = vst [vmem:[%s1026_s3 + $0x10] sm:$0xff] %v286_v35  ;;  %351 = vst [vmem:[%s1026_s3 + $0x18] sm:$0xff] %v287_v36  ;;  %v444_v46 = vunpack.c.l.bf16 %v551_v34  ;;  %v445_v47 = vunpack.c.h.bf16 %v551_v34  ;;  %v448_v50 = vunpack.c.l.bf16 %v552_v39  ;;  %v449_v51 = vunpack.c.h.bf16 %v552_v39 }
   0xc   :  { %352 = vst [vmem:[%s1026_s3 + $0x20] sm:$0xff] %v288_v37  ;;  %353 = vst [vmem:[%s1026_s3 + $0x28] sm:$0xff] %v289_v38  ;;  %v157_v48 = vmul.f32 %v436_v42, %v603_v1  ;;  %v158_v49 = vmul.f32 %v437_v43, %v603_v1  ;;  %v159_v52 = vmul.f32 %v440_v44, %v603_v1  ;;  %v452_v16 = vunpack.c.l.bf16 %v553_v0  ;;  %v557_v38 = vld [vmem:[%s1023_s0 + $0x60] sm:$0xff]   ;;  %v558_v43 = vld [vmem:[%s1023_s0 + $0x68] sm:$0xff]  }
   0xd   :  { %354 = vst [vmem:[%s1026_s3 + $0x30] sm:$0xff] %v290_v40  ;;  %355 = vst [vmem:[%s1026_s3 + $0x38] sm:$0xff] %v291_v41  ;;  %v160_v53 = vmul.f32 %v441_v45, %v603_v1  ;;  %v161_v54 = vmul.f32 %v444_v46, %v603_v1  ;;  %v162_v55 = vmul.f32 %v445_v47, %v603_v1  ;;  %v453_v17 = vunpack.c.h.bf16 %v553_v0  ;;  %v559_v44 = vld [vmem:[%s1023_s0 + $0x70] sm:$0xff]  }
   0xe   :  { %v228_v56 = vadd.f32 %v617_v7, %v157_v48  ;;  %v229_v57 = vadd.f32 %v617_v7, %v158_v49  ;;  %v163_v58 = vmul.f32 %v448_v50, %v603_v1  ;;  %v164_v59 = vmul.f32 %v449_v51, %v603_v1  ;;  %v560_v49 = vld [vmem:[%s1023_s0 + $0x78] sm:$0xff]  }
   0xf   :  { %v230_v60 = vadd.f32 %v617_v7, %v159_v52  ;;  %v231_v61 = vadd.f32 %v617_v7, %v160_v53  ;;  %v232_v62 = vadd.f32 %v617_v7, %v161_v54  ;;  %v233_v63 = vadd.f32 %v617_v7, %v162_v55 }
  0x10   :  { %v292_v2 = vmax.f32 %v228_v56, 0.0  ;;  %v293_v3 = vmax.f32 %v229_v57, 0.0  ;;  %v234_v4 = vadd.f32 %v617_v7, %v163_v58  ;;  %v235_v5 = vadd.f32 %v617_v7, %v164_v59 }
  0x11   :  { %v294_v9 = vmax.f32 %v230_v60, 0.0  ;;  %v295_v10 = vmax.f32 %v231_v61, 0.0  ;;  %v296_v11 = vmax.f32 %v232_v62, 0.0  ;;  %v297_v12 = vmax.f32 %v233_v63, 0.0 }
  0x12   :  { %356 = vst [vmem:[%s1026_s3 + $0x40] sm:$0xff] %v292_v2  ;;  %357 = vst [vmem:[%s1026_s3 + $0x48] sm:$0xff] %v293_v3  ;;  %v298_v14 = vmax.f32 %v234_v4, 0.0  ;;  %v299_v15 = vmax.f32 %v235_v5, 0.0  ;;  %v456_v18 = vunpack.c.l.bf16 %v554_v6  ;;  %v457_v19 = vunpack.c.h.bf16 %v554_v6 }
  0x13   :  { %358 = vst [vmem:[%s1026_s3 + $0x50] sm:$0xff] %v294_v9  ;;  %359 = vst [vmem:[%s1026_s3 + $0x58] sm:$0xff] %v295_v10  ;;  %v460_v20 = vunpack.c.l.bf16 %v555_v8  ;;  %v461_v21 = vunpack.c.h.bf16 %v555_v8  ;;  %v165_v22 = vmul.f32 %v452_v16, %v603_v1  ;;  %v166_v23 = vmul.f32 %v453_v17, %v603_v1  ;;  %v562_v17 = vld [vmem:[%s1023_s0 + $0x88] sm:$0xff]  }
  0x14   :  { %360 = vst [vmem:[%s1026_s3 + $0x60] sm:$0xff] %v296_v11  ;;  %361 = vst [vmem:[%s1026_s3 + $0x68] sm:$0xff] %v297_v12  ;;  %v464_v24 = vunpack.c.l.bf16 %v556_v13  ;;  %v465_v25 = vunpack.c.h.bf16 %v556_v13  ;;  %v167_v26 = vmul.f32 %v456_v18, %v603_v1  ;;  %v168_v27 = vmul.f32 %v457_v19, %v603_v1  ;;  %v561_v12 = vld [vmem:[%s1023_s0 + $0x80] sm:$0xff]   ;;  %v563_v18 = vld [vmem:[%s1023_s0 + $0x90] sm:$0xff]  }
  0x15   :  { %362 = vst [vmem:[%s1026_s3 + $0x70] sm:$0xff] %v298_v14  ;;  %363 = vst [vmem:[%s1026_s3 + $0x78] sm:$0xff] %v299_v15  ;;  %v169_v28 = vmul.f32 %v460_v20, %v603_v1  ;;  %v170_v29 = vmul.f32 %v461_v21, %v603_v1  ;;  %v236_v30 = vadd.f32 %v617_v7, %v165_v22  ;;  %v468_v52 = vunpack.c.l.bf16 %v557_v38 }
  0x16   :  { %v237_v31 = vadd.f32 %v617_v7, %v166_v23  ;;  %v171_v32 = vmul.f32 %v464_v24, %v603_v1  ;;  %v172_v33 = vmul.f32 %v465_v25, %v603_v1  ;;  %v238_v34 = vadd.f32 %v617_v7, %v167_v26  ;;  %v564_v23 = vld [vmem:[%s1023_s0 + $0x98] sm:$0xff]  }
  0x17   :  { %v239_v35 = vadd.f32 %v617_v7, %v168_v27  ;;  %v240_v36 = vadd.f32 %v617_v7, %v169_v28  ;;  %v241_v37 = vadd.f32 %v617_v7, %v170_v29  ;;  %v300_v39 = vmax.f32 %v236_v30, 0.0 }
  0x18   :  { %v301_v40 = vmax.f32 %v237_v31, 0.0  ;;  %v242_v41 = vadd.f32 %v617_v7, %v171_v32  ;;  %v243_v42 = vadd.f32 %v617_v7, %v172_v33  ;;  %v302_v45 = vmax.f32 %v238_v34, 0.0 }
  0x19   :  { %v303_v46 = vmax.f32 %v239_v35, 0.0  ;;  %v304_v47 = vmax.f32 %v240_v36, 0.0  ;;  %v305_v48 = vmax.f32 %v241_v37, 0.0  ;;  %364 = vst [vmem:[%s1026_s3 + $0x80] sm:$0xff] %v300_v39  ;;  %v469_v53 = vunpack.c.h.bf16 %v557_v38 }
  0x1a   :  { %365 = vst [vmem:[%s1026_s3 + $0x88] sm:$0xff] %v301_v40  ;;  %v306_v50 = vmax.f32 %v242_v41, 0.0  ;;  %v307_v51 = vmax.f32 %v243_v42, 0.0  ;;  %366 = vst [vmem:[%s1026_s3 + $0x90] sm:$0xff] %v302_v45  ;;  %v472_v54 = vunpack.c.l.bf16 %v558_v43  ;;  %v473_v55 = vunpack.c.h.bf16 %v558_v43 }
  0x1b   :  { %367 = vst [vmem:[%s1026_s3 + $0x98] sm:$0xff] %v303_v46  ;;  %368 = vst [vmem:[%s1026_s3 + $0xa0] sm:$0xff] %v304_v47  ;;  %v476_v56 = vunpack.c.l.bf16 %v559_v44  ;;  %v477_v57 = vunpack.c.h.bf16 %v559_v44  ;;  %v173_v58 = vmul.f32 %v468_v52, %v603_v1  ;;  %v174_v59 = vmul.f32 %v469_v53, %v603_v1  ;;  %v566_v53 = vld [vmem:[%s1023_s0 + $0xa8] sm:$0xff]  }
  0x1c   :  { %369 = vst [vmem:[%s1026_s3 + $0xa8] sm:$0xff] %v305_v48  ;;  %370 = vst [vmem:[%s1026_s3 + $0xb0] sm:$0xff] %v306_v50  ;;  %v480_v60 = vunpack.c.l.bf16 %v560_v49  ;;  %v481_v61 = vunpack.c.h.bf16 %v560_v49  ;;  %v175_v62 = vmul.f32 %v472_v54, %v603_v1  ;;  %v176_v63 = vmul.f32 %v473_v55, %v603_v1  ;;  %v565_v48 = vld [vmem:[%s1023_s0 + $0xa0] sm:$0xff]   ;;  %v567_v54 = vld [vmem:[%s1023_s0 + $0xb0] sm:$0xff]  }
  0x1d   :  { %371 = vst [vmem:[%s1026_s3 + $0xb8] sm:$0xff] %v307_v51  ;;  %v177_v0 = vmul.f32 %v476_v56, %v603_v1  ;;  %v178_v2 = vmul.f32 %v477_v57, %v603_v1  ;;  %v244_v3 = vadd.f32 %v617_v7, %v173_v58  ;;  %v245_v4 = vadd.f32 %v617_v7, %v174_v59  ;;  %v568_v59 = vld [vmem:[%s1023_s0 + $0xb8] sm:$0xff]  }
  0x1e   :  { %v179_v5 = vmul.f32 %v480_v60, %v603_v1  ;;  %v180_v6 = vmul.f32 %v481_v61, %v603_v1  ;;  %v246_v8 = vadd.f32 %v617_v7, %v175_v62  ;;  %v247_v9 = vadd.f32 %v617_v7, %v176_v63 }
  0x1f   :  { %v248_v10 = vadd.f32 %v617_v7, %v177_v0  ;;  %v249_v11 = vadd.f32 %v617_v7, %v178_v2  ;;  %v308_v13 = vmax.f32 %v244_v3, 0.0  ;;  %v309_v14 = vmax.f32 %v245_v4, 0.0 }
  0x20   :  { %v250_v15 = vadd.f32 %v617_v7, %v179_v5  ;;  %v251_v16 = vadd.f32 %v617_v7, %v180_v6  ;;  %v310_v19 = vmax.f32 %v246_v8, 0.0  ;;  %v311_v20 = vmax.f32 %v247_v9, 0.0 }
  0x21   :  { %v312_v21 = vmax.f32 %v248_v10, 0.0  ;;  %v313_v22 = vmax.f32 %v249_v11, 0.0  ;;  %372 = vst [vmem:[%s1026_s3 + $0xc0] sm:$0xff] %v308_v13  ;;  %373 = vst [vmem:[%s1026_s3 + $0xc8] sm:$0xff] %v309_v14  ;;  %v484_v26 = vunpack.c.l.bf16 %v561_v12  ;;  %v485_v27 = vunpack.c.h.bf16 %v561_v12 }
  0x22   :  { %v314_v24 = vmax.f32 %v250_v15, 0.0  ;;  %v315_v25 = vmax.f32 %v251_v16, 0.0  ;;  %374 = vst [vmem:[%s1026_s3 + $0xd0] sm:$0xff] %v310_v19  ;;  %375 = vst [vmem:[%s1026_s3 + $0xd8] sm:$0xff] %v311_v20  ;;  %v488_v28 = vunpack.c.l.bf16 %v562_v17  ;;  %v489_v29 = vunpack.c.h.bf16 %v562_v17 }
  0x23   :  { %376 = vst [vmem:[%s1026_s3 + $0xe0] sm:$0xff] %v312_v21  ;;  %377 = vst [vmem:[%s1026_s3 + $0xe8] sm:$0xff] %v313_v22  ;;  %v492_v30 = vunpack.c.l.bf16 %v563_v18  ;;  %v493_v31 = vunpack.c.h.bf16 %v563_v18  ;;  %v181_v32 = vmul.f32 %v484_v26, %v603_v1  ;;  %v182_v33 = vmul.f32 %v485_v27, %v603_v1  ;;  %v569_v22 = vld [vmem:[%s1023_s0 + $0xc0] sm:$0xff]   ;;  %v570_v27 = vld [vmem:[%s1023_s0 + $0xc8] sm:$0xff]  }
  0x24   :  { %378 = vst [vmem:[%s1026_s3 + $0xf0] sm:$0xff] %v314_v24  ;;  %379 = vst [vmem:[%s1026_s3 + $0xf8] sm:$0xff] %v315_v25  ;;  %v496_v34 = vunpack.c.l.bf16 %v564_v23  ;;  %v497_v35 = vunpack.c.h.bf16 %v564_v23  ;;  %v183_v36 = vmul.f32 %v488_v28, %v603_v1  ;;  %v184_v37 = vmul.f32 %v489_v29, %v603_v1  ;;  %v571_v28 = vld [vmem:[%s1023_s0 + $0xd0] sm:$0xff]  }
  0x25   :  { %v185_v38 = vmul.f32 %v492_v30, %v603_v1  ;;  %v186_v39 = vmul.f32 %v493_v31, %v603_v1  ;;  %v252_v40 = vadd.f32 %v617_v7, %v181_v32  ;;  %v253_v41 = vadd.f32 %v617_v7, %v182_v33  ;;  %v572_v33 = vld [vmem:[%s1023_s0 + $0xd8] sm:$0xff]  }
  0x26   :  { %v187_v42 = vmul.f32 %v496_v34, %v603_v1  ;;  %v188_v43 = vmul.f32 %v497_v35, %v603_v1  ;;  %v254_v44 = vadd.f32 %v617_v7, %v183_v36  ;;  %v255_v45 = vadd.f32 %v617_v7, %v184_v37 }
  0x27   :  { %v256_v46 = vadd.f32 %v617_v7, %v185_v38  ;;  %v257_v47 = vadd.f32 %v617_v7, %v186_v39  ;;  %v316_v49 = vmax.f32 %v252_v40, 0.0  ;;  %v317_v50 = vmax.f32 %v253_v41, 0.0 }
  0x28   :  { %v258_v51 = vadd.f32 %v617_v7, %v187_v42  ;;  %v259_v52 = vadd.f32 %v617_v7, %v188_v43  ;;  %v318_v55 = vmax.f32 %v254_v44, 0.0  ;;  %v319_v56 = vmax.f32 %v255_v45, 0.0 }
  0x29   :  { %v320_v57 = vmax.f32 %v256_v46, 0.0  ;;  %v321_v58 = vmax.f32 %v257_v47, 0.0  ;;  %380 = vst [vmem:[%s1026_s3 + $0x100] sm:$0xff] %v316_v49  ;;  %381 = vst [vmem:[%s1026_s3 + $0x108] sm:$0xff] %v317_v50  ;;  %v500_v62 = vunpack.c.l.bf16 %v565_v48  ;;  %v501_v63 = vunpack.c.h.bf16 %v565_v48 }
  0x2a   :  { %v322_v60 = vmax.f32 %v258_v51, 0.0  ;;  %v323_v61 = vmax.f32 %v259_v52, 0.0  ;;  %382 = vst [vmem:[%s1026_s3 + $0x110] sm:$0xff] %v318_v55  ;;  %383 = vst [vmem:[%s1026_s3 + $0x118] sm:$0xff] %v319_v56  ;;  %v504_v0 = vunpack.c.l.bf16 %v566_v53  ;;  %v505_v2 = vunpack.c.h.bf16 %v566_v53 }
  0x2b   :  { %384 = vst [vmem:[%s1026_s3 + $0x120] sm:$0xff] %v320_v57  ;;  %385 = vst [vmem:[%s1026_s3 + $0x128] sm:$0xff] %v321_v58  ;;  %v508_v3 = vunpack.c.l.bf16 %v567_v54  ;;  %v509_v4 = vunpack.c.h.bf16 %v567_v54  ;;  %v189_v5 = vmul.f32 %v500_v62, %v603_v1  ;;  %v190_v6 = vmul.f32 %v501_v63, %v603_v1  ;;  %v573_v58 = vld [vmem:[%s1023_s0 + $0xe0] sm:$0xff]   ;;  %v574_v63 = vld [vmem:[%s1023_s0 + $0xe8] sm:$0xff]  }
  0x2c   :  { %386 = vst [vmem:[%s1026_s3 + $0x130] sm:$0xff] %v322_v60  ;;  %387 = vst [vmem:[%s1026_s3 + $0x138] sm:$0xff] %v323_v61  ;;  %v512_v8 = vunpack.c.l.bf16 %v568_v59  ;;  %v513_v9 = vunpack.c.h.bf16 %v568_v59  ;;  %v191_v10 = vmul.f32 %v504_v0, %v603_v1  ;;  %v192_v11 = vmul.f32 %v505_v2, %v603_v1  ;;  %v575_v0 = vld [vmem:[%s1023_s0 + $0xf0] sm:$0xff]  }
  0x2d   :  { %v193_v12 = vmul.f32 %v508_v3, %v603_v1  ;;  %v194_v13 = vmul.f32 %v509_v4, %v603_v1  ;;  %v260_v14 = vadd.f32 %v617_v7, %v189_v5  ;;  %v261_v15 = vadd.f32 %v617_v7, %v190_v6  ;;  %v576_v6 = vld [vmem:[%s1023_s0 + $0xf8] sm:$0xff]  }
  0x2e   :  { %v195_v16 = vmul.f32 %v512_v8, %v603_v1  ;;  %v196_v17 = vmul.f32 %v513_v9, %v603_v1  ;;  %v262_v18 = vadd.f32 %v617_v7, %v191_v10  ;;  %v263_v19 = vadd.f32 %v617_v7, %v192_v11 }
  0x2f   :  { %v264_v20 = vadd.f32 %v617_v7, %v193_v12  ;;  %v265_v21 = vadd.f32 %v617_v7, %v194_v13  ;;  %v324_v23 = vmax.f32 %v260_v14, 0.0  ;;  %v325_v24 = vmax.f32 %v261_v15, 0.0 }
  0x30   :  { %v266_v25 = vadd.f32 %v617_v7, %v195_v16  ;;  %v267_v26 = vadd.f32 %v617_v7, %v196_v17  ;;  %v326_v29 = vmax.f32 %v262_v18, 0.0  ;;  %v327_v30 = vmax.f32 %v263_v19, 0.0 }
  0x31   :  { %v328_v31 = vmax.f32 %v264_v20, 0.0  ;;  %v329_v32 = vmax.f32 %v265_v21, 0.0  ;;  %388 = vst [vmem:[%s1026_s3 + $0x140] sm:$0xff] %v324_v23  ;;  %389 = vst [vmem:[%s1026_s3 + $0x148] sm:$0xff] %v325_v24  ;;  %v516_v36 = vunpack.c.l.bf16 %v569_v22  ;;  %v517_v37 = vunpack.c.h.bf16 %v569_v22 }
  0x32   :  { %v330_v34 = vmax.f32 %v266_v25, 0.0  ;;  %v331_v35 = vmax.f32 %v267_v26, 0.0  ;;  %390 = vst [vmem:[%s1026_s3 + $0x150] sm:$0xff] %v326_v29  ;;  %391 = vst [vmem:[%s1026_s3 + $0x158] sm:$0xff] %v327_v30  ;;  %v520_v38 = vunpack.c.l.bf16 %v570_v27  ;;  %v521_v39 = vunpack.c.h.bf16 %v570_v27 }
  0x33   :  { %392 = vst [vmem:[%s1026_s3 + $0x160] sm:$0xff] %v328_v31  ;;  %393 = vst [vmem:[%s1026_s3 + $0x168] sm:$0xff] %v329_v32  ;;  %v524_v40 = vunpack.c.l.bf16 %v571_v28  ;;  %v525_v41 = vunpack.c.h.bf16 %v571_v28  ;;  %v197_v42 = vmul.f32 %v516_v36, %v603_v1  ;;  %v198_v43 = vmul.f32 %v517_v37, %v603_v1 }
  0x34   :  { %394 = vst [vmem:[%s1026_s3 + $0x170] sm:$0xff] %v330_v34  ;;  %395 = vst [vmem:[%s1026_s3 + $0x178] sm:$0xff] %v331_v35  ;;  %v528_v44 = vunpack.c.l.bf16 %v572_v33  ;;  %v529_v45 = vunpack.c.h.bf16 %v572_v33  ;;  %v199_v46 = vmul.f32 %v520_v38, %v603_v1  ;;  %v200_v47 = vmul.f32 %v521_v39, %v603_v1 }
  0x35   :  { %v201_v48 = vmul.f32 %v524_v40, %v603_v1  ;;  %v202_v49 = vmul.f32 %v525_v41, %v603_v1  ;;  %v268_v50 = vadd.f32 %v617_v7, %v197_v42  ;;  %v269_v51 = vadd.f32 %v617_v7, %v198_v43 }
  0x36   :  { %v203_v52 = vmul.f32 %v528_v44, %v603_v1  ;;  %v204_v53 = vmul.f32 %v529_v45, %v603_v1  ;;  %v270_v54 = vadd.f32 %v617_v7, %v199_v46  ;;  %v271_v55 = vadd.f32 %v617_v7, %v200_v47 }
  0x37   :  { %v272_v56 = vadd.f32 %v617_v7, %v201_v48  ;;  %v273_v57 = vadd.f32 %v617_v7, %v202_v49  ;;  %v332_v59 = vmax.f32 %v268_v50, 0.0  ;;  %v333_v60 = vmax.f32 %v269_v51, 0.0 }
  0x38   :  { %v274_v61 = vadd.f32 %v617_v7, %v203_v52  ;;  %v275_v62 = vadd.f32 %v617_v7, %v204_v53  ;;  %v334_v2 = vmax.f32 %v270_v54, 0.0  ;;  %v335_v3 = vmax.f32 %v271_v55, 0.0 }
  0x39   :  { %v336_v4 = vmax.f32 %v272_v56, 0.0  ;;  %v337_v5 = vmax.f32 %v273_v57, 0.0  ;;  %396 = vst [vmem:[%s1026_s3 + $0x180] sm:$0xff] %v332_v59  ;;  %397 = vst [vmem:[%s1026_s3 + $0x188] sm:$0xff] %v333_v60  ;;  %v532_v10 = vunpack.c.l.bf16 %v573_v58  ;;  %v533_v11 = vunpack.c.h.bf16 %v573_v58 }
  0x3a   :  { %v338_v8 = vmax.f32 %v274_v61, 0.0  ;;  %v339_v9 = vmax.f32 %v275_v62, 0.0  ;;  %398 = vst [vmem:[%s1026_s3 + $0x190] sm:$0xff] %v334_v2  ;;  %399 = vst [vmem:[%s1026_s3 + $0x198] sm:$0xff] %v335_v3  ;;  %v536_v12 = vunpack.c.l.bf16 %v574_v63  ;;  %v537_v13 = vunpack.c.h.bf16 %v574_v63 }
  0x3b   :  { %400 = vst [vmem:[%s1026_s3 + $0x1a0] sm:$0xff] %v336_v4  ;;  %401 = vst [vmem:[%s1026_s3 + $0x1a8] sm:$0xff] %v337_v5  ;;  %v540_v14 = vunpack.c.l.bf16 %v575_v0  ;;  %v541_v15 = vunpack.c.h.bf16 %v575_v0  ;;  %v205_v16 = vmul.f32 %v532_v10, %v603_v1  ;;  %v206_v17 = vmul.f32 %v533_v11, %v603_v1 }
  0x3c   :  { %402 = vst [vmem:[%s1026_s3 + $0x1b0] sm:$0xff] %v338_v8  ;;  %403 = vst [vmem:[%s1026_s3 + $0x1b8] sm:$0xff] %v339_v9  ;;  %v544_v18 = vunpack.c.l.bf16 %v576_v6  ;;  %v545_v19 = vunpack.c.h.bf16 %v576_v6  ;;  %v207_v20 = vmul.f32 %v536_v12, %v603_v1  ;;  %v208_v21 = vmul.f32 %v537_v13, %v603_v1 }
  0x3d   :  { %v209_v22 = vmul.f32 %v540_v14, %v603_v1  ;;  %v210_v23 = vmul.f32 %v541_v15, %v603_v1  ;;  %v276_v24 = vadd.f32 %v617_v7, %v205_v16  ;;  %v277_v25 = vadd.f32 %v617_v7, %v206_v17 }
  0x3e   :  { %v211_v26 = vmul.f32 %v544_v18, %v603_v1  ;;  %v212_v27 = vmul.f32 %v545_v19, %v603_v1  ;;  %v278_v28 = vadd.f32 %v617_v7, %v207_v20  ;;  %v279_v29 = vadd.f32 %v617_v7, %v208_v21 }
  0x3f   :  { %v280_v30 = vadd.f32 %v617_v7, %v209_v22  ;;  %v281_v31 = vadd.f32 %v617_v7, %v210_v23  ;;  %v340_v32 = vmax.f32 %v276_v24, 0.0  ;;  %v341_v33 = vmax.f32 %v277_v25, 0.0 }
  0x40   :  { %v282_v34 = vadd.f32 %v617_v7, %v211_v26  ;;  %v283_v35 = vadd.f32 %v617_v7, %v212_v27  ;;  %v342_v36 = vmax.f32 %v278_v28, 0.0  ;;  %v343_v37 = vmax.f32 %v279_v29, 0.0 }
  0x41   :  { %v344_v38 = vmax.f32 %v280_v30, 0.0  ;;  %v345_v39 = vmax.f32 %v281_v31, 0.0  ;;  %404 = vst [vmem:[%s1026_s3 + $0x1c0] sm:$0xff] %v340_v32  ;;  %405 = vst [vmem:[%s1026_s3 + $0x1c8] sm:$0xff] %v341_v33 }
  0x42   :  { %v346_v1 = vmax.f32 %v282_v34, 0.0  ;;  %v347_v40 = vmax.f32 %v283_v35, 0.0  ;;  %406 = vst [vmem:[%s1026_s3 + $0x1d0] sm:$0xff] %v342_v36  ;;  %407 = vst [vmem:[%s1026_s3 + $0x1d8] sm:$0xff] %v343_v37 }
  0x43   :  { %408 = vst [vmem:[%s1026_s3 + $0x1e0] sm:$0xff] %v344_v38  ;;  %409 = vst [vmem:[%s1026_s3 + $0x1e8] sm:$0xff] %v345_v39 }
  0x44   :  { %410 = vst [vmem:[%s1026_s3 + $0x1f0] sm:$0xff] %v346_v1  ;;  %411 = vst [vmem:[%s1026_s3 + $0x1f8] sm:$0xff] %v347_v40 }

// kernel: inconv_forward.3
= control target key start
LH: loop header
LB: loop body
LE: loop exit
PB: predicated region body
PF: predicated region fallthrough
CT: control target
= control target key end

     0   :  { %s5862_s18 = smov 0   ;;  %s5864_s19 = smov 0   ;;  %s7422_s0 = inlined_call_operand.vmem [shape: f32[2,16,16,4], index: 0, kind: input, shape index: {}, may-alias: {0,1,2}]   ;;  %s7423_s1 = inlined_call_operand.vmem [shape: f32[2,16,16,4], index: 1, kind: input, shape index: {}, may-alias: {0,1,2}]   ;;  %s7424_s2 = inlined_call_operand.vmem [shape: f32[2,16,16,4], index: 2, kind: input, shape index: {}, may-alias: {0,1,2}]   ;;  %s7425_s3 = inlined_call_operand.vmem [shape: bf16[128,128], index: 3, kind: input, shape index: {}]   ;;  %s7426_s4 = inlined_call_operand.vmem [shape: bf16[2,16,16,128], index: 4, kind: output, shape index: {0}]   ;;  %s7427_s5 = inlined_call_operand.vmem [shape: f32[2,1,2,128], index: 5, kind: output, shape index: {1}]  }
   0x1   :  { %s5866_s20 = smov 0  }
   0x2 LB: > { %s28_s21 = sadd.s32 1, %s5816_s19  ;;  %p5053_p0 = scmp.ge.s32.totalorder %s5820_s20, 1  ;;  %s5820_s20 = sphi %s5866_s20, %s16_s20   ;;  %s5816_s19 = sphi %s5864_s19, %s7443_s19   ;;  %s5812_s18 = sphi %s5862_s18, %s7442_s18  }
   0x3   : > { %p30_p1 = scmp.ge.s32.totalorder %s28_s21, 2  ;;  %p278_p2 = scmp.lt.s32.totalorder %s5820_s20, 3 }
   0x5   : > { %s7445_s21 = smov (%p30_p1, %s28_s21), 0  ;;  %p279_p3 = pnand %p5053_p0, %p278_p2 }
   0x6   : > { %p350_p4 = scmp.lt.s32.totalorder (!%p279_p3), %s5812_s18, 1  ;;  %vm7428_vm0 = vcmask (!%p279_p3), 24576   ;;  %vm414_vm1 = vsmask.f32 (!%p279_p3), 256  ;;  %v419_v0 = vld [vmem:[#allocation2 + $0xc] sm:$0x1] (!%p279_p3) }
   0x7   : > { %282 = sbr.rel (%p279_p3) target bundleno = 1016 (0x3f8), region = 36  ;;  %vm5882_vm2 = vmand (!%p279_p3), %vm7428_vm0, %vm414_vm1  ;;  %vm470_vm3 = vsmask.f32 (!%p279_p3), 7938  ;;  %v422_v4 = vld [vmem:[#allocation2 + $0x18] sm:$0x1] (!%p279_p3)  ;;  %vm977_vm6 = vcmask (!%p279_p3), 27648  }
   0x8   : > { %v420_v2 = vsel (!%p279_p3), %vm5882_vm2, 0, %v419_v0  ;;  %vm5892_vm4 = vmand (!%p279_p3), %vm7428_vm0, %vm470_vm3  ;;  %v425_v5 = vld [vmem:[#allocation2 + $0x24] sm:$0x1] (!%p279_p3)  ;;  %v423_v6 = vsel (!%p279_p3), %vm5882_vm2, 0, %v422_v4  ;;  %v475_v8 = vld [vmem:[#allocation2 + $0x14] sm:$0x1] (!%p279_p3) }
   0x9   : > { %421 = vst [vmem:[#allocation2 + $0xc] sm:$0x1] (!%p279_p3), %v420_v2  ;;  %v426_v7 = vsel (!%p279_p3), %vm5882_vm2, 0, %v425_v5  ;;  %vm654_vm5 = vsmask.f32 (!%p279_p3), 4368  ;;  %v476_v9 = vsel (!%p279_p3), %vm5892_vm4, 0, %v475_v8  ;;  %vm5931_vm10 = vmand (!%p279_p3), %vm977_vm6, %vm470_vm3 }
   0xa   : > { %424 = vst [vmem:[#allocation2 + $0x18] sm:$0x1] (!%p279_p3), %v423_v6  ;;  %427 = vst [vmem:[#allocation2 + $0x24] sm:$0x1] (!%p279_p3), %v426_v7  ;;  %v478_v10 = vld [vmem:[#allocation2 + $0x20] sm:$0x1] (!%p279_p3) }
   0xb   : > { %477 = vst [vmem:[#allocation2 + $0x14] sm:$0x1] (!%p279_p3), %v476_v9  ;;  %v479_v11 = vsel (!%p279_p3), %vm5892_vm4, 0, %v478_v10  ;;  %v481_v12 = vld [vmem:[#allocation2 + $0x2c] sm:$0x1] (!%p279_p3)  ;;  %vm5925_vm7 = vmor (!%p279_p3), %vm414_vm1, %vm654_vm5  ;;  %vm1980_vm8 = vcmask (!%p279_p3), 1042432  }
   0xc   : > { %v416_v13 = vld [vmem:[#allocation2] sm:$0x1] (!%p279_p3)  ;;  %480 = vst [vmem:[#allocation2 + $0x20] sm:$0x1] (!%p279_p3), %v479_v11  ;;  %v482_v17 = vsel (!%p279_p3), %vm5892_vm4, 0, %v481_v12  ;;  %vm1981_vm9 = vcmask (!%p279_p3), 1046532  }
   0xd   : > { %v417_v18 = vsel (!%p279_p3), %vm5882_vm2, 0, %v416_v13  ;;  %483 = vst [vmem:[#allocation2 + $0x2c] sm:$0x1] (!%p279_p3), %v482_v17  ;;  %v472_v62 = vld [vmem:[#allocation2 + $0x8] sm:$0x1] (!%p279_p3)  ;;  %vm5973_vm11 = vmor (!%p279_p3), %vm1980_vm8, %vm1981_vm9  ;;  %s5822_s29 = smov (!%p279_p3), 12  }
   0xe   : > { %s7447_s18 = smov (!%p350_p4, %s5812_s18), 1  ;;  %418 = vst [vmem:[#allocation2] sm:$0x1] %v417_v18  ;;  %v428_v9 = vld [vmem:[#allocation2 + $0x30] sm:$0x1]  ;;  %s5824_s30 = smov 24  }
   0xf   : > { %s5901_s22 = sshll.u32 %s7447_s18, 8  ;;  %v484_v18 = vld [vmem:[#allocation2 + $0x38] sm:$0x1]  ;;  %vm1384_vm12 = vsmask.f32 3328  ;;  %s5825_s6 = smov 20  }
  0x10   : > { %s5909_s25 = scalar_lea.vmem %s7422_s0, %s5901_s22  ;;  %v979_v39 = vld [vmem:[#allocation2 + $0xc] sm:$0xf]  ;;  %s372_s28 = scalar_lea.vmem %s7423_s1, %s5901_s22  ;;  %vm1385_vm13 = vsmask.f32 7440  ;;  %vm1174_vm15 = vcmask 1047840   ;;  %vm1319_vm1 = vcmask 31744  }
  0x11   : > { %v526_v14 = vld [vmem:[%s5909_s25] sm:$0xff]  ;;  %v527_v15 = vld [vmem:[%s5909_s25 + $0x8] sm:$0xff]  ;;  %v528_v16 = vld [vmem:[%s5909_s25 + $0x10] sm:$0xff]  ;;  %s5826_s7 = smov 8   ;;  %s5827_s8 = smov 32   ;;  %vm1867_vm3 = vcmask 64544  }
  0x12   : > { %v5338_v19 = vpack.c.bf16 %v526_v14, %v526_v14  ;;  %v5339_v20 = vpack.c.bf16 %v527_v15, %v527_v15  ;;  %v529_v21 = vld [vmem:[%s5909_s25 + $0x18] sm:$0xff]  ;;  %v5340_v22 = vpack.c.bf16 %v528_v16, %v528_v16  ;;  %v530_v23 = vld [vmem:[%s5909_s25 + $0x20] sm:$0xff]  ;;  %v531_v24 = vld [vmem:[%s5909_s25 + $0x28] sm:$0xff]  ;;  %v473_v14 = vsel %vm5892_vm4, 0, %v472_v62  ;;  %s5828_s9 = smov 4   ;;  %s5829_s10 = smov 16  }
  0x13   : > { %v5341_v25 = vpack.c.bf16 %v529_v21, %v529_v21  ;;  %v5342_v26 = vpack.c.bf16 %v530_v23, %v530_v23  ;;  %v5343_v27 = vpack.c.bf16 %v531_v24, %v531_v24  ;;  %v987_v45 = vld [vmem:[#allocation2 + $0x18] sm:$0xf]  ;;  %v984_v52 = vld [vmem:[#allocation2 + $0x14] sm:$0x1]  ;;  %v991_v53 = vld [vmem:[#allocation2 + $0x20] sm:$0x1] }
  0x14   : > { %v657_v28 = vshrl.u32 %v5338_v19, 16  ;;  %v660_v29 = vshll.u32 %v5338_v19, 16  ;;  %v665_v30 = vshrl.u32 %v5339_v20, 16  ;;  %v668_v31 = vshll.u32 %v5339_v20, 16  ;;  %v1092_v63 = vld [vmem:[%s372_s28] sm:$0xff]  ;;  %v1093_v0 = vld [vmem:[%s372_s28 + $0x8] sm:$0xff]  ;;  %vm6039_vm14 = vmor %vm1384_vm12, %vm1385_vm13 }
  0x15   : > { %v674_v32 = vshrl.u32 %v5340_v22, 16  ;;  %v677_v33 = vshll.u32 %v5340_v22, 16  ;;  %v682_v34 = vshrl.u32 %v5341_v25, 16  ;;  %v685_v35 = vshll.u32 %v5341_v25, 16  ;;  %v994_v5 = vld [vmem:[#allocation2 + $0x24] sm:$0xf] }
  0x16   : > { %v659_v37 = vrot.slane %v657_v28, 7  ;;  %v667_v38 = vrot.slane %v665_v30, 7  ;;  %v691_v40 = vshrl.u32 %v5342_v26, 16  ;;  %v694_v41 = vshll.u32 %v5342_v26, 16  ;;  %v998_v8 = vld [vmem:[#allocation2 + $0x2c] sm:$0x1] }
  0x17   : > { %v676_v43 = vrot.slane %v674_v32, 7  ;;  %v684_v44 = vrot.slane %v682_v34, 7  ;;  %v699_v46 = vshrl.u32 %v5343_v27, 16  ;;  %v702_v47 = vshll.u32 %v5343_v27, 16  ;;  %v532_v17 = vld [vmem:[%s5909_s25 + $0x30] sm:$0xff]  ;;  %s5830_s11 = smov 28  }
  0x18   : > { %v662_v48 = vor.u32 %v660_v29, %v659_v37  ;;  %v663_v49 = vrot.slane %v659_v37, 4  ;;  %v670_v50 = vor.u32 %v668_v31, %v667_v38  ;;  %v672_v51 = vrot.slane %v667_v38, 4  ;;  %v431_v19 = vld [vmem:[#allocation2 + $0x3c] sm:$0x1]  ;;  %474 = vst [vmem:[#allocation2 + $0x8] sm:$0x1] %v473_v14 }
  0x19   : > { %v679_v54 = vor.u32 %v677_v33, %v676_v43  ;;  %v680_v55 = vrot.slane %v676_v43, 4  ;;  %v687_v56 = vor.u32 %v685_v35, %v684_v44  ;;  %v689_v57 = vrot.slane %v684_v44, 4  ;;  %v1120_v28 = vld [vmem:[#allocation2] sm:$0xf]  ;;  %s5336_s17 = sadd.s32 240, %s5901_s22 }
  0x1a   : > { %v671_v58 = vsel %vm5925_vm7, %v663_v49, %v670_v50  ;;  %v980_v59 = vsel %vm5931_vm10, %v662_v48, %v979_v39  ;;  %v693_v60 = vrot.slane %v691_v40, 7  ;;  %v701_v61 = vrot.slane %v699_v46, 7  ;;  %s6916_s24 = scalar_lea.vmem %s7424_s2, %s5336_s17 }
  0x1b   : > { %981 = vst [vmem:[#allocation2 + $0xc] sm:$0xf] %v980_v59  ;;  %983 = vst.msk [vmem:[#allocation2 + $0x10] sm:$0xf] %vm977_vm6, %v671_v58  ;;  %v688_v2 = vsel %vm5925_vm7, %v680_v55, %v687_v56  ;;  %v988_v4 = vsel %vm5931_vm10, %v679_v54, %v987_v45  ;;  %v985_v6 = vsel %vm5882_vm2, %v672_v51, %v984_v52  ;;  %v429_v23 = vsel %vm5882_vm2, 0, %v428_v9  ;;  %v533_v45 = vld [vmem:[%s5909_s25 + $0x38] sm:$0xff] }
  0x1c   : > { %v992_v7 = vsel %vm5882_vm2, %v689_v57, %v991_v53  ;;  %989 = vst [vmem:[#allocation2 + $0x18] sm:$0xf] %v988_v4  ;;  %990 = vst.msk [vmem:[#allocation2 + $0x1c] sm:$0xf] %vm977_vm6, %v688_v2  ;;  %v696_v10 = vor.u32 %v694_v41, %v693_v60  ;;  %v697_v11 = vrot.slane %v693_v60, 4  ;;  %v704_v12 = vor.u32 %v702_v47, %v701_v61  ;;  %v534_v53 = vld [vmem:[%s5909_s25 + $0x40] sm:$0xff] }
  0x1d   : > { %v706_v13 = vrot.slane %v701_v61, 4  ;;  %986 = vst [vmem:[#allocation2 + $0x14] sm:$0x1] %v985_v6  ;;  %993 = vst [vmem:[#allocation2 + $0x20] sm:$0x1] %v992_v7  ;;  %v5370_v15 = vpack.c.bf16 %v1092_v63, %v1092_v63  ;;  %v5371_v16 = vpack.c.bf16 %v1093_v0, %v1093_v0  ;;  %v5965_v29 = vpack.c.bf16 %v532_v17, %v532_v17 }
  0x1e   : > { %v705_v20 = vsel %vm5925_vm7, %v697_v11, %v704_v12  ;;  %v995_v21 = vsel %vm5931_vm10, %v696_v10, %v994_v5  ;;  %430 = vst [vmem:[#allocation2 + $0x30] sm:$0x1] %v429_v23  ;;  %v485_v30 = vsel %vm5892_vm4, 0, %v484_v18  ;;  %v432_v31 = vsel %vm5882_vm2, 0, %v431_v19  ;;  %v535_v12 = vld [vmem:[%s5909_s25 + $0x48] sm:$0xff] }
  0x1f   : > { %v999_v22 = vsel %vm5882_vm2, %v706_v13, %v998_v8  ;;  %996 = vst [vmem:[#allocation2 + $0x24] sm:$0xf] %v995_v21  ;;  %997 = vst.msk [vmem:[#allocation2 + $0x28] sm:$0xf] %vm977_vm6, %v705_v20  ;;  %v1101_v24 = vshrl.u32 %v5370_v15, 16  ;;  %v1104_v25 = vshll.u32 %v5370_v15, 16  ;;  %v5999_v6 = vpack.c.bf16 %v533_v45, %v533_v45 }
  0x20   : > { %1000 = vst [vmem:[#allocation2 + $0x2c] sm:$0x1] %v999_v22  ;;  %v1109_v26 = vshrl.u32 %v5371_v16, 16  ;;  %v1112_v27 = vshll.u32 %v5371_v16, 16  ;;  %486 = vst [vmem:[#allocation2 + $0x38] sm:$0x1] %v485_v30  ;;  %v6006_v18 = vpack.c.bf16 %v534_v53, %v534_v53 }
  0x21   : > { %v1103_v33 = vrot.slane %v1101_v24, 7  ;;  %433 = vst [vmem:[#allocation2 + $0x3c] sm:$0x1] %v432_v31  ;;  %v708_v37 = vshrl.u32 %v5965_v29, 16  ;;  %v5823_v58 = vmov 0   ;;  %vm2191_vm5 = vcmask 97344  }
  0x22   : > { %v5977_v34 = vrot.slane %v1109_v26, 7  ;;  %v5742_v35 = vld [vmem:[#allocation2 + $0xc] sm:$0xff]   ;;  %1176 = vst.msk [vmem:[#allocation3 + $0x8] sm:$0xff] %vm1174_vm15, %v5823_v58  ;;  %1175 = vst.msk [vmem:[#allocation3] sm:$0xff] %vm1174_vm15, %v5823_v58  ;;  %vm2368_vm8 = vcmask 130144   ;;  %vm2913_vm9 = vcmask 162944  }
  0x23   : > { %v5743_v38 = vld [vmem:[#allocation2 + $0x18] sm:$0xff]   ;;  %v1106_v39 = vor.u32 %v1104_v25, %v1103_v33  ;;  %v1107_v40 = vrot.slane %v1103_v33, 4  ;;  %2320 = vrot.lane.b32.xlu0 %v5742_v35, %s5822_s29  ;;  %v2930_v46 = vld [vmem:[#allocation2 + $0xc] sm:$0xe]  ;;  %v2931_v47 = vld [vmem:[#allocation2 + $0x10] sm:$0xf] }
  0x24   : > { %v1114_v41 = vor.u32 %v1112_v27, %v5977_v34  ;;  %v5744_v43 = vld [vmem:[#allocation2 + $0x18] sm:$0xff]   ;;  %v1116_v44 = vrot.slane %v5977_v34, 4  ;;  %2322 = vrot.lane.b32.xlu1 %v5743_v38, %s5822_s29  ;;  %v2932_v48 = vld [vmem:[#allocation2 + $0x14] sm:$0x1]  ;;  %v5195_v52 = vrot.slane %v2930_v46, 9  ;;  %v3028_v54 = vrot.slane %v2931_v47, 5 }
  0x25   : > { %v1121_v50 = vsel %vm5931_vm10, %v1106_v39, %v1120_v28  ;;  %v3031_v55 = vrot.slane %v2932_v48, 5  ;;  %v1887_v56 = vld [vmem:[#allocation2 + $0xc] sm:$0xe]  ;;  %v1888_v57 = vld [vmem:[#allocation2 + $0x10] sm:$0xf]  ;;  %1177 = vst.msk [vmem:[#allocation3 + $0x10] sm:$0xff] %vm1174_vm15, %v5823_v58 }
  0x26   : > { %v1115_v49 = vsel %vm5925_vm7, %v1107_v40, %v1114_v41  ;;  %v5745_v51 = vld [vmem:[#allocation2 + $0x24] sm:$0xff]   ;;  %1122 = vst [vmem:[#allocation2] sm:$0xf] %v1121_v50  ;;  %v1889_v59 = vld [vmem:[#allocation2 + $0x14] sm:$0x1]  ;;  %v5132_v60 = vrot.slane %v1887_v56, 9  ;;  %v3029_v63 = vsel %vm5973_vm11, %v5195_v52, %v3028_v54  ;;  %v6015_v40 = vpack.c.bf16 %v535_v12, %v535_v12 }
  0x27   : > { %1123 = vst.msk [vmem:[#allocation2 + $0x4] sm:$0xf] %vm977_vm6, %v1115_v49  ;;  %1167 = vst.msk [vmem:[#allocation2] sm:$0xf] %vm977_vm6, %v5823_v58  ;;  %3364 = vrot.lane.b32.xlu0 %v5744_v43, %s5824_s30  ;;  %v1992_v61 = vrot.slane %v1888_v57, 5  ;;  %v3030_v0 = vrot.slane %v3028_v54, 4 }
  0x28   : > { %1168 = vst.msk [vmem:[#allocation2 + $0x4] sm:$0xf] %vm977_vm6, %v5823_v58  ;;  %v3974_v62 = vld [vmem:[#allocation2 + $0x18] sm:$0xe]  ;;  %3366 = vrot.lane.b32.xlu1 %v5745_v51, %s5824_s30  ;;  %v1995_v2 = vrot.slane %v1889_v59, 5  ;;  %vm3234_vm12 = vcmask 195744  }
  0x29   : > { %v3975_v4 = vld [vmem:[#allocation2 + $0x1c] sm:$0xf]  ;;  %v3976_v5 = vld [vmem:[#allocation2 + $0x20] sm:$0x1]  ;;  %v1993_v7 = vsel %vm5973_vm11, %v5132_v60, %v1992_v61  ;;  %v1994_v8 = vrot.slane %v1992_v61, 4  ;;  %v5259_v9 = vrot.slane %v3974_v62, 9  ;;  %v3032_v13 = vsel %vm5973_vm11, %v3030_v0, %v3031_v55 }
  0x2a   : > { %v4072_v10 = vrot.slane %v3975_v4, 5  ;;  %v2933_v11 = vld [vmem:[#allocation2 + $0x18] sm:$0xe]  ;;  %v4075_v14 = vrot.slane %v3976_v5, 5  ;;  %v2934_v15 = vld [vmem:[#allocation2 + $0x1c] sm:$0xf]  ;;  %v5211_v19 = vcombine.low %v3029_v63, %v3032_v13 }
  0x2b   : > { %v2935_v16 = vld [vmem:[#allocation2 + $0x20] sm:$0x1]  ;;  %v5196_v17 = vrot.slane %v2933_v11, 9  ;;  %v1996_v20 = vsel %vm5973_vm11, %v1994_v8, %v1995_v2  ;;  %v3977_v23 = vld [vmem:[#allocation2 + $0x24] sm:$0xe]  ;;  %v3035_v26 = vrot.slane %v2934_v15, 5 }
  0x2c   : > { %v4073_v21 = vsel %vm5973_vm11, %v5259_v9, %v4072_v10  ;;  %v4074_v22 = vrot.slane %v4072_v10, 4  ;;  %v3978_v24 = vld [vmem:[#allocation2 + $0x28] sm:$0xf]  ;;  %v5148_v25 = vcombine.low %v1993_v7, %v1996_v20  ;;  %v3038_v27 = vrot.slane %v2935_v16, 5  ;;  %v3979_v28 = vld [vmem:[#allocation2 + $0x2c] sm:$0x1]  ;;  %3186 = vrot.lane.b32.xlu0 %v5211_v19, %s5825_s6 }
  0x2d   : > { %v5260_v30 = vrot.slane %v3977_v23, 9  ;;  %v4079_v33 = vrot.slane %v3978_v24, 5  ;;  %v4082_v35 = vrot.slane %v3979_v28, 5  ;;  %v1124_v38 = vld [vmem:[#allocation2 + $0x8] sm:$0x1]  ;;  %v3036_v43 = vsel %vm5973_vm11, %v5196_v17, %v3035_v26  ;;  %1178 = vst.msk [vmem:[#allocation3 + $0x18] sm:$0xff] %vm1174_vm15, %v5823_v58 }
  0x2e   : > { %v4076_v31 = vsel %vm5973_vm11, %v4074_v22, %v4075_v14  ;;  %v1884_v39 = vld [vmem:[#allocation2] sm:$0xe]  ;;  %2145 = vrot.lane.b32.xlu1 %v5148_v25, %s5826_s7  ;;  %v3037_v45 = vrot.slane %v3035_v26, 4  ;;  %v1125_v46 = vsel %vm5882_vm2, %v1116_v44, %v1124_v38  ;;  %v1339_v48 = vld [vmem:[#allocation2 + $0xc] sm:$0xf]  ;;  %1179 = vst.msk [vmem:[#allocation3 + $0x20] sm:$0xff] %vm1174_vm15, %v5823_v58 }
  0x2f   : > { %v5275_v41 = vcombine.low %v4073_v21, %v4076_v31  ;;  %v1885_v47 = vld [vmem:[#allocation2 + $0x4] sm:$0xf]  ;;  %v4080_v49 = vsel %vm5973_vm11, %v5260_v30, %v4079_v33  ;;  %v4081_v50 = vrot.slane %v4079_v33, 4  ;;  %1126 = vst [vmem:[#allocation2 + $0x8] sm:$0x1] %v1125_v46  ;;  %v5131_v51 = vrot.slane %v1884_v39, 9 }
  0x30   : > { %v1985_v52 = vrot.slane %v1885_v47, 5  ;;  %v1340_v53 = vld [vmem:[#allocation2 + $0x10] sm:$0xf]  ;;  %v3039_v54 = vsel %vm5973_vm11, %v3037_v45, %v3038_v27  ;;  %1170 = vst.msk [vmem:[#allocation2 + $0x8] sm:$0x1] %vm7428_vm0, %v5823_v58  ;;  %v1412_v55 = vshrl.u32 %v1339_v48, 16 }
  0x31   : > { %v1341_v34 = vld [vmem:[#allocation2 + $0x14] sm:$0x1]  ;;  %v1415_v56 = vshll.u32 %v1339_v48, 16  ;;  %v1421_v44 = vshll.u32 %v1340_v53, 16  ;;  %4230 = vrot.lane.b32.xlu0 %v5275_v41, %s5827_s8  ;;  %v5212_v57 = vcombine.low %v3036_v43, %v3039_v54  ;;  %v4083_v59 = vsel %vm5973_vm11, %v4081_v50, %v4082_v35  ;;  %v2388_v62 = vld [vmem:[#allocation2 + $0x18] sm:$0xf] }
  0x32   : > { %v1986_v60 = vsel %vm5973_vm11, %v5131_v51, %v1985_v52  ;;  %v1987_v61 = vrot.slane %v1985_v52, 4  ;;  %v2389_v63 = vld [vmem:[#allocation2 + $0x1c] sm:$0xf]  ;;  %v5276_v0 = vcombine.low %v4080_v49, %v4083_v59  ;;  %v1414_v2 = vrot.slane %v1412_v55, 4  ;;  %v2390_v7 = vld [vmem:[#allocation2 + $0x20] sm:$0x1] }
  0x33   : > { %v1417_v4 = vrot.slane %v1415_v56, 5  ;;  %v1423_v5 = vrot.slane %v1421_v44, 5  ;;  %3188 = vrot.lane.b32.xlu1 %v5212_v57, %s5825_s6  ;;  %v1425_v8 = vshrl.u32 %v1340_v53, 16  ;;  %v1431_v9 = vshll.u32 %v1341_v34, 16  ;;  %v2385_v16 = vld [vmem:[#allocation2 + $0xc] sm:$0xf] }
  0x34   : > { %v2458_v10 = vshrl.u32 %v2388_v62, 16  ;;  %v2461_v11 = vshll.u32 %v2388_v62, 16  ;;  %v2467_v13 = vshll.u32 %v2389_v63, 16  ;;  %v2471_v14 = vshrl.u32 %v2389_v63, 16  ;;  %v2386_v23 = vld [vmem:[#allocation2 + $0x10] sm:$0xf] }
  0x35   : > { %v1418_v12 = vor.u32 %v1417_v4, %v1414_v2  ;;  %v2477_v15 = vshll.u32 %v2390_v7, 16  ;;  %4232 = vrot.lane.b32.xlu0 %v5276_v0, %s5827_s8  ;;  %v1427_v19 = vrot.slane %v1425_v8, 4  ;;  %v1433_v20 = vrot.slane %v1431_v9, 5  ;;  %v2387_v47 = vld [vmem:[#allocation2 + $0x14] sm:$0x1]  ;;  %1180 = vst.msk [vmem:[#allocation3 + $0x28] sm:$0xff] %vm1174_vm15, %v5823_v58 }
  0x36   : > { %v2460_v21 = vrot.slane %v2458_v10, 4  ;;  %v2463_v22 = vrot.slane %v2461_v11, 5  ;;  %v2469_v25 = vrot.slane %v2467_v13, 5  ;;  %v2473_v26 = vrot.slane %v2471_v14, 4  ;;  %v3432_v54 = vld [vmem:[#allocation2 + $0x24] sm:$0xf] }
  0x37   : > { %v1419_v24 = vrot.slane %v1418_v12, 4  ;;  %v2479_v27 = vrot.slane %v2477_v15, 5  ;;  %v1886_v28 = vld [vmem:[#allocation2 + $0x8] sm:$0x1]  ;;  %v1428_v30 = vor.u32 %v1427_v19, %v1423_v5  ;;  %v2434_v33 = vshrl.u32 %v2385_v16, 16  ;;  %1181 = vst.msk [vmem:[#allocation3 + $0x30] sm:$0xff] %vm1174_vm15, %v5823_v58 }
  0x38   : > { %v2464_v31 = vor.u32 %v2463_v22, %v2460_v21  ;;  %v2437_v35 = vshll.u32 %v2385_v16, 16  ;;  %v1988_v38 = vrot.slane %v1886_v28, 5  ;;  %v2474_v41 = vor.u32 %v2473_v26, %v2469_v25  ;;  %v3433_v57 = vld [vmem:[#allocation2 + $0x28] sm:$0xf]  ;;  %v3429_v7 = vld [vmem:[#allocation2 + $0x18] sm:$0xf] }
  0x39   : > { %v1424_v39 = vsel %vm6039_vm14, %v1419_v24, %v1423_v5  ;;  %v2443_v43 = vshll.u32 %v2386_v23, 16  ;;  %v1429_v45 = vrot.slane %v1428_v30, 4  ;;  %v2436_v48 = vrot.slane %v2434_v33, 4  ;;  %v3430_v12 = vld [vmem:[#allocation2 + $0x1c] sm:$0xf]  ;;  %1182 = vst.msk [vmem:[#allocation3 + $0x38] sm:$0xff] %vm1174_vm15, %v5823_v58 }
  0x3a   : > { %v2465_v46 = vrot.slane %v2464_v31, 4  ;;  %v2439_v49 = vrot.slane %v2437_v35, 5  ;;  %v1989_v50 = vsel %vm5973_vm11, %v1987_v61, %v1988_v38  ;;  %v2475_v51 = vrot.slane %v2474_v41, 4  ;;  %v3434_v61 = vld [vmem:[#allocation2 + $0x2c] sm:$0x1]  ;;  %1183 = vst.msk [vmem:[#allocation3 + $0x40] sm:$0xff] %vm1174_vm15, %v5823_v58 }
  0x3b   : > { %v2445_v52 = vrot.slane %v2443_v43, 5  ;;  %v2447_v53 = vshrl.u32 %v2386_v23, 16  ;;  %v5147_v34 = vcombine.low %v1986_v60, %v1989_v50  ;;  %v1434_v55 = vsel %vm6039_vm14, %v1429_v45, %v1433_v20  ;;  %v3431_v22 = vld [vmem:[#allocation2 + $0x20] sm:$0x1]  ;;  %v1342_v28 = vld [vmem:[#allocation2 + $0x18] sm:$0xf] }
  0x3c   : > { %v2470_v56 = vsel %vm6039_vm14, %v2465_v46, %v2469_v25  ;;  %v2440_v44 = vor.u32 %v2439_v49, %v2436_v48  ;;  %v5116_v59 = vcombine.low %v1424_v39, %v1434_v55  ;;  %v2480_v62 = vsel %vm6039_vm14, %v2475_v51, %v2479_v27  ;;  %v1343_v38 = vld [vmem:[#allocation2 + $0x1c] sm:$0xf]  ;;  %v1344_v46 = vld [vmem:[#allocation2 + $0x20] sm:$0x1]  ;;  %v1890_v51 = vld [vmem:[#allocation2 + $0x18] sm:$0xe] }
  0x3d   : > { %v2449_v63 = vrot.slane %v2447_v53, 4  ;;  %v2453_v0 = vshll.u32 %v2387_v47, 16  ;;  %2143 = vrot.lane.b32.xlu1 %v5147_v34, %s5826_s7  ;;  %v5180_v2 = vcombine.low %v2470_v56, %v2480_v62  ;;  %v3502_v60 = vshrl.u32 %v3432_v54, 16  ;;  %v1891_v55 = vld [vmem:[#allocation2 + $0x1c] sm:$0xf]  ;;  %1184 = vst.msk [vmem:[#allocation3 + $0x48] sm:$0xff] %vm1174_vm15, %v5823_v58 }
  0x3e   : > { %v2441_v4 = vrot.slane %v2440_v44, 4  ;;  %v3505_v5 = vshll.u32 %v3432_v54, 16  ;;  %1821 = vrot.lane.b32.xlu0 %v5116_v59, %s5828_s9  ;;  %v3511_v10 = vshll.u32 %v3433_v57, 16  ;;  %v3515_v11 = vshrl.u32 %v3433_v57, 16  ;;  %v1892_v62 = vld [vmem:[#allocation2 + $0x20] sm:$0x1] }
  0x3f   : > { %v2450_v8 = vor.u32 %v2449_v63, %v2445_v52  ;;  %v2455_v9 = vrot.slane %v2453_v0, 5  ;;  %v3504_v14 = vrot.slane %v3502_v60, 4  ;;  %v3521_v16 = vshll.u32 %v3434_v61, 16  ;;  %1185 = vst.msk [vmem:[#allocation3 + $0x50] sm:$0xff] %vm1174_vm15, %v5823_v58  ;;  %1186 = vst.msk [vmem:[#allocation3 + $0x58] sm:$0xff] %vm1174_vm15, %v5823_v58 }
  0x40   : > { %v2446_v13 = vsel %vm6039_vm14, %v2441_v4, %v2445_v52  ;;  %v3507_v15 = vrot.slane %v3505_v5, 5  ;;  %v3513_v20 = vrot.slane %v3511_v10, 5  ;;  %v3517_v21 = vrot.slane %v3515_v11, 4  ;;  %v1345_v4 = vld [vmem:[#allocation2 + $0x24] sm:$0xf]  ;;  %1187 = vst.msk [vmem:[#allocation3 + $0x60] sm:$0xff] %vm1174_vm15, %v5823_v58 }
  0x41   : > { %v2451_v19 = vrot.slane %v2450_v8, 4  ;;  %v3478_v23 = vshrl.u32 %v3429_v7, 16  ;;  %2867 = vrot.lane.b32.xlu1 %v5180_v2, %s5829_s10  ;;  %v3523_v25 = vrot.slane %v3521_v16, 5  ;;  %v3481_v26 = vshll.u32 %v3429_v7, 16  ;;  %1188 = vst.msk [vmem:[#allocation3 + $0x68] sm:$0xff] %vm1174_vm15, %v5823_v58  ;;  %1189 = vst.msk [vmem:[#allocation3 + $0x70] sm:$0xff] %vm1174_vm15, %v5823_v58 }
  0x42   : > { %v3508_v24 = vor.u32 %v3507_v15, %v3504_v14  ;;  %v3487_v27 = vshll.u32 %v3430_v12, 16  ;;  %v3518_v31 = vor.u32 %v3517_v21, %v3513_v20  ;;  %v3491_v35 = vshrl.u32 %v3430_v12, 16  ;;  %1190 = vst.msk [vmem:[#allocation3 + $0x78] sm:$0xff] %vm1174_vm15, %v5823_v58 }
  0x43   : > { %v2456_v30 = vsel %vm6039_vm14, %v2451_v19, %v2455_v9  ;;  %v3480_v33 = vrot.slane %v3478_v23, 4  ;;  %v3483_v43 = vrot.slane %v3481_v26, 5  ;;  %v3497_v49 = vshll.u32 %v3431_v22, 16  ;;  %v1347_v19 = vld [vmem:[#allocation2 + $0x2c] sm:$0x1] }
  0x44   : > { %v5179_v39 = vcombine.low %v2446_v13, %v2456_v30  ;;  %v3509_v41 = vrot.slane %v3508_v24, 4  ;;  %v3489_v45 = vrot.slane %v3487_v27, 5  ;;  %v3519_v47 = vrot.slane %v3518_v31, 4  ;;  %v1346_v13 = vld [vmem:[#allocation2 + $0x28] sm:$0xf] }
  0x45   : > { %v3493_v48 = vrot.slane %v3491_v35, 4  ;;  %v1436_v50 = vshrl.u32 %v1342_v28, 16  ;;  %v3484_v53 = vor.u32 %v3483_v43, %v3480_v33  ;;  %v1439_v54 = vshll.u32 %v1342_v28, 16  ;;  %v1336_v30 = vld [vmem:[#allocation2] sm:$0xf] }
  0x46   : > { %2865 = vrot.lane.b32.xlu0 %v5179_v39, %s5829_s10  ;;  %v3514_v52 = vsel %vm6039_vm14, %v3509_v41, %v3513_v20  ;;  %v1445_v34 = vshll.u32 %v1343_v38, 16  ;;  %v3524_v56 = vsel %vm6039_vm14, %v3519_v47, %v3523_v25  ;;  %v3499_v57 = vrot.slane %v3497_v49, 5  ;;  %v1337_v39 = vld [vmem:[#allocation2 + $0x4] sm:$0xf]  ;;  %v1338_v41 = vld [vmem:[#allocation2 + $0x8] sm:$0x1] }
  0x47   : > { %v3494_v44 = vor.u32 %v3493_v48, %v3489_v45  ;;  %v1438_v59 = vrot.slane %v1436_v50, 4  ;;  %v5244_v63 = vcombine.low %v3514_v52, %v3524_v56  ;;  %v3485_v0 = vrot.slane %v3484_v53, 4  ;;  %v1893_v48 = vld [vmem:[#allocation2 + $0x24] sm:$0xe]  ;;  %v1894_v49 = vld [vmem:[#allocation2 + $0x28] sm:$0xf] }
  0x48   : > { %v1441_v61 = vrot.slane %v1439_v54, 5  ;;  %v1447_v2 = vrot.slane %v1445_v34, 5  ;;  %v1449_v5 = vshrl.u32 %v1343_v38, 16  ;;  %v1455_v7 = vshll.u32 %v1344_v46, 16  ;;  %v1895_v54 = vld [vmem:[#allocation2 + $0x2c] sm:$0x1] }
  0x49   : > { %v3495_v60 = vrot.slane %v3494_v44, 4  ;;  %v5133_v8 = vrot.slane %v1890_v51, 9  ;;  %3911 = vrot.lane.b32.xlu1 %v5244_v63, %s5830_s11  ;;  %v3490_v9 = vsel %vm6039_vm14, %v3485_v0, %v3489_v45  ;;  %v1999_v11 = vrot.slane %v1891_v55, 5 }
  0x4a   : > { %v1442_v10 = vor.u32 %v1441_v61, %v1438_v59  ;;  %v2002_v12 = vrot.slane %v1892_v62, 5  ;;  %v1451_v15 = vrot.slane %v1449_v5, 4  ;;  %v1457_v16 = vrot.slane %v1455_v7, 5 }
  0x4b   : > { %v3500_v14 = vsel %vm6039_vm14, %v3495_v60, %v3499_v57  ;;  %v1460_v20 = vshrl.u32 %v1345_v4, 16  ;;  %v2000_v23 = vsel %vm5973_vm11, %v5133_v8, %v1999_v11  ;;  %v2001_v24 = vrot.slane %v1999_v11, 4 }
  0x4c   : > { %v5243_v21 = vcombine.low %v3490_v9, %v3500_v14  ;;  %v1443_v22 = vrot.slane %v1442_v10, 4  ;;  %v1452_v25 = vor.u32 %v1451_v15, %v1447_v2  ;;  %v1463_v27 = vshll.u32 %v1345_v4, 16 }
  0x4d   : > { %v1462_v26 = vrot.slane %v1460_v20, 4  ;;  %v1469_v28 = vshll.u32 %v1346_v13, 16  ;;  %v2003_v33 = vsel %vm5973_vm11, %v2001_v24, %v2002_v12  ;;  %v1473_v35 = vshrl.u32 %v1346_v13, 16  ;;  %v2391_v13 = vld [vmem:[#allocation2 + $0x24] sm:$0xf] }
  0x4e   : > { %3909 = vrot.lane.b32.xlu0 %v5243_v21, %s5830_s11  ;;  %v1448_v31 = vsel %vm6039_vm14, %v1443_v22, %v1447_v2  ;;  %v1479_v38 = vshll.u32 %v1347_v19, 16  ;;  %v1453_v43 = vrot.slane %v1452_v25, 4  ;;  %v5149_v45 = vcombine.low %v2000_v23, %v2003_v33  ;;  %v1001_v20 = vld [vmem:[#allocation2 + $0x30] sm:$0xf]  ;;  %v2392_v21 = vld [vmem:[#allocation2 + $0x28] sm:$0xf] }
  0x4f   : > { %v1465_v46 = vrot.slane %v1463_v27, 5  ;;  %v1471_v47 = vrot.slane %v1469_v28, 5  ;;  %v1475_v50 = vrot.slane %v1473_v35, 4  ;;  %v1388_v52 = vshrl.u32 %v1336_v30, 16  ;;  %v2393_v22 = vld [vmem:[#allocation2 + $0x2c] sm:$0x1] }
  0x50   : > { %v1481_v51 = vrot.slane %v1479_v38, 5  ;;  %v1391_v53 = vshll.u32 %v1336_v30, 16  ;;  %v1458_v34 = vsel %vm6039_vm14, %v1453_v43, %v1457_v16  ;;  %v1397_v56 = vshll.u32 %v1337_v39, 16  ;;  %v2936_v33 = vld [vmem:[#allocation2 + $0x24] sm:$0xe] }
  0x51   : > { %v1466_v55 = vor.u32 %v1465_v46, %v1462_v26  ;;  %v1401_v44 = vshrl.u32 %v1337_v39, 16  ;;  %v5117_v57 = vcombine.low %v1448_v31, %v1458_v34  ;;  %v1476_v59 = vor.u32 %v1475_v50, %v1471_v47 }
  0x52   : > { %2147 = vrot.lane.b32.xlu0 %v5149_v45, %s5826_s7  ;;  %v1390_v62 = vrot.slane %v1388_v52, 4  ;;  %v1393_v63 = vrot.slane %v1391_v53, 5  ;;  %v1399_v61 = vrot.slane %v1397_v56, 5  ;;  %v1407_v4 = vshll.u32 %v1338_v41, 16  ;;  %v2937_v41 = vld [vmem:[#allocation2 + $0x28] sm:$0xf] }
  0x53   : > { %v1467_v0 = vrot.slane %v1466_v55, 4  ;;  %v1403_v2 = vrot.slane %v1401_v44, 4  ;;  %1823 = vrot.lane.b32.xlu1 %v5117_v57, %s5828_s9  ;;  %v1477_v60 = vrot.slane %v1476_v59, 4  ;;  %v5134_v7 = vrot.slane %v1893_v48, 9  ;;  %v2938_v48 = vld [vmem:[#allocation2 + $0x2c] sm:$0x1] }
  0x54   : > { %v1394_v5 = vor.u32 %v1393_v63, %v1390_v62  ;;  %v2006_v8 = vrot.slane %v1894_v49, 5  ;;  %v1409_v11 = vrot.slane %v1407_v4, 5  ;;  %v2009_v12 = vrot.slane %v1895_v54, 5  ;;  %v5746_v52 = vld [vmem:[#allocation2 + $0x24] sm:$0xff]  }
  0x55   : > { %v1472_v9 = vsel %vm6039_vm14, %v1467_v0, %v1471_v47  ;;  %v1404_v10 = vor.u32 %v1403_v2, %v1399_v61  ;;  %v1482_v14 = vsel %vm6039_vm14, %v1477_v60, %v1481_v51  ;;  %v710_v25 = vrot.slane %v708_v37, 7  ;;  %v487_v56 = vld [vmem:[#allocation2 + $0x44] sm:$0x1]  ;;  %v434_v63 = vld [vmem:[#allocation2 + $0x48] sm:$0x1] }
  0x56   : > { %v1395_v15 = vrot.slane %v1394_v5, 4  ;;  %v2007_v16 = vsel %vm5973_vm11, %v5134_v7, %v2006_v8  ;;  %v2008_v19 = vrot.slane %v2006_v8, 4  ;;  %v5118_v23 = vcombine.low %v1472_v9, %v1482_v14 }
  0x57   : > { %v1405_v24 = vrot.slane %v1404_v10, 4  ;;  %v711_v26 = vshll.u32 %v5965_v29, 16  ;;  %v716_v30 = vshrl.u32 %v5999_v6, 16  ;;  %v719_v31 = vshll.u32 %v5999_v6, 16  ;;  %v1005_v29 = vld [vmem:[#allocation2 + $0x38] sm:$0x1] }
  0x58   : > { %v1400_v27 = vsel %vm6039_vm14, %v1395_v15, %v1399_v61  ;;  %v2010_v28 = vsel %vm5973_vm11, %v2008_v19, %v2009_v12  ;;  %1825 = vrot.lane.b32.xlu1 %v5118_v23, %s5828_s9  ;;  %v714_v39 = vrot.slane %v710_v25, 4  ;;  %v2482_v46 = vshrl.u32 %v2391_v13, 16 }
  0x59   : > { %v1410_v35 = vsel %vm6039_vm14, %v1405_v24, %v1409_v11  ;;  %v5150_v38 = vcombine.low %v2007_v16, %v2010_v28  ;;  %v713_v37 = vor.u32 %v711_v26, %v710_v25  ;;  %v718_v45 = vrot.slane %v716_v30, 7 }
  0x5a   : > { %v5115_v43 = vcombine.low %v1400_v27, %v1410_v35  ;;  %v2485_v47 = vshll.u32 %v2391_v13, 16  ;;  %v2491_v6 = vshll.u32 %v2392_v21, 16  ;;  %v2495_v50 = vshrl.u32 %v2392_v21, 16 }
  0x5b   : > { %v1002_v49 = vsel %vm5931_vm10, %v713_v37, %v1001_v20  ;;  %v2501_v51 = vshll.u32 %v2393_v22, 16  ;;  %v721_v53 = vor.u32 %v719_v31, %v718_v45  ;;  %v723_v54 = vrot.slane %v718_v45, 4  ;;  %v1008_v20 = vld [vmem:[#allocation2 + $0x3c] sm:$0xf] }
  0x5c   : > { %1819 = vrot.lane.b32.xlu0 %v5115_v43, %s5828_s9  ;;  %1003 = vst [vmem:[#allocation2 + $0x30] sm:$0xf] %v1002_v49  ;;  %v2484_v34 = vrot.slane %v2482_v46, 4  ;;  %v2487_v55 = vrot.slane %v2485_v47, 5  ;;  %2149 = vrot.lane.b32.xlu1 %v5150_v38, %s5826_s7  ;;  %v2493_v44 = vrot.slane %v2491_v6, 5  ;;  %v2497_v57 = vrot.slane %v2495_v50, 4 }
  0x5d   : > { %v2503_v59 = vrot.slane %v2501_v51, 5  ;;  %v5197_v62 = vrot.slane %v2936_v33, 9  ;;  %v722_v0 = vsel %vm5925_vm7, %v714_v39, %v721_v53  ;;  %v1006_v2 = vsel %vm5882_vm2, %v723_v54, %v1005_v29  ;;  %v536_v39 = vld [vmem:[%s5909_s25 + $0x50] sm:$0xff]  ;;  %v537_v29 = vld [vmem:[%s5909_s25 + $0x58] sm:$0xff]  ;;  %v538_v51 = vld [vmem:[%s5909_s25 + $0x60] sm:$0xff] }
  0x5e   : > { %v2488_v61 = vor.u32 %v2487_v55, %v2484_v34  ;;  %v3042_v4 = vrot.slane %v2937_v41, 5  ;;  %1004 = vst.msk [vmem:[#allocation2 + $0x34] sm:$0xf] %vm977_vm6, %v722_v0  ;;  %v2498_v60 = vor.u32 %v2497_v57, %v2493_v44  ;;  %1007 = vst [vmem:[#allocation2 + $0x38] sm:$0x1] %v1006_v2  ;;  %v3045_v5 = vrot.slane %v2938_v48, 5 }
  0x5f   : > { %v725_v7 = vshrl.u32 %v6006_v18, 16  ;;  %v728_v8 = vshll.u32 %v6006_v18, 16  ;;  %v733_v11 = vshrl.u32 %v6015_v40, 16  ;;  %v736_v14 = vshll.u32 %v6015_v40, 16 }
  0x60   : > { %2324 = vrot.lane.b32.xlu0 %v5746_v52, %s5822_s29  ;;  %v2489_v9 = vrot.slane %v2488_v61, 4  ;;  %v3044_v10 = vrot.slane %v3042_v4, 4  ;;  %v2499_v12 = vrot.slane %v2498_v60, 4  ;;  %v488_v15 = vsel %vm5892_vm4, 0, %v487_v56 }
  0x61   : > { %v727_v13 = vrot.slane %v725_v7, 7  ;;  %v6117_v19 = vrot.slane %v733_v11, 7  ;;  %489 = vst [vmem:[#allocation2 + $0x44] sm:$0x1] %v488_v15  ;;  %v435_v18 = vsel %vm5882_vm2, 0, %v434_v63  ;;  %v3043_v40 = vsel %vm5973_vm11, %v5197_v62, %v3042_v4 }
  0x62   : > { %v2494_v16 = vsel %vm6039_vm14, %v2489_v9, %v2493_v44  ;;  %v2504_v21 = vsel %vm6039_vm14, %v2499_v12, %v2503_v59  ;;  %v3046_v23 = vsel %vm5973_vm11, %v3044_v10, %v3045_v5  ;;  %436 = vst [vmem:[#allocation2 + $0x48] sm:$0x1] %v435_v18  ;;  %v6139_v55 = vpack.c.bf16 %v536_v39, %v536_v39  ;;  %v539_v10 = vld [vmem:[%s5909_s25 + $0x68] sm:$0xff] }
  0x63   : > { %v2394_v22 = vld [vmem:[#allocation2 + $0x30] sm:$0xf]  ;;  %v730_v25 = vor.u32 %v728_v8, %v727_v13  ;;  %v5181_v26 = vcombine.low %v2494_v16, %v2504_v21  ;;  %v731_v31 = vrot.slane %v727_v13, 4  ;;  %v738_v33 = vor.u32 %v736_v14, %v6117_v19 }
  0x64   : > { %v2939_v24 = vld [vmem:[#allocation2 + $0x30] sm:$0xe]  ;;  %v2506_v27 = vshrl.u32 %v2394_v22, 16  ;;  %v2509_v28 = vshll.u32 %v2394_v22, 16  ;;  %v740_v35 = vrot.slane %v6117_v19, 4  ;;  %v5213_v46 = vcombine.low %v3043_v40, %v3046_v23 }
  0x65   : > { %v5198_v30 = vrot.slane %v2939_v24, 9  ;;  %v1009_v38 = vsel %vm5931_vm10, %v730_v25, %v1008_v20  ;;  %v3435_v37 = vld [vmem:[#allocation2 + $0x30] sm:$0xf]  ;;  %2869 = vrot.lane.b32.xlu0 %v5181_v26, %s5829_s10  ;;  %v2395_v43 = vld [vmem:[#allocation2 + $0x34] sm:$0xf]  ;;  %v739_v50 = vsel %vm5925_vm7, %v731_v31, %v738_v33  ;;  %v6142_v4 = vpack.c.bf16 %v537_v29, %v537_v29 }
  0x66   : > { %v5747_v41 = vld [vmem:[#allocation2 + $0x30] sm:$0xff]   ;;  %v2508_v45 = vrot.slane %v2506_v27, 4  ;;  %1010 = vst [vmem:[#allocation2 + $0x3c] sm:$0xf] %v1009_v38  ;;  %v2396_v47 = vld [vmem:[#allocation2 + $0x38] sm:$0x1]  ;;  %v6144_v60 = vpack.c.bf16 %v538_v51, %v538_v51  ;;  %v6154_v27 = vpack.c.bf16 %v539_v10, %v539_v10 }
  0x67   : > { %v2511_v48 = vrot.slane %v2509_v28, 5  ;;  %v2515_v49 = vshll.u32 %v2395_v43, 16  ;;  %v2519_v6 = vshrl.u32 %v2395_v43, 16  ;;  %2326 = vrot.lane.b32.xlu1 %v5747_v41, %s5822_s29  ;;  %v2525_v52 = vshll.u32 %v2396_v47, 16  ;;  %v2940_v53 = vld [vmem:[#allocation2 + $0x34] sm:$0xf] }
  0x68   : > { %v2941_v54 = vld [vmem:[#allocation2 + $0x38] sm:$0x1]  ;;  %1011 = vst.msk [vmem:[#allocation2 + $0x40] sm:$0xf] %vm977_vm6, %v739_v50  ;;  %v3526_v34 = vshrl.u32 %v3435_v37, 16  ;;  %v3049_v59 = vrot.slane %v2940_v53, 5 }
  0x69   : > { %v2512_v56 = vor.u32 %v2511_v48, %v2508_v45  ;;  %v2517_v44 = vrot.slane %v2515_v49, 5  ;;  %v2521_v57 = vrot.slane %v2519_v6, 4  ;;  %v5748_v62 = vld [vmem:[#allocation2 + $0x30] sm:$0xff]   ;;  %v2527_v63 = vrot.slane %v2525_v52, 5  ;;  %3190 = vrot.lane.b32.xlu0 %v5213_v46, %s5825_s6  ;;  %v3437_v2 = vld [vmem:[#allocation2 + $0x38] sm:$0x1] }
  0x6a   : > { %v3052_v0 = vrot.slane %v2941_v54, 5  ;;  %v3436_v61 = vld [vmem:[#allocation2 + $0x34] sm:$0xf]  ;;  %v3050_v8 = vsel %vm5973_vm11, %v5198_v30, %v3049_v59  ;;  %v3051_v9 = vrot.slane %v3049_v59, 4  ;;  %v3528_v11 = vrot.slane %v3526_v34, 4  ;;  %v5759_v28 = vld [vmem:[%s7425_s3] sm:$0xff]  }
  0x6b   : > { %v2513_v5 = vrot.slane %v2512_v56, 4  ;;  %v2522_v7 = vor.u32 %v2521_v57, %v2517_v44  ;;  %v3529_v12 = vshll.u32 %v3435_v37, 16  ;;  %v3535_v13 = vshll.u32 %v3436_v61, 16  ;;  %v1012_v15 = vld [vmem:[#allocation2 + $0x44] sm:$0x1]  ;;  %5596 = vmatprep.subr.bf16.mxu0 %v5759_v28 }
  0x6c   : > { %v3539_v14 = vshrl.u32 %v3436_v61, 16  ;;  %v3980_v16 = vld [vmem:[#allocation2 + $0x30] sm:$0xe]  ;;  %v3053_v21 = vsel %vm5973_vm11, %v3051_v9, %v3052_v0  ;;  %v3545_v22 = vshll.u32 %v3437_v2, 16  ;;  %v3981_v26 = vld [vmem:[#allocation2 + $0x34] sm:$0xf]  ;;  %v1013_v38 = vsel %vm5882_vm2, %v740_v35, %v1012_v15  ;;  %5597 = vmatpush3.bf16.msra.mxu0 %v5759_v28 }
  0x6d   : > { %v2518_v20 = vsel %vm6039_vm14, %v2513_v5, %v2517_v44  ;;  %v2523_v18 = vrot.slane %v2522_v7, 4  ;;  %v3438_v40 = vld [vmem:[#allocation2 + $0x3c] sm:$0xf]  ;;  %3368 = vrot.lane.b32.xlu0 %v5748_v62, %s5824_s30  ;;  %v3531_v23 = vrot.slane %v3529_v12, 5  ;;  %v3537_v24 = vrot.slane %v3535_v13, 5 }
  0x6e   : > { %v3541_v25 = vrot.slane %v3539_v14, 4  ;;  %v5214_v31 = vcombine.low %v3050_v8, %v3053_v21  ;;  %v3547_v33 = vrot.slane %v3545_v22, 5  ;;  %1014 = vst [vmem:[#allocation2 + $0x44] sm:$0x1] %v1013_v38  ;;  %v3550_v43 = vshrl.u32 %v3438_v40, 16  ;;  %v5762_v22 = vld [vmem:[%s7425_s3 + $0x8] sm:$0xff]  }
  0x6f   : > { %v2528_v30 = vsel %vm6039_vm14, %v2523_v18, %v2527_v63  ;;  %v3439_v37 = vld [vmem:[#allocation2 + $0x40] sm:$0xf]  ;;  %v3532_v29 = vor.u32 %v3531_v23, %v3528_v11  ;;  %v3982_v45 = vld [vmem:[#allocation2 + $0x38] sm:$0x1]  ;;  %v3553_v46 = vshll.u32 %v3438_v40, 16  ;;  %v5261_v49 = vrot.slane %v3980_v16, 9  ;;  %5598 = vmatprep.subr.bf16.mxu0 %v5762_v22 }
  0x70   : > { %v5182_v39 = vcombine.low %v2518_v20, %v2528_v30  ;;  %v3542_v41 = vor.u32 %v3541_v25, %v3537_v24  ;;  %v3559_v47 = vshll.u32 %v3439_v37, 16  ;;  %v3563_v48 = vshrl.u32 %v3439_v37, 16  ;;  %v1348_v35 = vld [vmem:[#allocation2 + $0x30] sm:$0xf]  ;;  %v1349_v56 = vld [vmem:[#allocation2 + $0x34] sm:$0xf]  ;;  %5599 = vmatpush3.bf16.msra.mxu0 %v5762_v22 }
  0x71   : > { %v3533_v6 = vrot.slane %v3532_v29, 4  ;;  %v3552_v50 = vrot.slane %v3550_v43, 4  ;;  %v4086_v51 = vrot.slane %v3981_v26, 5  ;;  %v3555_v52 = vrot.slane %v3553_v46, 5  ;;  %v1350_v63 = vld [vmem:[#allocation2 + $0x38] sm:$0x1] }
  0x72   : > { %2871 = vrot.lane.b32.xlu1 %v5182_v39, %s5829_s10  ;;  %v3543_v19 = vrot.slane %v3542_v41, 4  ;;  %v3561_v53 = vrot.slane %v3559_v47, 5  ;;  %v3565_v54 = vrot.slane %v3563_v48, 4  ;;  %v4089_v34 = vrot.slane %v3982_v45, 5  ;;  %v3983_v7 = vld [vmem:[#allocation2 + $0x3c] sm:$0xe] }
  0x73   : > { %v3538_v44 = vsel %vm6039_vm14, %v3533_v6, %v3537_v24  ;;  %v4087_v59 = vsel %vm5973_vm11, %v5261_v49, %v4086_v51  ;;  %v4088_v62 = vrot.slane %v4086_v51, 4  ;;  %v3556_v61 = vor.u32 %v3555_v52, %v3552_v50  ;;  %v3984_v8 = vld [vmem:[#allocation2 + $0x40] sm:$0xf]  ;;  %v1351_v14 = vld [vmem:[#allocation2 + $0x3c] sm:$0xf] }
  0x74   : > { %v3548_v57 = vsel %vm6039_vm14, %v3543_v19, %v3547_v33  ;;  %v3566_v2 = vor.u32 %v3565_v54, %v3561_v53  ;;  %v1484_v5 = vshrl.u32 %v1348_v35, 16  ;;  %v5749_v9 = vld [vmem:[#allocation2 + $0x3c] sm:$0xff]   ;;  %v1487_v11 = vshll.u32 %v1348_v35, 16  ;;  %v1896_v49 = vld [vmem:[#allocation2 + $0x30] sm:$0xe] }
  0x75   : > { %v5245_v0 = vcombine.low %v3538_v44, %v3548_v57  ;;  %v4090_v10 = vsel %vm5973_vm11, %v4088_v62, %v4089_v34  ;;  %v1493_v12 = vshll.u32 %v1349_v56, 16  ;;  %v1497_v13 = vshrl.u32 %v1349_v56, 16  ;;  %v3440_v15 = vld [vmem:[#allocation2 + $0x44] sm:$0x1]  ;;  %v1352_v41 = vld [vmem:[#allocation2 + $0x40] sm:$0xf] }
  0x76   : > { %3192 = vrot.lane.b32.xlu1 %v5214_v31, %s5825_s6  ;;  %v3557_v16 = vrot.slane %v3556_v61, 4  ;;  %v3567_v20 = vrot.slane %v3566_v2, 4  ;;  %v5277_v18 = vcombine.low %v4087_v59, %v4090_v10  ;;  %v1486_v21 = vrot.slane %v1484_v5, 4  ;;  %v3985_v26 = vld [vmem:[#allocation2 + $0x44] sm:$0x1] }
  0x77   : > { %3913 = vrot.lane.b32.xlu0 %v5245_v0, %s5830_s11  ;;  %v3569_v40 = vshll.u32 %v3440_v15, 16  ;;  %v1489_v23 = vrot.slane %v1487_v11, 5  ;;  %v1495_v24 = vrot.slane %v1493_v12, 5  ;;  %v1499_v25 = vrot.slane %v1497_v13, 4  ;;  %v1353_v43 = vld [vmem:[#allocation2 + $0x44] sm:$0x1] }
  0x78   : > { %v3562_v28 = vsel %vm6039_vm14, %v3557_v16, %v3561_v53  ;;  %v1503_v30 = vshll.u32 %v1350_v63, 16  ;;  %v5262_v31 = vrot.slane %v3983_v7, 9  ;;  %v4093_v33 = vrot.slane %v3984_v8, 5  ;;  %v1897_v34 = vld [vmem:[#allocation2 + $0x34] sm:$0xf] }
  0x79   : > { %v3571_v38 = vrot.slane %v3569_v40, 5  ;;  %v1490_v37 = vor.u32 %v1489_v23, %v1486_v21  ;;  %v1500_v39 = vor.u32 %v1499_v25, %v1495_v24  ;;  %v4096_v29 = vrot.slane %v3985_v26, 5  ;;  %v1898_v56 = vld [vmem:[#allocation2 + $0x38] sm:$0x1]  ;;  %v1899_v63 = vld [vmem:[#allocation2 + $0x3c] sm:$0xe] }
  0x7a   : > { %3370 = vrot.lane.b32.xlu1 %v5749_v9, %s5824_s30  ;;  %v1505_v45 = vrot.slane %v1503_v30, 5  ;;  %v4094_v46 = vsel %vm5973_vm11, %v5262_v31, %v4093_v33  ;;  %v4095_v47 = vrot.slane %v4093_v33, 4  ;;  %v1508_v48 = vshrl.u32 %v1351_v14, 16  ;;  %v1900_v0 = vld [vmem:[#allocation2 + $0x40] sm:$0xf] }
  0x7b   : > { %4234 = vrot.lane.b32.xlu0 %v5277_v18, %s5827_s8  ;;  %v3572_v6 = vsel %vm6039_vm14, %v3567_v20, %v3571_v38  ;;  %v1491_v19 = vrot.slane %v1490_v37, 4  ;;  %v1501_v50 = vrot.slane %v1500_v39, 4  ;;  %v1511_v51 = vshll.u32 %v1351_v14, 16  ;;  %v1901_v8 = vld [vmem:[#allocation2 + $0x44] sm:$0x1] }
  0x7c   : > { %v5246_v35 = vcombine.low %v3562_v28, %v3572_v6  ;;  %v4097_v52 = vsel %vm5973_vm11, %v4095_v47, %v4096_v29  ;;  %v1510_v53 = vrot.slane %v1508_v48, 4  ;;  %v1517_v54 = vshll.u32 %v1352_v41, 16  ;;  %v2397_v26 = vld [vmem:[#allocation2 + $0x3c] sm:$0xf]  ;;  %v5763_v28 = vld [vmem:[%s7425_s3 + $0x10] sm:$0xff]  }
  0x7d   : > { %v1496_v44 = vsel %vm6039_vm14, %v1491_v19, %v1495_v24  ;;  %v1506_v57 = vsel %vm6039_vm14, %v1501_v50, %v1505_v45  ;;  %v5278_v59 = vcombine.low %v4094_v46, %v4097_v52  ;;  %v1513_v62 = vrot.slane %v1511_v51, 5  ;;  %v1015_v37 = vld [vmem:[#allocation2 + $0x48] sm:$0xf]  ;;  %v2398_v39 = vld [vmem:[#allocation2 + $0x40] sm:$0xf]  ;;  %5600 = vmatprep.subr.bf16.mxu0 %v5763_v28 }
  0x7e   : > { %3915 = vrot.lane.b32.xlu1 %v5246_v35, %s5830_s11  ;;  %v5119_v61 = vcombine.low %v1496_v44, %v1506_v57  ;;  %v1519_v2 = vrot.slane %v1517_v54, 5  ;;  %v1521_v5 = vshrl.u32 %v1352_v41, 16  ;;  %v1527_v7 = vshll.u32 %v1353_v43, 16  ;;  %v490_v46 = vld [vmem:[#allocation2 + $0x50] sm:$0x1]  ;;  %5601 = vmatpush3.bf16.msra.mxu0 %v5763_v28  ;;  %v5750_v50 = vld [vmem:[#allocation2 + $0x3c] sm:$0xff]  }
  0x7f   : > { %4236 = vrot.lane.b32.xlu0 %v5278_v59, %s5827_s8  ;;  %v1514_v9 = vor.u32 %v1513_v62, %v1510_v53  ;;  %v5135_v10 = vrot.slane %v1896_v49, 9  ;;  %v2013_v11 = vrot.slane %v1897_v34, 5  ;;  %v2016_v12 = vrot.slane %v1898_v56, 5  ;;  %v2399_v6 = vld [vmem:[#allocation2 + $0x44] sm:$0x1]  ;;  %v5765_v34 = vld [vmem:[%s7425_s3 + $0x18] sm:$0xff]  }
  0x80   : > { %v1523_v13 = vrot.slane %v1521_v5, 4  ;;  %v1529_v14 = vrot.slane %v1527_v7, 5  ;;  %v5136_v15 = vrot.slane %v1899_v63, 9  ;;  %v2020_v16 = vrot.slane %v1900_v0, 5  ;;  %v2942_v53 = vld [vmem:[#allocation2 + $0x3c] sm:$0xe]  ;;  %5602 = vmatprep.subr.bf16.mxu0 %v5765_v34 }
  0x81   : > { %v1515_v20 = vrot.slane %v1514_v9, 4  ;;  %v2014_v18 = vsel %vm5973_vm11, %v5135_v10, %v2013_v11  ;;  %v2015_v21 = vrot.slane %v2013_v11, 4  ;;  %v2023_v22 = vrot.slane %v1901_v8, 5  ;;  %v437_v54 = vld [vmem:[#allocation2 + $0x54] sm:$0x1] }
  0x82   : > { %1827 = vrot.lane.b32.xlu1 %v5119_v61, %s5828_s9  ;;  %v1524_v40 = vor.u32 %v1523_v13, %v1519_v2  ;;  %v6200_v23 = vsel %vm5973_vm11, %v5136_v15, %v2020_v16  ;;  %v2022_v24 = vrot.slane %v2020_v16, 4  ;;  %v742_v25 = vshrl.u32 %v6139_v55, 16  ;;  %v2943_v59 = vld [vmem:[#allocation2 + $0x40] sm:$0xf]  ;;  %5603 = vmatpush3.bf16.msra.mxu0 %v5765_v34 }
  0x83   : > { %v1520_v30 = vsel %vm6039_vm14, %v1515_v20, %v1519_v2  ;;  %v2017_v31 = vsel %vm5973_vm11, %v2015_v21, %v2016_v12  ;;  %v745_v33 = vshll.u32 %v6139_v55, 16  ;;  %v750_v38 = vshrl.u32 %v6142_v4, 16  ;;  %v2944_v2 = vld [vmem:[#allocation2 + $0x44] sm:$0x1]  ;;  %v493_v21 = vld [vmem:[#allocation2 + $0x5c] sm:$0x1] }
  0x84   : > { %v1525_v29 = vrot.slane %v1524_v40, 4  ;;  %v5151_v41 = vcombine.low %v2014_v18, %v2017_v31  ;;  %v2024_v43 = vsel %vm5973_vm11, %v2022_v24, %v2023_v22  ;;  %v744_v45 = vrot.slane %v742_v25, 7 }
  0x85   : > { %v5152_v47 = vcombine.low %v6200_v23, %v2024_v43  ;;  %v6215_v48 = vrot.slane %v750_v38, 7  ;;  %v753_v49 = vshll.u32 %v6142_v4, 16  ;;  %v2530_v55 = vshrl.u32 %v2397_v26, 16 }
  0x86   : > { %v1530_v19 = vsel %vm6039_vm14, %v1525_v29, %v1529_v14  ;;  %2151 = vrot.lane.b32.xlu0 %v5151_v41, %s5826_s7  ;;  %v747_v51 = vor.u32 %v745_v33, %v744_v45  ;;  %v748_v35 = vrot.slane %v744_v45, 4  ;;  %v2533_v52 = vshll.u32 %v2397_v26, 16  ;;  %v5770_v14 = vld [vmem:[%s7425_s3 + $0x20] sm:$0xff]  }
  0x87   : > { %v5120_v56 = vcombine.low %v1520_v30, %v1530_v19  ;;  %v755_v4 = vor.u32 %v753_v49, %v6215_v48  ;;  %v757_v44 = vrot.slane %v6215_v48, 4  ;;  %v2532_v57 = vrot.slane %v2530_v55, 4  ;;  %5604 = vmatprep.subr.bf16.mxu0 %v5770_v14  ;;  %v440_v41 = vld [vmem:[#allocation2 + $0x60] sm:$0x1] }
  0x88   : > { %v1016_v62 = vsel %vm5931_vm10, %v747_v51, %v1015_v37  ;;  %v2535_v63 = vrot.slane %v2533_v52, 5  ;;  %v2539_v0 = vshll.u32 %v2398_v39, 16  ;;  %v2543_v61 = vshrl.u32 %v2398_v39, 16  ;;  %5605 = vmatpush3.bf16.msra.mxu0 %v5770_v14  ;;  %v5771_v39 = vld [vmem:[%s7425_s3 + $0x28] sm:$0xff]  }
  0x89   : > { %1829 = vrot.lane.b32.xlu1 %v5120_v56, %s5828_s9  ;;  %v756_v5 = vsel %vm5925_vm7, %v748_v35, %v755_v4  ;;  %1017 = vst [vmem:[#allocation2 + $0x48] sm:$0xf] %v1016_v62  ;;  %v2549_v7 = vshll.u32 %v2399_v6, 16  ;;  %v491_v8 = vsel %vm5892_vm4, 0, %v490_v46  ;;  %v5199_v9 = vrot.slane %v2942_v53, 9  ;;  %5606 = vmatprep.subr.bf16.mxu0 %v5771_v39 }
  0x8a   : > { %2328 = vrot.lane.b32.xlu0 %v5750_v50, %s5822_s29  ;;  %1018 = vst.msk [vmem:[#allocation2 + $0x4c] sm:$0xf] %vm977_vm6, %v756_v5  ;;  %v2536_v10 = vor.u32 %v2535_v63, %v2532_v57  ;;  %v2541_v11 = vrot.slane %v2539_v0, 5  ;;  %v2545_v12 = vrot.slane %v2543_v61, 4  ;;  %492 = vst [vmem:[#allocation2 + $0x50] sm:$0x1] %v491_v8 }
  0x8b   : > { %v3056_v13 = vrot.slane %v2943_v59, 5  ;;  %v2551_v15 = vrot.slane %v2549_v7, 5  ;;  %v3059_v16 = vrot.slane %v2944_v2, 5  ;;  %v438_v20 = vsel %vm5882_vm2, 0, %v437_v54  ;;  %v540_v7 = vld [vmem:[%s5909_s25 + $0x70] sm:$0xff] }
  0x8c   : > { %v759_v18 = vshrl.u32 %v6144_v60, 16  ;;  %v2537_v22 = vrot.slane %v2536_v10, 4  ;;  %v2546_v40 = vor.u32 %v2545_v12, %v2541_v11  ;;  %439 = vst [vmem:[#allocation2 + $0x54] sm:$0x1] %v438_v20  ;;  %v762_v26 = vshll.u32 %v6144_v60, 16  ;;  %5607 = vmatpush3.bf16.msra.mxu0 %v5771_v39  ;;  %v5772_v8 = vld [vmem:[%s7425_s3 + $0x30] sm:$0xff]  }
  0x8d   : > { %v3057_v23 = vsel %vm5973_vm11, %v5199_v9, %v3056_v13  ;;  %v3058_v24 = vrot.slane %v3056_v13, 4  ;;  %2153 = vrot.lane.b32.xlu1 %v5152_v47, %s5826_s7  ;;  %v767_v28 = vshrl.u32 %v6154_v27, 16  ;;  %v770_v30 = vshll.u32 %v6154_v27, 16  ;;  %5608 = vmatprep.subr.bf16.mxu0 %v5772_v8 }
  0x8e   : > { %v761_v25 = vrot.slane %v759_v18, 7  ;;  %v2542_v31 = vsel %vm6039_vm14, %v2537_v22, %v2541_v11  ;;  %v2547_v33 = vrot.slane %v2546_v40, 4  ;;  %v494_v37 = vsel %vm5892_vm4, 0, %v493_v21  ;;  %v5773_v22 = vld [vmem:[%s7425_s3 + $0x38] sm:$0xff]  }
  0x8f   : > { %v3060_v38 = vsel %vm5973_vm11, %v3058_v24, %v3059_v16  ;;  %v769_v29 = vrot.slane %v767_v28, 7  ;;  %495 = vst [vmem:[#allocation2 + $0x5c] sm:$0x1] %v494_v37  ;;  %v441_v62 = vsel %vm5882_vm2, 0, %v440_v41  ;;  %v6292_v41 = vpack.c.bf16 %v540_v7, %v540_v7 }
  0x90   : > { %v765_v60 = vrot.slane %v761_v25, 4  ;;  %v2552_v27 = vsel %vm6039_vm14, %v2547_v33, %v2551_v15  ;;  %v2400_v43 = vld [vmem:[#allocation2 + $0x48] sm:$0xf]  ;;  %v5215_v6 = vcombine.low %v3057_v23, %v3060_v38  ;;  %v764_v53 = vor.u32 %v762_v26, %v761_v25  ;;  %442 = vst [vmem:[#allocation2 + $0x60] sm:$0x1] %v441_v62  ;;  %v541_v26 = vld [vmem:[%s5909_s25 + $0x78] sm:$0xff]  ;;  %5609 = vmatpush3.bf16.msra.mxu0 %v5772_v8 }
  0x91   : > { %v6258_v45 = vld [vmem:[#allocation2 + $0x48] sm:$0xe]  ;;  %v5183_v47 = vcombine.low %v2542_v31, %v2552_v27  ;;  %v1019_v48 = vld [vmem:[#allocation2 + $0x50] sm:$0x1]  ;;  %v2554_v49 = vshrl.u32 %v2400_v43, 16  ;;  %v772_v55 = vor.u32 %v770_v30, %v769_v29  ;;  %v2557_v51 = vshll.u32 %v2400_v43, 16  ;;  %5610 = vmatprep.subr.bf16.mxu0 %v5773_v22 }
  0x92   : > { %v5751_v46 = vld [vmem:[#allocation2 + $0x48] sm:$0xff]   ;;  %v1020_v19 = vsel %vm5882_vm2, %v757_v44, %v1019_v48  ;;  %v5200_v52 = vrot.slane %v6258_v45, 9  ;;  %v774_v59 = vrot.slane %v769_v29, 4  ;;  %vm3412_vm13 = vcmask 228544  }
  0x93   : > { %v2401_v50 = vld [vmem:[#allocation2 + $0x4c] sm:$0xf]  ;;  %2330 = vrot.lane.b32.xlu1 %v5751_v46, %s5822_s29  ;;  %2873 = vrot.lane.b32.xlu0 %v5183_v47, %s5829_s10  ;;  %1021 = vst [vmem:[#allocation2 + $0x50] sm:$0x1] %v1020_v19  ;;  %v2556_v54 = vrot.slane %v2554_v49, 4  ;;  %v2559_v57 = vrot.slane %v2557_v51, 5  ;;  %v773_v44 = vsel %vm5925_vm7, %v765_v60, %v772_v55  ;;  %v6299_v55 = vpack.c.bf16 %v541_v26, %v541_v26 }
  0x94   : > { %v2946_v35 = vld [vmem:[#allocation2 + $0x4c] sm:$0xf]  ;;  %v2563_v34 = vshll.u32 %v2401_v50, 16  ;;  %v2567_v56 = vshrl.u32 %v2401_v50, 16  ;;  %v1022_v5 = vld [vmem:[#allocation2 + $0x54] sm:$0xf]  ;;  %5611 = vmatpush3.bf16.msra.mxu0 %v5773_v22 }
  0x95   : > { %v3063_v4 = vrot.slane %v2946_v35, 5  ;;  %v5752_v2 = vld [vmem:[#allocation2 + $0x48] sm:$0xff]   ;;  %1025 = vst.msk [vmem:[#allocation2 + $0x58] sm:$0xf] %vm977_vm6, %v773_v44  ;;  %v2560_v9 = vor.u32 %v2559_v57, %v2556_v54  ;;  %v1023_v10 = vsel %vm5931_vm10, %v764_v53, %v1022_v5  ;;  %v6280_v21 = vpop.permute.xlu0 %2320  ;;  %v542_v47 = vld [vmem:[%s5909_s25 + $0x80] sm:$0xff]  ;;  %vm3957_vm15 = vcmask 261344  }
  0x96   : > { %v6269_v63 = vrot.slane %v2563_v34, 5  ;;  %v2569_v0 = vrot.slane %v2567_v56, 4  ;;  %v3441_v11 = vld [vmem:[#allocation2 + $0x48] sm:$0xf]  ;;  %v3442_v12 = vld [vmem:[#allocation2 + $0x4c] sm:$0xf]  ;;  %v6308_v57 = vpack.c.bf16 %v542_v47, %v542_v47 }
  0x97   : > { %v3065_v61 = vrot.slane %v3063_v4, 4  ;;  %v1026_v13 = vld [vmem:[#allocation2 + $0x5c] sm:$0x1]  ;;  %3194 = vrot.lane.b32.xlu0 %v5215_v6, %s5825_s6  ;;  %1024 = vst [vmem:[#allocation2 + $0x54] sm:$0xf] %v1023_v10  ;;  %v3574_v15 = vshrl.u32 %v3441_v11, 16  ;;  %v6290_v60 = vsel %vm5973_vm11, %v5200_v52, %v3063_v4 }
  0x98   : > { %v2570_v14 = vor.u32 %v2569_v0, %v6269_v63  ;;  %v3577_v16 = vshll.u32 %v3441_v11, 16  ;;  %v3583_v20 = vshll.u32 %v3442_v12, 16  ;;  %v3986_v18 = vld [vmem:[#allocation2 + $0x48] sm:$0xe]  ;;  %v2561_v40 = vrot.slane %v2560_v9, 4 }
  0x99   : > { %v3587_v23 = vshrl.u32 %v3442_v12, 16  ;;  %v1027_v24 = vsel %vm5882_vm2, %v774_v59, %v1026_v13  ;;  %v5263_v25 = vrot.slane %v3986_v18, 9  ;;  %v3576_v30 = vrot.slane %v3574_v15, 4  ;;  %v3987_v38 = vld [vmem:[#allocation2 + $0x4c] sm:$0xf]  ;;  %v6303_v53 = vpop.permute.xlu0 %3364  ;;  %v6316_v15 = vpop.permute.xlu1 %2322 }
  0x9a   : > { %v2571_v28 = vrot.slane %v2570_v14, 4  ;;  %v3579_v31 = vrot.slane %v3577_v16, 5  ;;  %v3585_v33 = vrot.slane %v3583_v20, 5  ;;  %1028 = vst [vmem:[#allocation2 + $0x5c] sm:$0x1] %v1027_v24  ;;  %v2566_v48 = vsel %vm6039_vm14, %v2561_v40, %v6269_v63 }
  0x9b   : > { %v2402_v37 = vld [vmem:[#allocation2 + $0x50] sm:$0x1]  ;;  %3372 = vrot.lane.b32.xlu0 %v5752_v2, %s5824_s30  ;;  %v3589_v46 = vrot.slane %v3587_v23, 4  ;;  %v4100_v6 = vrot.slane %v3987_v38, 5  ;;  %v1355_v14 = vld [vmem:[#allocation2 + $0x4c] sm:$0xf] }
  0x9c   : > { %v2947_v39 = vld [vmem:[#allocation2 + $0x50] sm:$0x1]  ;;  %v2573_v27 = vshll.u32 %v2402_v37, 16  ;;  %v3580_v45 = vor.u32 %v3579_v31, %v3576_v30  ;;  %v3445_v52 = vld [vmem:[#allocation2 + $0x58] sm:$0xf]  ;;  %v1545_v38 = vshrl.u32 %v1355_v14, 16 }
  0x9d   : > { %v3443_v29 = vld [vmem:[#allocation2 + $0x50] sm:$0x1]  ;;  %v3066_v43 = vrot.slane %v2947_v39, 5  ;;  %v3590_v35 = vor.u32 %v3589_v46, %v3585_v33  ;;  %v4101_v4 = vsel %vm5973_vm11, %v5263_v25, %v4100_v6  ;;  %v3607_v8 = vshll.u32 %v3445_v52, 16  ;;  %v3990_v39 = vld [vmem:[#allocation2 + $0x58] sm:$0xf] }
  0x9e   : > { %v3593_v49 = vshll.u32 %v3443_v29, 16  ;;  %v2575_v19 = vrot.slane %v2573_v27, 5  ;;  %v3581_v51 = vrot.slane %v3580_v45, 4  ;;  %v3444_v56 = vld [vmem:[#allocation2 + $0x54] sm:$0xf]  ;;  %v3611_v9 = vshrl.u32 %v3445_v52, 16 }
  0x9f   : > { %v3067_v50 = vsel %vm5973_vm11, %v3065_v61, %v3066_v43  ;;  %v3591_v62 = vrot.slane %v3590_v35, 4  ;;  %v3598_v63 = vshrl.u32 %v3444_v56, 16  ;;  %v3988_v0 = vld [vmem:[#allocation2 + $0x50] sm:$0x1]  ;;  %v1354_v61 = vld [vmem:[#allocation2 + $0x48] sm:$0xf] }
  0xa0   : > { %v5216_v54 = vcombine.low %v6290_v60, %v3067_v50  ;;  %v3595_v34 = vrot.slane %v3593_v49, 5  ;;  %v2576_v44 = vsel %vm6039_vm14, %v2571_v28, %v2575_v19  ;;  %v3586_v59 = vsel %vm6039_vm14, %v3581_v51, %v3585_v33  ;;  %v1356_v40 = vld [vmem:[#allocation2 + $0x50] sm:$0x1]  ;;  %v6319_v28 = vpop.permute.xlu0 %3186  ;;  %v3989_v37 = vld [vmem:[#allocation2 + $0x54] sm:$0xe] }
  0xa1   : > { %v5184_v2 = vcombine.low %v2566_v48, %v2576_v44  ;;  %v3446_v5 = vld [vmem:[#allocation2 + $0x5c] sm:$0x1]  ;;  %v3601_v7 = vshll.u32 %v3444_v56, 16  ;;  %v3600_v11 = vrot.slane %v3598_v63, 4  ;;  %v4102_v13 = vrot.slane %v4100_v6, 4  ;;  %v5753_v46 = vld [vmem:[#allocation2 + $0x54] sm:$0xff]   ;;  %v6325_v56 = vpop.permute.xlu1 %3366 }
  0xa2   : > { %v3596_v10 = vsel %vm6039_vm14, %v3591_v62, %v3595_v34  ;;  %v3617_v12 = vshll.u32 %v3446_v5, 16  ;;  %v3609_v18 = vrot.slane %v3607_v8, 5  ;;  %v3613_v22 = vrot.slane %v3611_v9, 4  ;;  %v3991_v45 = vld [vmem:[#allocation2 + $0x5c] sm:$0x1] }
  0xa3   : > { %2875 = vrot.lane.b32.xlu1 %v5184_v2, %s5829_s10  ;;  %v5247_v16 = vcombine.low %v3586_v59, %v3596_v10  ;;  %v3603_v20 = vrot.slane %v3601_v7, 5  ;;  %v4103_v24 = vrot.slane %v3988_v0, 5  ;;  %v1532_v25 = vshrl.u32 %v1354_v61, 16  ;;  %v1357_v19 = vld [vmem:[#allocation2 + $0x54] sm:$0xf] }
  0xa4   : > { %v3619_v23 = vrot.slane %v3617_v12, 5  ;;  %v1535_v26 = vshll.u32 %v1354_v61, 16  ;;  %v3614_v31 = vor.u32 %v3613_v22, %v3609_v18  ;;  %v1541_v33 = vshll.u32 %v1355_v14, 16  ;;  %v1358_v34 = vld [vmem:[#allocation2 + $0x58] sm:$0xf]  ;;  %v6332_v8 = vpop.permute.xlu0 %4230 }
  0xa5   : > { %3917 = vrot.lane.b32.xlu0 %v5247_v16, %s5830_s11  ;;  %v3604_v30 = vor.u32 %v3603_v20, %v3600_v11  ;;  %v4104_v60 = vsel %vm5973_vm11, %v4102_v13, %v4103_v24  ;;  %v1534_v29 = vrot.slane %v1532_v25, 4  ;;  %v1551_v43 = vshll.u32 %v1356_v40, 16  ;;  %v1902_v63 = vld [vmem:[#allocation2 + $0x48] sm:$0xe]  ;;  %v1903_v7 = vld [vmem:[#allocation2 + $0x4c] sm:$0xf] }
  0xa6   : > { %v1537_v27 = vrot.slane %v1535_v26, 5  ;;  %v3615_v48 = vrot.slane %v3614_v31, 4  ;;  %v5279_v49 = vcombine.low %v4101_v4, %v4104_v60  ;;  %v1543_v6 = vrot.slane %v1541_v33, 5  ;;  %v1359_v4 = vld [vmem:[#allocation2 + $0x5c] sm:$0x1] }
  0xa7   : > { %3196 = vrot.lane.b32.xlu1 %v5216_v54, %s5825_s6  ;;  %v3605_v47 = vrot.slane %v3604_v30, 4  ;;  %v1547_v51 = vrot.slane %v1545_v38, 4  ;;  %v1553_v35 = vrot.slane %v1551_v43, 5  ;;  %v5264_v52 = vrot.slane %v3989_v37, 9  ;;  %v1904_v13 = vld [vmem:[#allocation2 + $0x50] sm:$0x1] }
  0xa8   : > { %v1538_v50 = vor.u32 %v1537_v27, %v1534_v29  ;;  %v3620_v59 = vsel %vm6039_vm14, %v3615_v48, %v3619_v23  ;;  %v4107_v54 = vrot.slane %v3990_v39, 5  ;;  %v4110_v62 = vrot.slane %v3991_v45, 5  ;;  %v1905_v22 = vld [vmem:[#allocation2 + $0x54] sm:$0xe]  ;;  %v1906_v26 = vld [vmem:[#allocation2 + $0x58] sm:$0xf]  ;;  %v6343_v39 = vpop.permute.xlu1 %2145 }
  0xa9   : > { %v3610_v44 = vsel %vm6039_vm14, %v3605_v47, %v3609_v18  ;;  %4238 = vrot.lane.b32.xlu0 %v5279_v49, %s5827_s8  ;;  %v1548_v2 = vor.u32 %v1547_v51, %v1543_v6  ;;  %v1556_v5 = vshrl.u32 %v1357_v19, 16  ;;  %v1559_v11 = vshll.u32 %v1357_v19, 16  ;;  %v1907_v37 = vld [vmem:[#allocation2 + $0x5c] sm:$0x1]  ;;  %v6347_v49 = vpop.permute.xlu0 %4232 }
  0xaa   : > { %v5248_v0 = vcombine.low %v3610_v44, %v3620_v59  ;;  %v1539_v61 = vrot.slane %v1538_v50, 4  ;;  %v4108_v9 = vsel %vm5973_vm11, %v5264_v52, %v4107_v54  ;;  %v4109_v10 = vrot.slane %v4107_v54, 4  ;;  %v2404_v54 = vld [vmem:[#allocation2 + $0x58] sm:$0xf] }
  0xab   : > { %3374 = vrot.lane.b32.xlu1 %v5753_v46, %s5824_s30  ;;  %v1565_v12 = vshll.u32 %v1358_v34, 16  ;;  %v1549_v16 = vrot.slane %v1548_v2, 4  ;;  %v1558_v20 = vrot.slane %v1556_v5, 4  ;;  %v1569_v18 = vshrl.u32 %v1358_v34, 16 }
  0xac   : > { %v1544_v14 = vsel %vm6039_vm14, %v1539_v61, %v1543_v6  ;;  %v4111_v40 = vsel %vm5973_vm11, %v4109_v10, %v4110_v62  ;;  %v1561_v23 = vrot.slane %v1559_v11, 5  ;;  %v1575_v25 = vshll.u32 %v1359_v4, 16  ;;  %v543_v62 = vld [vmem:[%s5909_s25 + $0x88] sm:$0xff]  ;;  %v6366_v11 = vpop.permute.xlu1 %3188 }
  0xad   : > { %v1567_v24 = vrot.slane %v1565_v12, 5  ;;  %v1554_v30 = vsel %vm6039_vm14, %v1549_v16, %v1553_v35  ;;  %v5280_v31 = vcombine.low %v4108_v9, %v4111_v40  ;;  %v1571_v33 = vrot.slane %v1569_v18, 4  ;;  %v2403_v35 = vld [vmem:[#allocation2 + $0x54] sm:$0xf]  ;;  %v496_v10 = vld [vmem:[#allocation2 + $0x68] sm:$0x1] }
  0xae   : > { %v5137_v38 = vrot.slane %v1902_v63, 9  ;;  %v5121_v60 = vcombine.low %v1544_v14, %v1554_v30  ;;  %v1562_v29 = vor.u32 %v1561_v23, %v1558_v20  ;;  %v1577_v27 = vrot.slane %v1575_v25, 5  ;;  %v1029_v16 = vld [vmem:[#allocation2 + $0x60] sm:$0xf]  ;;  %v5754_v18 = vld [vmem:[#allocation2 + $0x54] sm:$0xff]  }
  0xaf   : > { %3919 = vrot.lane.b32.xlu1 %v5248_v0, %s5830_s11  ;;  %v2027_v43 = vrot.slane %v1903_v7, 5  ;;  %4240 = vrot.lane.b32.xlu0 %v5280_v31, %s5827_s8  ;;  %v1572_v45 = vor.u32 %v1571_v33, %v1567_v24  ;;  %v2030_v46 = vrot.slane %v1904_v13, 5  ;;  %v5138_v47 = vrot.slane %v1905_v22, 9  ;;  %v443_v25 = vld [vmem:[#allocation2 + $0x6c] sm:$0x1] }
  0xb0   : > { %v2034_v48 = vrot.slane %v1906_v26, 5  ;;  %v1563_v6 = vrot.slane %v1562_v29, 4  ;;  %v2037_v51 = vrot.slane %v1907_v37, 5  ;;  %v776_v59 = vshrl.u32 %v6292_v41, 16  ;;  %v6374_v26 = vpop.permute.xlu0 %1821  ;;  %v2949_v37 = vld [vmem:[#allocation2 + $0x58] sm:$0xf] }
  0xb1   : > { %v2028_v19 = vsel %vm5973_vm11, %v5137_v38, %v2027_v43  ;;  %v2029_v50 = vrot.slane %v2027_v43, 4  ;;  %v1573_v52 = vrot.slane %v1572_v45, 4  ;;  %v779_v0 = vshll.u32 %v6292_v41, 16  ;;  %v2405_v41 = vld [vmem:[#allocation2 + $0x5c] sm:$0x1] }
  0xb2   : > { %v2035_v34 = vsel %vm5973_vm11, %v5138_v47, %v2034_v48  ;;  %v2036_v44 = vrot.slane %v2034_v48, 4  ;;  %v1568_v4 = vsel %vm6039_vm14, %v1563_v6, %v1567_v24  ;;  %v784_v61 = vshrl.u32 %v6299_v55, 16  ;;  %v2948_v38 = vld [vmem:[#allocation2 + $0x54] sm:$0xe]  ;;  %v2950_v45 = vld [vmem:[#allocation2 + $0x5c] sm:$0x1] }
  0xb3   : > { %1831 = vrot.lane.b32.xlu1 %v5121_v60, %s5828_s9  ;;  %v2031_v63 = vsel %vm5973_vm11, %v2029_v50, %v2030_v46  ;;  %v1578_v2 = vsel %vm6039_vm14, %v1573_v52, %v1577_v27  ;;  %v778_v9 = vrot.slane %v776_v59, 7  ;;  %v787_v14 = vshll.u32 %v6299_v55, 16  ;;  %v6386_v52 = vpop.permute.xlu1 %2143 }
  0xb4   : > { %v5153_v5 = vcombine.low %v2028_v19, %v2031_v63  ;;  %v2038_v7 = vsel %vm5973_vm11, %v2036_v44, %v2037_v51  ;;  %v5122_v12 = vcombine.low %v1568_v4, %v1578_v2  ;;  %v6368_v13 = vrot.slane %v784_v61, 7 }
  0xb5   : > { %v6371_v20 = vpack.c.bf16 %v543_v62, %v543_v62  ;;  %v781_v22 = vor.u32 %v779_v0, %v778_v9  ;;  %v782_v40 = vrot.slane %v778_v9, 4  ;;  %v2578_v23 = vshrl.u32 %v2403_v35, 16  ;;  %v499_v62 = vld [vmem:[#allocation2 + $0x74] sm:$0x1] }
  0xb6   : > { %2155 = vrot.lane.b32.xlu0 %v5153_v5, %s5826_s7  ;;  %v2581_v24 = vshll.u32 %v2403_v35, 16  ;;  %v5154_v30 = vcombine.low %v2035_v34, %v2038_v7  ;;  %v789_v31 = vor.u32 %v787_v14, %v6368_v13  ;;  %v2587_v55 = vshll.u32 %v2404_v54, 16  ;;  %v544_v14 = vld [vmem:[%s5909_s25 + $0x90] sm:$0xff] }
  0xb7   : > { %1833 = vrot.lane.b32.xlu1 %v5122_v12, %s5828_s9  ;;  %v2591_v33 = vshrl.u32 %v2404_v54, 16  ;;  %v1030_v60 = vsel %vm5931_vm10, %v781_v22, %v1029_v16  ;;  %v2580_v29 = vrot.slane %v2578_v23, 4  ;;  %v2597_v43 = vshll.u32 %v2405_v41, 16  ;;  %v5764_v22 = vld [vmem:[#allocation2 + $0x18] sm:$0xff]   ;;  %v5769_v23 = vld [vmem:[#allocation2] sm:$0xff]  }
  0xb8   : > { %v2583_v27 = vrot.slane %v2581_v24, 5  ;;  %v790_v46 = vsel %vm5925_vm7, %v782_v40, %v789_v31  ;;  %1031 = vst [vmem:[#allocation2 + $0x60] sm:$0xf] %v1030_v60  ;;  %v2589_v47 = vrot.slane %v2587_v55, 5  ;;  %v497_v6 = vsel %vm5892_vm4, 0, %v496_v10  ;;  %v6392_v0 = vpop.permute.xlu0 %2865  ;;  %v5766_v40 = vld [vmem:[#allocation2 + $0x24] sm:$0xff]  }
  0xb9   : > { %v2593_v48 = vrot.slane %v2591_v33, 4  ;;  %1032 = vst.msk [vmem:[#allocation2 + $0x64] sm:$0xf] %vm977_vm6, %v790_v46  ;;  %v2599_v50 = vrot.slane %v2597_v43, 5  ;;  %498 = vst [vmem:[#allocation2 + $0x68] sm:$0x1] %v497_v6  ;;  %v6449_v33 = vpop.permute.xlu1 %2867 }
  0xba   : > { %2332 = vrot.lane.b32.xlu0 %v5754_v18, %s5822_s29  ;;  %v2584_v19 = vor.u32 %v2583_v27, %v2580_v29  ;;  %v5201_v51 = vrot.slane %v2948_v38, 9  ;;  %v3070_v35 = vrot.slane %v2949_v37, 5  ;;  %v3073_v44 = vrot.slane %v2950_v45, 5  ;;  %v5758_v18 = vld [vmem:[#allocation2 + $0xc] sm:$0xff]   ;;  %1322 = vst.msk [vmem:[#allocation3 + $0x10] sm:$0xff] %vm1319_vm1, %v5764_v22  ;;  %1323 = vst.msk [vmem:[#allocation3 + $0x18] sm:$0xff] %vm1319_vm1, %v5766_v40 }
  0xbb   : > { %2157 = vrot.lane.b32.xlu1 %v5154_v30, %s5826_s7  ;;  %v2594_v34 = vor.u32 %v2593_v48, %v2589_v47  ;;  %v444_v59 = vsel %vm5882_vm2, 0, %v443_v25  ;;  %v793_v54 = vshrl.u32 %v6308_v57, 16  ;;  %v791_v61 = vrot.slane %v6368_v13, 4  ;;  %v5776_v24 = vld [vmem:[#allocation2 + $0x30] sm:$0xff]   ;;  %v5777_v25 = vld [vmem:[#allocation2 + $0x3c] sm:$0xff]   ;;  %1321 = vst.msk [vmem:[#allocation3 + $0x8] sm:$0xff] %vm1319_vm1, %v5758_v18 }
  0xbc   : > { %v2585_v4 = vrot.slane %v2584_v19, 4  ;;  %v3072_v63 = vrot.slane %v3070_v35, 4  ;;  %445 = vst [vmem:[#allocation2 + $0x6c] sm:$0x1] %v444_v59  ;;  %v6397_v5 = vsel %vm5973_vm11, %v5201_v51, %v3070_v35  ;;  %v796_v7 = vshll.u32 %v6308_v57, 16  ;;  %1320 = vst.msk [vmem:[#allocation3] sm:$0xff] %vm1319_vm1, %v5769_v23 }
  0xbd   : > { %v2595_v2 = vrot.slane %v2594_v34, 4  ;;  %v6402_v10 = vrot.slane %v793_v54, 7  ;;  %v500_v12 = vsel %vm5892_vm4, 0, %v499_v62  ;;  %v801_v41 = vshrl.u32 %v6371_v20, 16  ;;  %1324 = vst.msk [vmem:[#allocation3 + $0x20] sm:$0xff] %vm1319_vm1, %v5776_v24  ;;  %1325 = vst.msk [vmem:[#allocation3 + $0x28] sm:$0xff] %vm1319_vm1, %v5777_v25 }
  0xbe   : > { %v2590_v9 = vsel %vm6039_vm14, %v2585_v4, %v2589_v47  ;;  %v6411_v16 = vsel %vm5973_vm11, %v3072_v63, %v3073_v44  ;;  %v804_v57 = vshll.u32 %v6371_v20, 16  ;;  %501 = vst [vmem:[#allocation2 + $0x74] sm:$0x1] %v500_v12  ;;  %v6451_v29 = vpack.c.bf16 %v544_v14, %v544_v14  ;;  %v546_v24 = vld [vmem:[%s5909_s25 + $0xa0] sm:$0xff]  ;;  %1869 = vst.msk [vmem:[#allocation3 + $0x8] sm:$0xff] %vm1867_vm3, %v6374_v26 }
  0xbf   : > { %v2600_v13 = vsel %vm6039_vm14, %v2595_v2, %v2599_v50  ;;  %v2406_v31 = vld [vmem:[#allocation2 + $0x60] sm:$0xf]  ;;  %v5217_v46 = vcombine.low %v6397_v5, %v6411_v16  ;;  %v798_v48 = vor.u32 %v796_v7, %v6402_v10  ;;  %v799_v44 = vrot.slane %v6402_v10, 4  ;;  %v545_v2 = vld [vmem:[%s5909_s25 + $0x98] sm:$0xff]  ;;  %v6478_v16 = vpop.permute.xlu1 %3911  ;;  %2193 = vst.msk [vmem:[#allocation3 + $0x8] sm:$0xff] %vm2191_vm5, %v6343_v39 }
  0xc0   : > { %v5185_v30 = vcombine.low %v2590_v9, %v2600_v13  ;;  %v6447_v55 = vld [vmem:[#allocation2 + $0x60] sm:$0xe]  ;;  %v1033_v37 = vld [vmem:[#allocation2 + $0x68] sm:$0x1]  ;;  %v2602_v60 = vshrl.u32 %v2406_v31, 16  ;;  %v2605_v45 = vshll.u32 %v2406_v31, 16  ;;  %v6459_v6 = vpop.permute.xlu0 %3909 }
  0xc1   : > { %v5755_v38 = vld [vmem:[#allocation2 + $0x60] sm:$0xff]   ;;  %v1034_v27 = vsel %vm5882_vm2, %v791_v61, %v1033_v37  ;;  %v803_v59 = vrot.slane %v801_v41, 7  ;;  %v5202_v4 = vrot.slane %v6447_v55, 9  ;;  %2370 = vst.msk [vmem:[#allocation3 + $0x8] sm:$0xff] %vm2368_vm8, %v6316_v15  ;;  %vm4278_vm0 = vcmask 294144  }
  0xc2   : > { %2877 = vrot.lane.b32.xlu0 %v5185_v30, %s5829_s10  ;;  %v2407_v43 = vld [vmem:[#allocation2 + $0x64] sm:$0xf]  ;;  %2334 = vrot.lane.b32.xlu1 %v5755_v38, %s5822_s29  ;;  %1035 = vst [vmem:[#allocation2 + $0x68] sm:$0x1] %v1034_v27  ;;  %v2604_v19 = vrot.slane %v2602_v60, 4  ;;  %v2607_v34 = vrot.slane %v2605_v45, 5 }
  0xc3   : > { %v2952_v47 = vld [vmem:[#allocation2 + $0x64] sm:$0xf]  ;;  %v2611_v50 = vshll.u32 %v2407_v43, 16  ;;  %v2615_v51 = vshrl.u32 %v2407_v43, 16  ;;  %v1036_v61 = vld [vmem:[#allocation2 + $0x6c] sm:$0xf]  ;;  %v806_v9 = vor.u32 %v804_v57, %v803_v59 }
  0xc4   : > { %v3077_v35 = vrot.slane %v2952_v47, 5  ;;  %v2608_v5 = vor.u32 %v2607_v34, %v2604_v19  ;;  %v5756_v7 = vld [vmem:[#allocation2 + $0x60] sm:$0xff]   ;;  %v808_v10 = vrot.slane %v803_v59, 4  ;;  %v1037_v12 = vsel %vm5931_vm10, %v798_v48, %v1036_v61  ;;  %v6486_v55 = vpop.permute.xlu0 %2147  ;;  %2915 = vst.msk [vmem:[#allocation3 + $0x8] sm:$0xff] %vm2913_vm9, %v6449_v33 }
  0xc5   : > { %v6463_v54 = vrot.slane %v2611_v50, 5  ;;  %v2617_v62 = vrot.slane %v2615_v51, 4  ;;  %v3447_v14 = vld [vmem:[#allocation2 + $0x60] sm:$0xf]  ;;  %v3448_v13 = vld [vmem:[#allocation2 + $0x64] sm:$0xf]  ;;  %v807_v20 = vsel %vm5925_vm7, %v799_v44, %v806_v9  ;;  %v6497_v50 = vpack.c.bf16 %v545_v2, %v545_v2 }
  0xc6   : > { %v3079_v63 = vrot.slane %v3077_v35, 4  ;;  %3198 = vrot.lane.b32.xlu0 %v5217_v46, %s5825_s6  ;;  %1038 = vst [vmem:[#allocation2 + $0x6c] sm:$0xf] %v1037_v12  ;;  %v3622_v18 = vshrl.u32 %v3447_v14, 16  ;;  %v3625_v22 = vshll.u32 %v3447_v14, 16  ;;  %v3631_v40 = vshll.u32 %v3448_v13, 16  ;;  %v6502_v14 = vpop.permute.xlu1 %1823 }
  0xc7   : > { %v2618_v41 = vor.u32 %v2617_v62, %v6463_v54  ;;  %v1040_v23 = vld [vmem:[#allocation2 + $0x74] sm:$0x1]  ;;  %v2609_v25 = vrot.slane %v2608_v5, 4  ;;  %v3635_v57 = vshrl.u32 %v3448_v13, 16  ;;  %v3992_v31 = vld [vmem:[#allocation2 + $0x60] sm:$0xe]  ;;  %v6494_v48 = vsel %vm5973_vm11, %v5202_v4, %v3077_v35 }
  0xc8   : > { %v1041_v30 = vsel %vm5882_vm2, %v808_v10, %v1040_v23  ;;  %1039 = vst.msk [vmem:[#allocation2 + $0x70] sm:$0xf] %vm977_vm6, %v807_v20  ;;  %v3624_v37 = vrot.slane %v3622_v18, 4  ;;  %v3627_v60 = vrot.slane %v3625_v22, 5  ;;  %v3633_v27 = vrot.slane %v3631_v40, 5  ;;  %v547_v5 = vld [vmem:[%s5909_s25 + $0xa8] sm:$0xff] }
  0xc9   : > { %v2619_v38 = vrot.slane %v2618_v41, 4  ;;  %1042 = vst [vmem:[#allocation2 + $0x74] sm:$0x1] %v1041_v30  ;;  %v3993_v43 = vld [vmem:[#allocation2 + $0x64] sm:$0xf]  ;;  %v2614_v46 = vsel %vm6039_vm14, %v2609_v25, %v6463_v54  ;;  %v6499_v51 = vpack.c.bf16 %v546_v24, %v546_v24  ;;  %v3637_v62 = vrot.slane %v3635_v57, 4 }
  0xca   : > { %v2408_v45 = vld [vmem:[#allocation2 + $0x68] sm:$0x1]  ;;  %3376 = vrot.lane.b32.xlu0 %v5756_v7, %s5824_s30  ;;  %v3628_v59 = vor.u32 %v3627_v60, %v3624_v37  ;;  %v5265_v54 = vrot.slane %v3992_v31, 9  ;;  %v4114_v10 = vrot.slane %v3993_v43, 5  ;;  %v6508_v40 = vpack.c.bf16 %v547_v5, %v547_v5  ;;  %v1360_v57 = vld [vmem:[#allocation2 + $0x60] sm:$0xf]  ;;  %v6522_v5 = vpop.permute.xlu1 %1825 }
  0xcb   : > { %v2953_v47 = vld [vmem:[#allocation2 + $0x68] sm:$0x1]  ;;  %v2621_v34 = vshll.u32 %v2408_v45, 16  ;;  %v3638_v7 = vor.u32 %v3637_v62, %v3633_v27  ;;  %v1361_v30 = vld [vmem:[#allocation2 + $0x64] sm:$0xf]  ;;  %1870 = vst.msk [vmem:[#allocation3 + $0x10] sm:$0xff] %vm1867_vm3, %v6502_v14 }
  0xcc   : > { %v3449_v19 = vld [vmem:[#allocation2 + $0x68] sm:$0x1]  ;;  %v3080_v44 = vrot.slane %v2953_v47, 5  ;;  %v3629_v2 = vrot.slane %v3628_v59, 4  ;;  %v4115_v18 = vsel %vm5973_vm11, %v5265_v54, %v4114_v10  ;;  %v4116_v22 = vrot.slane %v4114_v10, 4  ;;  %1871 = vst.msk [vmem:[#allocation3 + $0x18] sm:$0xff] %vm1867_vm3, %v6522_v5 }
  0xcd   : > { %v3994_v61 = vld [vmem:[#allocation2 + $0x68] sm:$0x1]  ;;  %v3641_v9 = vshll.u32 %v3449_v19, 16  ;;  %v2623_v35 = vrot.slane %v2621_v34, 5  ;;  %v3450_v41 = vld [vmem:[#allocation2 + $0x6c] sm:$0xf] }
  0xce   : > { %v4117_v12 = vrot.slane %v3994_v61, 5  ;;  %v3081_v4 = vsel %vm5973_vm11, %v3079_v63, %v3080_v44  ;;  %v6510_v23 = vpop.permute.xlu0 %1819  ;;  %v3634_v25 = vsel %vm6039_vm14, %v3629_v2, %v3633_v27  ;;  %v3639_v20 = vrot.slane %v3638_v7, 4  ;;  %v1362_v61 = vld [vmem:[#allocation2 + $0x68] sm:$0x1]  ;;  %2194 = vst.msk [vmem:[#allocation3 + $0x10] sm:$0xff] %vm2191_vm5, %v6486_v55 }
  0xcf   : > { %v3643_v13 = vrot.slane %v3641_v9, 5  ;;  %v2624_v24 = vsel %vm6039_vm14, %v2619_v38, %v2623_v35  ;;  %v3646_v63 = vshrl.u32 %v3450_v41, 16  ;;  %v5218_v37 = vcombine.low %v6494_v48, %v3081_v4  ;;  %v3451_v60 = vld [vmem:[#allocation2 + $0x70] sm:$0xf]  ;;  %v3995_v48 = vld [vmem:[#allocation2 + $0x6c] sm:$0xe] }
  0xd0   : > { %v5186_v31 = vcombine.low %v2614_v46, %v2624_v24  ;;  %v3649_v43 = vshll.u32 %v3450_v41, 16  ;;  %v4118_v45 = vsel %vm5973_vm11, %v4116_v22, %v4117_v12  ;;  %v3452_v19 = vld [vmem:[#allocation2 + $0x74] sm:$0x1]  ;;  %v3655_v34 = vshll.u32 %v3451_v60, 16  ;;  %v1363_v4 = vld [vmem:[#allocation2 + $0x6c] sm:$0xf] }
  0xd1   : > { %v3644_v47 = vsel %vm6039_vm14, %v3639_v20, %v3643_v13  ;;  %v3648_v38 = vrot.slane %v3646_v63, 4  ;;  %v3659_v44 = vshrl.u32 %v3451_v60, 16  ;;  %v3665_v62 = vshll.u32 %v3452_v19, 16  ;;  %v3996_v22 = vld [vmem:[#allocation2 + $0x70] sm:$0xf]  ;;  %1868 = vst.msk [vmem:[#allocation3] sm:$0xff] %vm1867_vm3, %v6510_v23 }
  0xd2   : > { %2879 = vrot.lane.b32.xlu1 %v5186_v31, %s5829_s10  ;;  %v5249_v27 = vcombine.low %v3634_v25, %v3644_v47  ;;  %v3651_v59 = vrot.slane %v3649_v43, 5  ;;  %v5281_v46 = vcombine.low %v4115_v18, %v4118_v45  ;;  %v6524_v9 = vpop.permute.xlu0 %2324  ;;  %v3657_v54 = vrot.slane %v3655_v34, 5  ;;  %v3997_v63 = vld [vmem:[#allocation2 + $0x74] sm:$0x1]  ;;  %v5757_v31 = vld [vmem:[#allocation2 + $0x6c] sm:$0xff]   ;;  %2192 = vst.msk [vmem:[#allocation3] sm:$0xff] %vm2191_vm5, %v6386_v52 }
  0xd3   : > { %v3661_v10 = vrot.slane %v3659_v44, 4  ;;  %v1580_v12 = vshrl.u32 %v1360_v57, 16  ;;  %v1583_v35 = vshll.u32 %v1360_v57, 16  ;;  %v3667_v7 = vrot.slane %v3665_v62, 5  ;;  %v1365_v62 = vld [vmem:[#allocation2 + $0x74] sm:$0x1] }
  0xd4   : > { %3921 = vrot.lane.b32.xlu0 %v5249_v27, %s5830_s11  ;;  %v3652_v2 = vor.u32 %v3651_v59, %v3648_v38  ;;  %v1589_v13 = vshll.u32 %v1361_v30, 16  ;;  %v1593_v41 = vshrl.u32 %v1361_v30, 16  ;;  %v1599_v20 = vshll.u32 %v1362_v61, 16  ;;  %v1364_v59 = vld [vmem:[#allocation2 + $0x70] sm:$0xf]  ;;  %2369 = vst.msk [vmem:[#allocation3] sm:$0xff] %vm2368_vm8, %v6280_v21 }
  0xd5   : > { %v3662_v24 = vor.u32 %v3661_v10, %v3657_v54  ;;  %v1582_v18 = vrot.slane %v1580_v12, 4  ;;  %v1585_v25 = vrot.slane %v1583_v35, 5  ;;  %v5266_v57 = vrot.slane %v3995_v48, 9  ;;  %v6531_v10 = vpop.permute.xlu1 %2149  ;;  %v5760_v39 = vld [vmem:[#allocation2 + $0x6c] sm:$0xff]   ;;  %2371 = vst.msk [vmem:[#allocation3 + $0x10] sm:$0xff] %vm2368_vm8, %v6524_v9 }
  0xd6   : > { %3200 = vrot.lane.b32.xlu1 %v5218_v37, %s5825_s6  ;;  %v3653_v60 = vrot.slane %v3652_v2, 4  ;;  %v1591_v43 = vrot.slane %v1589_v13, 5  ;;  %v1595_v45 = vrot.slane %v1593_v41, 4  ;;  %v1601_v34 = vrot.slane %v1599_v20, 5  ;;  %v1908_v37 = vld [vmem:[#allocation2 + $0x60] sm:$0xe] }
  0xd7   : > { %v3663_v47 = vrot.slane %v3662_v24, 4  ;;  %v1586_v19 = vor.u32 %v1585_v25, %v1582_v18  ;;  %v4121_v38 = vrot.slane %v3996_v22, 5  ;;  %v4124_v27 = vrot.slane %v3997_v63, 5  ;;  %v6533_v12 = vpop.permute.xlu0 %2869  ;;  %v1909_v24 = vld [vmem:[#allocation2 + $0x64] sm:$0xf]  ;;  %2195 = vst.msk [vmem:[#allocation3 + $0x18] sm:$0xff] %vm2191_vm5, %v6531_v10 }
  0xd8   : > { %v3658_v30 = vsel %vm6039_vm14, %v3653_v60, %v3657_v54  ;;  %4242 = vrot.lane.b32.xlu0 %v5281_v46, %s5827_s8  ;;  %v1596_v44 = vor.u32 %v1595_v45, %v1591_v43  ;;  %v1604_v61 = vshrl.u32 %v1363_v4, 16  ;;  %v1607_v22 = vshll.u32 %v1363_v4, 16  ;;  %v1910_v63 = vld [vmem:[#allocation2 + $0x68] sm:$0x1]  ;;  %v1911_v60 = vld [vmem:[#allocation2 + $0x6c] sm:$0xe] }
  0xd9   : > { %v3668_v48 = vsel %vm6039_vm14, %v3663_v47, %v3667_v7  ;;  %v1587_v35 = vrot.slane %v1586_v19, 4  ;;  %v4122_v2 = vsel %vm5973_vm11, %v5266_v57, %v4121_v38  ;;  %v4123_v54 = vrot.slane %v4121_v38, 4  ;;  %v1912_v19 = vld [vmem:[#allocation2 + $0x70] sm:$0xf]  ;;  %v1913_v38 = vld [vmem:[#allocation2 + $0x74] sm:$0x1] }
  0xda   : > { %3378 = vrot.lane.b32.xlu1 %v5757_v31, %s5824_s30  ;;  %v5250_v46 = vcombine.low %v3658_v30, %v3668_v48  ;;  %v1597_v13 = vrot.slane %v1596_v44, 4  ;;  %v1606_v41 = vrot.slane %v1604_v61, 4  ;;  %v1613_v20 = vshll.u32 %v1364_v59, 16  ;;  %v2409_v55 = vld [vmem:[#allocation2 + $0x6c] sm:$0xf]  ;;  %v548_v10 = vld [vmem:[%s5909_s25 + $0xb0] sm:$0xff] }
  0xdb   : > { %v1592_v18 = vsel %vm6039_vm14, %v1587_v35, %v1591_v43  ;;  %v4125_v25 = vsel %vm5973_vm11, %v4123_v54, %v4124_v27  ;;  %v1617_v7 = vshrl.u32 %v1364_v59, 16  ;;  %v1609_v31 = vrot.slane %v1607_v22, 5  ;;  %v6546_v43 = vpop.permute.xlu0 %3190  ;;  %v5782_v22 = vld [vmem:[#allocation2 + $0x48] sm:$0xff]   ;;  %v2410_v5 = vld [vmem:[#allocation2 + $0x70] sm:$0xf]  ;;  %2914 = vst.msk [vmem:[#allocation3] sm:$0xff] %vm2913_vm9, %v6392_v0 }
  0xdc   : > { %v1602_v45 = vsel %vm6039_vm14, %v1597_v13, %v1601_v34  ;;  %v5282_v57 = vcombine.low %v4122_v2, %v4125_v25  ;;  %v1623_v47 = vshll.u32 %v1365_v62, 16  ;;  %v1615_v30 = vrot.slane %v1613_v20, 5  ;;  %v2327_v34 = vpop.permute.xlu1 %2326  ;;  %v446_v20 = vld [vmem:[#allocation2 + $0x78] sm:$0x1]  ;;  %1326 = vst.msk [vmem:[#allocation3 + $0x30] sm:$0xff] %vm1319_vm1, %v5782_v22 }
  0xdd   : > { %v5123_v4 = vcombine.low %v1592_v18, %v1602_v45  ;;  %v1619_v44 = vrot.slane %v1617_v7, 4  ;;  %v5139_v61 = vrot.slane %v1908_v37, 9  ;;  %v1610_v27 = vor.u32 %v1609_v31, %v1606_v41  ;;  %2372 = vst.msk [vmem:[#allocation3 + $0x18] sm:$0xff] %vm2368_vm8, %v2327_v34  ;;  %v502_v0 = vld [vmem:[#allocation2 + $0x80] sm:$0x1] }
  0xde   : > { %3923 = vrot.lane.b32.xlu1 %v5250_v46, %s5830_s11  ;;  %4244 = vrot.lane.b32.xlu0 %v5282_v57, %s5827_s8  ;;  %v1625_v59 = vrot.slane %v1623_v47, 5  ;;  %v2041_v48 = vrot.slane %v1909_v24, 5  ;;  %v2044_v35 = vrot.slane %v1910_v63, 5  ;;  %v5140_v54 = vrot.slane %v1911_v60, 9  ;;  %v5783_v60 = vld [vmem:[#allocation2 + $0x54] sm:$0xff]   ;;  %2916 = vst.msk [vmem:[#allocation3 + $0x10] sm:$0xff] %vm2913_vm9, %v6533_v12 }
  0xdf   : > { %v1620_v2 = vor.u32 %v1619_v44, %v1615_v30  ;;  %v2048_v62 = vrot.slane %v1912_v19, 5  ;;  %v2051_v13 = vrot.slane %v1913_v38, 5  ;;  %v1611_v18 = vrot.slane %v1610_v27, 4  ;;  %v3369_v52 = vpop.permute.xlu0 %3368  ;;  %3236 = vst.msk [vmem:[#allocation3 + $0x8] sm:$0xff] %vm3234_vm12, %v6366_v11  ;;  %v2411_v19 = vld [vmem:[#allocation2 + $0x74] sm:$0x1] }
  0xe0   : > { %v2042_v37 = vsel %vm5973_vm11, %v5139_v61, %v2041_v48  ;;  %v2043_v25 = vrot.slane %v2041_v48, 4  ;;  %v447_v15 = vsel %vm5882_vm2, 0, %v446_v20  ;;  %v810_v21 = vshrl.u32 %v6451_v29, 16  ;;  %3235 = vst.msk [vmem:[#allocation3] sm:$0xff] %vm3234_vm12, %v6319_v28  ;;  %3237 = vst.msk [vmem:[#allocation3 + $0x10] sm:$0xff] %vm3234_vm12, %v6546_v43  ;;  %v549_v28 = vld [vmem:[%s5909_s25 + $0xb8] sm:$0xff] }
  0xe1   : > { %v1621_v46 = vrot.slane %v1620_v2, 4  ;;  %v6554_v41 = vsel %vm5973_vm11, %v5140_v54, %v2048_v62  ;;  %v2050_v24 = vrot.slane %v2048_v62, 4  ;;  %v1616_v7 = vsel %vm6039_vm14, %v1611_v18, %v1615_v30  ;;  %448 = vst [vmem:[#allocation2 + $0x78] sm:$0x1] %v447_v15  ;;  %1327 = vst.msk [vmem:[#allocation3 + $0x38] sm:$0xff] %vm1319_vm1, %v5783_v60 }
  0xe2   : > { %1835 = vrot.lane.b32.xlu1 %v5123_v4, %s5828_s9  ;;  %v2045_v63 = vsel %vm5973_vm11, %v2043_v25, %v2044_v35  ;;  %v813_v33 = vshll.u32 %v6451_v29, 16  ;;  %v818_v31 = vshrl.u32 %v6497_v50, 16  ;;  %v821_v47 = vshll.u32 %v6497_v50, 16  ;;  %3414 = vst.msk [vmem:[#allocation3 + $0x8] sm:$0xff] %vm3412_vm13, %v6325_v56  ;;  %3413 = vst.msk [vmem:[#allocation3] sm:$0xff] %vm3412_vm13, %v6303_v53 }
  0xe3   : > { %v1626_v26 = vsel %vm6039_vm14, %v1621_v46, %v1625_v59  ;;  %v5155_v14 = vcombine.low %v2042_v37, %v2045_v63  ;;  %v6582_v23 = vsel %vm5973_vm11, %v2050_v24, %v2051_v13  ;;  %v812_v11 = vrot.slane %v810_v21, 7  ;;  %3415 = vst.msk [vmem:[#allocation3 + $0x10] sm:$0xff] %vm3412_vm13, %v3369_v52  ;;  %v2954_v30 = vld [vmem:[#allocation2 + $0x6c] sm:$0xe]  ;;  %v2955_v61 = vld [vmem:[#allocation2 + $0x70] sm:$0xf] }
  0xe4   : > { %v5124_v45 = vcombine.low %v1616_v7, %v1626_v26  ;;  %v5156_v57 = vcombine.low %v6554_v41, %v6582_v23  ;;  %v2872_v9 = vpop.permute.xlu1 %2871  ;;  %v2626_v29 = vshrl.u32 %v2409_v55, 16  ;;  %v6622_v50 = vrot.slane %v818_v31, 7  ;;  %3959 = vst.msk [vmem:[#allocation3 + $0x8] sm:$0xff] %vm3957_vm15, %v6478_v16  ;;  %3958 = vst.msk [vmem:[#allocation3] sm:$0xff] %vm3957_vm15, %v6459_v6  ;;  %v2956_v35 = vld [vmem:[#allocation2 + $0x74] sm:$0x1] }
  0xe5   : > { %2159 = vrot.lane.b32.xlu0 %v5155_v14, %s5826_s7  ;;  %2917 = vst.msk [vmem:[#allocation3 + $0x18] sm:$0xff] %vm2913_vm9, %v2872_v9  ;;  %v2629_v12 = vshll.u32 %v2409_v55, 16  ;;  %v2635_v38 = vshll.u32 %v2410_v5, 16  ;;  %v2639_v4 = vshrl.u32 %v2410_v5, 16  ;;  %v816_v56 = vrot.slane %v812_v11, 4 }
  0xe6   : > { %1837 = vrot.lane.b32.xlu1 %v5124_v45, %s5828_s9  ;;  %4280 = vst.msk [vmem:[#allocation3 + $0x8] sm:$0xff] %vm4278_vm0, %v6347_v49  ;;  %v2628_v53 = vrot.slane %v2626_v29, 4  ;;  %v2645_v44 = vshll.u32 %v2411_v19, 16  ;;  %4279 = vst.msk [vmem:[#allocation3] sm:$0xff] %vm4278_vm0, %v6332_v8  ;;  %v6632_v27 = vpack.c.bf16 %v548_v10, %v548_v10  ;;  %v815_v16 = vor.u32 %v813_v33, %v812_v11  ;;  %v449_v34 = vld [vmem:[#allocation2 + $0x84] sm:$0x1] }
  0xe7   : > { %v823_v59 = vor.u32 %v821_v47, %v6622_v50  ;;  %v2631_v48 = vrot.slane %v2629_v12, 5  ;;  %v2637_v6 = vrot.slane %v2635_v38, 5  ;;  %v2641_v2 = vrot.slane %v2639_v4, 4  ;;  %v505_v25 = vld [vmem:[#allocation2 + $0x8c] sm:$0x1] }
  0xe8   : > { %v3193_v43 = vpop.permute.xlu1 %3192  ;;  %v2647_v54 = vrot.slane %v2645_v44, 5  ;;  %v503_v8 = vsel %vm5892_vm4, 0, %v502_v0  ;;  %v6640_v62 = vpack.c.bf16 %v549_v28, %v549_v28  ;;  %v5203_v18 = vrot.slane %v2954_v30, 9  ;;  %v452_v20 = vld [vmem:[#allocation2 + $0x90] sm:$0x1] }
  0xe9   : > { %2336 = vrot.lane.b32.xlu0 %v5760_v39, %s5822_s29  ;;  %3238 = vst.msk [vmem:[#allocation3 + $0x18] sm:$0xff] %vm3234_vm12, %v3193_v43  ;;  %v3914_v49 = vpop.permute.xlu0 %3913  ;;  %v824_v13 = vsel %vm5925_vm7, %v816_v56, %v823_v59  ;;  %v2632_v22 = vor.u32 %v2631_v48, %v2628_v53  ;;  %504 = vst [vmem:[#allocation2 + $0x80] sm:$0x1] %v503_v8  ;;  %v3084_v37 = vrot.slane %v2955_v61, 5  ;;  %v1043_v46 = vld [vmem:[#allocation2 + $0x78] sm:$0xf] }
  0xea   : > { %2161 = vrot.lane.b32.xlu1 %v5156_v57, %s5826_s7  ;;  %3960 = vst.msk [vmem:[#allocation3 + $0x10] sm:$0xff] %vm3957_vm15, %v3914_v49  ;;  %v2642_v41 = vor.u32 %v2641_v2, %v2637_v6  ;;  %v3087_v24 = vrot.slane %v2956_v35, 5  ;;  %v450_v7 = vsel %vm5882_vm2, 0, %v449_v34  ;;  %v827_v63 = vshrl.u32 %v6499_v51, 16  ;;  %v508_v57 = vld [vmem:[#allocation2 + $0x98] sm:$0x1] }
  0xeb   : > { %1046 = vst.msk [vmem:[#allocation2 + $0x7c] sm:$0xf] %vm977_vm6, %v824_v13  ;;  %v825_v14 = vrot.slane %v6622_v50, 4  ;;  %v1044_v23 = vsel %vm5931_vm10, %v815_v16, %v1043_v46  ;;  %v2633_v39 = vrot.slane %v2632_v22, 4  ;;  %v3086_v55 = vrot.slane %v3084_v37, 4  ;;  %v550_v35 = vld [vmem:[%s5909_s25 + $0xc0] sm:$0xff] }
  0xec   : > { %v3371_v26 = vpop.permute.xlu1 %3370  ;;  %451 = vst [vmem:[#allocation2 + $0x84] sm:$0x1] %v450_v7  ;;  %1045 = vst [vmem:[#allocation2 + $0x78] sm:$0xf] %v1044_v23  ;;  %v2643_v52 = vrot.slane %v2642_v41, 4  ;;  %v829_v10 = vrot.slane %v827_v63, 7  ;;  %v3085_v19 = vsel %vm5973_vm11, %v5203_v18, %v3084_v37 }
  0xed   : > { %3416 = vst.msk [vmem:[#allocation3 + $0x18] sm:$0xff] %vm3412_vm13, %v3371_v26  ;;  %v4235_v5 = vpop.permute.xlu0 %4234  ;;  %v830_v60 = vshll.u32 %v6499_v51, 16  ;;  %v835_v45 = vshrl.u32 %v6508_v40, 16  ;;  %v2638_v15 = vsel %vm6039_vm14, %v2633_v39, %v2637_v6  ;;  %v838_v21 = vshll.u32 %v6508_v40, 16  ;;  %v4295_v33 = vld [vmem:[#allocation3] sm:$0xff]  ;;  %v4296_v40 = vld [vmem:[#allocation3 + $0x8] sm:$0xff] }
  0xee   : > { %4281 = vst.msk [vmem:[#allocation3 + $0x10] sm:$0xff] %vm4278_vm0, %v4235_v5  ;;  %v506_v9 = vsel %vm5892_vm4, 0, %v505_v25  ;;  %v453_v31 = vsel %vm5882_vm2, 0, %v452_v20  ;;  %v455_v47 = vld [vmem:[#allocation2 + $0x9c] sm:$0x1]  ;;  %v2648_v51 = vsel %vm6039_vm14, %v2643_v52, %v2647_v54  ;;  %v3088_v0 = vsel %vm5973_vm11, %v3086_v55, %v3087_v24  ;;  %5612 = vmatprep.mubr.bf16.mxu0 %v4295_v33  ;;  %v551_v8 = vld [vmem:[%s5909_s25 + $0xc8] sm:$0xff] }
  0xef   : > { %v833_v11 = vrot.slane %v829_v10, 4  ;;  %507 = vst [vmem:[#allocation2 + $0x8c] sm:$0x1] %v506_v9  ;;  %454 = vst [vmem:[#allocation2 + $0x90] sm:$0x1] %v453_v31  ;;  %v5187_v29 = vcombine.low %v2638_v15, %v2648_v51  ;;  %v6669_v28 = vrot.slane %v835_v45, 7  ;;  %5613 = vmatmul.mubr.bf16.vlgmr.msra.gmra.mrb[0].mxu0 %v4296_v40  ;;  %v5219_v59 = vcombine.low %v3085_v19, %v3088_v0 }
  0xf0   : > { %v844_v50 = vshrl.u32 %v6632_v27, 16  ;;  %v847_v12 = vshll.u32 %v6632_v27, 16  ;;  %v3916_v38 = vpop.permute.xlu1 %3915  ;;  %v1047_v4 = vld [vmem:[#allocation2 + $0x80] sm:$0x1]  ;;  %v852_v30 = vshrl.u32 %v6640_v62, 16  ;;  %v855_v56 = vshll.u32 %v6640_v62, 16 }
  0xf1   : > { %3961 = vst.msk [vmem:[#allocation3 + $0x18] sm:$0xff] %vm3957_vm15, %v3916_v38  ;;  %v509_v53 = vsel %vm5892_vm4, 0, %v508_v57  ;;  %v4237_v44 = vpop.permute.xlu0 %4236  ;;  %v456_v61 = vsel %vm5882_vm2, 0, %v455_v47  ;;  %2881 = vrot.lane.b32.xlu0 %v5187_v29, %s5829_s10  ;;  %v1048_v43 = vsel %vm5882_vm2, %v825_v14, %v1047_v4  ;;  %v840_v6 = vor.u32 %v838_v21, %v6669_v28 }
  0xf2   : > { %v2413_v16 = vld [vmem:[#allocation2 + $0x7c] sm:$0xf]  ;;  %510 = vst [vmem:[#allocation2 + $0x98] sm:$0x1] %v509_v53  ;;  %4282 = vst.msk [vmem:[#allocation3 + $0x18] sm:$0xff] %vm4278_vm0, %v4237_v44  ;;  %v842_v54 = vrot.slane %v6669_v28, 4  ;;  %v832_v18 = vor.u32 %v830_v60, %v829_v10  ;;  %v6700_v45 = vpack.c.bf16 %v550_v35, %v550_v35  ;;  %v6704_v31 = vpack.c.bf16 %v551_v8, %v551_v8 }
  0xf3   : > { %v2958_v48 = vld [vmem:[#allocation2 + $0x7c] sm:$0xf]  ;;  %457 = vst [vmem:[#allocation2 + $0x9c] sm:$0x1] %v456_v61  ;;  %1049 = vst [vmem:[#allocation2 + $0x80] sm:$0x1] %v1048_v43  ;;  %v841_v37 = vsel %vm5925_vm7, %v833_v11, %v840_v6 }
  0xf4   : > { %v2659_v34 = vshll.u32 %v2413_v16, 16  ;;  %v2663_v49 = vshrl.u32 %v2413_v16, 16  ;;  %v3091_v2 = vrot.slane %v2958_v48, 5  ;;  %v5761_v13 = vld [vmem:[#allocation2 + $0x78] sm:$0xff]   ;;  %v6690_v25 = vrot.slane %v844_v50, 7  ;;  %v1828_v20 = vpop.permute.xlu1 %1827 }
  0xf5   : > { %v2412_v22 = vld [vmem:[#allocation2 + $0x78] sm:$0xf]  ;;  %1053 = vst.msk [vmem:[#allocation2 + $0x88] sm:$0xf] %vm977_vm6, %v841_v37  ;;  %2338 = vrot.lane.b32.xlu1 %v5761_v13, %s5822_s29  ;;  %3202 = vrot.lane.b32.xlu0 %v5219_v59, %s5825_s6  ;;  %v1050_v10 = vld [vmem:[#allocation2 + $0x84] sm:$0xf] }
  0xf6   : > { %v2650_v46 = vshrl.u32 %v2412_v22, 16  ;;  %v2653_v41 = vshll.u32 %v2412_v22, 16  ;;  %v6692_v24 = vrot.slane %v2659_v34, 5  ;;  %v2665_v7 = vrot.slane %v2663_v49, 4  ;;  %v2957_v63 = vld [vmem:[#allocation2 + $0x78] sm:$0xe] }
  0xf7   : > { %1872 = vst.msk [vmem:[#allocation3 + $0x20] sm:$0xff] %vm1867_vm3, %v1828_v20  ;;  %v5204_v26 = vrot.slane %v2957_v63, 9  ;;  %v3093_v14 = vrot.slane %v3091_v2, 4  ;;  %v5767_v23 = vld [vmem:[#allocation2 + $0x78] sm:$0xff]   ;;  %v850_v39 = vrot.slane %v6690_v25, 4  ;;  %v1051_v57 = vsel %vm5931_vm10, %v832_v18, %v1050_v10  ;;  %v4297_v29 = vld [vmem:[#allocation3 + $0x10] sm:$0xff] }
  0xf8   : > { %v2652_v55 = vrot.slane %v2650_v46, 4  ;;  %v2655_v5 = vrot.slane %v2653_v41, 5  ;;  %v2666_v52 = vor.u32 %v2665_v7, %v6692_v24  ;;  %v3453_v60 = vld [vmem:[#allocation2 + $0x78] sm:$0xf]  ;;  %v3454_v15 = vld [vmem:[#allocation2 + $0x7c] sm:$0xf]  ;;  %v2152_v47 = vpop.permute.xlu0 %2151  ;;  %v6717_v44 = vor.u32 %v847_v12, %v6690_v25  ;;  %5616 = vmatprep.mubr.bf16.mxu0 %v4297_v29 }
  0xf9   : > { %v3670_v21 = vshrl.u32 %v3453_v60, 16  ;;  %v3673_v9 = vshll.u32 %v3453_v60, 16  ;;  %v1054_v33 = vld [vmem:[#allocation2 + $0x8c] sm:$0x1]  ;;  %1052 = vst [vmem:[#allocation2 + $0x84] sm:$0xf] %v1051_v57  ;;  %v6709_v38 = vsel %vm5973_vm11, %v5204_v26, %v3091_v2  ;;  %3380 = vrot.lane.b32.xlu0 %v5767_v23, %s5824_s30 }
  0xfa   : > { %v2656_v51 = vor.u32 %v2655_v5, %v2652_v55  ;;  %v2667_v19 = vrot.slane %v2666_v52, 4  ;;  %v3679_v0 = vshll.u32 %v3454_v15, 16  ;;  %v3683_v11 = vshrl.u32 %v3454_v15, 16  ;;  %v3998_v40 = vld [vmem:[#allocation2 + $0x78] sm:$0xe]  ;;  %2196 = vst.msk [vmem:[#allocation3 + $0x20] sm:$0xff] %vm2191_vm5, %v2152_v47 }
  0xfb   : > { %v2414_v28 = vld [vmem:[#allocation2 + $0x80] sm:$0x1]  ;;  %v1055_v53 = vsel %vm5882_vm2, %v842_v54, %v1054_v33  ;;  %v3672_v59 = vrot.slane %v3670_v21, 4  ;;  %v3999_v48 = vld [vmem:[#allocation2 + $0x7c] sm:$0xf]  ;;  %v1830_v6 = vpop.permute.xlu1 %1829  ;;  %v3675_v35 = vrot.slane %v3673_v9, 5 }
  0xfc   : > { %v2959_v50 = vld [vmem:[#allocation2 + $0x80] sm:$0x1]  ;;  %v2657_v61 = vrot.slane %v2656_v51, 4  ;;  %v2669_v43 = vshll.u32 %v2414_v28, 16  ;;  %1056 = vst [vmem:[#allocation2 + $0x8c] sm:$0x1] %v1055_v53  ;;  %v2329_v54 = vpop.permute.xlu0 %2328 }
  0xfd   : > { %v3455_v4 = vld [vmem:[#allocation2 + $0x80] sm:$0x1]  ;;  %v3094_v16 = vrot.slane %v2959_v50, 5  ;;  %v3681_v34 = vrot.slane %v3679_v0, 5  ;;  %v3685_v49 = vrot.slane %v3683_v11, 4  ;;  %1873 = vst.msk [vmem:[#allocation3 + $0x28] sm:$0xff] %vm1867_vm3, %v1830_v6  ;;  %v3676_v20 = vor.u32 %v3675_v35, %v3672_v59 }
  0xfe   : > { %v3689_v2 = vshll.u32 %v3455_v4, 16  ;;  %v2662_v27 = vsel %vm6039_vm14, %v2657_v61, %v6692_v24  ;;  %v2671_v12 = vrot.slane %v2669_v43, 5  ;;  %v3457_v13 = vld [vmem:[#allocation2 + $0x88] sm:$0xf]  ;;  %v4000_v22 = vld [vmem:[#allocation2 + $0x80] sm:$0x1] }
  0xff   : > { %v3095_v8 = vsel %vm5973_vm11, %v3093_v14, %v3094_v16  ;;  %v5267_v18 = vrot.slane %v3998_v40, 9  ;;  %2373 = vst.msk [vmem:[#allocation3 + $0x20] sm:$0xff] %vm2368_vm8, %v2329_v54  ;;  %v3686_v46 = vor.u32 %v3685_v49, %v3681_v34  ;;  %v4298_v7 = vld [vmem:[#allocation3 + $0x18] sm:$0xff]  ;;  %v3703_v26 = vshll.u32 %v3457_v13, 16  ;;  %v1366_v55 = vld [vmem:[#allocation2 + $0x78] sm:$0xf]  ;;  %v2154_v5 = vpop.permute.xlu1 %2153 }
 0x100   : > { %v5220_v37 = vcombine.low %v6709_v38, %v3095_v8  ;;  %v3691_v41 = vrot.slane %v3689_v2, 5  ;;  %v2672_v63 = vsel %vm6039_vm14, %v2667_v19, %v2671_v12  ;;  %v3707_v24 = vshrl.u32 %v3457_v13, 16  ;;  %5617 = vmatmul.mubr.bf16.gmra.mrb[4].mxu0 %v4298_v7  ;;  %2197 = vst.msk [vmem:[#allocation3 + $0x28] sm:$0xff] %vm2191_vm5, %v2154_v5  ;;  %v3456_v57 = vld [vmem:[#allocation2 + $0x84] sm:$0xf] }
 0x101   : > { %v4128_v23 = vrot.slane %v3999_v48, 5  ;;  %v5188_v14 = vcombine.low %v2662_v27, %v2672_v63  ;;  %v3677_v52 = vrot.slane %v3676_v20, 4  ;;  %v3687_v10 = vrot.slane %v3686_v46, 4  ;;  %v1367_v40 = vld [vmem:[#allocation2 + $0x7c] sm:$0xf]  ;;  %v5768_v61 = vld [vmem:[#allocation2 + $0x84] sm:$0xff]  }
 0x102   : > { %v4131_v60 = vrot.slane %v4000_v22, 5  ;;  %v6730_v15 = vrot.slane %v3703_v26, 5  ;;  %v3709_v21 = vrot.slane %v3707_v24, 4  ;;  %v3694_v0 = vshrl.u32 %v3456_v57, 16  ;;  %v1368_v4 = vld [vmem:[#allocation2 + $0x80] sm:$0x1] }
 0x103   : > { %v4129_v9 = vsel %vm5973_vm11, %v5267_v18, %v4128_v23  ;;  %v4130_v33 = vrot.slane %v4128_v23, 4  ;;  %2883 = vrot.lane.b32.xlu1 %v5188_v14, %s5829_s10  ;;  %v3682_v47 = vsel %vm6039_vm14, %v3677_v52, %v3681_v34  ;;  %v3692_v51 = vsel %vm6039_vm14, %v3687_v10, %v3691_v41  ;;  %v3458_v19 = vld [vmem:[#allocation2 + $0x8c] sm:$0x1]  ;;  %v4001_v53 = vld [vmem:[#allocation2 + $0x84] sm:$0xe] }
 0x104   : > { %v3697_v11 = vshll.u32 %v3456_v57, 16  ;;  %v5251_v29 = vcombine.low %v3682_v47, %v3692_v51  ;;  %v3710_v28 = vor.u32 %v3709_v21, %v6730_v15  ;;  %v3713_v50 = vshll.u32 %v3458_v19, 16  ;;  %v4002_v6 = vld [vmem:[#allocation2 + $0x88] sm:$0xf]  ;;  %v4003_v54 = vld [vmem:[#allocation2 + $0x8c] sm:$0x1] }
 0x105   : > { %v4132_v38 = vsel %vm5973_vm11, %v4130_v33, %v4131_v60  ;;  %v3696_v43 = vrot.slane %v3694_v0, 4  ;;  %v1628_v48 = vshrl.u32 %v1366_v55, 16  ;;  %v1631_v49 = vshll.u32 %v1366_v55, 16  ;;  %v2331_v27 = vpop.permute.xlu1 %2330  ;;  %v2874_v12 = vpop.permute.xlu0 %2873  ;;  %v1369_v20 = vld [vmem:[#allocation2 + $0x84] sm:$0xf] }
 0x106   : > { %v3699_v16 = vrot.slane %v3697_v11, 5  ;;  %v5283_v59 = vcombine.low %v4129_v9, %v4132_v38  ;;  %3925 = vrot.lane.b32.xlu0 %v5251_v29, %s5830_s11  ;;  %v3711_v35 = vrot.slane %v3710_v28, 4  ;;  %v3715_v34 = vrot.slane %v3713_v50, 5  ;;  %2374 = vst.msk [vmem:[#allocation3 + $0x28] sm:$0xff] %vm2368_vm8, %v2331_v27  ;;  %v5788_v46 = vld [vmem:[#allocation2 + $0x60] sm:$0xff]   ;;  %v5789_v11 = vld [vmem:[#allocation2 + $0x6c] sm:$0xff]  }
 0x107   : > { %v1637_v2 = vshll.u32 %v1367_v40, 16  ;;  %3204 = vrot.lane.b32.xlu1 %v5220_v37, %s5825_s6  ;;  %v1630_v13 = vrot.slane %v1628_v48, 4  ;;  %v1641_v22 = vshrl.u32 %v1367_v40, 16  ;;  %v1647_v18 = vshll.u32 %v1368_v4, 16  ;;  %2918 = vst.msk [vmem:[#allocation3 + $0x20] sm:$0xff] %vm2913_vm9, %v2874_v12 }
 0x108   : > { %v3700_v8 = vor.u32 %v3699_v16, %v3696_v43  ;;  %v3716_v41 = vsel %vm6039_vm14, %v3711_v35, %v3715_v34  ;;  %v1633_v7 = vrot.slane %v1631_v49, 5  ;;  %v5268_v26 = vrot.slane %v4001_v53, 9  ;;  %v1370_v5 = vld [vmem:[#allocation2 + $0x88] sm:$0xf]  ;;  %1328 = vst.msk [vmem:[#allocation3 + $0x40] sm:$0xff] %vm1319_vm1, %v5788_v46  ;;  %1329 = vst.msk [vmem:[#allocation3 + $0x48] sm:$0xff] %vm1319_vm1, %v5789_v11 }
 0x109   : > { %v1639_v63 = vrot.slane %v1637_v2, 5  ;;  %v1643_v23 = vrot.slane %v1641_v22, 4  ;;  %v1649_v55 = vrot.slane %v1647_v18, 5  ;;  %v4135_v37 = vrot.slane %v4002_v6, 5  ;;  %v1371_v10 = vld [vmem:[#allocation2 + $0x8c] sm:$0x1]  ;;  %v3195_v21 = vpop.permute.xlu0 %3194 }
 0x10a   : > { %v3701_v24 = vrot.slane %v3700_v8, 4  ;;  %4246 = vrot.lane.b32.xlu0 %v5283_v59, %s5827_s8  ;;  %v1634_v14 = vor.u32 %v1633_v7, %v1630_v13  ;;  %v4138_v52 = vrot.slane %v4003_v54, 5  ;;  %v1652_v60 = vshrl.u32 %v1369_v20, 16  ;;  %v1914_v19 = vld [vmem:[#allocation2 + $0x78] sm:$0xe]  ;;  %3239 = vst.msk [vmem:[#allocation3 + $0x20] sm:$0xff] %vm3234_vm12, %v3195_v21 }
 0x10b   : > { %v1655_v57 = vshll.u32 %v1369_v20, 16  ;;  %3382 = vrot.lane.b32.xlu1 %v5768_v61, %s5824_s30  ;;  %v1644_v33 = vor.u32 %v1643_v23, %v1639_v63  ;;  %v4136_v47 = vsel %vm5973_vm11, %v5268_v26, %v4135_v37  ;;  %v4137_v51 = vrot.slane %v4135_v37, 4  ;;  %v1915_v0 = vld [vmem:[#allocation2 + $0x7c] sm:$0xf]  ;;  %v1916_v38 = vld [vmem:[#allocation2 + $0x80] sm:$0x1] }
 0x10c   : > { %v3706_v9 = vsel %vm6039_vm14, %v3701_v24, %v6730_v15  ;;  %v1635_v29 = vrot.slane %v1634_v14, 4  ;;  %v1654_v28 = vrot.slane %v1652_v60, 4  ;;  %v1917_v4 = vld [vmem:[#allocation2 + $0x84] sm:$0xe]  ;;  %v1661_v61 = vshll.u32 %v1370_v5, 16 }
 0x10d   : > { %v5252_v40 = vcombine.low %v3706_v9, %v3716_v41  ;;  %v1657_v50 = vrot.slane %v1655_v57, 5  ;;  %v1645_v53 = vrot.slane %v1644_v33, 4  ;;  %v4139_v15 = vsel %vm5973_vm11, %v4137_v51, %v4138_v52  ;;  %v1918_v35 = vld [vmem:[#allocation2 + $0x88] sm:$0xf]  ;;  %v3373_v34 = vpop.permute.xlu0 %3372  ;;  %v1919_v12 = vld [vmem:[#allocation2 + $0x8c] sm:$0x1] }
 0x10e   : > { %v1665_v43 = vshrl.u32 %v1370_v5, 16  ;;  %v1640_v16 = vsel %vm6039_vm14, %v1635_v29, %v1639_v63  ;;  %v5284_v59 = vcombine.low %v4136_v47, %v4139_v15  ;;  %v1671_v6 = vshll.u32 %v1371_v10, 16  ;;  %3417 = vst.msk [vmem:[#allocation3 + $0x20] sm:$0xff] %vm3412_vm13, %v3373_v34  ;;  %v1057_v20 = vld [vmem:[#allocation2 + $0x90] sm:$0xf]  ;;  %v5774_v15 = vld [vmem:[#allocation2 + $0x84] sm:$0xff]  }
 0x10f   : > { %v1658_v48 = vor.u32 %v1657_v50, %v1654_v28  ;;  %3927 = vrot.lane.b32.xlu1 %v5252_v40, %s5830_s11  ;;  %v1650_v49 = vsel %vm6039_vm14, %v1645_v53, %v1649_v55  ;;  %v1663_v2 = vrot.slane %v1661_v61, 5  ;;  %v5141_v27 = vrot.slane %v1914_v19, 9  ;;  %v2415_v26 = vld [vmem:[#allocation2 + $0x84] sm:$0xf]  ;;  %v2416_v5 = vld [vmem:[#allocation2 + $0x88] sm:$0xf] }
 0x110   : > { %v1667_v54 = vrot.slane %v1665_v43, 4  ;;  %v5125_v8 = vcombine.low %v1640_v16, %v1650_v49  ;;  %4248 = vrot.lane.b32.xlu0 %v5284_v59, %s5827_s8  ;;  %v1673_v22 = vrot.slane %v1671_v6, 5  ;;  %v2055_v18 = vrot.slane %v1915_v0, 5  ;;  %v2417_v57 = vld [vmem:[#allocation2 + $0x8c] sm:$0x1] }
 0x111   : > { %v1659_v13 = vrot.slane %v1658_v48, 4  ;;  %v2058_v41 = vrot.slane %v1916_v38, 5  ;;  %v5142_v7 = vrot.slane %v1917_v4, 9  ;;  %v2062_v63 = vrot.slane %v1918_v35, 5  ;;  %v1061_v51 = vld [vmem:[#allocation2 + $0x98] sm:$0x1] }
 0x112   : > { %v1668_v46 = vor.u32 %v1667_v54, %v1663_v2  ;;  %v2056_v23 = vsel %vm5973_vm11, %v5141_v27, %v2055_v18  ;;  %v2057_v55 = vrot.slane %v2055_v18, 4  ;;  %v2065_v37 = vrot.slane %v1919_v12, 5  ;;  %v2960_v19 = vld [vmem:[#allocation2 + $0x84] sm:$0xe]  ;;  %v2961_v29 = vld [vmem:[#allocation2 + $0x88] sm:$0xf] }
 0x113   : > { %v1664_v24 = vsel %vm6039_vm14, %v1659_v13, %v1663_v2  ;;  %1839 = vrot.lane.b32.xlu1 %v5125_v8, %s5828_s9  ;;  %v2063_v52 = vsel %vm5973_vm11, %v5142_v7, %v2062_v63  ;;  %v2064_v10 = vrot.slane %v2062_v63, 4  ;;  %v854_v60 = vrot.slane %v852_v30, 7  ;;  %v2962_v28 = vld [vmem:[#allocation2 + $0x8c] sm:$0x1] }
 0x114   : > { %v1669_v14 = vrot.slane %v1668_v46, 4  ;;  %v2059_v21 = vsel %vm5973_vm11, %v2057_v55, %v2058_v41  ;;  %v1058_v9 = vsel %vm5931_vm10, %v6717_v44, %v1057_v20  ;;  %v2674_v33 = vshrl.u32 %v2415_v26, 16  ;;  %v552_v20 = vld [vmem:[%s5909_s25 + $0xd0] sm:$0xff] }
 0x115   : > { %v2677_v47 = vshll.u32 %v2415_v26, 16  ;;  %v5157_v11 = vcombine.low %v2056_v23, %v2059_v21  ;;  %v2066_v40 = vsel %vm5973_vm11, %v2064_v10, %v2065_v37  ;;  %v857_v30 = vor.u32 %v855_v56, %v854_v60  ;;  %1059 = vst [vmem:[#allocation2 + $0x90] sm:$0xf] %v1058_v9  ;;  %v2876_v50 = vpop.permute.xlu1 %2875 }
 0x116   : > { %v1674_v0 = vsel %vm6039_vm14, %v1669_v14, %v1673_v22  ;;  %v5158_v44 = vcombine.low %v2063_v52, %v2066_v40  ;;  %v859_v4 = vrot.slane %v854_v60, 4  ;;  %v2676_v53 = vrot.slane %v2674_v33, 4  ;;  %2919 = vst.msk [vmem:[#allocation3 + $0x28] sm:$0xff] %vm2913_vm9, %v2876_v50 }
 0x117   : > { %v5126_v38 = vcombine.low %v1664_v24, %v1674_v0  ;;  %2163 = vrot.lane.b32.xlu0 %v5157_v11, %s5826_s7  ;;  %v858_v61 = vsel %vm5925_vm7, %v850_v39, %v857_v30  ;;  %v2679_v62 = vrot.slane %v2677_v47, 5  ;;  %v2683_v56 = vshll.u32 %v2416_v5, 16  ;;  %v3918_v16 = vpop.permute.xlu0 %3917  ;;  %v1064_v11 = vld [vmem:[#allocation2 + $0x9c] sm:$0xf] }
 0x118   : > { %v2687_v43 = vshrl.u32 %v2416_v5, 16  ;;  %1060 = vst.msk [vmem:[#allocation2 + $0x94] sm:$0xf] %vm977_vm6, %v858_v61  ;;  %v2693_v59 = vshll.u32 %v2417_v57, 16  ;;  %v1062_v48 = vsel %vm5882_vm2, %v859_v4, %v1061_v51  ;;  %v5205_v6 = vrot.slane %v2960_v19, 9 }
 0x119   : > { %1841 = vrot.lane.b32.xlu1 %v5126_v38, %s5828_s9  ;;  %v3098_v35 = vrot.slane %v2961_v29, 5  ;;  %3962 = vst.msk [vmem:[#allocation3 + $0x20] sm:$0xff] %vm3957_vm15, %v3918_v16  ;;  %v2680_v25 = vor.u32 %v2679_v62, %v2676_v53  ;;  %v2685_v34 = vrot.slane %v2683_v56, 5  ;;  %1063 = vst [vmem:[#allocation2 + $0x98] sm:$0x1] %v1062_v48  ;;  %v3197_v49 = vpop.permute.xlu1 %3196  ;;  %v3101_v27 = vrot.slane %v2962_v28, 5 }
 0x11a   : > { %v2689_v39 = vrot.slane %v2687_v43, 4  ;;  %v2695_v2 = vrot.slane %v2693_v59, 5  ;;  %v861_v12 = vshrl.u32 %v6700_v45, 16  ;;  %3240 = vst.msk [vmem:[#allocation3 + $0x28] sm:$0xff] %vm3234_vm12, %v3197_v49  ;;  %v864_v22 = vshll.u32 %v6700_v45, 16 }
 0x11b   : > { %v3100_v54 = vrot.slane %v3098_v35, 4  ;;  %2340 = vrot.lane.b32.xlu0 %v5774_v15, %s5822_s29  ;;  %v2681_v8 = vrot.slane %v2680_v25, 4  ;;  %v869_v18 = vshrl.u32 %v6704_v31, 16  ;;  %v4239_v46 = vpop.permute.xlu0 %4238  ;;  %v3099_v7 = vsel %vm5973_vm11, %v5205_v6, %v3098_v35  ;;  %v511_v49 = vld [vmem:[#allocation2 + $0xa4] sm:$0x1] }
 0x11c   : > { %v2690_v13 = vor.u32 %v2689_v39, %v2685_v34  ;;  %v2418_v41 = vld [vmem:[#allocation2 + $0x90] sm:$0xf]  ;;  %4283 = vst.msk [vmem:[#allocation3 + $0x20] sm:$0xff] %vm4278_vm0, %v4239_v46  ;;  %v863_v14 = vrot.slane %v861_v12, 7  ;;  %v6817_v9 = vpack.c.bf16 %v552_v20, %v552_v20  ;;  %v872_v59 = vshll.u32 %v6704_v31, 16 }
 0x11d   : > { %2165 = vrot.lane.b32.xlu1 %v5158_v44, %s5826_s7  ;;  %v2963_v63 = vld [vmem:[#allocation2 + $0x90] sm:$0xe]  ;;  %v2686_v26 = vsel %vm6039_vm14, %v2681_v8, %v2685_v34  ;;  %v2698_v23 = vshrl.u32 %v2418_v41, 16  ;;  %v2701_v55 = vshll.u32 %v2418_v41, 16  ;;  %v3375_v45 = vpop.permute.xlu1 %3374  ;;  %v3102_v37 = vsel %vm5973_vm11, %v3100_v54, %v3101_v27 }
 0x11e   : > { %v2691_v24 = vrot.slane %v2690_v13, 4  ;;  %v5206_v5 = vrot.slane %v2963_v63, 9  ;;  %v6812_v52 = vrot.slane %v869_v18, 7  ;;  %3418 = vst.msk [vmem:[#allocation3 + $0x28] sm:$0xff] %vm3412_vm13, %v3375_v45  ;;  %v3459_v40 = vld [vmem:[#allocation2 + $0x90] sm:$0xf]  ;;  %v5221_v29 = vcombine.low %v3099_v7, %v3102_v37 }
 0x11f   : > { %v5775_v10 = vld [vmem:[#allocation2 + $0x90] sm:$0xff]   ;;  %v2700_v21 = vrot.slane %v2698_v23, 4  ;;  %v2703_v51 = vrot.slane %v2701_v55, 5  ;;  %v866_v38 = vor.u32 %v864_v22, %v863_v14  ;;  %v867_v44 = vrot.slane %v863_v14, 4 }
 0x120   : > { %v2696_v60 = vsel %vm6039_vm14, %v2691_v24, %v2695_v2  ;;  %v2419_v57 = vld [vmem:[#allocation2 + $0x94] sm:$0xf]  ;;  %v2420_v47 = vld [vmem:[#allocation2 + $0x98] sm:$0x1]  ;;  %v876_v48 = vrot.slane %v6812_v52, 4  ;;  %v874_v27 = vor.u32 %v872_v59, %v6812_v52  ;;  %v3718_v8 = vshrl.u32 %v3459_v40, 16 }
 0x121   : > { %v5189_v33 = vcombine.low %v2686_v26, %v2696_v60  ;;  %v2707_v19 = vshll.u32 %v2419_v57, 16  ;;  %v2711_v0 = vshrl.u32 %v2419_v57, 16  ;;  %2342 = vrot.lane.b32.xlu1 %v5775_v10, %s5822_s29  ;;  %v2717_v30 = vshll.u32 %v2420_v47, 16  ;;  %v2964_v28 = vld [vmem:[#allocation2 + $0x94] sm:$0xf]  ;;  %v3920_v4 = vpop.permute.xlu1 %3919  ;;  %v4241_v56 = vpop.permute.xlu0 %4240  ;;  %v553_v2 = vld [vmem:[%s5909_s25 + $0xd8] sm:$0xff] }
 0x122   : > { %v2965_v50 = vld [vmem:[#allocation2 + $0x98] sm:$0x1]  ;;  %v2704_v53 = vor.u32 %v2703_v51, %v2700_v21  ;;  %v3105_v62 = vrot.slane %v2964_v28, 5  ;;  %3963 = vst.msk [vmem:[#allocation3 + $0x28] sm:$0xff] %vm3957_vm15, %v3920_v4  ;;  %v3460_v6 = vld [vmem:[#allocation2 + $0x94] sm:$0xf]  ;;  %v1065_v31 = vsel %vm5931_vm10, %v866_v38, %v1064_v11  ;;  %v875_v26 = vsel %vm5925_vm7, %v867_v44, %v874_v27 }
 0x123   : > { %2885 = vrot.lane.b32.xlu0 %v5189_v33, %s5829_s10  ;;  %v2709_v15 = vrot.slane %v2707_v19, 5  ;;  %v2713_v61 = vrot.slane %v2711_v0, 4  ;;  %v2719_v43 = vrot.slane %v2717_v30, 5  ;;  %v3108_v16 = vrot.slane %v2965_v50, 5  ;;  %4284 = vst.msk [vmem:[#allocation3 + $0x28] sm:$0xff] %vm4278_vm0, %v4241_v56  ;;  %v5778_v54 = vld [vmem:[#allocation2 + $0x90] sm:$0xff]  }
 0x124   : > { %v2705_v35 = vrot.slane %v2704_v53, 4  ;;  %v6827_v34 = vsel %vm5973_vm11, %v5206_v5, %v3105_v62  ;;  %v3107_v39 = vrot.slane %v3105_v62, 4  ;;  %v3461_v12 = vld [vmem:[#allocation2 + $0x98] sm:$0x1]  ;;  %v3721_v13 = vshll.u32 %v3459_v40, 16  ;;  %v554_v40 = vld [vmem:[%s5909_s25 + $0xe0] sm:$0xff] }
 0x125   : > { %v2714_v25 = vor.u32 %v2713_v61, %v2709_v15  ;;  %v1832_v22 = vpop.permute.xlu1 %1831  ;;  %1066 = vst [vmem:[#allocation2 + $0x9c] sm:$0xf] %v1065_v31  ;;  %v3727_v41 = vshll.u32 %v3460_v6, 16  ;;  %v6840_v7 = vld [vmem:[#allocation2 + $0x90] sm:$0xe]  ;;  %v3720_v24 = vrot.slane %v3718_v8, 4  ;;  %v6847_v37 = vpack.c.bf16 %v553_v2, %v553_v2 }
 0x126   : > { %v2710_v18 = vsel %vm6039_vm14, %v2705_v35, %v2709_v15  ;;  %v6838_v46 = vsel %vm5973_vm11, %v3107_v39, %v3108_v16  ;;  %v6842_v63 = vld [vmem:[#allocation2 + $0x94] sm:$0xf]  ;;  %1874 = vst.msk [vmem:[#allocation3 + $0x30] sm:$0xff] %vm1867_vm3, %v1832_v22  ;;  %v3723_v23 = vrot.slane %v3721_v13, 5  ;;  %v4006_v55 = vld [vmem:[#allocation2 + $0x98] sm:$0x1] }
 0x127   : > { %v2715_v20 = vrot.slane %v2714_v25, 4  ;;  %3206 = vrot.lane.b32.xlu0 %v5221_v29, %s5825_s6  ;;  %v1372_v45 = vld [vmem:[#allocation2 + $0x90] sm:$0xf]  ;;  %1067 = vst.msk [vmem:[#allocation2 + $0xa0] sm:$0xf] %vm977_vm6, %v875_v26  ;;  %v6852_v14 = vrot.slane %v3727_v41, 5  ;;  %v5222_v51 = vcombine.low %v6827_v34, %v6838_v46 }
 0x128   : > { %v3731_v10 = vshrl.u32 %v3460_v6, 16  ;;  %v3737_v60 = vshll.u32 %v3461_v12, 16  ;;  %v6854_v57 = vld [vmem:[#allocation2 + $0x94] sm:$0xf]  ;;  %v2156_v21 = vpop.permute.xlu0 %2155  ;;  %v4299_v33 = vld [vmem:[#allocation3 + $0x20] sm:$0xff]  ;;  %v3724_v19 = vor.u32 %v3723_v23, %v3720_v24  ;;  %v512_v0 = vsel %vm5892_vm4, 0, %v511_v49 }
 0x129   : > { %v2720_v5 = vsel %vm6039_vm14, %v2715_v20, %v2719_v43  ;;  %v1834_v11 = vpop.permute.xlu1 %1833  ;;  %2198 = vst.msk [vmem:[#allocation3 + $0x30] sm:$0xff] %vm2191_vm5, %v2156_v21  ;;  %5620 = vmatprep.mubr.bf16.mxu0 %v4299_v33  ;;  %v5792_v30 = vld [vmem:[#allocation2 + $0x78] sm:$0xff]   ;;  %v5793_v29 = vld [vmem:[#allocation2 + $0x84] sm:$0xff]   ;;  %513 = vst [vmem:[#allocation2 + $0xa4] sm:$0x1] %v512_v0  ;;  %v5269_v50 = vrot.slane %v6840_v7, 9  ;;  %v6873_v49 = vpack.c.bf16 %v554_v40, %v554_v40 }
 0x12a   : > { %v5190_v47 = vcombine.low %v2710_v18, %v2720_v5  ;;  %v3733_v28 = vrot.slane %v3731_v10, 4  ;;  %v4142_v38 = vrot.slane %v6842_v63, 5  ;;  %v4145_v44 = vrot.slane %v4006_v55, 5  ;;  %1875 = vst.msk [vmem:[#allocation3 + $0x38] sm:$0xff] %vm1867_vm3, %v1834_v11  ;;  %v555_v4 = vld [vmem:[%s5909_s25 + $0xe8] sm:$0xff]  ;;  %v4300_v53 = vld [vmem:[#allocation3 + $0x28] sm:$0xff] }
 0x12b   : > { %3384 = vrot.lane.b32.xlu0 %v5778_v54, %s5824_s30  ;;  %v3725_v15 = vrot.slane %v3724_v19, 4  ;;  %v1676_v61 = vshrl.u32 %v1372_v45, 16  ;;  %v1679_v62 = vshll.u32 %v1372_v45, 16  ;;  %v1685_v56 = vshll.u32 %v6854_v57, 16  ;;  %5621 = vmatmul.mubr.bf16.gmra.mrb[8].mxu0 %v4300_v53  ;;  %1330 = vst.msk [vmem:[#allocation3 + $0x50] sm:$0xff] %vm1319_vm1, %v5792_v30  ;;  %1331 = vst.msk [vmem:[#allocation3 + $0x58] sm:$0xff] %vm1319_vm1, %v5793_v29 }
 0x12c   : > { %2887 = vrot.lane.b32.xlu1 %v5190_v47, %s5829_s10  ;;  %v3734_v43 = vor.u32 %v3733_v28, %v6852_v14  ;;  %v3739_v16 = vrot.slane %v3737_v60, 5  ;;  %v4144_v59 = vrot.slane %v4142_v38, 4  ;;  %v1689_v6 = vshrl.u32 %v6854_v57, 16  ;;  %v2333_v35 = vpop.permute.xlu0 %2332  ;;  %v3462_v25 = vld [vmem:[#allocation2 + $0x9c] sm:$0xf]  ;;  %v556_v5 = vld [vmem:[%s5909_s25 + $0xf0] sm:$0xff] }
 0x12d   : > { %v1678_v34 = vrot.slane %v1676_v61, 4  ;;  %v1681_v39 = vrot.slane %v1679_v62, 5  ;;  %v6875_v2 = vpack.c.bf16 %v555_v4, %v555_v4  ;;  %v2158_v54 = vpop.permute.xlu1 %2157  ;;  %2375 = vst.msk [vmem:[#allocation3 + $0x30] sm:$0xff] %vm2368_vm8, %v2333_v35  ;;  %v3730_v27 = vsel %vm6039_vm14, %v3725_v15, %v6852_v14  ;;  %v1374_v13 = vld [vmem:[#allocation2 + $0x98] sm:$0x1] }
 0x12e   : > { %v3735_v31 = vrot.slane %v3734_v43, 4  ;;  %v3742_v12 = vshrl.u32 %v3462_v25, 16  ;;  %v3745_v8 = vshll.u32 %v3462_v25, 16  ;;  %2199 = vst.msk [vmem:[#allocation3 + $0x38] sm:$0xff] %vm2191_vm5, %v2158_v54  ;;  %v5779_v22 = vld [vmem:[#allocation2 + $0x9c] sm:$0xff]   ;;  %v4143_v20 = vsel %vm5973_vm11, %v5269_v50, %v4142_v38 }
 0x12f   : > { %v3463_v18 = vld [vmem:[#allocation2 + $0xa0] sm:$0xf]  ;;  %v4146_v46 = vsel %vm5973_vm11, %v4144_v59, %v4145_v44  ;;  %v1682_v41 = vor.u32 %v1681_v39, %v1678_v34  ;;  %v6887_v7 = vrot.slane %v1685_v56, 5  ;;  %v6889_v63 = vld [vmem:[#allocation2 + $0x9c] sm:$0xe]  ;;  %v1691_v21 = vrot.slane %v1689_v6, 4 }
 0x130   : > { %3208 = vrot.lane.b32.xlu1 %v5222_v51, %s5825_s6  ;;  %v3740_v26 = vsel %vm6039_vm14, %v3735_v31, %v3739_v16  ;;  %v3744_v24 = vrot.slane %v3742_v12, 4  ;;  %v3747_v23 = vrot.slane %v3745_v8, 5  ;;  %v3751_v55 = vshll.u32 %v3463_v18, 16  ;;  %v6893_v45 = vld [vmem:[#allocation2 + $0xa0] sm:$0xf]  ;;  %v557_v50 = vld [vmem:[%s5909_s25 + $0xf8] sm:$0xff] }
 0x131   : > { %v5253_v14 = vcombine.low %v3730_v27, %v3740_v26  ;;  %v1068_v10 = vld [vmem:[#allocation2 + $0xa4] sm:$0x1]  ;;  %v3755_v60 = vshrl.u32 %v3463_v18, 16  ;;  %v1683_v57 = vrot.slane %v1682_v41, 4  ;;  %v1695_v19 = vshll.u32 %v1374_v13, 16  ;;  %v5794_v6 = vld [vmem:[#allocation2 + $0x90] sm:$0xff]  }
 0x132   : > { %v1069_v33 = vsel %vm5882_vm2, %v876_v48, %v1068_v10  ;;  %v3748_v47 = vor.u32 %v3747_v23, %v3744_v24  ;;  %v6901_v51 = vrot.slane %v3751_v55, 5  ;;  %v1375_v0 = vld [vmem:[#allocation2 + $0x9c] sm:$0xf]  ;;  %v1376_v11 = vld [vmem:[#allocation2 + $0xa0] sm:$0xf]  ;;  %v5285_v30 = vcombine.low %v4143_v20, %v4146_v46  ;;  %1332 = vst.msk [vmem:[#allocation3 + $0x60] sm:$0xff] %vm1319_vm1, %v5794_v6 }
 0x133   : > { %3929 = vrot.lane.b32.xlu0 %v5253_v14, %s5830_s11  ;;  %1070 = vst [vmem:[#allocation2 + $0xa4] sm:$0x1] %v1069_v33  ;;  %v3757_v40 = vrot.slane %v3755_v60, 4  ;;  %v1692_v29 = vor.u32 %v1691_v21, %v6887_v7  ;;  %v1920_v28 = vld [vmem:[#allocation2 + $0x90] sm:$0xe]  ;;  %v6907_v38 = vpack.c.bf16 %v556_v5, %v556_v5  ;;  %v1697_v48 = vrot.slane %v1695_v19, 5 }
 0x134   : > { %3386 = vrot.lane.b32.xlu1 %v5779_v22, %s5824_s30  ;;  %v1921_v52 = vld [vmem:[#allocation2 + $0x94] sm:$0xf]  ;;  %v5270_v44 = vrot.slane %v6889_v63, 9  ;;  %v4149_v4 = vrot.slane %v6893_v45, 5  ;;  %v1700_v53 = vshrl.u32 %v1375_v0, 16  ;;  %v2878_v61 = vpop.permute.xlu0 %2877  ;;  %v1703_v43 = vshll.u32 %v1375_v0, 16  ;;  %v2335_v59 = vpop.permute.xlu1 %2334 }
 0x135   : > { %v6911_v15 = vld [vmem:[#allocation2 + $0x98] sm:$0x1]  ;;  %v3758_v62 = vor.u32 %v3757_v40, %v6901_v51  ;;  %v1693_v56 = vrot.slane %v1692_v29, 4  ;;  %v1709_v16 = vshll.u32 %v1376_v11, 16  ;;  %2920 = vst.msk [vmem:[#allocation3 + $0x30] sm:$0xff] %vm2913_vm9, %v2878_v61  ;;  %v3749_v35 = vrot.slane %v3748_v47, 4 }
 0x136   : > { %v1688_v25 = vsel %vm6039_vm14, %v1683_v57, %v6887_v7  ;;  %v1702_v34 = vrot.slane %v1700_v53, 4  ;;  %v1923_v39 = vld [vmem:[#allocation2 + $0x9c] sm:$0xe]  ;;  %v1924_v54 = vld [vmem:[#allocation2 + $0xa0] sm:$0xf]  ;;  %2376 = vst.msk [vmem:[#allocation3 + $0x38] sm:$0xff] %vm2368_vm8, %v2335_v59  ;;  %v6924_v27 = vpack.c.bf16 %v557_v50, %v557_v50  ;;  %v4150_v60 = vsel %vm5973_vm11, %v5270_v44, %v4149_v4 }
 0x137   : > { %v3759_v31 = vrot.slane %v3758_v62, 4  ;;  %4250 = vrot.lane.b32.xlu0 %v5285_v30, %s5827_s8  ;;  %v1698_v12 = vsel %vm6039_vm14, %v1693_v56, %v1697_v48  ;;  %v4151_v8 = vrot.slane %v4149_v4, 4  ;;  %v1705_v13 = vrot.slane %v1703_v43, 5  ;;  %v1127_v22 = vld [vmem:[%s6916_s24] sm:$0xff]  ;;  %v2421_v6 = vld [vmem:[#allocation2 + $0x9c] sm:$0xf] }
 0x138   : > { %v6931_v18 = vrot.slane %v1709_v16, 5  ;;  %v1713_v20 = vshrl.u32 %v1376_v11, 16  ;;  %v5143_v46 = vrot.slane %v1920_v28, 9  ;;  %v2069_v41 = vrot.slane %v1921_v52, 5  ;;  %v3199_v7 = vpop.permute.xlu0 %3198  ;;  %v5795_v55 = vld [vmem:[#allocation2 + $0x9c] sm:$0xff]   ;;  %s5337_s25 = sshll.u32 %s7447_s18, 7 }
 0x139   : > { %v1706_v63 = vor.u32 %v1705_v13, %v1702_v34  ;;  %v2072_v26 = vrot.slane %v6911_v15, 5  ;;  %v5144_v24 = vrot.slane %v1923_v39, 9  ;;  %v2076_v23 = vrot.slane %v1924_v54, 5  ;;  %3241 = vst.msk [vmem:[#allocation3 + $0x30] sm:$0xff] %vm3234_vm12, %v3199_v7  ;;  %v458_v28 = vld [vmem:[#allocation2 + $0xa8] sm:$0x1] }
 0x13a   : > { %v3464_v45 = vld [vmem:[#allocation2 + $0xa4] sm:$0x1]  ;;  %v3754_v5 = vsel %vm6039_vm14, %v3749_v35, %v6901_v51  ;;  %v6938_v14 = vcombine.low %v1688_v25, %v1698_v12  ;;  %v6942_v21 = vpack.c.bf16 %v1127_v22, %v1127_v22  ;;  %v1715_v19 = vrot.slane %v1713_v20, 4  ;;  %1333 = vst.msk [vmem:[#allocation3 + $0x68] sm:$0xff] %vm1319_vm1, %v5795_v55  ;;  %v2422_v54 = vld [vmem:[#allocation2 + $0xa0] sm:$0xf] }
 0x13b   : > { %v4009_v10 = vld [vmem:[#allocation2 + $0xa4] sm:$0x1]  ;;  %v3761_v33 = vshll.u32 %v3464_v45, 16  ;;  %v2070_v0 = vsel %vm5973_vm11, %v5143_v46, %v2069_v41  ;;  %v1707_v40 = vrot.slane %v1706_v63, 4  ;;  %v2071_v30 = vrot.slane %v2069_v41, 4  ;;  %v5780_v45 = vld [vmem:[#allocation2 + $0x9c] sm:$0xff]  }
 0x13c   : > { %v1377_v57 = vld [vmem:[#allocation2 + $0xa4] sm:$0x1]  ;;  %v4152_v47 = vrot.slane %v4009_v10, 5  ;;  %v2078_v29 = vrot.slane %v2076_v23, 4  ;;  %v3377_v52 = vpop.permute.xlu0 %3376  ;;  %v1716_v44 = vor.u32 %v1715_v19, %v6931_v18  ;;  %v6952_v4 = vsel %vm5973_vm11, %v5144_v24, %v2076_v23  ;;  %v514_v20 = vld [vmem:[#allocation2 + $0xb0] sm:$0x1] }
 0x13d   : > { %v1925_v11 = vld [vmem:[#allocation2 + $0xa4] sm:$0x1]  ;;  %v1719_v51 = vshll.u32 %v1377_v57, 16  ;;  %v3763_v50 = vrot.slane %v3761_v33, 5  ;;  %3419 = vst.msk [vmem:[#allocation3 + $0x30] sm:$0xff] %vm3412_vm13, %v3377_v52  ;;  %v2073_v61 = vsel %vm5973_vm11, %v2071_v30, %v2072_v26  ;;  %v459_v59 = vsel %vm5882_vm2, 0, %v458_v28 }
 0x13e   : > { %v4153_v48 = vsel %vm5973_vm11, %v4151_v8, %v4152_v47  ;;  %v2079_v62 = vrot.slane %v1925_v11, 5  ;;  %v1717_v43 = vrot.slane %v1716_v44, 4  ;;  %v5159_v16 = vcombine.low %v2070_v0, %v2073_v61  ;;  %460 = vst [vmem:[#allocation2 + $0xa8] sm:$0x1] %v459_v59  ;;  %v2966_v63 = vld [vmem:[#allocation2 + $0x9c] sm:$0xe] }
 0x13f   : > { %v5286_v53 = vcombine.low %v4150_v60, %v4153_v48  ;;  %v1721_v15 = vrot.slane %v1719_v51, 5  ;;  %v3764_v56 = vsel %vm6039_vm14, %v3759_v31, %v3763_v50  ;;  %v878_v34 = vshrl.u32 %v6817_v9, 16  ;;  %v2423_v31 = vld [vmem:[#allocation2 + $0xa4] sm:$0x1]  ;;  %v2967_v55 = vld [vmem:[#allocation2 + $0xa0] sm:$0xf] }
 0x140   : > { %v5254_v35 = vcombine.low %v3754_v5, %v3764_v56  ;;  %v6964_v25 = vsel %vm5973_vm11, %v2078_v29, %v2079_v62  ;;  %v881_v39 = vshll.u32 %v6817_v9, 16  ;;  %v1712_v12 = vsel %vm6039_vm14, %v1707_v40, %v6931_v18  ;;  %v2968_v57 = vld [vmem:[#allocation2 + $0xa4] sm:$0x1]  ;;  %v461_v40 = vld [vmem:[#allocation2 + $0xb4] sm:$0x1] }
 0x141   : > { %4252 = vrot.lane.b32.xlu0 %v5286_v53, %s5827_s8  ;;  %v1722_v8 = vsel %vm6039_vm14, %v1717_v43, %v1721_v15  ;;  %v886_v13 = vshrl.u32 %v6847_v37, 16  ;;  %v889_v22 = vshll.u32 %v6847_v37, 16  ;;  %v5160_v46 = vcombine.low %v6952_v4, %v6964_v25  ;;  %v517_v61 = vld [vmem:[#allocation2 + $0xbc] sm:$0x1]  ;;  %v464_v59 = vld [vmem:[#allocation2 + $0xc0] sm:$0x1] }
 0x142   : > { %3931 = vrot.lane.b32.xlu1 %v5254_v35, %s5830_s11  ;;  %v880_v9 = vrot.slane %v878_v34, 7  ;;  %v2722_v41 = vshrl.u32 %v2421_v6, 16  ;;  %v2725_v7 = vshll.u32 %v2421_v6, 16  ;;  %v2731_v18 = vshll.u32 %v2422_v54, 16 }
 0x143   : > { %v6978_v26 = vrot.slane %v886_v13, 7  ;;  %v2735_v24 = vshrl.u32 %v2422_v54, 16  ;;  %v2741_v23 = vshll.u32 %v2423_v31, 16  ;;  %v5128_v47 = vcombine.low %v1712_v12, %v1722_v8 }
 0x144   : > { %v883_v37 = vor.u32 %v881_v39, %v880_v9  ;;  %v884_v5 = vrot.slane %v880_v9, 4  ;;  %v2724_v10 = vrot.slane %v2722_v41, 4  ;;  %v2727_v60 = vrot.slane %v2725_v7, 5  ;;  %v2880_v33 = vpop.permute.xlu1 %2879  ;;  %v520_v7 = vld [vmem:[#allocation2 + $0xc8] sm:$0x1] }
 0x145   : > { %2167 = vrot.lane.b32.xlu0 %v5159_v16, %s5826_s7  ;;  %v891_v19 = vor.u32 %v889_v22, %v6978_v26  ;;  %v2733_v0 = vrot.slane %v2731_v18, 5  ;;  %v2737_v11 = vrot.slane %v2735_v24, 4  ;;  %2921 = vst.msk [vmem:[#allocation3 + $0x38] sm:$0xff] %vm2913_vm9, %v2880_v33  ;;  %v2743_v30 = vrot.slane %v2741_v23, 5  ;;  %v1071_v48 = vld [vmem:[#allocation2 + $0xa8] sm:$0xf] }
 0x146   : > { %1843 = vrot.lane.b32.xlu1 %v6938_v14, %s5828_s9  ;;  %v2728_v51 = vor.u32 %v2727_v60, %v2724_v10  ;;  %v515_v29 = vsel %vm5892_vm4, 0, %v514_v20  ;;  %v5207_v28 = vrot.slane %v2966_v63, 9  ;;  %v3922_v52 = vpop.permute.xlu0 %3921  ;;  %v3112_v53 = vrot.slane %v2967_v55, 5  ;;  %v467_v63 = vld [vmem:[#allocation2 + $0xcc] sm:$0x1] }
 0x147   : > { %v892_v50 = vsel %vm5925_vm7, %v884_v5, %v891_v19  ;;  %v2738_v44 = vor.u32 %v2737_v11, %v2733_v0  ;;  %516 = vst [vmem:[#allocation2 + $0xb0] sm:$0x1] %v515_v29  ;;  %v3115_v15 = vrot.slane %v2968_v57, 5  ;;  %3964 = vst.msk [vmem:[#allocation3 + $0x30] sm:$0xff] %vm3957_vm15, %v3922_v52  ;;  %v1072_v14 = vsel %vm5931_vm10, %v883_v37, %v1071_v48 }
 0x148   : > { %1074 = vst.msk [vmem:[#allocation2 + $0xac] sm:$0xf] %vm977_vm6, %v892_v50  ;;  %v2729_v62 = vrot.slane %v2728_v51, 4  ;;  %v462_v56 = vsel %vm5882_vm2, 0, %v461_v40  ;;  %v895_v43 = vshrl.u32 %v6873_v49, 16  ;;  %v3201_v16 = vpop.permute.xlu1 %3200  ;;  %v893_v6 = vrot.slane %v6978_v26, 4 }
 0x149   : > { %2344 = vrot.lane.b32.xlu0 %v5780_v45, %s5822_s29  ;;  %1073 = vst [vmem:[#allocation2 + $0xa8] sm:$0xf] %v1072_v14  ;;  %v2739_v35 = vrot.slane %v2738_v44, 4  ;;  %v3113_v34 = vsel %vm5973_vm11, %v5207_v28, %v3112_v53  ;;  %v3114_v39 = vrot.slane %v3112_v53, 4  ;;  %463 = vst [vmem:[#allocation2 + $0xb4] sm:$0x1] %v462_v56 }
 0x14a   : > { %3242 = vst.msk [vmem:[#allocation3 + $0x38] sm:$0xff] %vm3234_vm12, %v3201_v16  ;;  %1845 = vrot.lane.b32.xlu1 %v5128_v47, %s5828_s9  ;;  %v2734_v54 = vsel %vm6039_vm14, %v2729_v62, %v2733_v0  ;;  %v897_v31 = vrot.slane %v895_v43, 7  ;;  %v903_v12 = vshrl.u32 %v6875_v2, 16  ;;  %v906_v8 = vshll.u32 %v6875_v2, 16  ;;  %v4243_v13 = vpop.permute.xlu0 %4242 }
 0x14b   : > { %v2744_v22 = vsel %vm6039_vm14, %v2739_v35, %v2743_v30  ;;  %v3116_v20 = vsel %vm5973_vm11, %v3114_v39, %v3115_v15  ;;  %v518_v9 = vsel %vm5892_vm4, 0, %v517_v61  ;;  %v465_v41 = vsel %vm5882_vm2, 0, %v464_v59  ;;  %4285 = vst.msk [vmem:[#allocation3 + $0x30] sm:$0xff] %vm4278_vm0, %v4243_v13 }
 0x14c   : > { %v5191_v26 = vcombine.low %v2734_v54, %v2744_v22  ;;  %v5223_v18 = vcombine.low %v3113_v34, %v3116_v20  ;;  %v898_v2 = vshll.u32 %v6873_v49, 16  ;;  %v901_v24 = vrot.slane %v897_v31, 4  ;;  %519 = vst [vmem:[#allocation2 + $0xbc] sm:$0x1] %v518_v9  ;;  %v3379_v23 = vpop.permute.xlu1 %3378  ;;  %466 = vst [vmem:[#allocation2 + $0xc0] sm:$0x1] %v465_v41 }
 0x14d   : > { %v7016_v55 = vrot.slane %v903_v12, 7  ;;  %3420 = vst.msk [vmem:[#allocation3 + $0x38] sm:$0xff] %vm3412_vm13, %v3379_v23  ;;  %v912_v45 = vshrl.u32 %v6907_v38, 16  ;;  %v915_v37 = vshll.u32 %v6907_v38, 16  ;;  %v920_v5 = vshrl.u32 %v6924_v27, 16 }
 0x14e   : > { %2169 = vrot.lane.b32.xlu1 %v5160_v46, %s5826_s7  ;;  %2889 = vrot.lane.b32.xlu0 %v5191_v26, %s5829_s10  ;;  %v1075_v49 = vld [vmem:[#allocation2 + $0xb0] sm:$0x1]  ;;  %v923_v10 = vshll.u32 %v6924_v27, 16  ;;  %v521_v60 = vsel %vm5892_vm4, 0, %v520_v7  ;;  %v468_v57 = vsel %vm5882_vm2, 0, %v467_v63  ;;  %v1136_v33 = vshrl.u32 %v6942_v21, 16 }
 0x14f   : > { %v1076_v47 = vsel %vm5882_vm2, %v893_v6, %v1075_v49  ;;  %v2425_v19 = vld [vmem:[#allocation2 + $0xac] sm:$0xf]  ;;  %v908_v4 = vor.u32 %v906_v8, %v7016_v55  ;;  %522 = vst [vmem:[#allocation2 + $0xc8] sm:$0x1] %v521_v60  ;;  %469 = vst [vmem:[#allocation2 + $0xcc] sm:$0x1] %v468_v57  ;;  %v900_v40 = vor.u32 %v898_v2, %v897_v31 }
 0x150   : > { %v7035_v0 = vld [vmem:[#allocation2 + $0xac] sm:$0xf]  ;;  %1077 = vst [vmem:[#allocation2 + $0xb0] sm:$0x1] %v1076_v47  ;;  %v2424_v46 = vld [vmem:[#allocation2 + $0xa8] sm:$0xf]  ;;  %v3924_v51 = vpop.permute.xlu1 %3923  ;;  %v4245_v30 = vpop.permute.xlu0 %4244 }
 0x151   : > { %v5781_v25 = vld [vmem:[#allocation2 + $0xa8] sm:$0xff]   ;;  %v2755_v11 = vshll.u32 %v2425_v19, 16  ;;  %v2746_v29 = vshrl.u32 %v2424_v46, 16  ;;  %v2749_v28 = vshll.u32 %v2424_v46, 16  ;;  %v2759_v52 = vshrl.u32 %v2425_v19, 16  ;;  %3965 = vst.msk [vmem:[#allocation3 + $0x38] sm:$0xff] %vm3957_vm15, %v3924_v51 }
 0x152   : > { %v2969_v50 = vld [vmem:[#allocation2 + $0xa8] sm:$0xe]  ;;  %v3119_v48 = vrot.slane %v7035_v0, 5  ;;  %2346 = vrot.lane.b32.xlu1 %v5781_v25, %s5822_s29  ;;  %3210 = vrot.lane.b32.xlu0 %v5223_v18, %s5825_s6  ;;  %v909_v15 = vsel %vm5925_vm7, %v901_v24, %v908_v4  ;;  %4286 = vst.msk [vmem:[#allocation3 + $0x38] sm:$0xff] %vm4278_vm0, %v4245_v30  ;;  %v910_v59 = vrot.slane %v7016_v55, 4  ;;  %v7049_v34 = vrot.slane %v912_v45, 7 }
 0x153   : > { %v7041_v44 = vrot.slane %v2755_v11, 5  ;;  %v5208_v53 = vrot.slane %v2969_v50, 9  ;;  %v2748_v61 = vrot.slane %v2746_v29, 4  ;;  %v2751_v14 = vrot.slane %v2749_v28, 5  ;;  %v5784_v43 = vld [vmem:[#allocation2 + $0xa8] sm:$0xff]  }
 0x154   : > { %v2761_v62 = vrot.slane %v2759_v52, 4  ;;  %v3121_v56 = vrot.slane %v3119_v48, 4  ;;  %1081 = vst.msk [vmem:[#allocation2 + $0xb8] sm:$0xf] %vm977_vm6, %v909_v15  ;;  %v4301_v16 = vld [vmem:[#allocation3 + $0x30] sm:$0xff]  ;;  %v1836_v39 = vpop.permute.xlu1 %1835 }
 0x155   : > { %v1078_v6 = vld [vmem:[#allocation2 + $0xb4] sm:$0xf]  ;;  %v3465_v35 = vld [vmem:[#allocation2 + $0xa8] sm:$0xf]  ;;  %5624 = vmatprep.mubr.bf16.mxu0 %v4301_v16  ;;  %v2752_v54 = vor.u32 %v2751_v14, %v2748_v61  ;;  %v3466_v8 = vld [vmem:[#allocation2 + $0xac] sm:$0xf]  ;;  %v3120_v19 = vsel %vm5973_vm11, %v5208_v53, %v3119_v48 }
 0x156   : > { %v2762_v31 = vor.u32 %v2761_v62, %v7041_v44  ;;  %v1079_v12 = vsel %vm5931_vm10, %v900_v40, %v1078_v6  ;;  %v3766_v13 = vshrl.u32 %v3465_v35, 16  ;;  %v1082_v22 = vld [vmem:[#allocation2 + $0xbc] sm:$0x1]  ;;  %1876 = vst.msk [vmem:[#allocation3 + $0x40] sm:$0xff] %vm1867_vm3, %v1836_v39  ;;  %3388 = vrot.lane.b32.xlu0 %v5784_v43, %s5824_s30  ;;  %v3769_v20 = vshll.u32 %v3465_v35, 16 }
 0x157   : > { %1080 = vst [vmem:[#allocation2 + $0xb4] sm:$0xf] %v1079_v12  ;;  %v3775_v9 = vshll.u32 %v3466_v8, 16  ;;  %v3779_v41 = vshrl.u32 %v3466_v8, 16  ;;  %v1083_v7 = vsel %vm5882_vm2, %v910_v59, %v1082_v22  ;;  %v4010_v63 = vld [vmem:[#allocation2 + $0xa8] sm:$0xe]  ;;  %v2160_v23 = vpop.permute.xlu0 %2159 }
 0x158   : > { %v2426_v26 = vld [vmem:[#allocation2 + $0xb0] sm:$0x1]  ;;  %v2753_v18 = vrot.slane %v2752_v54, 4  ;;  %v2763_v2 = vrot.slane %v2762_v31, 4  ;;  %1084 = vst [vmem:[#allocation2 + $0xbc] sm:$0x1] %v1083_v7  ;;  %v1838_v47 = vpop.permute.xlu1 %1837  ;;  %v7073_v54 = vor.u32 %v915_v37, %v7049_v34 }
 0x159   : > { %v2971_v24 = vld [vmem:[#allocation2 + $0xb0] sm:$0x1]  ;;  %v2765_v55 = vshll.u32 %v2426_v26, 16  ;;  %v3768_v60 = vrot.slane %v3766_v13, 4  ;;  %v3771_v57 = vrot.slane %v3769_v20, 5  ;;  %2200 = vst.msk [vmem:[#allocation3 + $0x40] sm:$0xff] %vm2191_vm5, %v2160_v23 }
 0x15a   : > { %v3122_v45 = vrot.slane %v2971_v24, 5  ;;  %v3467_v49 = vld [vmem:[#allocation2 + $0xb0] sm:$0x1]  ;;  %v3777_v0 = vrot.slane %v3775_v9, 5  ;;  %v3781_v4 = vrot.slane %v3779_v41, 4  ;;  %1877 = vst.msk [vmem:[#allocation3 + $0x48] sm:$0xff] %vm1867_vm3, %v1838_v47  ;;  %v2758_v40 = vsel %vm6039_vm14, %v2753_v18, %v7041_v44 }
 0x15b   : > { %v3785_v25 = vshll.u32 %v3467_v49, 16  ;;  %v4011_v46 = vld [vmem:[#allocation2 + $0xac] sm:$0xf]  ;;  %v4302_v11 = vld [vmem:[#allocation3 + $0x38] sm:$0xff]  ;;  %v2767_v51 = vrot.slane %v2765_v55, 5  ;;  %v3772_v29 = vor.u32 %v3771_v57, %v3768_v60  ;;  %v5271_v53 = vrot.slane %v4010_v63, 9  ;;  %v2337_v15 = vpop.permute.xlu0 %2336 }
 0x15c   : > { %v3123_v30 = vsel %vm5973_vm11, %v3121_v56, %v3122_v45  ;;  %v3469_v28 = vld [vmem:[#allocation2 + $0xb8] sm:$0xf]  ;;  %5625 = vmatmul.mubr.bf16.gmra.mrb[12].mxu0 %v4302_v11  ;;  %v3782_v52 = vor.u32 %v3781_v4, %v3777_v0  ;;  %v4012_v43 = vld [vmem:[#allocation2 + $0xb0] sm:$0x1]  ;;  %v4156_v16 = vrot.slane %v4011_v46, 5  ;;  %v2162_v59 = vpop.permute.xlu1 %2161  ;;  %2377 = vst.msk [vmem:[#allocation3 + $0x40] sm:$0xff] %vm2368_vm8, %v2337_v15 }
 0x15d   : > { %v3787_v50 = vrot.slane %v3785_v25, 5  ;;  %v3799_v48 = vshll.u32 %v3469_v28, 16  ;;  %v2768_v61 = vsel %vm6039_vm14, %v2763_v2, %v2767_v51  ;;  %v3773_v14 = vrot.slane %v3772_v29, 4  ;;  %v1378_v44 = vld [vmem:[#allocation2 + $0xa8] sm:$0xf]  ;;  %2201 = vst.msk [vmem:[#allocation3 + $0x48] sm:$0xff] %vm2191_vm5, %v2162_v59 }
 0x15e   : > { %v3803_v62 = vshrl.u32 %v3469_v28, 16  ;;  %v5192_v56 = vcombine.low %v2758_v40, %v2768_v61  ;;  %v5224_v6 = vcombine.low %v3120_v19, %v3123_v30  ;;  %v3783_v35 = vrot.slane %v3782_v52, 4  ;;  %v3468_v39 = vld [vmem:[#allocation2 + $0xb4] sm:$0xf]  ;;  %v1379_v37 = vld [vmem:[#allocation2 + $0xac] sm:$0xf] }
 0x15f   : > { %v3778_v31 = vsel %vm6039_vm14, %v3773_v14, %v3777_v0  ;;  %v3470_v12 = vld [vmem:[#allocation2 + $0xbc] sm:$0x1]  ;;  %v3790_v8 = vshrl.u32 %v3468_v39, 16  ;;  %v3793_v13 = vshll.u32 %v3468_v39, 16  ;;  %v3801_v22 = vrot.slane %v3799_v48, 5  ;;  %v5796_v24 = vld [vmem:[#allocation2 + $0xa8] sm:$0xff]  }
 0x160   : > { %2891 = vrot.lane.b32.xlu1 %v5192_v56, %s5829_s10  ;;  %v3788_v20 = vsel %vm6039_vm14, %v3783_v35, %v3787_v50  ;;  %v3805_v9 = vrot.slane %v3803_v62, 4  ;;  %v3809_v41 = vshll.u32 %v3470_v12, 16  ;;  %v4157_v38 = vsel %vm5973_vm11, %v5271_v53, %v4156_v16  ;;  %v1380_v2 = vld [vmem:[#allocation2 + $0xb0] sm:$0x1]  ;;  %v4013_v60 = vld [vmem:[#allocation2 + $0xb4] sm:$0xe] }
 0x161   : > { %v5255_v7 = vcombine.low %v3778_v31, %v3788_v20  ;;  %v3792_v63 = vrot.slane %v3790_v8, 4  ;;  %v3795_v26 = vrot.slane %v3793_v13, 5  ;;  %v4158_v18 = vrot.slane %v4156_v16, 4  ;;  %v4014_v4 = vld [vmem:[#allocation2 + $0xb8] sm:$0xf]  ;;  %1334 = vst.msk [vmem:[#allocation3 + $0x70] sm:$0xff] %vm1319_vm1, %v5796_v24 }
 0x162   : > { %v3806_v23 = vor.u32 %v3805_v9, %v3801_v22  ;;  %v3811_v55 = vrot.slane %v3809_v41, 5  ;;  %v4159_v45 = vrot.slane %v4012_v43, 5  ;;  %v1724_v49 = vshrl.u32 %v1378_v44, 16  ;;  %v5797_v25 = vld [vmem:[#allocation2 + $0xb4] sm:$0xff]   ;;  %v4015_v29 = vld [vmem:[#allocation2 + $0xbc] sm:$0x1] }
 0x163   : > { %3933 = vrot.lane.b32.xlu0 %v5255_v7, %s5830_s11  ;;  %v3796_v57 = vor.u32 %v3795_v26, %v3792_v63  ;;  %v1727_v47 = vshll.u32 %v1378_v44, 16  ;;  %v1733_v19 = vshll.u32 %v1379_v37, 16  ;;  %v1737_v0 = vshrl.u32 %v1379_v37, 16  ;;  %v5785_v46 = vld [vmem:[#allocation2 + $0xb4] sm:$0xff]   ;;  %1335 = vst.msk [vmem:[#allocation3 + $0x78] sm:$0xff] %vm1319_vm1, %v5797_v25  ;;  %v2882_v16 = vpop.permute.xlu0 %2881 }
 0x164   : > { %3212 = vrot.lane.b32.xlu1 %v5224_v6, %s5825_s6  ;;  %v3807_v11 = vrot.slane %v3806_v23, 4  ;;  %v4160_v40 = vsel %vm5973_vm11, %v4158_v18, %v4159_v45  ;;  %v1726_v51 = vrot.slane %v1724_v49, 4  ;;  %v1743_v30 = vshll.u32 %v1380_v2, 16  ;;  %v1381_v53 = vld [vmem:[#allocation2 + $0xb4] sm:$0xf]  ;;  %2922 = vst.msk [vmem:[#allocation3 + $0x40] sm:$0xff] %vm2913_vm9, %v2882_v16 }
 0x165   : > { %v3797_v28 = vrot.slane %v3796_v57, 4  ;;  %v5287_v52 = vcombine.low %v4157_v38, %v4160_v40  ;;  %v1729_v50 = vrot.slane %v1727_v47, 5  ;;  %v1735_v48 = vrot.slane %v1733_v19, 5  ;;  %v1382_v43 = vld [vmem:[#allocation2 + $0xb8] sm:$0xf] }
 0x166   : > { %v3812_v15 = vsel %vm6039_vm14, %v3807_v11, %v3811_v55  ;;  %v1739_v61 = vrot.slane %v1737_v0, 4  ;;  %v1745_v14 = vrot.slane %v1743_v30, 5  ;;  %v5272_v62 = vrot.slane %v4013_v60, 9  ;;  %v1383_v35 = vld [vmem:[#allocation2 + $0xbc] sm:$0x1] }
 0x167   : > { %v3802_v44 = vsel %vm6039_vm14, %v3797_v28, %v3801_v22  ;;  %4254 = vrot.lane.b32.xlu0 %v5287_v52, %s5827_s8  ;;  %v1730_v59 = vor.u32 %v1729_v50, %v1726_v51  ;;  %v4163_v56 = vrot.slane %v4014_v4, 5  ;;  %v4166_v6 = vrot.slane %v4015_v29, 5  ;;  %v1926_v13 = vld [vmem:[#allocation2 + $0xa8] sm:$0xe]  ;;  %v1927_v20 = vld [vmem:[#allocation2 + $0xac] sm:$0xf]  ;;  %v2339_v2 = vpop.permute.xlu1 %2338  ;;  %v3203_v24 = vpop.permute.xlu0 %3202 }
 0x168   : > { %3390 = vrot.lane.b32.xlu1 %v5785_v46, %s5824_s30  ;;  %v5256_v39 = vcombine.low %v3802_v44, %v3812_v15  ;;  %v1740_v31 = vor.u32 %v1739_v61, %v1735_v48  ;;  %v1748_v12 = vshrl.u32 %v1381_v53, 16  ;;  %v1751_v8 = vshll.u32 %v1381_v53, 16  ;;  %v1928_v37 = vld [vmem:[#allocation2 + $0xb0] sm:$0x1]  ;;  %v1929_v60 = vld [vmem:[#allocation2 + $0xb4] sm:$0xe] }
 0x169   : > { %v1731_v9 = vrot.slane %v1730_v59, 4  ;;  %v4164_v22 = vsel %vm5973_vm11, %v5272_v62, %v4163_v56  ;;  %v4165_v41 = vrot.slane %v4163_v56, 4  ;;  %v1757_v38 = vshll.u32 %v1382_v43, 16  ;;  %2378 = vst.msk [vmem:[#allocation3 + $0x48] sm:$0xff] %vm2368_vm8, %v2339_v2  ;;  %v1930_v4 = vld [vmem:[#allocation2 + $0xb8] sm:$0xf] }
 0x16a   : > { %v1741_v7 = vrot.slane %v1740_v31, 4  ;;  %v1750_v63 = vrot.slane %v1748_v12, 4  ;;  %v1753_v26 = vrot.slane %v1751_v8, 5  ;;  %v1761_v18 = vshrl.u32 %v1382_v43, 16  ;;  %3243 = vst.msk [vmem:[#allocation3 + $0x40] sm:$0xff] %vm3234_vm12, %v3203_v24 }
 0x16b   : > { %v1736_v23 = vsel %vm6039_vm14, %v1731_v9, %v1735_v48  ;;  %v4167_v55 = vsel %vm5973_vm11, %v4165_v41, %v4166_v6  ;;  %v1759_v45 = vrot.slane %v1757_v38, 5  ;;  %v1767_v49 = vshll.u32 %v1383_v35, 16  ;;  %v1931_v25 = vld [vmem:[#allocation2 + $0xbc] sm:$0x1]  ;;  %v1085_v30 = vld [vmem:[#allocation2 + $0xc0] sm:$0xf]  ;;  %v3381_v53 = vpop.permute.xlu0 %3380 }
 0x16c   : > { %3935 = vrot.lane.b32.xlu1 %v5256_v39, %s5830_s11  ;;  %v1746_v57 = vsel %vm6039_vm14, %v1741_v7, %v1745_v14  ;;  %v5288_v47 = vcombine.low %v4164_v22, %v4167_v55  ;;  %v1754_v19 = vor.u32 %v1753_v26, %v1750_v63  ;;  %v1763_v0 = vrot.slane %v1761_v18, 4  ;;  %v2427_v48 = vld [vmem:[#allocation2 + $0xb4] sm:$0xf]  ;;  %v2428_v43 = vld [vmem:[#allocation2 + $0xb8] sm:$0xf]  ;;  %3421 = vst.msk [vmem:[#allocation3 + $0x40] sm:$0xff] %vm3412_vm13, %v3381_v53 }
 0x16d   : > { %v5129_v46 = vcombine.low %v1736_v23, %v1746_v57  ;;  %v1769_v11 = vrot.slane %v1767_v49, 5  ;;  %v5145_v40 = vrot.slane %v1926_v13, 9  ;;  %v2083_v51 = vrot.slane %v1927_v20, 5  ;;  %v2429_v6 = vld [vmem:[#allocation2 + $0xbc] sm:$0x1]  ;;  %v5786_v63 = vld [vmem:[#allocation2 + $0xb4] sm:$0xff]  }
 0x16e   : > { %4256 = vrot.lane.b32.xlu0 %v5288_v47, %s5827_s8  ;;  %v1755_v29 = vrot.slane %v1754_v19, 4  ;;  %v1764_v28 = vor.u32 %v1763_v0, %v1759_v45  ;;  %v2086_v52 = vrot.slane %v1928_v37, 5  ;;  %v5146_v50 = vrot.slane %v1929_v60, 9  ;;  %v1089_v35 = vld [vmem:[#allocation2 + $0xc8] sm:$0x1] }
 0x16f   : > { %v2084_v15 = vsel %vm5973_vm11, %v5145_v40, %v2083_v51  ;;  %v2085_v61 = vrot.slane %v2083_v51, 4  ;;  %v2090_v14 = vrot.slane %v1930_v4, 5  ;;  %v2093_v62 = vrot.slane %v1931_v25, 5  ;;  %v2972_v13 = vld [vmem:[#allocation2 + $0xb4] sm:$0xe]  ;;  %v1128_v47 = vld [vmem:[%s6916_s24 + $0x8] sm:$0xff] }
 0x170   : > { %1847 = vrot.lane.b32.xlu1 %v5129_v46, %s5828_s9  ;;  %v1760_v16 = vsel %vm6039_vm14, %v1755_v29, %v1759_v45  ;;  %v1765_v44 = vrot.slane %v1764_v28, 4  ;;  %v918_v59 = vrot.slane %v7049_v34, 4  ;;  %v922_v56 = vrot.slane %v920_v5, 7  ;;  %v2973_v20 = vld [vmem:[#allocation2 + $0xb8] sm:$0xf] }
 0x171   : > { %v2087_v39 = vsel %vm5973_vm11, %v2085_v61, %v2086_v52  ;;  %v2091_v31 = vsel %vm5973_vm11, %v5146_v50, %v2090_v14  ;;  %v2092_v12 = vrot.slane %v2090_v14, 4  ;;  %v1086_v8 = vsel %vm5931_vm10, %v7073_v54, %v1085_v30  ;;  %v2974_v27 = vld [vmem:[#allocation2 + $0xbc] sm:$0x1] }
 0x172   : > { %v1770_v34 = vsel %vm6039_vm14, %v1765_v44, %v1769_v11  ;;  %v5161_v9 = vcombine.low %v2084_v15, %v2087_v39  ;;  %v925_v5 = vor.u32 %v923_v10, %v922_v56  ;;  %v927_v22 = vrot.slane %v922_v56, 4  ;;  %1087 = vst [vmem:[#allocation2 + $0xc0] sm:$0xf] %v1086_v8 }
 0x173   : > { %v5130_v41 = vcombine.low %v1760_v16, %v1770_v34  ;;  %v2094_v38 = vsel %vm5973_vm11, %v2092_v12, %v2093_v62  ;;  %v2770_v37 = vshrl.u32 %v2427_v48, 16  ;;  %v2773_v7 = vshll.u32 %v2427_v48, 16  ;;  %v1156_v16 = vld [vmem:[#allocation2 + $0xcc] sm:$0xf] }
 0x174   : > { %2171 = vrot.lane.b32.xlu0 %v5161_v9, %s5826_s7  ;;  %v5162_v54 = vcombine.low %v2091_v31, %v2094_v38  ;;  %v926_v26 = vsel %vm5925_vm7, %v918_v59, %v925_v5  ;;  %v2779_v18 = vshll.u32 %v2428_v43, 16  ;;  %v2783_v2 = vshrl.u32 %v2428_v43, 16 }
 0x175   : > { %1849 = vrot.lane.b32.xlu1 %v5130_v41, %s5828_s9  ;;  %1088 = vst.msk [vmem:[#allocation2 + $0xc4] sm:$0xf] %vm977_vm6, %v926_v26  ;;  %v2772_v10 = vrot.slane %v2770_v37, 4  ;;  %v2775_v24 = vrot.slane %v2773_v7, 5  ;;  %v2789_v23 = vshll.u32 %v2429_v6, 16  ;;  %v1090_v55 = vsel %vm5882_vm2, %v927_v22, %v1089_v35  ;;  %v2884_v19 = vpop.permute.xlu1 %2883 }
 0x176   : > { %v2781_v45 = vrot.slane %v2779_v18, 5  ;;  %v2785_v49 = vrot.slane %v2783_v2, 4  ;;  %1091 = vst [vmem:[#allocation2 + $0xc8] sm:$0x1] %v1090_v55  ;;  %v5209_v60 = vrot.slane %v2972_v13, 9  ;;  %v3126_v57 = vrot.slane %v2973_v20, 5 }
 0x177   : > { %v2776_v0 = vor.u32 %v2775_v24, %v2772_v10  ;;  %v3129_v4 = vrot.slane %v2974_v27, 5  ;;  %v7140_v25 = vrot.slane %v1136_v33, 7  ;;  %2923 = vst.msk [vmem:[#allocation3 + $0x48] sm:$0xff] %vm2913_vm9, %v2884_v19  ;;  %v2791_v11 = vrot.slane %v2789_v23, 5 }
 0x178   : > { %2348 = vrot.lane.b32.xlu0 %v5786_v63, %s5822_s29  ;;  %v2786_v46 = vor.u32 %v2785_v49, %v2781_v45  ;;  %v3128_v40 = vrot.slane %v3126_v57, 4  ;;  %v1139_v51 = vshll.u32 %v6942_v21, 16  ;;  %v5373_v28 = vpack.c.bf16 %v1128_v47, %v1128_v47  ;;  %v3926_v52 = vpop.permute.xlu0 %3925 }
 0x179   : > { %2173 = vrot.lane.b32.xlu1 %v5162_v54, %s5826_s7  ;;  %v2777_v30 = vrot.slane %v2776_v0, 4  ;;  %v2430_v29 = vld [vmem:[#allocation2 + $0xc0] sm:$0xf]  ;;  %v3127_v33 = vsel %vm5973_vm11, %v5209_v60, %v3126_v57  ;;  %v3205_v61 = vpop.permute.xlu1 %3204  ;;  %3966 = vst.msk [vmem:[#allocation3 + $0x40] sm:$0xff] %vm3957_vm15, %v3926_v52  ;;  %v1142_v2 = vrot.slane %v7140_v25, 4  ;;  %s5062_s7 = sshll.u32 %s7447_s18, 1 }
 0x17a   : > { %v2787_v50 = vrot.slane %v2786_v46, 4  ;;  %v2794_v48 = vshrl.u32 %v2430_v29, 16  ;;  %v2797_v53 = vshll.u32 %v2430_v29, 16  ;;  %v2975_v15 = vld [vmem:[#allocation2 + $0xc0] sm:$0xe]  ;;  %v3130_v21 = vsel %vm5973_vm11, %v3128_v40, %v3129_v4  ;;  %3244 = vst.msk [vmem:[#allocation3 + $0x48] sm:$0xff] %vm3234_vm12, %v3205_v61 }
 0x17b   : > { %v2782_v14 = vsel %vm6039_vm14, %v2777_v30, %v2781_v45  ;;  %v5210_v62 = vrot.slane %v2975_v15, 9  ;;  %v1141_v43 = vor.u32 %v1139_v51, %v7140_v25  ;;  %v3471_v13 = vld [vmem:[#allocation2 + $0xc0] sm:$0xf]  ;;  %v5225_v9 = vcombine.low %v3127_v33, %v3130_v21  ;;  %v523_v40 = vld [vmem:[#allocation2 + $0xd4] sm:$0x1] }
 0x17c   : > { %v5787_v44 = vld [vmem:[#allocation2 + $0xc0] sm:$0xff]   ;;  %v2792_v59 = vsel %vm6039_vm14, %v2787_v50, %v2791_v11  ;;  %v2796_v6 = vrot.slane %v2794_v48, 4  ;;  %v2799_v31 = vrot.slane %v2797_v53, 5  ;;  %v4247_v20 = vpop.permute.xlu0 %4246  ;;  %v1144_v41 = vshrl.u32 %v5373_v28, 16 }
 0x17d   : > { %v2431_v56 = vld [vmem:[#allocation2 + $0xc4] sm:$0xf]  ;;  %v5193_v35 = vcombine.low %v2782_v14, %v2792_v59  ;;  %v2432_v39 = vld [vmem:[#allocation2 + $0xc8] sm:$0x1]  ;;  %2350 = vrot.lane.b32.xlu1 %v5787_v44, %s5822_s29  ;;  %v1157_v38 = vsel %vm5931_vm10, %v1141_v43, %v1156_v16  ;;  %v3383_v37 = vpop.permute.xlu1 %3382  ;;  %4287 = vst.msk [vmem:[#allocation3 + $0x40] sm:$0xff] %vm4278_vm0, %v4247_v20  ;;  %v1147_v10 = vshll.u32 %v5373_v28, 16 }
 0x17e   : > { %v2803_v12 = vshll.u32 %v2431_v56, 16  ;;  %v2807_v8 = vshrl.u32 %v2431_v56, 16  ;;  %v2813_v34 = vshll.u32 %v2432_v39, 16  ;;  %v2976_v5 = vld [vmem:[#allocation2 + $0xc4] sm:$0xf]  ;;  %v2800_v7 = vor.u32 %v2799_v31, %v2796_v6  ;;  %3422 = vst.msk [vmem:[#allocation3 + $0x48] sm:$0xff] %vm3412_vm13, %v3383_v37 }
 0x17f   : > { %v2977_v22 = vld [vmem:[#allocation2 + $0xc8] sm:$0x1]  ;;  %2893 = vrot.lane.b32.xlu0 %v5193_v35, %s5829_s10  ;;  %v3133_v26 = vrot.slane %v2976_v5, 5  ;;  %1158 = vst [vmem:[#allocation2 + $0xcc] sm:$0xf] %v1157_v38  ;;  %v7164_v27 = vrot.slane %v1144_v41, 7 }
 0x180   : > { %v2805_v54 = vrot.slane %v2803_v12, 5  ;;  %v2809_v63 = vrot.slane %v2807_v8, 4  ;;  %v3136_v18 = vrot.slane %v2977_v22, 5  ;;  %1171 = vst.msk [vmem:[#allocation2 + $0xcc] sm:$0xf] %vm977_vm6, %v5823_v58  ;;  %v2801_v24 = vrot.slane %v2800_v7, 4 }
 0x181   : > { %v3472_v42 = vld [vmem:[#allocation2 + $0xc4] sm:$0xf]  ;;  %v2815_v55 = vrot.slane %v2813_v34, 5  ;;  %v3135_v45 = vrot.slane %v3133_v26, 4  ;;  %v1149_v49 = vor.u32 %v1147_v10, %v7164_v27  ;;  %v3473_v60 = vld [vmem:[#allocation2 + $0xc8] sm:$0x1]  ;;  %v3928_v19 = vpop.permute.xlu1 %3927  ;;  %v3134_v25 = vsel %vm5973_vm11, %v5210_v62, %v3133_v26 }
 0x182   : > { %v2810_v23 = vor.u32 %v2809_v63, %v2805_v54  ;;  %v3814_v57 = vshrl.u32 %v3471_v13, 16  ;;  %v3817_v47 = vshll.u32 %v3471_v13, 16  ;;  %v2806_v0 = vsel %vm6039_vm14, %v2801_v24, %v2805_v54  ;;  %v5790_v46 = vld [vmem:[#allocation2 + $0xc0] sm:$0xff]   ;;  %3967 = vst.msk [vmem:[#allocation3 + $0x48] sm:$0xff] %vm3957_vm15, %v3928_v19  ;;  %v4249_v51 = vpop.permute.xlu0 %4248  ;;  %v4018_v43 = vld [vmem:[#allocation2 + $0xc8] sm:$0x1] }
 0x183   : > { %3214 = vrot.lane.b32.xlu0 %v5225_v9, %s5825_s6  ;;  %v3823_v11 = vshll.u32 %v3472_v42, 16  ;;  %v3137_v30 = vsel %vm5973_vm11, %v3135_v45, %v3136_v18  ;;  %v1150_v29 = vsel %vm5925_vm7, %v1142_v2, %v1149_v49  ;;  %4288 = vst.msk [vmem:[#allocation3 + $0x48] sm:$0xff] %vm4278_vm0, %v4249_v51  ;;  %v3827_v53 = vshrl.u32 %v3472_v42, 16  ;;  %v4017_v15 = vld [vmem:[#allocation2 + $0xc4] sm:$0xf] }
 0x184   : > { %v2811_v4 = vrot.slane %v2810_v23, 4  ;;  %v3816_v28 = vrot.slane %v3814_v57, 4  ;;  %v3819_v52 = vrot.slane %v3817_v47, 5  ;;  %1159 = vst.msk [vmem:[#allocation2 + $0xd0] sm:$0xf] %vm977_vm6, %v1150_v29  ;;  %v3833_v33 = vshll.u32 %v3473_v60, 16 }
 0x185   : > { %v3825_v48 = vrot.slane %v3823_v11, 5  ;;  %v4303_v61 = vld [vmem:[#allocation3 + $0x40] sm:$0xff]  ;;  %1172 = vst.msk [vmem:[#allocation2 + $0xd0] sm:$0xf] %vm977_vm6, %v5823_v58  ;;  %v524_v21 = vsel %vm5892_vm4, 0, %v523_v40  ;;  %v1840_v16 = vpop.permute.xlu1 %1839  ;;  %v3829_v44 = vrot.slane %v3827_v53, 4  ;;  %v5226_v56 = vcombine.low %v3134_v25, %v3137_v30 }
 0x186   : > { %v2816_v50 = vsel %vm6039_vm14, %v2811_v4, %v2815_v55  ;;  %v3820_v36 = vor.u32 %v3819_v52, %v3816_v28  ;;  %v4016_v62 = vld [vmem:[#allocation2 + $0xc0] sm:$0xe]  ;;  %5628 = vmatprep.mubr.bf16.mxu0 %v4303_v61  ;;  %525 = vst [vmem:[#allocation2 + $0xd4] sm:$0x1] %v524_v21  ;;  %1878 = vst.msk [vmem:[#allocation3 + $0x50] sm:$0xff] %vm1867_vm3, %v1840_v16  ;;  %v4170_v35 = vrot.slane %v4017_v15, 5 }
 0x187   : > { %v5194_v14 = vcombine.low %v2806_v0, %v2816_v50  ;;  %3392 = vrot.lane.b32.xlu0 %v5790_v46, %s5824_s30  ;;  %v3474_v59 = vld [vmem:[#allocation2 + $0xcc] sm:$0xf]  ;;  %v3830_v39 = vor.u32 %v3829_v44, %v3825_v48  ;;  %v3835_v31 = vrot.slane %v3833_v33, 5  ;;  %v5273_v3 = vrot.slane %v4016_v62, 9 }
 0x188   : > { %v3821_v6 = vrot.slane %v3820_v36, 4  ;;  %v4173_v12 = vrot.slane %v4018_v43, 5  ;;  %v1151_v8 = vrot.slane %v7164_v27, 4  ;;  %v3838_v13 = vshrl.u32 %v3474_v59, 16  ;;  %v4019_v4 = vld [vmem:[#allocation2 + $0xcc] sm:$0xe] }
 0x189   : > { %2895 = vrot.lane.b32.xlu1 %v5194_v14, %s5829_s10  ;;  %v2164_v20 = vpop.permute.xlu0 %2163  ;;  %v3831_v9 = vrot.slane %v3830_v39, 4  ;;  %v3841_v5 = vshll.u32 %v3474_v59, 16  ;;  %v4172_v22 = vrot.slane %v4170_v35, 4  ;;  %v4171_v63 = vsel %vm5973_vm11, %v5273_v3, %v4170_v35  ;;  %s411_s10 = scalar_lea.vmem %s7427_s5, %s5062_s7 }
 0x18a   : > { %v3826_v34 = vsel %vm6039_vm14, %v3821_v6, %v3825_v48  ;;  %2202 = vst.msk [vmem:[#allocation3 + $0x50] sm:$0xff] %vm2191_vm5, %v2164_v20  ;;  %v4304_v38 = vld [vmem:[#allocation3 + $0x48] sm:$0xff]  ;;  %v3840_v23 = vrot.slane %v3838_v13, 4  ;;  %vm7441_vm4 = vcmask 24576   ;;  %v5274_v30 = vrot.slane %v4019_v4, 9 }
 0x18b   : > { %v1842_v41 = vpop.permute.xlu1 %1841  ;;  %5629 = vmatmul.mubr.bf16.gmra.mrb[16].mxu0 %v4304_v38  ;;  %v3836_v7 = vsel %vm6039_vm14, %v3831_v9, %v3835_v31  ;;  %v4174_v26 = vsel %vm5973_vm11, %v4172_v22, %v4173_v12  ;;  %v3843_v55 = vrot.slane %v3841_v5, 5 }
 0x18c   : > { %1879 = vst.msk [vmem:[#allocation3 + $0x58] sm:$0xff] %vm1867_vm3, %v1842_v41  ;;  %v5791_v37 = vld [vmem:[#allocation2 + $0xcc] sm:$0xff]   ;;  %v5257_v18 = vcombine.low %v3826_v34, %v3836_v7  ;;  %v5289_v49 = vcombine.low %v4171_v63, %v4174_v26 }
 0x18d   : > { %3216 = vrot.lane.b32.xlu1 %v5226_v56, %s5825_s6  ;;  %v3475_v54 = vld [vmem:[#allocation2 + $0xd0] sm:$0xf]  ;;  %v1160_v2 = vld [vmem:[#allocation2 + $0xd4] sm:$0x1]  ;;  %v2341_v42 = vpop.permute.xlu0 %2340  ;;  %v3844_v47 = vor.u32 %v3843_v55, %v3840_v23  ;;  %s7244_s6 = scalar_lea.vmem %s7426_s4, %s5337_s25 }
 0x18e   : > { %v3847_v27 = vshll.u32 %v3475_v54, 16  ;;  %v3851_v10 = vshrl.u32 %v3475_v54, 16  ;;  %v1161_v24 = vsel %vm5882_vm2, %v1151_v8, %v1160_v2  ;;  %2379 = vst.msk [vmem:[#allocation3 + $0x50] sm:$0xff] %vm2368_vm8, %v2341_v42  ;;  %3937 = vrot.lane.b32.xlu0 %v5257_v18, %s5830_s11  ;;  %v4020_v1 = vld [vmem:[#allocation2 + $0xd0] sm:$0xf] }
 0x18f   : > { %v2166_v45 = vpop.permute.xlu1 %2165  ;;  %1162 = vst [vmem:[#allocation2 + $0xd4] sm:$0x1] %v1161_v24  ;;  %v4177_v25 = vrot.slane %v4020_v1, 5  ;;  %v3845_v11 = vrot.slane %v3844_v47, 4 }
 0x190   : > { %2203 = vst.msk [vmem:[#allocation3 + $0x58] sm:$0xff] %vm2191_vm5, %v2166_v45  ;;  %v3849_v60 = vrot.slane %v3847_v27, 5  ;;  %v3853_v57 = vrot.slane %v3851_v10, 4 }
 0x191   : > { %3394 = vrot.lane.b32.xlu1 %v5791_v37, %s5824_s30  ;;  %1173 = vst.msk [vmem:[#allocation2 + $0xd4] sm:$0x1] %vm7441_vm4, %v5823_v58  ;;  %v4179_v28 = vrot.slane %v4177_v25, 4  ;;  %v4178_v15 = vsel %vm5973_vm11, %v5274_v30, %v4177_v25 }
 0x192   : > { %4258 = vrot.lane.b32.xlu0 %v5289_v49, %s5827_s8  ;;  %v3854_v0 = vor.u32 %v3853_v57, %v3849_v60  ;;  %v3850_v48 = vsel %vm6039_vm14, %v3845_v11, %v3849_v60 }
 0x193   : > { %v2343_v19 = vpop.permute.xlu1 %2342 }
 0x194   : > { %2380 = vst.msk [vmem:[#allocation3 + $0x58] sm:$0xff] %vm2368_vm8, %v2343_v19  ;;  %v3855_v58 = vrot.slane %v3854_v0, 4 }
 0x195   : > { %v2886_v46 = vpop.permute.xlu0 %2885 }
 0x196   : > { %2924 = vst.msk [vmem:[#allocation3 + $0x50] sm:$0xff] %vm2913_vm9, %v2886_v46 }
 0x198   : > { %v3476_v40 = vld [vmem:[#allocation2 + $0xd4] sm:$0x1] }
 0x199   : > { %v4021_v51 = vld [vmem:[#allocation2 + $0xd4] sm:$0x1]  ;;  %v3857_v29 = vshll.u32 %v3476_v40, 16  ;;  %v3207_v50 = vpop.permute.xlu0 %3206 }
 0x19a   : > { %v4180_v52 = vrot.slane %v4021_v51, 5  ;;  %3245 = vst.msk [vmem:[#allocation3 + $0x50] sm:$0xff] %vm3234_vm12, %v3207_v50 }
 0x19b   : > { %v3859_v53 = vrot.slane %v3857_v29, 5 }
 0x19c   : > { %v4181_v61 = vsel %vm5973_vm11, %v4179_v28, %v4180_v52 }
 0x19d   : > { %v3860_v33 = vsel %vm6039_vm14, %v3855_v58, %v3859_v53  ;;  %v3385_v14 = vpop.permute.xlu0 %3384  ;;  %v5290_v62 = vcombine.low %v4178_v15, %v4181_v61 }
 0x19e   : > { %v5258_v36 = vcombine.low %v3850_v48, %v3860_v33  ;;  %v2888_v21 = vpop.permute.xlu1 %2887  ;;  %3423 = vst.msk [vmem:[#allocation3 + $0x50] sm:$0xff] %vm3412_vm13, %v3385_v14 }
 0x19f   : > { %2925 = vst.msk [vmem:[#allocation3 + $0x58] sm:$0xff] %vm2913_vm9, %v2888_v21 }
 0x1a0   : > { %3939 = vrot.lane.b32.xlu1 %v5258_v36, %s5830_s11 }
 0x1a2   : > { %v3209_v43 = vpop.permute.xlu1 %3208 }
 0x1a3   : > { %3246 = vst.msk [vmem:[#allocation3 + $0x58] sm:$0xff] %vm3234_vm12, %v3209_v43 }
 0x1a4   : > { %4260 = vrot.lane.b32.xlu1 %v5290_v62, %s5827_s8 }
 0x1a5   : > { %v3930_v16 = vpop.permute.xlu0 %3929 }
 0x1a6   : > { %v3387_v17 = vpop.permute.xlu1 %3386  ;;  %3968 = vst.msk [vmem:[#allocation3 + $0x50] sm:$0xff] %vm3957_vm15, %v3930_v16 }
 0x1a7   : > { %3424 = vst.msk [vmem:[#allocation3 + $0x58] sm:$0xff] %vm3412_vm13, %v3387_v17 }
 0x1a9   : > { %v4251_v32 = vpop.permute.xlu0 %4250 }
 0x1aa   : > { %4289 = vst.msk [vmem:[#allocation3 + $0x50] sm:$0xff] %vm4278_vm0, %v4251_v32 }
 0x1b1   : > { %v4305_v44 = vld [vmem:[#allocation3 + $0x50] sm:$0xff] }
 0x1b2   : > { %5632 = vmatprep.mubr.bf16.mxu0 %v4305_v44 }
 0x1b3   : > { %v4253_v59 = vpop.permute.xlu0 %4252 }
 0x1b4   : > { %v3932_v56 = vpop.permute.xlu1 %3931 }
 0x1b5   : > { %3969 = vst.msk [vmem:[#allocation3 + $0x58] sm:$0xff] %vm3957_vm15, %v3932_v56 }
 0x1b6   : > { %4290 = vst.msk [vmem:[#allocation3 + $0x58] sm:$0xff] %vm4278_vm0, %v4253_v59 }
 0x1b7   : > { %v2168_v6 = vpop.permute.xlu0 %2167 }
 0x1b8   : > { %v1844_v35 = vpop.permute.xlu1 %1843 }
 0x1b9   : > { %1880 = vst.msk [vmem:[#allocation3 + $0x60] sm:$0xff] %vm1867_vm3, %v1844_v35 }
 0x1ba   : > { %2204 = vst.msk [vmem:[#allocation3 + $0x60] sm:$0xff] %vm2191_vm5, %v2168_v6 }
 0x1bb   : > { %v2345_v39 = vpop.permute.xlu0 %2344 }
 0x1bc   : > { %2381 = vst.msk [vmem:[#allocation3 + $0x60] sm:$0xff] %vm2368_vm8, %v2345_v39  ;;  %v1846_v31 = vpop.permute.xlu1 %1845 }
 0x1bd   : > { %1881 = vst.msk [vmem:[#allocation3 + $0x68] sm:$0xff] %vm1867_vm3, %v1846_v31  ;;  %v4306_v3 = vld [vmem:[#allocation3 + $0x58] sm:$0xff] }
 0x1be   : > { %5633 = vmatmul.mubr.bf16.gmra.mrb[20].mxu0 %v4306_v3 }
 0x1c0   : > { %v2170_v12 = vpop.permute.xlu1 %2169  ;;  %v2890_v8 = vpop.permute.xlu0 %2889 }
 0x1c1   : > { %2205 = vst.msk [vmem:[#allocation3 + $0x68] sm:$0xff] %vm2191_vm5, %v2170_v12 }
 0x1c2   : > { %2926 = vst.msk [vmem:[#allocation3 + $0x60] sm:$0xff] %vm2913_vm9, %v2890_v8  ;;  %v5614_v34 = vpop.f32.mrb[0].mxu0 }
 0x1c3   : > { %v4409_v9 = vpop.f32.mrb[1].mxu0  ;;  %v7246_v41 = vmul.f32 %v5614_v34, %v5614_v34 }
 0x1c4   : > { %v2347_v13 = vpop.permute.xlu1 %2346  ;;  %v3211_v20 = vpop.permute.xlu0 %3210  ;;  %v7253_v54 = vmul.f32 %v4409_v9, %v4409_v9 }
 0x1c5   : > { %2382 = vst.msk [vmem:[#allocation3 + $0x68] sm:$0xff] %vm2368_vm8, %v2347_v13  ;;  %v5615_v5 = vpop.f32.mrb[2].mxu0 }
 0x1c6   : > { %3247 = vst.msk [vmem:[#allocation3 + $0x60] sm:$0xff] %vm3234_vm12, %v3211_v20  ;;  %v7248_v38 = vpack.c.bf16 %v5615_v5, %v5614_v34  ;;  %v7250_v37 = vmul.f32 %v5615_v5, %v5615_v5  ;;  %v4412_v7 = vpop.f32.mrb[3].mxu0 }
 0x1c7   : > { %v7255_v63 = vmul.f32 %v4412_v7, %v4412_v7  ;;  %v7257_v26 = vpack.c.bf16 %v4412_v7, %v4409_v9 }
 0x1c8   : > { %v3389_v22 = vpop.permute.xlu0 %3388  ;;  %5487 = vst [vmem:[%s7244_s6 + $0x8] sm:$0xff] %v7248_v38   ;;  %v5682_v18 = vpack.c.bf16 %v7250_v37, %v7246_v41 }
 0x1c9   : > { %3425 = vst.msk [vmem:[#allocation3 + $0x60] sm:$0xff] %vm3412_vm13, %v3389_v22  ;;  %v5678_v2 = vpack.c.bf16 %v7255_v63, %v7253_v54  ;;  %5410 = vst [vmem:[%s7244_s6] sm:$0xff] %v7257_v26  }
 0x1d2   : > { %v2892_v27 = vpop.permute.xlu1 %2891 }
 0x1d3   : > { %2927 = vst.msk [vmem:[#allocation3 + $0x68] sm:$0xff] %vm2913_vm9, %v2892_v27  ;;  %v5618_v10 = vpop.f32.mrb[4].mxu0 }
 0x1d4   : > { %v4425_v24 = vpop.f32.mrb[5].mxu0  ;;  %v7270_v45 = vmul.f32 %v5618_v10, %v5618_v10 }
 0x1d5   : > { %v3934_v42 = vpop.permute.xlu0 %3933  ;;  %v5619_v55 = vpop.f32.mrb[6].mxu0  ;;  %v7276_v1 = vmul.f32 %v4425_v24, %v4425_v24 }
 0x1d6   : > { %v3213_v23 = vpop.permute.xlu1 %3212  ;;  %3970 = vst.msk [vmem:[#allocation3 + $0x60] sm:$0xff] %vm3957_vm15, %v3934_v42  ;;  %v7272_v49 = vpack.c.bf16 %v5619_v55, %v5618_v10  ;;  %v7274_v60 = vmul.f32 %v5619_v55, %v5619_v55  ;;  %v4428_v57 = vpop.f32.mrb[7].mxu0 }
 0x1d7   : > { %3248 = vst.msk [vmem:[#allocation3 + $0x68] sm:$0xff] %vm3234_vm12, %v3213_v23  ;;  %v7278_v47 = vpack.c.bf16 %v4428_v57, %v4425_v24  ;;  %v7280_v19 = vmul.f32 %v4428_v57, %v4428_v57 }
 0x1d8   : > { %5489 = vst [vmem:[%s7244_s6 + $0x18] sm:$0xff] %v7272_v49   ;;  %v5690_v4 = vpack.c.bf16 %v7274_v60, %v7270_v45 }
 0x1d9   : > { %v4255_v0 = vpop.permute.xlu0 %4254  ;;  %5488 = vst [vmem:[%s7244_s6 + $0x10] sm:$0xff] %v7278_v47   ;;  %v5686_v46 = vpack.c.bf16 %v7280_v19, %v7276_v1 }
 0x1da   : > { %v3391_v25 = vpop.permute.xlu1 %3390  ;;  %4291 = vst.msk [vmem:[#allocation3 + $0x60] sm:$0xff] %vm4278_vm0, %v4255_v0 }
 0x1db   : > { %3426 = vst.msk [vmem:[#allocation3 + $0x68] sm:$0xff] %vm3412_vm13, %v3391_v25 }
 0x1de   : > { %v3936_v11 = vpop.permute.xlu1 %3935 }
 0x1df   : > { %3971 = vst.msk [vmem:[#allocation3 + $0x68] sm:$0xff] %vm3957_vm15, %v3936_v11 }
 0x1e0   : > { %v4257_v40 = vpop.permute.xlu0 %4256 }
 0x1e1   : > { %4292 = vst.msk [vmem:[#allocation3 + $0x68] sm:$0xff] %vm4278_vm0, %v4257_v40  ;;  %v4307_v51 = vld [vmem:[#allocation3 + $0x60] sm:$0xff] }
 0x1e2   : > { %v1848_v30 = vpop.permute.xlu1 %1847  ;;  %5636 = vmatprep.mubr.bf16.mxu0 %v4307_v51 }
 0x1e3   : > { %1882 = vst.msk [vmem:[#allocation3 + $0x70] sm:$0xff] %vm1867_vm3, %v1848_v30 }
 0x1e6   : > { %v2172_v58 = vpop.permute.xlu0 %2171 }
 0x1e7   : > { %v1850_v29 = vpop.permute.xlu1 %1849  ;;  %2206 = vst.msk [vmem:[#allocation3 + $0x70] sm:$0xff] %vm2191_vm5, %v2172_v58 }
 0x1e8   : > { %1883 = vst.msk [vmem:[#allocation3 + $0x78] sm:$0xff] %vm1867_vm3, %v1850_v29  ;;  %v4308_v28 = vld [vmem:[#allocation3 + $0x68] sm:$0xff] }
 0x1e9   : > { %5637 = vmatmul.mubr.bf16.gmra.mrb[24].mxu0 %v4308_v28 }
 0x1ea   : > { %v2349_v52 = vpop.permute.xlu0 %2348 }
 0x1eb   : > { %v2174_v50 = vpop.permute.xlu1 %2173  ;;  %2383 = vst.msk [vmem:[#allocation3 + $0x70] sm:$0xff] %vm2368_vm8, %v2349_v52 }
 0x1ec   : > { %2207 = vst.msk [vmem:[#allocation3 + $0x78] sm:$0xff] %vm2191_vm5, %v2174_v50 }
 0x1ef   : > { %v2351_v48 = vpop.permute.xlu1 %2350 }
 0x1f0   : > { %2384 = vst.msk [vmem:[#allocation3 + $0x78] sm:$0xff] %vm2368_vm8, %v2351_v48 }
 0x1f1   : > { %v2894_v53 = vpop.permute.xlu0 %2893 }
 0x1f2   : > { %2928 = vst.msk [vmem:[#allocation3 + $0x70] sm:$0xff] %vm2913_vm9, %v2894_v53  ;;  %v5831_v53 = vmov 1.0  }
 0x1f3   : > { %4760 = vmatprep.mubr.f32.mxu1 %v5831_v53 }
 0x1f5   : > { %v3215_v33 = vpop.permute.xlu0 %3214 }
 0x1f6   : > { %3249 = vst.msk [vmem:[#allocation3 + $0x70] sm:$0xff] %vm3234_vm12, %v3215_v33 }
 0x1f9   : > { %v3393_v15 = vpop.permute.xlu0 %3392 }
 0x1fa   : > { %3427 = vst.msk [vmem:[#allocation3 + $0x70] sm:$0xff] %vm3412_vm13, %v3393_v15 }
 0x1fb   : > { %v2896_v61 = vpop.permute.xlu1 %2895 }
 0x1fc   : > { %2929 = vst.msk [vmem:[#allocation3 + $0x78] sm:$0xff] %vm2913_vm9, %v2896_v61 }
 0x1fe   : > { %v5622_v36 = vpop.f32.mrb[8].mxu0 }
 0x1ff   : > { %v3217_v14 = vpop.permute.xlu1 %3216  ;;  %v4441_v21 = vpop.f32.mrb[9].mxu0  ;;  %v7305_v16 = vmul.f32 %v5622_v36, %v5622_v36 }
 0x200   : > { %3250 = vst.msk [vmem:[#allocation3 + $0x78] sm:$0xff] %vm3234_vm12, %v3217_v14  ;;  %v5623_v62 = vpop.f32.mrb[10].mxu0  ;;  %v3938_v17 = vpop.permute.xlu0 %3937  ;;  %v7313_v56 = vmul.f32 %v4441_v21, %v4441_v21 }
 0x201   : > { %v7307_v32 = vpack.c.bf16 %v5623_v62, %v5622_v36  ;;  %v7309_v44 = vmul.f32 %v5623_v62, %v5623_v62  ;;  %3972 = vst.msk [vmem:[#allocation3 + $0x70] sm:$0xff] %vm3957_vm15, %v3938_v17  ;;  %v4444_v59 = vpop.f32.mrb[11].mxu0 }
 0x202   : > { %v7319_v35 = vpack.c.bf16 %v4444_v59, %v4441_v21  ;;  %v7321_v39 = vmul.f32 %v4444_v59, %v4444_v59 }
 0x203   : > { %v3395_v43 = vpop.permute.xlu1 %3394  ;;  %5491 = vst [vmem:[%s7244_s6 + $0x28] sm:$0xff] %v7307_v32   ;;  %v5698_v6 = vpack.c.bf16 %v7309_v44, %v7305_v16 }
 0x204   : > { %3428 = vst.msk [vmem:[#allocation3 + $0x78] sm:$0xff] %vm3412_vm13, %v3395_v43  ;;  %v4259_v31 = vpop.permute.xlu0 %4258  ;;  %5490 = vst [vmem:[%s7244_s6 + $0x20] sm:$0xff] %v7319_v35   ;;  %v5694_v3 = vpack.c.bf16 %v7321_v39, %v7313_v56 }
 0x205   : > { %4293 = vst.msk [vmem:[#allocation3 + $0x70] sm:$0xff] %vm4278_vm0, %v4259_v31 }
 0x20c   : > { %v4309_v12 = vld [vmem:[#allocation3 + $0x70] sm:$0xff] }
 0x20d   : > { %5640 = vmatprep.mubr.bf16.mxu0 %v4309_v12 }
 0x212   : > { %v3940_v8 = vpop.permute.xlu1 %3939 }
 0x213   : > { %3973 = vst.msk [vmem:[#allocation3 + $0x78] sm:$0xff] %vm3957_vm15, %v3940_v8 }
 0x216   : > { %v4261_v13 = vpop.permute.xlu1 %4260 }
 0x217   : > { %4294 = vst.msk [vmem:[#allocation3 + $0x78] sm:$0xff] %vm4278_vm0, %v4261_v13 }
 0x21e   : > { %v4310_v20 = vld [vmem:[#allocation3 + $0x78] sm:$0xff] }
 0x21f   : > { %5641 = vmatmul.mubr.bf16.gmra.mrb[28].mxu0 %v4310_v20 }
 0x22f   : > { %v5626_v34 = vpop.f32.mrb[12].mxu0 }
 0x230   : > { %v4457_v9 = vpop.f32.mrb[13].mxu0  ;;  %v7330_v22 = vmul.f32 %v5626_v34, %v5626_v34 }
 0x231   : > { %v5627_v5 = vpop.f32.mrb[14].mxu0  ;;  %v7336_v42 = vmul.f32 %v4457_v9, %v4457_v9 }
 0x232   : > { %v7332_v7 = vpack.c.bf16 %v5627_v5, %v5626_v34  ;;  %v7334_v27 = vmul.f32 %v5627_v5, %v5627_v5  ;;  %v4460_v10 = vpop.f32.mrb[15].mxu0 }
 0x233   : > { %v7338_v24 = vpack.c.bf16 %v4460_v10, %v4457_v9  ;;  %v7340_v23 = vmul.f32 %v4460_v10, %v4460_v10 }
 0x234   : > { %5493 = vst [vmem:[%s7244_s6 + $0x38] sm:$0xff] %v7332_v7   ;;  %v5706_v55 = vpack.c.bf16 %v7334_v27, %v7330_v22 }
 0x235   : > { %5492 = vst [vmem:[%s7244_s6 + $0x30] sm:$0xff] %v7338_v24   ;;  %v5702_v57 = vpack.c.bf16 %v7340_v23, %v7336_v42 }
 0x25e   : > { %v5630_v0 = vpop.f32.mrb[16].mxu0 }
 0x25f   : > { %v4473_v25 = vpop.f32.mrb[17].mxu0  ;;  %v7350_v40 = vmul.f32 %v5630_v0, %v5630_v0 }
 0x260   : > { %v5631_v11 = vpop.f32.mrb[18].mxu0  ;;  %v7354_v29 = vmul.f32 %v4473_v25, %v4473_v25 }
 0x261   : > { %v5454_v51 = vpack.c.bf16 %v5631_v11, %v5630_v0  ;;  %v7352_v30 = vmul.f32 %v5631_v11, %v5631_v11  ;;  %v4476_v58 = vpop.f32.mrb[19].mxu0 }
 0x262   : > { %v7356_v28 = vmul.f32 %v4476_v58, %v4476_v58  ;;  %v5449_v52 = vpack.c.bf16 %v4476_v58, %v4473_v25 }
 0x263   : > { %5495 = vst [vmem:[%s7244_s6 + $0x48] sm:$0xff] %v5454_v51   ;;  %v5680_v50 = vpack.c.bf16 %v7352_v30, %v7350_v40 }
 0x264   : > { %v5676_v48 = vpack.c.bf16 %v7356_v28, %v7354_v29  ;;  %5494 = vst [vmem:[%s7244_s6 + $0x40] sm:$0xff] %v5449_v52   ;;  %5645 = vmatprep.subr.bf16.mxu1 %v5449_v52 }
 0x265   : > { %5647 = vmatpush3.bf16.msra.mxu1 %v7257_v26 }
 0x266   : > { %5649 = vmatprep.subr.bf16.mxu1 %v5454_v51 }
 0x269   : > { %5651 = vmatpush3.bf16.msra.mxu1 %v7248_v38 }
 0x291   : > { %v5634_v33 = vpop.f32.mrb[20].mxu0 }
 0x292   : > { %v4489_v15 = vpop.f32.mrb[21].mxu0  ;;  %v4789_v14 = vmul.f32 %v5634_v33, %v5634_v33 }
 0x293   : > { %v5635_v61 = vpop.f32.mrb[22].mxu0  ;;  %v4787_v43 = vmul.f32 %v4489_v15, %v4489_v15 }
 0x294   : > { %v5464_v36 = vpack.c.bf16 %v5635_v61, %v5634_v33  ;;  %v4790_v21 = vmul.f32 %v5635_v61, %v5635_v61  ;;  %v4492_v62 = vpop.f32.mrb[23].mxu0 }
 0x295   : > { %v5459_v17 = vpack.c.bf16 %v4492_v62, %v4489_v15  ;;  %v4788_v59 = vmul.f32 %v4492_v62, %v4492_v62 }
 0x296   : > { %5497 = vst [vmem:[%s7244_s6 + $0x58] sm:$0xff] %v5464_v36   ;;  %v5688_v31 = vpack.c.bf16 %v4790_v21, %v4789_v14 }
 0x297   : > { %5496 = vst [vmem:[%s7244_s6 + $0x50] sm:$0xff] %v5459_v17   ;;  %v5684_v26 = vpack.c.bf16 %v4788_v59, %v4787_v43  ;;  %5653 = vmatprep.subr.bf16.mxu1 %v5459_v17 }
 0x298   : > { %5655 = vmatpush3.bf16.msra.mxu1 %v7278_v47 }
 0x299   : > { %5657 = vmatprep.subr.bf16.mxu1 %v5464_v36 }
 0x29c   : > { %5659 = vmatpush3.bf16.msra.mxu1 %v7272_v49 }
 0x2bc   : > { %v5638_v38 = vpop.f32.mrb[24].mxu0 }
 0x2bd   : > { %v4505_v12 = vpop.f32.mrb[25].mxu0  ;;  %v4793_v13 = vmul.f32 %v5638_v38, %v5638_v38 }
 0x2be   : > { %v5639_v8 = vpop.f32.mrb[26].mxu0  ;;  %v4791_v5 = vmul.f32 %v4505_v12, %v4505_v12 }
 0x2bf   : > { %v5474_v20 = vpack.c.bf16 %v5639_v8, %v5638_v38  ;;  %v4794_v34 = vmul.f32 %v5639_v8, %v5639_v8  ;;  %v4508_v9 = vpop.f32.mrb[27].mxu0 }
 0x2c0   : > { %v5469_v10 = vpack.c.bf16 %v4508_v9, %v4505_v12  ;;  %v4792_v0 = vmul.f32 %v4508_v9, %v4508_v9 }
 0x2c1   : > { %5499 = vst [vmem:[%s7244_s6 + $0x68] sm:$0xff] %v5474_v20   ;;  %v5696_v25 = vpack.c.bf16 %v4794_v34, %v4793_v13 }
 0x2c2   : > { %5498 = vst [vmem:[%s7244_s6 + $0x60] sm:$0xff] %v5469_v10   ;;  %v5692_v11 = vpack.c.bf16 %v4792_v0, %v4791_v5  ;;  %5661 = vmatprep.subr.bf16.mxu1 %v5469_v10 }
 0x2c3   : > { %5663 = vmatpush3.bf16.msra.mxu1 %v7319_v35 }
 0x2c4   : > { %5665 = vmatprep.subr.bf16.mxu1 %v5474_v20 }
 0x2c7   : > { %5667 = vmatpush3.bf16.msra.mxu1 %v7307_v32 }
 0x2f2   : > { %v5642_v49 = vpop.f32.mrb[28].mxu0 }
 0x2f3   : > { %v4521_v47 = vpop.f32.mrb[29].mxu0  ;;  %v4797_v58 = vmul.f32 %v5642_v49, %v5642_v49 }
 0x2f4   : > { %v5643_v51 = vpop.f32.mrb[30].mxu0  ;;  %v4795_v33 = vmul.f32 %v4521_v47, %v4521_v47 }
 0x2f5   : > { %v5484_v29 = vpack.c.bf16 %v5643_v51, %v5642_v49  ;;  %v4798_v28 = vmul.f32 %v5643_v51, %v5643_v51  ;;  %v4524_v52 = vpop.f32.mrb[31].mxu0 }
 0x2f6   : > { %v5479_v15 = vpack.c.bf16 %v4524_v52, %v4521_v47  ;;  %v4796_v61 = vmul.f32 %v4524_v52, %v4524_v52 }
 0x2f7   : > { %5501 = vst [vmem:[%s7244_s6 + $0x78] sm:$0xff] %v5484_v29   ;;  %v5704_v14 = vpack.c.bf16 %v4798_v28, %v4797_v58 }
 0x2f8   : > { %5500 = vst [vmem:[%s7244_s6 + $0x70] sm:$0xff] %v5479_v15   ;;  %v5700_v36 = vpack.c.bf16 %v4796_v61, %v4795_v33  ;;  %5669 = vmatprep.subr.bf16.mxu1 %v5479_v15 }
 0x2f9   : > { %5671 = vmatpush3.bf16.msra.mxu1 %v7338_v24 }
 0x2fa   : > { %5673 = vmatprep.subr.bf16.mxu1 %v5484_v29 }
 0x2fd   : > { %5675 = vmatpush3.bf16.msra.mxu1 %v7332_v7 }
 0x2fe   : > { %5677 = vmatprep.subr.bf16.mxu1 %v5676_v48 }
 0x300   : > { %4761 = vmatmul.mubr.f32.vlgmr.msra.gmra.mrb[0].mxu1 %v5831_v53 }
 0x301   : > { %5679 = vmatpush3.bf16.msra.mxu1 %v5678_v2  ;;  %4863 = vmatprep.mubr.f32.mxu1 %v5831_v53 }
 0x302   : > { %5681 = vmatprep.subr.bf16.mxu1 %v5680_v50 }
 0x305   : > { %5683 = vmatpush3.bf16.msra.mxu1 %v5682_v18 }
 0x306   : > { %5685 = vmatprep.subr.bf16.mxu1 %v5684_v26 }
 0x309   : > { %5687 = vmatpush3.bf16.msra.mxu1 %v5686_v46 }
 0x30a   : > { %5689 = vmatprep.subr.bf16.mxu1 %v5688_v31 }
 0x30d   : > { %5691 = vmatpush3.bf16.msra.mxu1 %v5690_v4 }
 0x30e   : > { %5693 = vmatprep.subr.bf16.mxu1 %v5692_v11 }
 0x311   : > { %5695 = vmatpush3.bf16.msra.mxu1 %v5694_v3 }
 0x312   : > { %5697 = vmatprep.subr.bf16.mxu1 %v5696_v25 }
 0x315   : > { %5699 = vmatpush3.bf16.msra.mxu1 %v5698_v6 }
 0x316   : > { %5701 = vmatprep.subr.bf16.mxu1 %v5700_v36 }
 0x319   : > { %5703 = vmatpush3.bf16.msra.mxu1 %v5702_v57 }
 0x31a   : > { %5705 = vmatprep.subr.bf16.mxu1 %v5704_v14 }
 0x31d   : > { %5707 = vmatpush3.bf16.msra.mxu1 %v5706_v55 }
 0x320   : > { %4864 = vmatmul.mubr.f32.vlgmr.msra.gmra.mrb[2].mxu1 %v5831_v53 }
 0x3d3   : > { %v5558_v41 = vpop.f32.mrb[0].mxu1 }
 0x3d4   : > { %v5559_v37 = vpop.f32.mrb[1].mxu1 }
 0x3d5   : > { %v5560_v54 = vadd.f32 %v5559_v37, %v5558_v41 }
 0x3d7   : > { %4766 = vst [vmem:[%s411_s10] sm:$0x1] %v5560_v54 }
 0x3f3   : > { %v5593_v63 = vpop.f32.mrb[2].mxu1 }
 0x3f4   : > { %v5594_v18 = vpop.f32.mrb[3].mxu1 }
 0x3f5   : > { %v5595_v2 = vadd.f32 %v5594_v18, %v5593_v63 }
 0x3f7   : > { %4869 = vst [vmem:[%s411_s10 + $0x1] sm:$0x1] %v5595_v2 }
 0x3f8 PF: > { %s16_s20 = sadd.s32 1, %s5820_s20   ;;  %s7442_s18 = smov %s5816_s19 }
 0x3f9   : > { %p13_p5 = scmp.ge.s32.totalorder %s16_s20, 4   ;;  %s7443_s19 = smov %s7445_s21 }
 0x3fb   :  { %15 = sbr.rel (!%p13_p5) target bundleno = 2 (0x2), region = 91 }

// kernel: inconv_forward.4
= control target key start
LH: loop header
LB: loop body
LE: loop exit
PB: predicated region body
PF: predicated region fallthrough
CT: control target
= control target key end

     0   :  { %s8795_s24 = smov 0   ;;  %s8797_s25 = smov 0   ;;  %s10882_s0 = inlined_call_operand.vmem [shape: bf16[2,16,16,128], index: 0, kind: input, shape index: {}, may-alias: {0,1,2}]   ;;  %s10883_s1 = inlined_call_operand.vmem [shape: bf16[2,16,16,128], index: 1, kind: input, shape index: {}, may-alias: {0,1,2}]   ;;  %s10884_s2 = inlined_call_operand.vmem [shape: bf16[2,16,16,128], index: 2, kind: input, shape index: {}, may-alias: {0,1,2}]   ;;  %s10885_s3 = inlined_call_operand.vmem [shape: f32[1,128], index: 3, kind: input, shape index: {}]   ;;  %s10886_s4 = inlined_call_operand.vmem [shape: f32[1,128], index: 4, kind: input, shape index: {}]   ;;  %s10887_s5 = inlined_call_operand.vmem [shape: bf16[9,128,128], index: 5, kind: input, shape index: {}]   ;;  %s10888_s6 = inlined_call_operand.vmem [shape: bf16[2,16,16,128], index: 6, kind: output, shape index: {0}]   ;;  %s10889_s7 = inlined_call_operand.vmem [shape: f32[2,1,2,128], index: 7, kind: output, shape index: {1}]  }
   0x1   :  { %s8799_s26 = smov 0  }
   0x2 LB: > { %s30_s27 = sadd.s32 1, %s8747_s25  ;;  %p6737_p0 = scmp.ge.s32.totalorder %s8751_s26, 1  ;;  %s8751_s26 = sphi %s8799_s26, %s18_s26   ;;  %s8747_s25 = sphi %s8797_s25, %s10989_s25   ;;  %s8743_s24 = sphi %s8795_s24, %s10988_s24  }
   0x3   : > { %p32_p1 = scmp.ge.s32.totalorder %s30_s27, 2  ;;  %p328_p2 = scmp.lt.s32.totalorder %s8751_s26, 3 }
   0x5   : > { %s10991_s27 = smov (%p32_p1, %s30_s27), 0  ;;  %p329_p3 = pnand %p6737_p0, %p328_p2 }
   0x7   : > { %332 = sbr.rel (%p329_p3) target bundleno = 1016 (0x3f8), region = 44 }
   0xe   : > { %v8535_v0 = vld [vmem:[%s10887_s5 + $0x100] sm:$0xff]   ;;  %v8537_v2 = vld [vmem:[%s10887_s5 + $0x108] sm:$0xff]   ;;  %p404_p4 = scmp.lt.s32.totalorder %s8743_s24, 1  ;;  %v8539_v4 = vld [vmem:[%s10887_s5 + $0x110] sm:$0xff]   ;;  %vm467_vm0 = vcmask 1040384   ;;  %vm1173_vm6 = vcmask 1043456  }
   0xf   : > { %v8536_v1 = vld [vmem:[%s10887_s5 + $0x40] sm:$0xff]   ;;  %7949 = vmatprep.subr.bf16.mxu0 %v8535_v0  ;;  %v8538_v3 = vld [vmem:[%s10887_s5 + $0x48] sm:$0xff]   ;;  %v8540_v5 = vld [vmem:[%s10887_s5 + $0x50] sm:$0xff]   ;;  %vm468_vm1 = vsmask.f32 256  ;;  %vm2506_vm12 = vcmask 1042432  }
  0x10   : > { %7757 = vmatprep.subr.bf16.mxu1 %v8536_v1  ;;  %7950 = vmatpush3.bf16.msra.mxu0 %v8535_v0  ;;  %s10993_s24 = smov (!%p404_p4, %s8743_s24), 1  ;;  %v8541_v6 = vld [vmem:[%s10887_s5 + $0x118] sm:$0xff]   ;;  %v8543_v8 = vld [vmem:[%s10887_s5 + $0x120] sm:$0xff]   ;;  %v8545_v10 = vld [vmem:[%s10887_s5 + $0x128] sm:$0xff]   ;;  %vm524_vm2 = vsmask.f32 7938 }
  0x11   : > { %7758 = vmatpush3.bf16.msra.mxu1 %v8536_v1  ;;  %7951 = vmatprep.subr.bf16.mxu0 %v8537_v2  ;;  %v8542_v7 = vld [vmem:[%s10887_s5 + $0x58] sm:$0xff]   ;;  %s8840_s21 = sshll.u32 %s10993_s24, 7  ;;  %v8544_v9 = vld [vmem:[%s10887_s5 + $0x60] sm:$0xff]   ;;  %v8546_v11 = vld [vmem:[%s10887_s5 + $0x68] sm:$0xff]   ;;  %vm850_vm5 = vsmask.f32 4368 }
  0x12   : > { %7759 = vmatprep.subr.bf16.mxu1 %v8538_v3  ;;  %s8855_s11 = scalar_lea.vmem %s10882_s0, %s8840_s21  ;;  %v473_v12 = vld [vmem:[#allocation2 + $0xc] sm:$0x1]  ;;  %s426_s16 = scalar_lea.vmem %s10883_s1, %s8840_s21  ;;  %vm8866_vm3 = vmand %vm467_vm0, %vm468_vm1  ;;  %v529_v14 = vld [vmem:[#allocation2 + $0x14] sm:$0x1]  ;;  %vm1476_vm9 = vsmask.f32 3328 }
  0x13   : > { %v7289_v15 = vld [vmem:[%s8855_s11] sm:$0xff]   ;;  %v8874_v16 = vld [vmem:[%s10887_s5 + $0x130] sm:$0xff]   ;;  %v474_v17 = vsel %vm8866_vm3, 0, %v473_v12  ;;  %vm8880_vm4 = vmand %vm467_vm0, %vm524_vm2  ;;  %vm1477_vm10 = vsmask.f32 7440  ;;  %vm2507_vm13 = vcmask 1046532   ;;  %s10696_s20 = scalar_lea.vmem %s10888_s6, %s8840_s21 }
  0x14   : > { %7952 = vmatpush3.bf16.msra.mxu0 %v8537_v2  ;;  %v7290_v19 = vunpack.c.l.bf16 %v7289_v15  ;;  %v7291_v20 = vunpack.c.h.bf16 %v7289_v15  ;;  %v8887_v21 = vld [vmem:[%s10885_s3] ss:$0 sm:$0xff]  ;;  %475 = vst [vmem:[#allocation2 + $0xc] sm:$0x1] %v474_v17  ;;  %v530_v22 = vsel %vm8880_vm4, 0, %v529_v14  ;;  %v8548_v25 = vld [vmem:[%s10887_s5 + $0x70] sm:$0xff]   ;;  %vm8935_vm7 = vmor %vm468_vm1, %vm850_vm5 }
  0x15   : > { %7760 = vmatpush3.bf16.msra.mxu1 %v8538_v3  ;;  %7953 = vmatprep.subr.bf16.mxu0 %v8539_v4  ;;  %v8894_v23 = vld [vmem:[%s10886_s4] ss:$0 sm:$0xff]  ;;  %531 = vst [vmem:[#allocation2 + $0x14] sm:$0x1] %v530_v22  ;;  %v526_v29 = vld [vmem:[#allocation2 + $0x8] sm:$0x1]  ;;  %vm8943_vm8 = vmand %vm1173_vm6, %vm524_vm2 }
  0x16   : > { %7761 = vmatprep.subr.bf16.mxu1 %v8540_v5  ;;  %v7353_v24 = vld [vmem:[%s426_s16] sm:$0xff]   ;;  %v651_v26 = vmul.f32 %v7290_v19, %v8887_v21  ;;  %v652_v27 = vmul.f32 %v7291_v20, %v8887_v21  ;;  %v527_v33 = vsel %vm8880_vm4, 0, %v526_v29  ;;  %v476_v34 = vld [vmem:[#allocation2 + $0x18] sm:$0x1]  ;;  %v7441_v40 = vld [vmem:[%s8855_s11 + $0x8] sm:$0xff]   ;;  %s7218_s18 = sadd.s32 120, %s8840_s21 }
  0x17   : > { %v470_v28 = vld [vmem:[#allocation2] sm:$0x1]  ;;  %v7354_v30 = vunpack.c.l.bf16 %v7353_v24  ;;  %v7355_v31 = vunpack.c.h.bf16 %v7353_v24  ;;  %528 = vst [vmem:[#allocation2 + $0x8] sm:$0x1] %v527_v33  ;;  %v479_v41 = vld [vmem:[#allocation2 + $0x24] sm:$0x1]  ;;  %v7294_v45 = vunpack.c.l.bf16 %v7441_v40  ;;  %v7295_v46 = vunpack.c.h.bf16 %v7441_v40  ;;  %vm8996_vm11 = vmor %vm1476_vm9, %vm1477_vm10  ;;  %s443_s23 = scalar_lea.vmem %s10884_s2, %s7218_s18 }
  0x18   : > { %7954 = vmatpush3.bf16.msra.mxu0 %v8539_v4  ;;  %v471_v32 = vsel %vm8866_vm3, 0, %v470_v28  ;;  %v532_v35 = vld [vmem:[#allocation2 + $0x20] sm:$0x1]  ;;  %v690_v36 = vadd.f32 %v8894_v23, %v651_v26  ;;  %v691_v37 = vadd.f32 %v8894_v23, %v652_v27  ;;  %v535_v42 = vld [vmem:[#allocation2 + $0x2c] sm:$0x1]  ;;  %v477_v43 = vsel %vm8866_vm3, 0, %v476_v34  ;;  %vm9539_vm14 = vmor %vm2506_vm12, %vm2507_vm13 }
  0x19   : > { %7762 = vmatpush3.bf16.msra.mxu1 %v8540_v5  ;;  %7955 = vmatprep.subr.bf16.mxu0 %v8541_v6  ;;  %472 = vst [vmem:[#allocation2] sm:$0x1] %v471_v32  ;;  %v1298_v38 = vmul.f32 %v7354_v30, %v8887_v21  ;;  %v1299_v39 = vmul.f32 %v7355_v31, %v8887_v21  ;;  %v533_v44 = vsel %vm8880_vm4, 0, %v532_v35  ;;  %v8549_v47 = vld [vmem:[%s10887_s5 + $0x138] sm:$0xff]   ;;  %478 = vst [vmem:[#allocation2 + $0x18] sm:$0x1] %v477_v43 }
  0x1a   : > { %7763 = vmatprep.subr.bf16.mxu1 %v8542_v7  ;;  %v722_v48 = vmax.f32 %v690_v36, 0.0  ;;  %v723_v49 = vmax.f32 %v691_v37, 0.0  ;;  %534 = vst [vmem:[#allocation2 + $0x20] sm:$0x1] %v533_v44  ;;  %v7442_v52 = vld [vmem:[%s8855_s11 + $0x10] sm:$0xff]   ;;  %v8550_v53 = vld [vmem:[%s10887_s5 + $0x78] sm:$0xff]   ;;  %v653_v54 = vmul.f32 %v7294_v45, %v8887_v21  ;;  %v654_v55 = vmul.f32 %v7295_v46, %v8887_v21 }
  0x1b   : > { %v1307_v50 = vadd.f32 %v8894_v23, %v1298_v38  ;;  %v1308_v51 = vadd.f32 %v8894_v23, %v1299_v39  ;;  %v480_v56 = vsel %vm8866_vm3, 0, %v479_v41  ;;  %v536_v57 = vsel %vm8880_vm4, 0, %v535_v42  ;;  %v1175_v14 = vld [vmem:[#allocation2 + $0xc] sm:$0xf]  ;;  %v482_v34 = vld [vmem:[#allocation2 + $0x30] sm:$0x1] }
  0x1c   : > { %7956 = vmatpush3.bf16.msra.mxu0 %v8541_v6  ;;  %v7220_v58 = vpack.c.bf16 %v722_v48, %v722_v48  ;;  %v7221_v59 = vpack.c.bf16 %v723_v49, %v723_v49  ;;  %481 = vst [vmem:[#allocation2 + $0x24] sm:$0x1] %v480_v56  ;;  %537 = vst [vmem:[#allocation2 + $0x2c] sm:$0x1] %v536_v57  ;;  %v692_v62 = vadd.f32 %v8894_v23, %v653_v54  ;;  %v1179_v19 = vld [vmem:[#allocation2 + $0x14] sm:$0x1] }
  0x1d   : > { %7764 = vmatpush3.bf16.msra.mxu1 %v8542_v7  ;;  %7957 = vmatprep.subr.bf16.mxu0 %v8543_v8  ;;  %v1309_v60 = vmax.f32 %v1307_v50, 0.0  ;;  %v1310_v61 = vmax.f32 %v1308_v51, 0.0  ;;  %v693_v63 = vadd.f32 %v8894_v23, %v654_v55  ;;  %v7298_v0 = vunpack.c.l.bf16 %v7442_v52  ;;  %v7443_v41 = vld [vmem:[%s8855_s11 + $0x18] sm:$0xff]   ;;  %s6746_s21 = sshll.u32 %s10993_s24, 1 }
  0x1e   : > { %7765 = vmatprep.subr.bf16.mxu1 %v8544_v9  ;;  %v7299_v1 = vunpack.c.h.bf16 %v7442_v52  ;;  %v853_v2 = vshrl.u32 %v7220_v58, 16  ;;  %v856_v3 = vshll.u32 %v7220_v58, 16  ;;  %v861_v4 = vshrl.u32 %v7221_v59, 16  ;;  %v1341_v39 = vld [vmem:[#allocation2 + $0x8] sm:$0x1] }
  0x1f   : > { %v864_v5 = vshll.u32 %v7221_v59, 16  ;;  %v7252_v6 = vpack.c.bf16 %v1309_v60, %v1309_v60  ;;  %v7253_v7 = vpack.c.bf16 %v1310_v61, %v1310_v61  ;;  %v655_v15 = vmul.f32 %v7298_v0, %v8887_v21  ;;  %v538_v50 = vld [vmem:[#allocation2 + $0x38] sm:$0x1] }
  0x20   : > { %7958 = vmatpush3.bf16.msra.mxu0 %v8543_v8  ;;  %v724_v8 = vmax.f32 %v692_v62, 0.0  ;;  %v863_v12 = vrot.slane %v861_v4, 7  ;;  %v1337_v38 = vld [vmem:[#allocation2] sm:$0xf]  ;;  %v1182_v54 = vld [vmem:[#allocation2 + $0x18] sm:$0xf]  ;;  %v7303_v0 = vunpack.c.h.bf16 %v7443_v41 }
  0x21   : > { %7766 = vmatpush3.bf16.msra.mxu1 %v8544_v9  ;;  %7959 = vmatprep.subr.bf16.mxu0 %v8545_v10  ;;  %v725_v9 = vmax.f32 %v693_v63, 0.0  ;;  %v1318_v20 = vshrl.u32 %v7252_v6, 16  ;;  %v1321_v22 = vshll.u32 %v7252_v6, 16  ;;  %v1326_v24 = vshrl.u32 %v7253_v7, 16  ;;  %v1186_v55 = vld [vmem:[#allocation2 + $0x20] sm:$0x1] }
  0x22   : > { %7767 = vmatprep.subr.bf16.mxu1 %v8546_v11  ;;  %v866_v28 = vor.u32 %v864_v5, %v863_v12  ;;  %v868_v29 = vrot.slane %v863_v12, 4  ;;  %v7222_v32 = vpack.c.bf16 %v724_v8, %v724_v8  ;;  %v694_v40 = vadd.f32 %v8894_v23, %v655_v15 }
  0x23   : > { %v1320_v30 = vrot.slane %v1318_v20, 7  ;;  %v1328_v31 = vrot.slane %v1326_v24, 7  ;;  %v7223_v33 = vpack.c.bf16 %v725_v9, %v725_v9  ;;  %v483_v59 = vsel %vm8866_vm3, 0, %v482_v34 }
  0x24   : > { %7960 = vmatpush3.bf16.msra.mxu0 %v8545_v10  ;;  %v1180_v37 = vsel %vm8866_vm3, %v868_v29, %v1179_v19  ;;  %v870_v46 = vshrl.u32 %v7222_v32, 16  ;;  %v10890_v60 = vmov 0   ;;  %v726_v61 = vmax.f32 %v694_v40, 0.0  ;;  %484 = vst [vmem:[#allocation2 + $0x30] sm:$0x1] %v483_v59 }
  0x25   : > { %7768 = vmatpush3.bf16.msra.mxu1 %v8546_v11  ;;  %7961 = vmatprep.subr.bf16.mxu0 %v8874_v16  ;;  %v855_v11 = vrot.slane %v853_v2, 7  ;;  %1181 = vst [vmem:[#allocation2 + $0x14] sm:$0x1] %v1180_v37  ;;  %v1323_v42 = vor.u32 %v1321_v22, %v1320_v30  ;;  %v1324_v43 = vrot.slane %v1320_v30, 4  ;;  %v1333_v45 = vrot.slane %v1328_v31, 4  ;;  %v8977_v22 = vld [vmem:[%s8855_s11 + $0x20] sm:$0xff]  }
  0x26   : > { %7769 = vmatprep.subr.bf16.mxu1 %v8548_v25  ;;  %v878_v48 = vshrl.u32 %v7223_v33, 16  ;;  %v881_v49 = vshll.u32 %v7223_v33, 16  ;;  %v872_v57 = vrot.slane %v870_v46, 7  ;;  %v539_v62 = vsel %vm8880_vm4, 0, %v538_v50 }
  0x27   : > { %v858_v26 = vor.u32 %v856_v3, %v855_v11  ;;  %v859_v27 = vrot.slane %v855_v11, 4  ;;  %v1338_v52 = vsel %vm8943_vm8, %v1323_v42, %v1337_v38  ;;  %v7302_v63 = vunpack.c.l.bf16 %v7443_v41  ;;  %540 = vst [vmem:[#allocation2 + $0x38] sm:$0x1] %v539_v62 }
  0x28   : > { %7962 = vmatpush3.bf16.msra.mxu0 %v8874_v16  ;;  %v656_v16 = vmul.f32 %v7299_v1, %v8887_v21  ;;  %1339 = vst [vmem:[#allocation2] sm:$0xf] %v1338_v52  ;;  %v880_v58 = vrot.slane %v878_v48, 7  ;;  %v876_v2 = vrot.slane %v872_v57, 4  ;;  %v7306_v37 = vunpack.c.l.bf16 %v8977_v22 }
  0x29   : > { %7770 = vmatpush3.bf16.msra.mxu1 %v8548_v25  ;;  %7963 = vmatprep.subr.bf16.mxu0 %v8549_v47  ;;  %v1329_v25 = vshll.u32 %v7253_v7, 16  ;;  %v867_v35 = vsel %vm8935_vm7, %v859_v27, %v866_v28  ;;  %v1176_v36 = vsel %vm8943_vm8, %v858_v26, %v1175_v14  ;;  %1406 = vst [vmem:[#allocation2] sm:$0xf] %v10890_v60 }
  0x2a   : > { %7771 = vmatprep.subr.bf16.mxu1 %v8550_v53  ;;  %1177 = vst [vmem:[#allocation2 + $0xc] sm:$0xf] %v1176_v36  ;;  %1178 = vst [vmem:[#allocation2 + $0x10] sm:$0xf] %v867_v35  ;;  %v695_v56 = vadd.f32 %v8894_v23, %v656_v16  ;;  %v883_v3 = vor.u32 %v881_v49, %v880_v58  ;;  %v885_v4 = vrot.slane %v880_v58, 4 }
  0x2b   : > { %v1331_v44 = vor.u32 %v1329_v25, %v1328_v31  ;;  %v657_v14 = vmul.f32 %v7302_v63, %v8887_v21  ;;  %v8979_v25 = vpack.c.bf16 %v726_v61, %v726_v61  ;;  %v658_v26 = vmul.f32 %v7303_v0, %v8887_v21  ;;  %v8985_v31 = vld [vmem:[%s10887_s5 + $0x140] sm:$0xff]  }
  0x2c   : > { %7964 = vmatpush3.bf16.msra.mxu0 %v8549_v47  ;;  %v873_v47 = vshll.u32 %v7222_v32, 16  ;;  %v727_v5 = vmax.f32 %v695_v56, 0.0  ;;  %v3331_v8 = vld [vmem:[#allocation2 + $0x14] sm:$0x1]  ;;  %v884_v9 = vsel %vm8935_vm7, %v876_v2, %v883_v3  ;;  %v1187_v12 = vsel %vm8866_vm3, %v885_v4, %v1186_v55 }
  0x2d   : > { %7772 = vmatpush3.bf16.msra.mxu1 %v8550_v53  ;;  %v1332_v51 = vsel %vm8935_vm7, %v1324_v43, %v1331_v44  ;;  %v1342_v53 = vsel %vm8866_vm3, %v1333_v45, %v1341_v39  ;;  %1185 = vst [vmem:[#allocation2 + $0x1c] sm:$0xf] %v884_v9  ;;  %1188 = vst [vmem:[#allocation2 + $0x20] sm:$0x1] %v1187_v12  ;;  %v3397_v24 = vshll.u32 %v3331_v8, 16  ;;  %7997 = vmatprep.subr.bf16.mxu0 %v8985_v31 }
  0x2e   : > { %1340 = vst [vmem:[#allocation2 + $0x4] sm:$0xf] %v1332_v51  ;;  %1343 = vst [vmem:[#allocation2 + $0x8] sm:$0x1] %v1342_v53  ;;  %v875_v1 = vor.u32 %v873_v47, %v872_v57  ;;  %v8987_v35 = vpack.c.bf16 %v727_v5, %v727_v5  ;;  %v8990_v36 = vadd.f32 %v8894_v23, %v657_v14 }
  0x2f   : > { %1407 = vst [vmem:[#allocation2 + $0x4] sm:$0xf] %v10890_v60  ;;  %1408 = vst [vmem:[#allocation2 + $0x8] sm:$0x1] %v10890_v60  ;;  %v3399_v32 = vrot.slane %v3397_v24, 5  ;;  %v9001_v48 = vadd.f32 %v8894_v23, %v658_v26  ;;  %v9015_v26 = vmul.f32 %v7306_v37, %v8887_v21 }
  0x30   : > { %v1183_v11 = vsel %vm8943_vm8, %v875_v1, %v1182_v54  ;;  %v1412_v33 = vld [vmem:[#allocation2] sm:$0xf] }
  0x31   : > { %v3329_v6 = vld [vmem:[#allocation2 + $0xc] sm:$0xf]  ;;  %v3330_v7 = vld [vmem:[#allocation2 + $0x10] sm:$0xf]  ;;  %1184 = vst [vmem:[#allocation2 + $0x18] sm:$0xf] %v1183_v11 }
  0x32   : > { %v3378_v15 = vshrl.u32 %v3329_v6, 16  ;;  %v3381_v16 = vshll.u32 %v3329_v6, 16  ;;  %v3387_v19 = vshll.u32 %v3330_v7, 16  ;;  %v3391_v20 = vshrl.u32 %v3330_v7, 16  ;;  %v1414_v43 = vld [vmem:[#allocation2 + $0xc] sm:$0xf] }
  0x33   : > { %v1480_v41 = vshrl.u32 %v1412_v33, 16  ;;  %v1483_v42 = vshll.u32 %v1412_v33, 16  ;;  %v1504_v57 = vshrl.u32 %v1414_v43, 16  ;;  %v1415_v14 = vld [vmem:[#allocation2 + $0x10] sm:$0xf] }
  0x34   : > { %v3380_v27 = vrot.slane %v3378_v15, 4  ;;  %v3383_v28 = vrot.slane %v3381_v16, 5  ;;  %v3389_v29 = vrot.slane %v3387_v19, 5  ;;  %v3393_v30 = vrot.slane %v3391_v20, 4  ;;  %v9007_v62 = vld [vmem:[#allocation2 + $0x1c] sm:$0xf] }
  0x35   : > { %v1482_v51 = vrot.slane %v1480_v41, 4  ;;  %v1485_v52 = vrot.slane %v1483_v42, 5  ;;  %v3334_v63 = vld [vmem:[#allocation2 + $0x20] sm:$0x1]  ;;  %v3411_v4 = vshll.u32 %v9007_v62, 16  ;;  %v3415_v7 = vshrl.u32 %v9007_v62, 16 }
  0x36   : > { %v1413_v34 = vld [vmem:[#allocation2 + $0x4] sm:$0xf]  ;;  %v3384_v38 = vor.u32 %v3383_v28, %v3380_v27  ;;  %v3394_v39 = vor.u32 %v3393_v30, %v3389_v29  ;;  %v1460_v40 = vld [vmem:[#allocation2 + $0x8] sm:$0x1]  ;;  %v3421_v8 = vshll.u32 %v3334_v63, 16  ;;  %v7307_v15 = vunpack.c.h.bf16 %v8977_v22 }
  0x37   : > { %v1489_v45 = vshll.u32 %v1413_v34, 16  ;;  %v1493_v46 = vshrl.u32 %v1413_v34, 16  ;;  %v1499_v47 = vshll.u32 %v1460_v40, 16  ;;  %v1486_v61 = vor.u32 %v1485_v52, %v1482_v51  ;;  %v1461_v20 = vld [vmem:[#allocation2 + $0x14] sm:$0x1] }
  0x38   : > { %v3385_v49 = vrot.slane %v3384_v38, 4  ;;  %v3395_v50 = vrot.slane %v3394_v39, 4  ;;  %v3332_v56 = vld [vmem:[#allocation2 + $0x18] sm:$0xf]  ;;  %v3413_v12 = vrot.slane %v3411_v4, 5  ;;  %v3417_v19 = vrot.slane %v3415_v7, 4 }
  0x39   : > { %v1491_v53 = vrot.slane %v1489_v45, 5  ;;  %v1495_v54 = vrot.slane %v1493_v46, 4  ;;  %v1501_v55 = vrot.slane %v1499_v47, 5  ;;  %v3402_v0 = vshrl.u32 %v3332_v56, 16  ;;  %v1416_v39 = vld [vmem:[#allocation2 + $0x18] sm:$0xf] }
  0x3a   : > { %v3390_v58 = vsel %vm8996_vm11, %v3385_v49, %v3389_v29  ;;  %v3400_v59 = vsel %vm8996_vm11, %v3395_v50, %v3399_v32  ;;  %v3405_v3 = vshll.u32 %v3332_v56, 16  ;;  %v1487_v5 = vrot.slane %v1486_v61, 4  ;;  %v1417_v50 = vld [vmem:[#allocation2 + $0x1c] sm:$0xf] }
  0x3b   : > { %v6965_v1 = vcombine.low %v3390_v58, %v3400_v59  ;;  %v1496_v2 = vor.u32 %v1495_v54, %v1491_v53  ;;  %v3404_v6 = vrot.slane %v3402_v0, 4  ;;  %v1506_v24 = vrot.slane %v1504_v57, 4  ;;  %v1189_v54 = vld [vmem:[#allocation2 + $0x24] sm:$0xf]  ;;  %v1193_v0 = vld [vmem:[#allocation2 + $0x2c] sm:$0x1] }
  0x3c   : > { %v3407_v11 = vrot.slane %v3405_v3, 5  ;;  %v1492_v16 = vsel %vm8996_vm11, %v1487_v5, %v1491_v53  ;;  %v3423_v29 = vrot.slane %v3421_v8, 5  ;;  %v1507_v30 = vshll.u32 %v1414_v43, 16  ;;  %v485_v7 = vld [vmem:[#allocation2 + $0x3c] sm:$0x1]  ;;  %v8553_v8 = vld [vmem:[%s10887_s5 + $0x148] sm:$0xff]  }
  0x3d   : > { %7965 = vmatprep.mubr.bf16.mxu0 %v6965_v1  ;;  %v1497_v9 = vrot.slane %v1496_v2, 4  ;;  %v3418_v33 = vor.u32 %v3417_v19, %v3413_v12  ;;  %v1513_v34 = vshll.u32 %v1415_v14, 16  ;;  %v1517_v38 = vshrl.u32 %v1415_v14, 16  ;;  %v8552_v2 = vld [vmem:[%s10887_s5] sm:$0xff]  }
  0x3e   : > { %v3408_v28 = vor.u32 %v3407_v11, %v3404_v6  ;;  %v4156_v41 = vrot.slane %v9007_v62, 5  ;;  %v1509_v42 = vrot.slane %v1507_v30, 5  ;;  %v1523_v45 = vshll.u32 %v1461_v20, 16  ;;  %v1462_v6 = vld [vmem:[#allocation2 + $0x20] sm:$0x1]  ;;  %7805 = vmatprep.subr.bf16.mxu1 %v8552_v2 }
  0x3f   : > { %v1502_v27 = vsel %vm8996_vm11, %v1497_v9, %v1501_v55  ;;  %v3419_v46 = vrot.slane %v3418_v33, 4  ;;  %v1515_v37 = vrot.slane %v1513_v34, 5  ;;  %v1519_v47 = vrot.slane %v1517_v38, 4  ;;  %v541_v14 = vld [vmem:[#allocation2 + $0x44] sm:$0x1] }
  0x40   : > { %v6805_v32 = vcombine.low %v1492_v16, %v1502_v27  ;;  %v3409_v40 = vrot.slane %v3408_v28, 4  ;;  %v887_v49 = vshrl.u32 %v8979_v25, 16  ;;  %v1510_v51 = vor.u32 %v1509_v42, %v1506_v24 }
  0x41   : > { %v1525_v52 = vrot.slane %v1523_v45, 5  ;;  %v890_v53 = vshll.u32 %v8979_v25, 16  ;;  %v3424_v55 = vsel %vm8996_vm11, %v3419_v46, %v3423_v29  ;;  %v1520_v56 = vor.u32 %v1519_v47, %v1515_v37 }
  0x42   : > { %7773 = vmatprep.mubr.bf16.mxu1 %v6805_v32  ;;  %v3414_v43 = vsel %vm8996_vm11, %v3409_v40, %v3413_v12  ;;  %v889_v57 = vrot.slane %v887_v49, 7  ;;  %v895_v58 = vshrl.u32 %v8987_v35, 16  ;;  %v1511_v61 = vrot.slane %v1510_v51, 4  ;;  %v8554_v32 = vld [vmem:[%s10887_s5 + $0x8] sm:$0xff]  }
  0x43   : > { %v6966_v59 = vcombine.low %v3414_v43, %v3424_v55  ;;  %v898_v63 = vshll.u32 %v8987_v35, 16  ;;  %v1528_v1 = vshrl.u32 %v1416_v39, 16  ;;  %v1521_v3 = vrot.slane %v1520_v56, 4 }
  0x44   : > { %v892_v25 = vor.u32 %v890_v53, %v889_v57  ;;  %v893_v4 = vrot.slane %v889_v57, 4  ;;  %v897_v5 = vrot.slane %v895_v58, 7  ;;  %v1516_v35 = vsel %vm8996_vm11, %v1511_v61, %v1515_v37 }
  0x45   : > { %7966 = vmatmul.mubr.bf16.vlgmr.msra.gmra.mrb[0].mxu0 %v6966_v59  ;;  %v1530_v9 = vrot.slane %v1528_v1, 4  ;;  %v1531_v11 = vshll.u32 %v1416_v39, 16  ;;  %v1537_v12 = vshll.u32 %v1417_v50, 16  ;;  %v1526_v16 = vsel %vm8996_vm11, %v1521_v3, %v1525_v52  ;;  %v9060_v52 = vld [vmem:[%s8855_s11 + $0x28] sm:$0xff]  }
  0x46   : > { %v900_v19 = vor.u32 %v898_v63, %v897_v5  ;;  %v902_v20 = vrot.slane %v897_v5, 4  ;;  %v1190_v24 = vsel %vm8943_vm8, %v892_v25, %v1189_v54  ;;  %7998 = vmatpush3.bf16.msra.mxu0 %v8985_v31  ;;  %v6806_v27 = vcombine.low %v1516_v35, %v1526_v16  ;;  %v488_v31 = vld [vmem:[#allocation2 + $0x48] sm:$0x1]  ;;  %v1196_v5 = vld [vmem:[#allocation2 + $0x30] sm:$0xf] }
  0x47   : > { %1191 = vst [vmem:[#allocation2 + $0x24] sm:$0xf] %v1190_v24  ;;  %v1533_v28 = vrot.slane %v1531_v11, 5  ;;  %v1539_v29 = vrot.slane %v1537_v12, 5  ;;  %v1541_v30 = vshrl.u32 %v1417_v50, 16  ;;  %7999 = vmatprep.subr.bf16.mxu0 %v8553_v8  ;;  %v1547_v38 = vshll.u32 %v1462_v6, 16 }
  0x48   : > { %v901_v33 = vsel %vm8935_vm7, %v893_v4, %v900_v19  ;;  %v1194_v34 = vsel %vm8866_vm3, %v902_v20, %v1193_v0  ;;  %v728_v39 = vmax.f32 %v8990_v36, 0.0  ;;  %7774 = vmatmul.mubr.bf16.vlgmr.msra.gmra.mrb[0].mxu1 %v6806_v27  ;;  %v729_v45 = vmax.f32 %v9001_v48, 0.0  ;;  %v1200_v20 = vld [vmem:[#allocation2 + $0x38] sm:$0x1] }
  0x49   : > { %1192 = vst [vmem:[#allocation2 + $0x28] sm:$0xf] %v901_v33  ;;  %1195 = vst [vmem:[#allocation2 + $0x2c] sm:$0x1] %v1194_v34  ;;  %v1534_v40 = vor.u32 %v1533_v28, %v1530_v9  ;;  %v1543_v42 = vrot.slane %v1541_v30, 4  ;;  %v486_v46 = vsel %vm8866_vm3, 0, %v485_v7  ;;  %v660_v36 = vmul.f32 %v7307_v15, %v8887_v21  ;;  %7806 = vmatpush3.bf16.msra.mxu1 %v8552_v2 }
  0x4a   : > { %v1549_v37 = vrot.slane %v1547_v38, 5  ;;  %v7226_v47 = vpack.c.bf16 %v728_v39, %v728_v39  ;;  %487 = vst [vmem:[#allocation2 + $0x3c] sm:$0x1] %v486_v46  ;;  %v542_v49 = vsel %vm8880_vm4, 0, %v541_v14  ;;  %8000 = vmatpush3.bf16.msra.mxu0 %v8553_v8  ;;  %v7227_v51 = vpack.c.bf16 %v729_v45, %v729_v45  ;;  %7807 = vmatprep.subr.bf16.mxu1 %v8554_v32  ;;  %v544_v46 = vld [vmem:[#allocation2 + $0x50] sm:$0x1] }
  0x4b   : > { %v1535_v50 = vrot.slane %v1534_v40, 4  ;;  %v1544_v43 = vor.u32 %v1543_v42, %v1539_v29  ;;  %543 = vst [vmem:[#allocation2 + $0x44] sm:$0x1] %v542_v49  ;;  %v698_v48 = vadd.f32 %v8894_v23, %v9015_v26  ;;  %v9063_v55 = vadd.f32 %v8894_v23, %v660_v36 }
  0x4c   : > { %v904_v53 = vshrl.u32 %v7226_v47, 16  ;;  %v907_v54 = vshll.u32 %v7226_v47, 16  ;;  %v489_v22 = vsel %vm8866_vm3, 0, %v488_v31  ;;  %v912_v57 = vshrl.u32 %v7227_v51, 16 }
  0x4d   : > { %v1540_v15 = vsel %vm8996_vm11, %v1535_v50, %v1539_v29  ;;  %v1545_v56 = vrot.slane %v1544_v43, 4  ;;  %v915_v58 = vshll.u32 %v7227_v51, 16  ;;  %490 = vst [vmem:[#allocation2 + $0x48] sm:$0x1] %v489_v22  ;;  %v730_v63 = vmax.f32 %v698_v48, 0.0  ;;  %7808 = vmatpush3.bf16.msra.mxu1 %v8554_v32 }
  0x4e   : > { %v3335_v59 = vld [vmem:[#allocation2 + $0x24] sm:$0xf]  ;;  %v906_v26 = vrot.slane %v904_v53, 7  ;;  %v7310_v0 = vunpack.c.l.bf16 %v9060_v52  ;;  %v7311_v1 = vunpack.c.h.bf16 %v9060_v52  ;;  %v914_v4 = vrot.slane %v912_v57, 7 }
  0x4f   : > { %v1418_v61 = vld [vmem:[#allocation2 + $0x24] sm:$0xf]  ;;  %v3426_v2 = vshrl.u32 %v3335_v59, 16  ;;  %v3429_v3 = vshll.u32 %v3335_v59, 16  ;;  %v1550_v25 = vsel %vm8996_vm11, %v1545_v56, %v1549_v37  ;;  %v731_v51 = vmax.f32 %v9063_v55, 0.0 }
  0x50   : > { %v3336_v6 = vld [vmem:[#allocation2 + $0x28] sm:$0xf]  ;;  %v3337_v7 = vld [vmem:[#allocation2 + $0x2c] sm:$0x1]  ;;  %v6807_v8 = vcombine.low %v1540_v15, %v1550_v25  ;;  %v909_v35 = vor.u32 %v907_v54, %v906_v26  ;;  %v910_v9 = vrot.slane %v906_v26, 4  ;;  %v1552_v11 = vshrl.u32 %v1418_v61, 16 }
  0x51   : > { %v3428_v12 = vrot.slane %v3426_v2, 4  ;;  %v3431_v14 = vrot.slane %v3429_v3, 5  ;;  %v3435_v16 = vshll.u32 %v3336_v6, 16  ;;  %v3439_v19 = vshrl.u32 %v3336_v6, 16  ;;  %v1419_v30 = vld [vmem:[#allocation2 + $0x28] sm:$0xf] }
  0x52   : > { %v3445_v24 = vshll.u32 %v3337_v7, 16  ;;  %7777 = vmatprep.mubr.bf16.mxu1 %v6807_v8  ;;  %v917_v27 = vor.u32 %v915_v58, %v914_v4  ;;  %v919_v28 = vrot.slane %v914_v4, 4  ;;  %v1197_v29 = vsel %vm8943_vm8, %v909_v35, %v1196_v5  ;;  %v1463_v38 = vld [vmem:[#allocation2 + $0x2c] sm:$0x1] }
  0x53   : > { %v3432_v32 = vor.u32 %v3431_v14, %v3428_v12  ;;  %v3437_v33 = vrot.slane %v3435_v16, 5  ;;  %v3441_v34 = vrot.slane %v3439_v19, 4  ;;  %1198 = vst [vmem:[#allocation2 + $0x30] sm:$0xf] %v1197_v29  ;;  %v1554_v39 = vrot.slane %v1552_v11, 4 }
  0x54   : > { %v3447_v31 = vrot.slane %v3445_v24, 5  ;;  %v918_v40 = vsel %vm8935_vm7, %v910_v9, %v917_v27  ;;  %v1201_v42 = vsel %vm8866_vm3, %v919_v28, %v1200_v20  ;;  %v1555_v45 = vshll.u32 %v1418_v61, 16  ;;  %v1203_v9 = vld [vmem:[#allocation2 + $0x3c] sm:$0xf]  ;;  %v1207_v11 = vld [vmem:[#allocation2 + $0x44] sm:$0x1] }
  0x55   : > { %v3433_v37 = vrot.slane %v3432_v32, 4  ;;  %v3442_v47 = vor.u32 %v3441_v34, %v3437_v33  ;;  %1199 = vst [vmem:[#allocation2 + $0x34] sm:$0xf] %v918_v40  ;;  %1202 = vst [vmem:[#allocation2 + $0x38] sm:$0x1] %v1201_v42  ;;  %v1561_v49 = vshll.u32 %v1419_v30, 16  ;;  %v7228_v48 = vpack.c.bf16 %v730_v63, %v730_v63 }
  0x56   : > { %v1565_v36 = vshrl.u32 %v1419_v30, 16  ;;  %v1557_v50 = vrot.slane %v1555_v45, 5  ;;  %v1571_v43 = vshll.u32 %v1463_v38, 16  ;;  %v7229_v58 = vpack.c.bf16 %v731_v51, %v731_v51  ;;  %v491_v51 = vld [vmem:[#allocation2 + $0x54] sm:$0x1] }
  0x57   : > { %v3438_v53 = vsel %vm8996_vm11, %v3433_v37, %v3437_v33  ;;  %v3443_v54 = vrot.slane %v3442_v47, 4  ;;  %v1563_v22 = vrot.slane %v1561_v49, 5  ;;  %v921_v59 = vshrl.u32 %v7228_v48, 16  ;;  %v8555_v47 = vld [vmem:[%s10887_s5 + $0x150] sm:$0xff]  }
  0x58   : > { %v1567_v15 = vrot.slane %v1565_v36, 4  ;;  %v1558_v56 = vor.u32 %v1557_v50, %v1554_v39  ;;  %v1573_v57 = vrot.slane %v1571_v43, 5  ;;  %v924_v2 = vshll.u32 %v7228_v48, 16  ;;  %v8556_v48 = vld [vmem:[%s10887_s5 + $0x10] sm:$0xff]   ;;  %8001 = vmatprep.subr.bf16.mxu0 %v8555_v47 }
  0x59   : > { %v3448_v26 = vsel %vm8996_vm11, %v3443_v54, %v3447_v31  ;;  %v545_v3 = vsel %vm8880_vm4, 0, %v544_v46  ;;  %v923_v4 = vrot.slane %v921_v59, 7  ;;  %v929_v5 = vshrl.u32 %v7229_v58, 16  ;;  %7809 = vmatprep.subr.bf16.mxu1 %v8556_v48  ;;  %8002 = vmatpush3.bf16.msra.mxu0 %v8555_v47 }
  0x5a   : > { %v1568_v61 = vor.u32 %v1567_v15, %v1563_v22  ;;  %v6967_v55 = vcombine.low %v3438_v53, %v3448_v26  ;;  %v3338_v63 = vld [vmem:[#allocation2 + $0x30] sm:$0xf]  ;;  %v1559_v25 = vrot.slane %v1558_v56, 4  ;;  %546 = vst [vmem:[#allocation2 + $0x50] sm:$0x1] %v545_v3  ;;  %v932_v35 = vshll.u32 %v7229_v58, 16  ;;  %7810 = vmatpush3.bf16.msra.mxu1 %v8556_v48 }
  0x5b   : > { %v3450_v6 = vshrl.u32 %v3338_v63, 16  ;;  %v3453_v7 = vshll.u32 %v3338_v63, 16  ;;  %v926_v19 = vor.u32 %v924_v2, %v923_v4  ;;  %v927_v20 = vrot.slane %v923_v4, 4  ;;  %v1420_v32 = vld [vmem:[#allocation2 + $0x30] sm:$0xf]  ;;  %v8558_v2 = vld [vmem:[%s10887_s5 + $0x18] sm:$0xff]  }
  0x5c   : > { %v1569_v8 = vrot.slane %v1568_v61, 4  ;;  %7969 = vmatprep.mubr.bf16.mxu0 %v6967_v55  ;;  %v3339_v12 = vld [vmem:[#allocation2 + $0x34] sm:$0xf]  ;;  %v3340_v14 = vld [vmem:[#allocation2 + $0x38] sm:$0x1]  ;;  %v1564_v16 = vsel %vm8996_vm11, %v1559_v25, %v1563_v22  ;;  %v931_v24 = vrot.slane %v929_v5, 7  ;;  %v661_v61 = vmul.f32 %v7310_v0, %v8887_v21  ;;  %7811 = vmatprep.subr.bf16.mxu1 %v8558_v2 }
  0x5d   : > { %v3452_v27 = vrot.slane %v3450_v6, 4  ;;  %v3455_v28 = vrot.slane %v3453_v7, 5  ;;  %v3459_v29 = vshll.u32 %v3339_v12, 16  ;;  %v3463_v30 = vshrl.u32 %v3339_v12, 16  ;;  %v1421_v31 = vld [vmem:[#allocation2 + $0x34] sm:$0xf] }
  0x5e   : > { %v3469_v33 = vshll.u32 %v3340_v14, 16  ;;  %v1574_v34 = vsel %vm8996_vm11, %v1569_v8, %v1573_v57  ;;  %v934_v38 = vor.u32 %v932_v35, %v931_v24  ;;  %v936_v39 = vrot.slane %v931_v24, 4  ;;  %v1464_v40 = vld [vmem:[#allocation2 + $0x38] sm:$0x1]  ;;  %v547_v56 = vld [vmem:[#allocation2 + $0x5c] sm:$0x1]  ;;  %7812 = vmatpush3.bf16.msra.mxu1 %v8558_v2 }
  0x5f   : > { %v3456_v42 = vor.u32 %v3455_v28, %v3452_v27  ;;  %v3461_v45 = vrot.slane %v3459_v29, 5  ;;  %v3465_v46 = vrot.slane %v3463_v30, 4  ;;  %v6808_v37 = vcombine.low %v1564_v16, %v1574_v34  ;;  %v8557_v57 = vld [vmem:[%s10887_s5 + $0x158] sm:$0xff]   ;;  %v9117_v7 = vld [vmem:[%s8855_s11 + $0x30] sm:$0xff]   ;;  %v9128_v14 = vld [vmem:[%s8855_s11 + $0x40] sm:$0xff]  }
  0x60   : > { %v3471_v49 = vrot.slane %v3469_v33, 5  ;;  %v935_v36 = vsel %vm8935_vm7, %v927_v20, %v934_v38  ;;  %v1204_v50 = vsel %vm8943_vm8, %v926_v19, %v1203_v9  ;;  %v1208_v43 = vsel %vm8866_vm3, %v936_v39, %v1207_v11  ;;  %8003 = vmatprep.subr.bf16.mxu0 %v8557_v57  ;;  %v9125_v12 = vld [vmem:[%s8855_s11 + $0x38] sm:$0xff]  }
  0x61   : > { %v3457_v53 = vrot.slane %v3456_v42, 4  ;;  %v3466_v54 = vor.u32 %v3465_v46, %v3461_v45  ;;  %7778 = vmatmul.mubr.bf16.gmra.mrb[4].mxu1 %v6808_v37  ;;  %1205 = vst [vmem:[#allocation2 + $0x3c] sm:$0xf] %v1204_v50  ;;  %1206 = vst [vmem:[#allocation2 + $0x40] sm:$0xf] %v935_v36  ;;  %v1576_v22 = vshrl.u32 %v1420_v32, 16  ;;  %v662_v0 = vmul.f32 %v7311_v1, %v8887_v21 }
  0x62   : > { %1209 = vst [vmem:[#allocation2 + $0x44] sm:$0x1] %v1208_v43  ;;  %v1579_v15 = vshll.u32 %v1420_v32, 16  ;;  %v1585_v58 = vshll.u32 %v1421_v31, 16  ;;  %v1589_v59 = vshrl.u32 %v1421_v31, 16  ;;  %v1595_v26 = vshll.u32 %v1464_v40, 16  ;;  %8004 = vmatpush3.bf16.msra.mxu0 %v8557_v57 }
  0x63   : > { %v3462_v3 = vsel %vm8996_vm11, %v3457_v53, %v3461_v45  ;;  %v3467_v55 = vrot.slane %v3466_v54, 4  ;;  %v1578_v63 = vrot.slane %v1576_v22, 4  ;;  %v700_v9 = vadd.f32 %v8894_v23, %v661_v61 }
  0x64   : > { %v1581_v25 = vrot.slane %v1579_v15, 5  ;;  %v1587_v4 = vrot.slane %v1585_v58, 5  ;;  %v1591_v5 = vrot.slane %v1589_v59, 4  ;;  %v1597_v6 = vrot.slane %v1595_v26, 5 }
  0x65   : > { %v3472_v8 = vsel %vm8996_vm11, %v3467_v55, %v3471_v49  ;;  %v492_v11 = vsel %vm8866_vm3, 0, %v491_v51  ;;  %v701_v21 = vadd.f32 %v8894_v23, %v662_v0  ;;  %v548_v52 = vsel %vm8880_vm4, 0, %v547_v56 }
  0x66   : > { %v1582_v35 = vor.u32 %v1581_v25, %v1578_v63  ;;  %v6968_v16 = vcombine.low %v3462_v3, %v3472_v8  ;;  %v1592_v19 = vor.u32 %v1591_v5, %v1587_v4  ;;  %493 = vst [vmem:[#allocation2 + $0x54] sm:$0x1] %v492_v11  ;;  %v732_v20 = vmax.f32 %v700_v9, 0.0  ;;  %549 = vst [vmem:[#allocation2 + $0x5c] sm:$0x1] %v548_v52 }
  0x67   : > { %v7314_v24 = vunpack.c.l.bf16 %v9117_v7  ;;  %v7315_v27 = vunpack.c.h.bf16 %v9117_v7  ;;  %v7318_v32 = vunpack.c.l.bf16 %v9125_v12  ;;  %v7319_v23 = vunpack.c.h.bf16 %v9125_v12  ;;  %v1210_v25 = vld [vmem:[#allocation2 + $0x48] sm:$0xf]  ;;  %v1214_v8 = vld [vmem:[#allocation2 + $0x50] sm:$0x1]  ;;  %v494_v52 = vld [vmem:[#allocation2 + $0x60] sm:$0x1] }
  0x68   : > { %v1583_v1 = vrot.slane %v1582_v35, 4  ;;  %7970 = vmatmul.mubr.bf16.gmra.mrb[4].mxu0 %v6968_v16  ;;  %v3341_v28 = vld [vmem:[#allocation2 + $0x3c] sm:$0xf]  ;;  %v3342_v29 = vld [vmem:[#allocation2 + $0x40] sm:$0xf]  ;;  %v7322_v33 = vunpack.c.l.bf16 %v9128_v14  ;;  %v7323_v34 = vunpack.c.h.bf16 %v9128_v14  ;;  %v1593_v46 = vrot.slane %v1592_v19, 4 }
  0x69   : > { %v3343_v30 = vld [vmem:[#allocation2 + $0x44] sm:$0x1]  ;;  %v3474_v38 = vshrl.u32 %v3341_v28, 16  ;;  %v3477_v39 = vshll.u32 %v3341_v28, 16  ;;  %v3483_v31 = vshll.u32 %v3342_v29, 16  ;;  %v3487_v40 = vshrl.u32 %v3342_v29, 16 }
  0x6a   : > { %v3493_v42 = vshll.u32 %v3343_v30, 16  ;;  %v1588_v45 = vsel %vm8996_vm11, %v1583_v1, %v1587_v4  ;;  %v733_v37 = vmax.f32 %v701_v21, 0.0  ;;  %v1422_v47 = vld [vmem:[#allocation2 + $0x3c] sm:$0xf]  ;;  %v1598_v48 = vsel %vm8996_vm11, %v1593_v46, %v1597_v6  ;;  %v1423_v57 = vld [vmem:[#allocation2 + $0x40] sm:$0xf] }
  0x6b   : > { %v3476_v49 = vrot.slane %v3474_v38, 4  ;;  %v3479_v36 = vrot.slane %v3477_v39, 5  ;;  %v3485_v50 = vrot.slane %v3483_v31, 5  ;;  %v3489_v43 = vrot.slane %v3487_v40, 4  ;;  %v1465_v3 = vld [vmem:[#allocation2 + $0x44] sm:$0x1] }
  0x6c   : > { %v3495_v51 = vrot.slane %v3493_v42, 5  ;;  %v7230_v53 = vpack.c.bf16 %v732_v20, %v732_v20  ;;  %v7231_v54 = vpack.c.bf16 %v733_v37, %v733_v37  ;;  %v6809_v56 = vcombine.low %v1588_v45, %v1598_v48  ;;  %v550_v1 = vld [vmem:[#allocation2 + $0x68] sm:$0x1]  ;;  %v497_v42 = vld [vmem:[#allocation2 + $0x6c] sm:$0x1] }
  0x6d   : > { %v3480_v22 = vor.u32 %v3479_v36, %v3476_v49  ;;  %v3490_v15 = vor.u32 %v3489_v43, %v3485_v50  ;;  %v1600_v58 = vshrl.u32 %v1422_v47, 16  ;;  %v1603_v5 = vshll.u32 %v1422_v47, 16  ;;  %v9154_v47 = vld [vmem:[%s10885_s3] ss:$0 sm:$0xff]  ;;  %v553_v36 = vld [vmem:[#allocation2 + $0x74] sm:$0x1] }
  0x6e   : > { %v938_v59 = vshrl.u32 %v7230_v53, 16  ;;  %v941_v26 = vshll.u32 %v7230_v53, 16  ;;  %v946_v61 = vshrl.u32 %v7231_v54, 16  ;;  %v949_v2 = vshll.u32 %v7231_v54, 16  ;;  %7781 = vmatprep.mubr.bf16.mxu1 %v6809_v56  ;;  %v9167_v53 = vld [vmem:[%s10886_s4] ss:$0 sm:$0xff] }
  0x6f   : > { %v3481_v55 = vrot.slane %v3480_v22, 4  ;;  %v3491_v63 = vrot.slane %v3490_v15, 4  ;;  %v1602_v4 = vrot.slane %v1600_v58, 4  ;;  %v1609_v35 = vshll.u32 %v1423_v57, 16  ;;  %v500_v15 = vld [vmem:[#allocation2 + $0x78] sm:$0x1] }
  0x70   : > { %v940_v0 = vrot.slane %v938_v59, 7  ;;  %v948_v6 = vrot.slane %v946_v61, 7  ;;  %v1613_v9 = vshrl.u32 %v1423_v57, 16  ;;  %v1605_v19 = vrot.slane %v1603_v5, 5  ;;  %v8559_v5 = vld [vmem:[%s10887_s5 + $0x160] sm:$0xff]  }
  0x71   : > { %v3486_v11 = vsel %vm8996_vm11, %v3481_v55, %v3485_v50  ;;  %v3496_v16 = vsel %vm8996_vm11, %v3491_v63, %v3495_v51  ;;  %v1619_v21 = vshll.u32 %v1465_v3, 16  ;;  %v1611_v31 = vrot.slane %v1609_v35, 5  ;;  %v8560_v35 = vld [vmem:[%s10887_s5 + $0x20] sm:$0xff]   ;;  %8005 = vmatprep.subr.bf16.mxu0 %v8559_v5 }
  0x72   : > { %v6969_v20 = vcombine.low %v3486_v11, %v3496_v16  ;;  %v943_v28 = vor.u32 %v941_v26, %v940_v0  ;;  %v944_v29 = vrot.slane %v940_v0, 4  ;;  %v951_v30 = vor.u32 %v949_v2, %v948_v6  ;;  %7813 = vmatprep.subr.bf16.mxu1 %v8560_v35  ;;  %8006 = vmatpush3.bf16.msra.mxu0 %v8559_v5 }
  0x73   : > { %v953_v38 = vrot.slane %v948_v6, 4  ;;  %v1606_v39 = vor.u32 %v1605_v19, %v1602_v4  ;;  %v1615_v40 = vrot.slane %v1613_v9, 4  ;;  %v1621_v37 = vrot.slane %v1619_v21, 5  ;;  %7814 = vmatpush3.bf16.msra.mxu1 %v8560_v35 }
  0x74   : > { %7973 = vmatprep.mubr.bf16.mxu0 %v6969_v20  ;;  %v952_v45 = vsel %vm8935_vm7, %v944_v29, %v951_v30  ;;  %v1211_v46 = vsel %vm8943_vm8, %v943_v28, %v1210_v25  ;;  %v663_v49 = vmul.f32 %v9154_v47, %v7314_v24  ;;  %v664_v48 = vmul.f32 %v9154_v47, %v7315_v27  ;;  %v1217_v29 = vld [vmem:[#allocation2 + $0x54] sm:$0xf] }
  0x75   : > { %1212 = vst [vmem:[#allocation2 + $0x48] sm:$0xf] %v1211_v46  ;;  %1213 = vst [vmem:[#allocation2 + $0x4c] sm:$0xf] %v952_v45  ;;  %v1215_v50 = vsel %vm8866_vm3, %v953_v38, %v1214_v8  ;;  %v1607_v43 = vrot.slane %v1606_v39, 4  ;;  %v1616_v51 = vor.u32 %v1615_v40, %v1611_v31  ;;  %v495_v54 = vsel %vm8866_vm3, 0, %v494_v52 }
  0x76   : > { %1216 = vst [vmem:[#allocation2 + $0x50] sm:$0x1] %v1215_v50  ;;  %v702_v24 = vadd.f32 %v9167_v53, %v663_v49  ;;  %v551_v22 = vsel %vm8880_vm4, 0, %v550_v1  ;;  %v665_v7 = vmul.f32 %v9154_v47, %v7318_v32  ;;  %v703_v57 = vadd.f32 %v9167_v53, %v664_v48  ;;  %496 = vst [vmem:[#allocation2 + $0x60] sm:$0x1] %v495_v54  ;;  %v8561_v48 = vld [vmem:[%s10887_s5 + $0x168] sm:$0xff]  }
  0x77   : > { %v1612_v27 = vsel %vm8996_vm11, %v1607_v43, %v1611_v31  ;;  %v1617_v56 = vrot.slane %v1616_v51, 4  ;;  %552 = vst [vmem:[#allocation2 + $0x68] sm:$0x1] %v551_v22  ;;  %v666_v58 = vmul.f32 %v9154_v47, %v7319_v23  ;;  %v498_v61 = vsel %vm8866_vm3, 0, %v497_v42  ;;  %v1221_v22 = vld [vmem:[#allocation2 + $0x5c] sm:$0x1]  ;;  %8007 = vmatprep.subr.bf16.mxu0 %v8561_v48 }
  0x78   : > { %v734_v59 = vmax.f32 %v702_v24, 0.0  ;;  %v704_v26 = vadd.f32 %v9167_v53, %v665_v7  ;;  %v554_v32 = vsel %vm8880_vm4, 0, %v553_v36  ;;  %v735_v3 = vmax.f32 %v703_v57, 0.0  ;;  %499 = vst [vmem:[#allocation2 + $0x6c] sm:$0x1] %v498_v61  ;;  %8008 = vmatpush3.bf16.msra.mxu0 %v8561_v48 }
  0x79   : > { %v1622_v2 = vsel %vm8996_vm11, %v1617_v56, %v1621_v37  ;;  %v9191_v55 = vadd.f32 %v9167_v53, %v666_v58  ;;  %555 = vst [vmem:[#allocation2 + $0x74] sm:$0x1] %v554_v32  ;;  %v667_v12 = vmul.f32 %v9154_v47, %v7322_v33  ;;  %v668_v4 = vmul.f32 %v9154_v47, %v7323_v34 }
  0x7a   : > { %v6810_v23 = vcombine.low %v1612_v27, %v1622_v2  ;;  %v7232_v63 = vpack.c.bf16 %v734_v59, %v734_v59  ;;  %v736_v25 = vmax.f32 %v704_v26, 0.0  ;;  %v7233_v0 = vpack.c.bf16 %v735_v3, %v735_v3 }
  0x7b   : > { %v737_v6 = vmax.f32 %v9191_v55, 0.0  ;;  %v9204_v8 = vadd.f32 %v9167_v53, %v667_v12  ;;  %v501_v33 = vsel %vm8866_vm3, 0, %v500_v15  ;;  %v9214_v19 = vadd.f32 %v9167_v53, %v668_v4  ;;  %v8562_v4 = vld [vmem:[%s10887_s5 + $0x28] sm:$0xff]  }
  0x7c   : > { %v3344_v14 = vld [vmem:[#allocation2 + $0x48] sm:$0xf]  ;;  %v3345_v9 = vld [vmem:[#allocation2 + $0x4c] sm:$0xf]  ;;  %7782 = vmatmul.mubr.bf16.gmra.mrb[8].mxu1 %v6810_v23  ;;  %v955_v34 = vshrl.u32 %v7232_v63, 16  ;;  %v958_v11 = vshll.u32 %v7232_v63, 16  ;;  %v9211_v16 = vpack.c.bf16 %v736_v25, %v736_v25  ;;  %7815 = vmatprep.subr.bf16.mxu1 %v8562_v4 }
  0x7d   : > { %502 = vst [vmem:[#allocation2 + $0x78] sm:$0x1] %v501_v33  ;;  %v3346_v21 = vld [vmem:[#allocation2 + $0x50] sm:$0x1]  ;;  %v3498_v52 = vshrl.u32 %v3344_v14, 16  ;;  %v3501_v1 = vshll.u32 %v3344_v14, 16  ;;  %7816 = vmatpush3.bf16.msra.mxu1 %v8562_v4 }
  0x7e   : > { %v3507_v20 = vshll.u32 %v3345_v9, 16  ;;  %v3511_v28 = vshrl.u32 %v3345_v9, 16  ;;  %v3517_v30 = vshll.u32 %v3346_v21, 16  ;;  %v957_v38 = vrot.slane %v955_v34, 7  ;;  %v1424_v40 = vld [vmem:[#allocation2 + $0x48] sm:$0xf] }
  0x7f   : > { %v963_v39 = vshrl.u32 %v7233_v0, 16  ;;  %v966_v31 = vshll.u32 %v7233_v0, 16  ;;  %v3500_v42 = vrot.slane %v3498_v52, 4  ;;  %v3503_v45 = vrot.slane %v3501_v1, 5  ;;  %v1425_v49 = vld [vmem:[#allocation2 + $0x4c] sm:$0xf] }
  0x80   : > { %v3509_v46 = vrot.slane %v3507_v20, 5  ;;  %v3513_v37 = vrot.slane %v3511_v28, 4  ;;  %v3519_v36 = vrot.slane %v3517_v30, 5  ;;  %v960_v50 = vor.u32 %v958_v11, %v957_v38  ;;  %v1466_v58 = vld [vmem:[#allocation2 + $0x50] sm:$0x1] }
  0x81   : > { %v961_v43 = vrot.slane %v957_v38, 4  ;;  %v965_v51 = vrot.slane %v963_v39, 7  ;;  %v3504_v24 = vor.u32 %v3503_v45, %v3500_v42  ;;  %v1624_v7 = vshrl.u32 %v1424_v40, 16  ;;  %v556_v25 = vld [vmem:[#allocation2 + $0x80] sm:$0x1] }
  0x82   : > { %v3514_v54 = vor.u32 %v3513_v37, %v3509_v46  ;;  %v1627_v15 = vshll.u32 %v1424_v40, 16  ;;  %v1218_v57 = vsel %vm8943_vm8, %v960_v50, %v1217_v29  ;;  %v1633_v59 = vshll.u32 %v1425_v49, 16  ;;  %v1224_v20 = vld [vmem:[#allocation2 + $0x60] sm:$0xf]  ;;  %v2464_v17 = vld [vmem:[#allocation2 + $0x48] sm:$0xe] }
  0x83   : > { %v968_v27 = vor.u32 %v966_v31, %v965_v51  ;;  %v970_v56 = vrot.slane %v965_v51, 4  ;;  %v3505_v26 = vrot.slane %v3504_v24, 4  ;;  %1219 = vst [vmem:[#allocation2 + $0x54] sm:$0xf] %v1218_v57  ;;  %v1626_v32 = vrot.slane %v1624_v7, 4 }
  0x84   : > { %v3515_v61 = vrot.slane %v3514_v54, 4  ;;  %v1629_v2 = vrot.slane %v1627_v15, 5  ;;  %v1635_v23 = vrot.slane %v1633_v59, 5  ;;  %v1637_v63 = vshrl.u32 %v1425_v49, 16 }
  0x85   : > { %v969_v3 = vsel %vm8935_vm7, %v961_v43, %v968_v27  ;;  %v1222_v12 = vsel %vm8866_vm3, %v970_v56, %v1221_v22  ;;  %v3510_v5 = vsel %vm8996_vm11, %v3505_v26, %v3509_v46  ;;  %v1643_v35 = vshll.u32 %v1466_v58, 16 }
  0x86   : > { %v3520_v0 = vsel %vm8996_vm11, %v3515_v61, %v3519_v36  ;;  %1220 = vst [vmem:[#allocation2 + $0x58] sm:$0xf] %v969_v3  ;;  %1223 = vst [vmem:[#allocation2 + $0x5c] sm:$0x1] %v1222_v12  ;;  %v1630_v33 = vor.u32 %v1629_v2, %v1626_v32  ;;  %v1639_v9 = vrot.slane %v1637_v63, 4  ;;  %v7235_v34 = vpack.c.bf16 %v737_v6, %v737_v6 }
  0x87   : > { %v6970_v14 = vcombine.low %v3510_v5, %v3520_v0  ;;  %v972_v11 = vshrl.u32 %v9211_v16, 16  ;;  %v1645_v52 = vrot.slane %v1643_v35, 5  ;;  %v975_v1 = vshll.u32 %v9211_v16, 16  ;;  %v1228_v6 = vld [vmem:[#allocation2 + $0x68] sm:$0x1] }
  0x88   : > { %v1631_v21 = vrot.slane %v1630_v33, 4  ;;  %v738_v28 = vmax.f32 %v9204_v8, 0.0  ;;  %v1640_v29 = vor.u32 %v1639_v9, %v1635_v23  ;;  %v980_v38 = vshrl.u32 %v7235_v34, 16 }
  0x89   : > { %7974 = vmatmul.mubr.bf16.gmra.mrb[8].mxu0 %v6970_v14  ;;  %v974_v30 = vrot.slane %v972_v11, 7  ;;  %v983_v39 = vshll.u32 %v7235_v34, 16  ;;  %v739_v31 = vmax.f32 %v9214_v19, 0.0  ;;  %v557_v16 = vsel %vm8880_vm4, 0, %v556_v25 }
  0x8a   : > { %v1636_v55 = vsel %vm8996_vm11, %v1631_v21, %v1635_v23  ;;  %v9241_v40 = vpack.c.bf16 %v738_v28, %v738_v28  ;;  %v3347_v42 = vld [vmem:[#allocation2 + $0x54] sm:$0xf]  ;;  %v1641_v45 = vrot.slane %v1640_v29, 4  ;;  %v982_v37 = vrot.slane %v980_v38, 7  ;;  %558 = vst [vmem:[#allocation2 + $0x80] sm:$0x1] %v557_v16 }
  0x8b   : > { %v977_v8 = vor.u32 %v975_v1, %v974_v30  ;;  %v978_v46 = vrot.slane %v974_v30, 4  ;;  %v3522_v49 = vshrl.u32 %v3347_v42, 16  ;;  %v3525_v36 = vshll.u32 %v3347_v42, 16  ;;  %v1426_v50 = vld [vmem:[#allocation2 + $0x54] sm:$0xf]  ;;  %v9262_v30 = vld [vmem:[%s8855_s11 + $0x48] sm:$0xff]  }
  0x8c   : > { %v9245_v43 = vpack.c.bf16 %v739_v31, %v739_v31  ;;  %v989_v51 = vshrl.u32 %v9241_v40, 16  ;;  %v1646_v24 = vsel %vm8996_vm11, %v1641_v45, %v1645_v52  ;;  %v985_v54 = vor.u32 %v983_v39, %v982_v37 }
  0x8d   : > { %v3348_v48 = vld [vmem:[#allocation2 + $0x58] sm:$0xf]  ;;  %v3349_v19 = vld [vmem:[#allocation2 + $0x5c] sm:$0x1]  ;;  %v987_v22 = vrot.slane %v982_v37, 4  ;;  %v1225_v7 = vsel %vm8943_vm8, %v977_v8, %v1224_v20  ;;  %v3524_v15 = vrot.slane %v3522_v49, 4  ;;  %v6811_v26 = vcombine.low %v1636_v55, %v1646_v24 }
  0x8e   : > { %v3527_v27 = vrot.slane %v3525_v36, 5  ;;  %v3531_v56 = vshll.u32 %v3348_v48, 16  ;;  %v3535_v57 = vshrl.u32 %v3348_v48, 16  ;;  %1226 = vst [vmem:[#allocation2 + $0x60] sm:$0xf] %v1225_v7  ;;  %v3541_v59 = vshll.u32 %v3349_v19, 16 }
  0x8f   : > { %v1427_v58 = vld [vmem:[#allocation2 + $0x58] sm:$0xf]  ;;  %v986_v61 = vsel %vm8935_vm7, %v978_v46, %v985_v54  ;;  %v1229_v32 = vsel %vm8866_vm3, %v987_v22, %v1228_v6  ;;  %v1467_v2 = vld [vmem:[#allocation2 + $0x5c] sm:$0x1]  ;;  %v1648_v63 = vshrl.u32 %v1426_v50, 16  ;;  %7785 = vmatprep.mubr.bf16.mxu1 %v6811_v26  ;;  %v1651_v4 = vshll.u32 %v1426_v50, 16 }
  0x90   : > { %v3528_v3 = vor.u32 %v3527_v27, %v3524_v15  ;;  %v3533_v12 = vrot.slane %v3531_v56, 5  ;;  %v3537_v23 = vrot.slane %v3535_v57, 4  ;;  %1227 = vst [vmem:[#allocation2 + $0x64] sm:$0xf] %v986_v61  ;;  %1230 = vst [vmem:[#allocation2 + $0x68] sm:$0x1] %v1229_v32 }
  0x91   : > { %v3543_v25 = vrot.slane %v3541_v59, 5  ;;  %v1657_v5 = vshll.u32 %v1427_v58, 16  ;;  %v1661_v0 = vshrl.u32 %v1427_v58, 16  ;;  %v1650_v14 = vrot.slane %v1648_v63, 4  ;;  %v1231_v46 = vld [vmem:[#allocation2 + $0x6c] sm:$0xf] }
  0x92   : > { %v3529_v33 = vrot.slane %v3528_v3, 4  ;;  %v3538_v35 = vor.u32 %v3537_v23, %v3533_v12  ;;  %v1667_v9 = vshll.u32 %v1467_v2, 16  ;;  %v1653_v34 = vrot.slane %v1651_v4, 5  ;;  %v1235_v22 = vld [vmem:[#allocation2 + $0x74] sm:$0x1] }
  0x93   : > { %v1659_v11 = vrot.slane %v1657_v5, 5  ;;  %v1663_v21 = vrot.slane %v1661_v0, 4  ;;  %v9256_v52 = vrot.slane %v989_v51, 7  ;;  %v992_v29 = vshll.u32 %v9241_v40, 16  ;;  %v8563_v3 = vld [vmem:[%s10887_s5 + $0x170] sm:$0xff]  }
  0x94   : > { %v3534_v1 = vsel %vm8996_vm11, %v3529_v33, %v3533_v12  ;;  %v3539_v20 = vrot.slane %v3538_v35, 4  ;;  %v1669_v28 = vrot.slane %v1667_v9, 5  ;;  %v1654_v39 = vor.u32 %v1653_v34, %v1650_v14  ;;  %v8564_v4 = vld [vmem:[%s10887_s5 + $0x30] sm:$0xff]   ;;  %8009 = vmatprep.subr.bf16.mxu0 %v8563_v3  ;;  %v8565_v14 = vld [vmem:[%s10887_s5 + $0x178] sm:$0xff]  }
  0x95   : > { %v3350_v38 = vld [vmem:[#allocation2 + $0x60] sm:$0xf]  ;;  %v1664_v55 = vor.u32 %v1663_v21, %v1659_v11  ;;  %v995_v6 = vrot.slane %v9256_v52, 4  ;;  %v997_v31 = vshrl.u32 %v9245_v43, 16  ;;  %v994_v8 = vor.u32 %v992_v29, %v9256_v52  ;;  %v503_v52 = vld [vmem:[#allocation2 + $0x84] sm:$0x1]  ;;  %7817 = vmatprep.subr.bf16.mxu1 %v8564_v4  ;;  %8010 = vmatpush3.bf16.msra.mxu0 %v8563_v3 }
  0x96   : > { %v3544_v16 = vsel %vm8996_vm11, %v3539_v20, %v3543_v25  ;;  %v3546_v42 = vshrl.u32 %v3350_v38, 16  ;;  %v3549_v45 = vshll.u32 %v3350_v38, 16  ;;  %v1655_v36 = vrot.slane %v1654_v39, 4  ;;  %v1428_v7 = vld [vmem:[#allocation2 + $0x60] sm:$0xf]  ;;  %7818 = vmatpush3.bf16.msra.mxu1 %v8564_v4  ;;  %8011 = vmatprep.subr.bf16.mxu0 %v8565_v14 }
  0x97   : > { %v6971_v37 = vcombine.low %v3534_v1, %v3544_v16  ;;  %v3351_v49 = vld [vmem:[#allocation2 + $0x64] sm:$0xf]  ;;  %v3352_v40 = vld [vmem:[#allocation2 + $0x68] sm:$0x1]  ;;  %v1665_v50 = vrot.slane %v1664_v55, 4  ;;  %v7326_v51 = vunpack.c.l.bf16 %v9262_v30  ;;  %v999_v57 = vrot.slane %v997_v31, 7 }
  0x98   : > { %v3548_v48 = vrot.slane %v3546_v42, 4  ;;  %v3551_v19 = vrot.slane %v3549_v45, 5  ;;  %v3555_v24 = vshll.u32 %v3351_v49, 16  ;;  %v3559_v54 = vshrl.u32 %v3351_v49, 16  ;;  %v1429_v58 = vld [vmem:[#allocation2 + $0x64] sm:$0xf] }
  0x99   : > { %7977 = vmatprep.mubr.bf16.mxu0 %v6971_v37  ;;  %v3565_v15 = vshll.u32 %v3352_v40, 16  ;;  %v1660_v27 = vsel %vm8996_vm11, %v1655_v36, %v1659_v11  ;;  %v1670_v56 = vsel %vm8996_vm11, %v1665_v50, %v1669_v28  ;;  %v1468_v2 = vld [vmem:[#allocation2 + $0x68] sm:$0x1]  ;;  %v1000_v23 = vshll.u32 %v9245_v43, 16  ;;  %v8566_v43 = vld [vmem:[%s10887_s5 + $0x38] sm:$0xff]   ;;  %v7450_v45 = vld [vmem:[%s8855_s11 + $0x50] sm:$0xff]   ;;  %8012 = vmatpush3.bf16.msra.mxu0 %v8565_v14 }
  0x9a   : > { %v3552_v59 = vor.u32 %v3551_v19, %v3548_v48  ;;  %v3557_v26 = vrot.slane %v3555_v24, 5  ;;  %v3561_v61 = vrot.slane %v3559_v54, 4  ;;  %v6812_v32 = vcombine.low %v1660_v27, %v1670_v56  ;;  %v559_v1 = vld [vmem:[#allocation2 + $0x8c] sm:$0x1]  ;;  %v506_v39 = vld [vmem:[#allocation2 + $0x90] sm:$0x1]  ;;  %7819 = vmatprep.subr.bf16.mxu1 %v8566_v43 }
  0x9b   : > { %v3567_v12 = vrot.slane %v3565_v15, 5  ;;  %v1004_v63 = vrot.slane %v999_v57, 4  ;;  %v1232_v25 = vsel %vm8943_vm8, %v994_v8, %v1231_v46  ;;  %v1672_v33 = vshrl.u32 %v1428_v7, 16  ;;  %7820 = vmatpush3.bf16.msra.mxu1 %v8566_v43 }
  0x9c   : > { %v3553_v5 = vrot.slane %v3552_v59, 4  ;;  %v3562_v0 = vor.u32 %v3561_v61, %v3557_v26  ;;  %7786 = vmatmul.mubr.bf16.gmra.mrb[12].mxu1 %v6812_v32  ;;  %1233 = vst [vmem:[#allocation2 + $0x6c] sm:$0xf] %v1232_v25  ;;  %v1675_v35 = vshll.u32 %v1428_v7, 16  ;;  %v1002_v9 = vor.u32 %v1000_v23, %v999_v57 }
  0x9d   : > { %v1236_v34 = vsel %vm8866_vm3, %v1004_v63, %v1235_v22  ;;  %v1681_v11 = vshll.u32 %v1429_v58, 16  ;;  %v1685_v21 = vshrl.u32 %v1429_v58, 16  ;;  %v1674_v29 = vrot.slane %v1672_v33, 4 }
  0x9e   : > { %v3558_v20 = vsel %vm8996_vm11, %v3553_v5, %v3557_v26  ;;  %v3563_v28 = vrot.slane %v3562_v0, 4  ;;  %1237 = vst [vmem:[#allocation2 + $0x74] sm:$0x1] %v1236_v34  ;;  %v1677_v38 = vrot.slane %v1675_v35, 5  ;;  %v1003_v55 = vsel %vm8935_vm7, %v995_v6, %v1002_v9 }
  0x9f   : > { %v1683_v31 = vrot.slane %v1681_v11, 5  ;;  %v1687_v16 = vrot.slane %v1685_v21, 4  ;;  %v1691_v42 = vshll.u32 %v1468_v2, 16  ;;  %1234 = vst [vmem:[#allocation2 + $0x70] sm:$0xf] %v1003_v55  ;;  %v7327_v37 = vunpack.c.h.bf16 %v9262_v30 }
  0xa0   : > { %v3568_v8 = vsel %vm8996_vm11, %v3563_v28, %v3567_v12  ;;  %v1678_v46 = vor.u32 %v1677_v38, %v1674_v29  ;;  %v669_v49 = vmul.f32 %v9154_v47, %v7326_v51  ;;  %v504_v6 = vsel %vm8866_vm3, 0, %v503_v52 }
  0xa1   : > { %v6972_v40 = vcombine.low %v3558_v20, %v3568_v8  ;;  %v1688_v36 = vor.u32 %v1687_v16, %v1683_v31  ;;  %v1693_v50 = vrot.slane %v1691_v42, 5  ;;  %v670_v19 = vmul.f32 %v9154_v47, %v7327_v37  ;;  %505 = vst [vmem:[#allocation2 + $0x84] sm:$0x1] %v504_v6  ;;  %v1238_v37 = vld [vmem:[#allocation2 + $0x78] sm:$0xf] }
  0xa2   : > { %v1679_v48 = vrot.slane %v1678_v46, 4  ;;  %v708_v24 = vadd.f32 %v9167_v53, %v669_v49  ;;  %v560_v54 = vsel %vm8880_vm4, 0, %v559_v1  ;;  %v7330_v7 = vunpack.c.l.bf16 %v7450_v45 }
  0xa3   : > { %7978 = vmatmul.mubr.bf16.gmra.mrb[12].mxu0 %v6972_v40  ;;  %v3353_v30 = vld [vmem:[#allocation2 + $0x6c] sm:$0xf]  ;;  %v1689_v51 = vrot.slane %v1688_v36, 4  ;;  %561 = vst [vmem:[#allocation2 + $0x8c] sm:$0x1] %v560_v54  ;;  %v7331_v15 = vunpack.c.h.bf16 %v7450_v45  ;;  %v507_v27 = vsel %vm8866_vm3, 0, %v506_v39  ;;  %v709_v59 = vadd.f32 %v9167_v53, %v670_v19 }
  0xa4   : > { %v1430_v22 = vld [vmem:[#allocation2 + $0x6c] sm:$0xf]  ;;  %v3570_v56 = vshrl.u32 %v3353_v30, 16  ;;  %v3573_v57 = vshll.u32 %v3353_v30, 16  ;;  %v1684_v58 = vsel %vm8996_vm11, %v1679_v48, %v1683_v31  ;;  %508 = vst [vmem:[#allocation2 + $0x90] sm:$0x1] %v507_v27  ;;  %v671_v3 = vmul.f32 %v9154_v47, %v7330_v7 }
  0xa5   : > { %v3355_v26 = vld [vmem:[#allocation2 + $0x74] sm:$0x1]  ;;  %v1694_v61 = vsel %vm8996_vm11, %v1689_v51, %v1693_v50  ;;  %v740_v32 = vmax.f32 %v708_v24, 0.0  ;;  %v1696_v2 = vshrl.u32 %v1430_v22, 16  ;;  %v741_v5 = vmax.f32 %v709_v59, 0.0  ;;  %v7451_v7 = vld [vmem:[%s8855_s11 + $0x58] sm:$0xff]  }
  0xa6   : > { %v3572_v12 = vrot.slane %v3570_v56, 4  ;;  %v3575_v23 = vrot.slane %v3573_v57, 5  ;;  %v3589_v63 = vshll.u32 %v3355_v26, 16  ;;  %v6813_v25 = vcombine.low %v1684_v58, %v1694_v61  ;;  %v3354_v4 = vld [vmem:[#allocation2 + $0x70] sm:$0xf] }
  0xa7   : > { %v7238_v0 = vpack.c.bf16 %v740_v32, %v740_v32  ;;  %v1431_v33 = vld [vmem:[#allocation2 + $0x70] sm:$0xf]  ;;  %v1698_v35 = vrot.slane %v1696_v2, 4  ;;  %v672_v14 = vmul.f32 %v9154_v47, %v7331_v15  ;;  %v3579_v9 = vshll.u32 %v3354_v4, 16  ;;  %v1469_v42 = vld [vmem:[#allocation2 + $0x74] sm:$0x1] }
  0xa8   : > { %v3576_v43 = vor.u32 %v3575_v23, %v3572_v12  ;;  %v3583_v34 = vshrl.u32 %v3354_v4, 16  ;;  %v3591_v11 = vrot.slane %v3589_v63, 5  ;;  %7789 = vmatprep.mubr.bf16.mxu1 %v6813_v25  ;;  %v7239_v21 = vpack.c.bf16 %v741_v5, %v741_v5  ;;  %v1242_v48 = vld [vmem:[#allocation2 + $0x80] sm:$0x1]  ;;  %v562_v24 = vld [vmem:[#allocation2 + $0x98] sm:$0x1] }
  0xa9   : > { %v1006_v52 = vshrl.u32 %v7238_v0, 16  ;;  %v1009_v1 = vshll.u32 %v7238_v0, 16  ;;  %v1699_v20 = vshll.u32 %v1430_v22, 16  ;;  %v3581_v29 = vrot.slane %v3579_v9, 5  ;;  %v509_v15 = vld [vmem:[#allocation2 + $0x9c] sm:$0x1] }
  0xaa   : > { %v3577_v28 = vrot.slane %v3576_v43, 4  ;;  %v3585_v38 = vrot.slane %v3583_v34, 4  ;;  %v1705_v39 = vshll.u32 %v1431_v33, 16  ;;  %v1014_v31 = vshrl.u32 %v7239_v21, 16  ;;  %v565_v27 = vld [vmem:[#allocation2 + $0xa4] sm:$0x1] }
  0xab   : > { %v1008_v55 = vrot.slane %v1006_v52, 7  ;;  %v1017_v16 = vshll.u32 %v7239_v21, 16  ;;  %v1701_v45 = vrot.slane %v1699_v20, 5  ;;  %v1709_v40 = vshrl.u32 %v1431_v33, 16  ;;  %v7452_v12 = vld [vmem:[%s8855_s11 + $0x60] sm:$0xff]  }
  0xac   : > { %v3582_v8 = vsel %vm8996_vm11, %v3577_v28, %v3581_v29  ;;  %v3586_v46 = vor.u32 %v3585_v38, %v3581_v29  ;;  %v1707_v49 = vrot.slane %v1705_v39, 5  ;;  %v1016_v6 = vrot.slane %v1014_v31, 7  ;;  %v9342_v38 = vld [vmem:[%s8855_s11 + $0x68] sm:$0xff]  }
  0xad   : > { %v1011_v36 = vor.u32 %v1009_v1, %v1008_v55  ;;  %v1012_v50 = vrot.slane %v1008_v55, 4  ;;  %v1702_v19 = vor.u32 %v1701_v45, %v1698_v35  ;;  %v1711_v30 = vrot.slane %v1709_v40, 4 }
  0xae   : > { %v3587_v54 = vrot.slane %v3586_v46, 4  ;;  %v1715_v51 = vshll.u32 %v1469_v42, 16  ;;  %v710_v22 = vadd.f32 %v9167_v53, %v671_v3  ;;  %v1019_v56 = vor.u32 %v1017_v16, %v1016_v6 }
  0xaf   : > { %v1021_v57 = vrot.slane %v1016_v6, 4  ;;  %v1239_v58 = vsel %vm8943_vm8, %v1011_v36, %v1238_v37  ;;  %v1703_v59 = vrot.slane %v1702_v19, 4  ;;  %v1712_v61 = vor.u32 %v1711_v30, %v1707_v49  ;;  %v1245_v19 = vld [vmem:[#allocation2 + $0x84] sm:$0xf] }
  0xb0   : > { %v3592_v26 = vsel %vm8996_vm11, %v3587_v54, %v3591_v11  ;;  %1240 = vst [vmem:[#allocation2 + $0x78] sm:$0xf] %v1239_v58  ;;  %v1717_v32 = vrot.slane %v1715_v51, 5  ;;  %v711_v2 = vadd.f32 %v9167_v53, %v672_v14  ;;  %v1020_v3 = vsel %vm8935_vm7, %v1012_v50, %v1019_v56 }
  0xb1   : > { %v6973_v23 = vcombine.low %v3582_v8, %v3592_v26  ;;  %v1243_v63 = vsel %vm8866_vm3, %v1021_v57, %v1242_v48  ;;  %v1708_v25 = vsel %vm8996_vm11, %v1703_v59, %v1707_v49  ;;  %1241 = vst [vmem:[#allocation2 + $0x7c] sm:$0xf] %v1020_v3  ;;  %v1713_v4 = vrot.slane %v1712_v61, 4  ;;  %v1249_v26 = vld [vmem:[#allocation2 + $0x8c] sm:$0x1] }
  0xb2   : > { %1244 = vst [vmem:[#allocation2 + $0x80] sm:$0x1] %v1243_v63  ;;  %v742_v5 = vmax.f32 %v710_v22, 0.0  ;;  %v743_v0 = vmax.f32 %v711_v2, 0.0  ;;  %v563_v33 = vsel %vm8880_vm4, 0, %v562_v24  ;;  %v7334_v35 = vunpack.c.l.bf16 %v7451_v7 }
  0xb3   : > { %7981 = vmatprep.mubr.bf16.mxu0 %v6973_v23  ;;  %564 = vst [vmem:[#allocation2 + $0x98] sm:$0x1] %v563_v33  ;;  %v7335_v14 = vunpack.c.h.bf16 %v7451_v7  ;;  %v510_v43 = vsel %vm8866_vm3, 0, %v509_v15  ;;  %v566_v9 = vsel %vm8880_vm4, 0, %v565_v27  ;;  %v1718_v34 = vsel %vm8996_vm11, %v1713_v4, %v1717_v32 }
  0xb4   : > { %v7240_v11 = vpack.c.bf16 %v742_v5, %v742_v5  ;;  %v7241_v21 = vpack.c.bf16 %v743_v0, %v743_v0  ;;  %511 = vst [vmem:[#allocation2 + $0x9c] sm:$0x1] %v510_v43  ;;  %567 = vst [vmem:[#allocation2 + $0xa4] sm:$0x1] %v566_v9  ;;  %v7338_v52 = vunpack.c.l.bf16 %v7452_v12  ;;  %v6814_v1 = vcombine.low %v1708_v25, %v1718_v34  ;;  %v8575_v5 = vld [vmem:[%s10887_s5 + $0x180] sm:$0xff]  }
  0xb5   : > { %v673_v20 = vmul.f32 %v9154_v47, %v7334_v35  ;;  %v674_v28 = vmul.f32 %v9154_v47, %v7335_v14  ;;  %v7339_v29 = vunpack.c.h.bf16 %v7452_v12  ;;  %v7342_v30 = vunpack.c.l.bf16 %v9342_v38  ;;  %8045 = vmatprep.subr.bf16.mxu0 %v8575_v5 }
  0xb6   : > { %v1023_v39 = vshrl.u32 %v7240_v11, 16  ;;  %v1026_v55 = vshll.u32 %v7240_v11, 16  ;;  %v1031_v31 = vshrl.u32 %v7241_v21, 16  ;;  %v1034_v16 = vshll.u32 %v7241_v21, 16  ;;  %7790 = vmatmul.mubr.bf16.gmra.mrb[16].mxu1 %v6814_v1 }
  0xb7   : > { %v3356_v42 = vld [vmem:[#allocation2 + $0x78] sm:$0xf]  ;;  %v712_v45 = vadd.f32 %v9167_v53, %v673_v20  ;;  %v713_v8 = vadd.f32 %v9167_v53, %v674_v28  ;;  %v675_v46 = vmul.f32 %v9154_v47, %v7338_v52  ;;  %v676_v37 = vmul.f32 %v9154_v47, %v7339_v29 }
  0xb8   : > { %v3594_v49 = vshrl.u32 %v3356_v42, 16  ;;  %v3597_v40 = vshll.u32 %v3356_v42, 16  ;;  %v1025_v36 = vrot.slane %v1023_v39, 7  ;;  %v1033_v50 = vrot.slane %v1031_v31, 7  ;;  %v3357_v6 = vld [vmem:[#allocation2 + $0x7c] sm:$0xf] }
  0xb9   : > { %v3358_v48 = vld [vmem:[#allocation2 + $0x80] sm:$0x1]  ;;  %v714_v24 = vadd.f32 %v9167_v53, %v675_v46  ;;  %v9350_v54 = vadd.f32 %v9167_v53, %v676_v37  ;;  %v7343_v51 = vunpack.c.h.bf16 %v9342_v38  ;;  %v3603_v15 = vshll.u32 %v3357_v6, 16  ;;  %v1432_v27 = vld [vmem:[#allocation2 + $0x78] sm:$0xf] }
  0xba   : > { %v3596_v22 = vrot.slane %v3594_v49, 4  ;;  %v3599_v7 = vrot.slane %v3597_v40, 5  ;;  %v3607_v47 = vshrl.u32 %v3357_v6, 16  ;;  %v3613_v56 = vshll.u32 %v3358_v48, 16  ;;  %v1433_v61 = vld [vmem:[#allocation2 + $0x7c] sm:$0xf] }
  0xbb   : > { %v1028_v57 = vor.u32 %v1026_v55, %v1025_v36  ;;  %v1029_v58 = vrot.slane %v1025_v36, 4  ;;  %v1036_v59 = vor.u32 %v1034_v16, %v1033_v50  ;;  %v3605_v2 = vrot.slane %v3603_v15, 5  ;;  %v1470_v23 = vld [vmem:[#allocation2 + $0x80] sm:$0x1] }
  0xbc   : > { %v3600_v32 = vor.u32 %v3599_v7, %v3596_v22  ;;  %v3609_v12 = vrot.slane %v3607_v47, 4  ;;  %v1038_v53 = vrot.slane %v1033_v50, 4  ;;  %v3615_v3 = vrot.slane %v3613_v56, 5  ;;  %v9371_v50 = vld [vmem:[%s10887_s5 + $0x80] sm:$0xff]  }
  0xbd   : > { %v1037_v63 = vsel %vm8935_vm7, %v1029_v58, %v1036_v59  ;;  %v1246_v25 = vsel %vm8943_vm8, %v1028_v57, %v1245_v19  ;;  %v1720_v4 = vshrl.u32 %v1432_v27, 16  ;;  %v1723_v14 = vshll.u32 %v1432_v27, 16  ;;  %7853 = vmatprep.subr.bf16.mxu1 %v9371_v50 }
  0xbe   : > { %v3601_v0 = vrot.slane %v3600_v32, 4  ;;  %v3610_v33 = vor.u32 %v3609_v12, %v3605_v2  ;;  %1247 = vst [vmem:[#allocation2 + $0x84] sm:$0xf] %v1246_v25  ;;  %1248 = vst [vmem:[#allocation2 + $0x88] sm:$0xf] %v1037_v63  ;;  %v1250_v35 = vsel %vm8866_vm3, %v1038_v53, %v1249_v26  ;;  %v1729_v9 = vshll.u32 %v1433_v61, 16 }
  0xbf   : > { %1251 = vst [vmem:[#allocation2 + $0x8c] sm:$0x1] %v1250_v35  ;;  %v1722_v43 = vrot.slane %v1720_v4, 4  ;;  %v1733_v34 = vshrl.u32 %v1433_v61, 16  ;;  %v1739_v11 = vshll.u32 %v1470_v23, 16  ;;  %v1725_v1 = vrot.slane %v1723_v14, 5 }
  0xc0   : > { %v3606_v21 = vsel %vm8996_vm11, %v3601_v0, %v3605_v2  ;;  %v3611_v52 = vrot.slane %v3610_v33, 4  ;;  %v744_v20 = vmax.f32 %v712_v45, 0.0  ;;  %v1731_v28 = vrot.slane %v1729_v9, 5  ;;  %v1252_v12 = vld [vmem:[#allocation2 + $0x90] sm:$0xf] }
  0xc1   : > { %v1735_v29 = vrot.slane %v1733_v34, 4  ;;  %v1741_v39 = vrot.slane %v1739_v11, 5  ;;  %v745_v55 = vmax.f32 %v713_v8, 0.0  ;;  %v1726_v16 = vor.u32 %v1725_v1, %v1722_v43  ;;  %v1256_v34 = vld [vmem:[#allocation2 + $0x98] sm:$0x1] }
  0xc2   : > { %v3616_v31 = vsel %vm8996_vm11, %v3611_v52, %v3615_v3  ;;  %v7242_v42 = vpack.c.bf16 %v744_v20, %v744_v20  ;;  %v746_v46 = vmax.f32 %v714_v24, 0.0  ;;  %v747_v36 = vmax.f32 %v9350_v54, 0.0  ;;  %v9380_v54 = vld [vmem:[%s10885_s3] ss:$0 sm:$0xff] }
  0xc3   : > { %v6974_v37 = vcombine.low %v3606_v21, %v3616_v31  ;;  %v1736_v49 = vor.u32 %v1735_v29, %v1731_v28  ;;  %v7243_v40 = vpack.c.bf16 %v745_v55, %v745_v55  ;;  %v1727_v45 = vrot.slane %v1726_v16, 4  ;;  %v512_v31 = vld [vmem:[#allocation2 + $0xa8] sm:$0x1] }
  0xc4   : > { %v1040_v6 = vshrl.u32 %v7242_v42, 16  ;;  %v1043_v48 = vshll.u32 %v7242_v42, 16  ;;  %v9373_v8 = vpack.c.bf16 %v746_v46, %v746_v46  ;;  %v9375_v15 = vpack.c.bf16 %v747_v36, %v747_v36 }
  0xc5   : > { %7982 = vmatmul.mubr.bf16.gmra.mrb[16].mxu0 %v6974_v37  ;;  %v3359_v19 = vld [vmem:[#allocation2 + $0x84] sm:$0xf]  ;;  %v3360_v22 = vld [vmem:[#allocation2 + $0x88] sm:$0xf]  ;;  %v1737_v7 = vrot.slane %v1736_v49, 4  ;;  %v1048_v24 = vshrl.u32 %v7243_v40, 16  ;;  %v9385_v47 = vmul.f32 %v9380_v54, %v7342_v30  ;;  %v1732_v61 = vsel %vm8996_vm11, %v1727_v45, %v1731_v28 }
  0xc6   : > { %v3361_v27 = vld [vmem:[#allocation2 + $0x8c] sm:$0x1]  ;;  %v3618_v56 = vshrl.u32 %v3359_v19, 16  ;;  %v3621_v57 = vshll.u32 %v3359_v19, 16  ;;  %v3627_v58 = vshll.u32 %v3360_v22, 16  ;;  %v3631_v59 = vshrl.u32 %v3360_v22, 16 }
  0xc7   : > { %v3637_v26 = vshll.u32 %v3361_v27, 16  ;;  %v1742_v32 = vsel %vm8996_vm11, %v1737_v7, %v1741_v39  ;;  %v1042_v2 = vrot.slane %v1040_v6, 7  ;;  %v1434_v53 = vld [vmem:[#allocation2 + $0x84] sm:$0xf]  ;;  %v1435_v25 = vld [vmem:[#allocation2 + $0x88] sm:$0xf] }
  0xc8   : > { %v3620_v23 = vrot.slane %v3618_v56, 4  ;;  %v3623_v30 = vrot.slane %v3621_v57, 5  ;;  %v3629_v3 = vrot.slane %v3627_v58, 5  ;;  %v3633_v63 = vrot.slane %v3631_v59, 4  ;;  %v1471_v55 = vld [vmem:[#allocation2 + $0x8c] sm:$0x1] }
  0xc9   : > { %v3639_v4 = vrot.slane %v3637_v26, 5  ;;  %v6815_v5 = vcombine.low %v1732_v61, %v1742_v32  ;;  %v1045_v0 = vor.u32 %v1043_v48, %v1042_v2  ;;  %v1046_v33 = vrot.slane %v1042_v2, 4  ;;  %v568_v49 = vld [vmem:[#allocation2 + $0xb0] sm:$0x1]  ;;  %v515_v48 = vld [vmem:[#allocation2 + $0xb4] sm:$0x1] }
  0xca   : > { %v3624_v35 = vor.u32 %v3623_v30, %v3620_v23  ;;  %v3634_v14 = vor.u32 %v3633_v63, %v3629_v3  ;;  %v1050_v43 = vrot.slane %v1048_v24, 7  ;;  %v1051_v9 = vshll.u32 %v7243_v40, 16  ;;  %v1259_v32 = vld [vmem:[#allocation2 + $0x9c] sm:$0xf] }
  0xcb   : > { %7793 = vmatprep.mubr.bf16.mxu1 %v6815_v5  ;;  %v1253_v11 = vsel %vm8943_vm8, %v1045_v0, %v1252_v12  ;;  %v1744_v21 = vshrl.u32 %v1434_v53, 16  ;;  %v1747_v52 = vshll.u32 %v1434_v53, 16  ;;  %v1753_v1 = vshll.u32 %v1435_v25, 16 }
  0xcc   : > { %v3625_v20 = vrot.slane %v3624_v35, 4  ;;  %v3635_v28 = vrot.slane %v3634_v14, 4  ;;  %v1053_v29 = vor.u32 %v1051_v9, %v1050_v43  ;;  %v1055_v39 = vrot.slane %v1050_v43, 4  ;;  %1254 = vst [vmem:[#allocation2 + $0x90] sm:$0xf] %v1253_v11 }
  0xcd   : > { %v1746_v16 = vrot.slane %v1744_v21, 4  ;;  %v1749_v42 = vrot.slane %v1747_v52, 5  ;;  %v1755_v46 = vrot.slane %v1753_v1, 5  ;;  %v1757_v37 = vshrl.u32 %v1435_v25, 16  ;;  %v9418_v25 = vld [vmem:[%s10886_s4] ss:$0 sm:$0xff] }
  0xce   : > { %v3630_v40 = vsel %vm8996_vm11, %v3625_v20, %v3629_v3  ;;  %v3640_v36 = vsel %vm8996_vm11, %v3635_v28, %v3639_v4  ;;  %v1054_v45 = vsel %vm8935_vm7, %v1046_v33, %v1053_v29  ;;  %v1257_v6 = vsel %vm8866_vm3, %v1055_v39, %v1256_v34  ;;  %v1263_v9 = vld [vmem:[#allocation2 + $0xa4] sm:$0x1] }
  0xcf   : > { %v6975_v19 = vcombine.low %v3630_v40, %v3640_v36  ;;  %1255 = vst [vmem:[#allocation2 + $0x94] sm:$0xf] %v1054_v45  ;;  %1258 = vst [vmem:[#allocation2 + $0x98] sm:$0x1] %v1257_v6  ;;  %v1750_v22 = vor.u32 %v1749_v42, %v1746_v16  ;;  %v1759_v7 = vrot.slane %v1757_v37, 4  ;;  %v1763_v24 = vshll.u32 %v1471_v55, 16 }
  0xd0   : > { %v1057_v27 = vshrl.u32 %v9373_v8, 16  ;;  %v1060_v56 = vshll.u32 %v9373_v8, 16  ;;  %v1065_v57 = vshrl.u32 %v9375_v15, 16  ;;  %v1068_v58 = vshll.u32 %v9375_v15, 16 }
  0xd1   : > { %7985 = vmatprep.mubr.bf16.mxu0 %v6975_v19  ;;  %v1751_v59 = vrot.slane %v1750_v22, 4  ;;  %v1760_v26 = vor.u32 %v1759_v7, %v1755_v46  ;;  %v1765_v61 = vrot.slane %v1763_v24, 5  ;;  %v513_v2 = vsel %vm8866_vm3, 0, %v512_v31  ;;  %v571_v24 = vld [vmem:[#allocation2 + $0xbc] sm:$0x1] }
  0xd2   : > { %v1059_v12 = vrot.slane %v1057_v27, 7  ;;  %v1067_v53 = vrot.slane %v1065_v57, 7  ;;  %514 = vst [vmem:[#allocation2 + $0xa8] sm:$0x1] %v513_v2  ;;  %v569_v23 = vsel %vm8880_vm4, 0, %v568_v49  ;;  %v678_v8 = vmul.f32 %v9380_v54, %v7343_v51 }
  0xd3   : > { %v3362_v30 = vld [vmem:[#allocation2 + $0x90] sm:$0xf]  ;;  %v1756_v15 = vsel %vm8996_vm11, %v1751_v59, %v1755_v46  ;;  %v1761_v3 = vrot.slane %v1760_v26, 4  ;;  %570 = vst [vmem:[#allocation2 + $0xb0] sm:$0x1] %v569_v23  ;;  %v716_v4 = vadd.f32 %v9418_v25, %v9385_v47  ;;  %v516_v38 = vsel %vm8866_vm3, 0, %v515_v48 }
  0xd4   : > { %v1436_v63 = vld [vmem:[#allocation2 + $0x90] sm:$0xf]  ;;  %v3642_v5 = vshrl.u32 %v3362_v30, 16  ;;  %v3645_v51 = vshll.u32 %v3362_v30, 16  ;;  %v1062_v0 = vor.u32 %v1060_v56, %v1059_v12  ;;  %v1063_v33 = vrot.slane %v1059_v12, 4 }
  0xd5   : > { %517 = vst [vmem:[#allocation2 + $0xb4] sm:$0x1] %v516_v38  ;;  %v1766_v35 = vsel %vm8996_vm11, %v1761_v3, %v1765_v61  ;;  %v1070_v14 = vor.u32 %v1068_v58, %v1067_v53  ;;  %v1072_v43 = vrot.slane %v1067_v53, 4  ;;  %v1768_v34 = vshrl.u32 %v1436_v63, 16  ;;  %v9442_v59 = vld [vmem:[%s8855_s11 + $0x70] sm:$0xff]  }
  0xd6   : > { %v9426_v11 = vld [vmem:[#allocation2 + $0x94] sm:$0xf]  ;;  %v3364_v21 = vld [vmem:[#allocation2 + $0x98] sm:$0x1]  ;;  %v3644_v52 = vrot.slane %v3642_v5, 4  ;;  %v3647_v47 = vrot.slane %v3645_v51, 5  ;;  %v6816_v1 = vcombine.low %v1756_v15, %v1766_v35  ;;  %v1260_v20 = vsel %vm8943_vm8, %v1062_v0, %v1259_v32 }
  0xd7   : > { %v3651_v28 = vshll.u32 %v9426_v11, 16  ;;  %v3655_v29 = vshrl.u32 %v9426_v11, 16  ;;  %v3661_v39 = vshll.u32 %v3364_v21, 16  ;;  %v1071_v55 = vsel %vm8935_vm7, %v1063_v33, %v1070_v14  ;;  %1261 = vst [vmem:[#allocation2 + $0x9c] sm:$0xf] %v1260_v20 }
  0xd8   : > { %v9434_v31 = vld [vmem:[#allocation2 + $0x94] sm:$0xf]  ;;  %v3648_v16 = vor.u32 %v3647_v47, %v3644_v52  ;;  %7794 = vmatmul.mubr.bf16.gmra.mrb[20].mxu1 %v6816_v1  ;;  %1262 = vst [vmem:[#allocation2 + $0xa0] sm:$0xf] %v1071_v55  ;;  %v1264_v42 = vsel %vm8866_vm3, %v1072_v43, %v1263_v9  ;;  %v1472_v46 = vld [vmem:[#allocation2 + $0x98] sm:$0x1]  ;;  %v717_v57 = vadd.f32 %v9418_v25, %v678_v8  ;;  %v7346_v8 = vunpack.c.l.bf16 %v9442_v59 }
  0xd9   : > { %v1770_v37 = vrot.slane %v1768_v34, 4  ;;  %v1771_v49 = vshll.u32 %v1436_v63, 16  ;;  %v3653_v40 = vrot.slane %v3651_v28, 5  ;;  %v3657_v36 = vrot.slane %v3655_v29, 4  ;;  %1265 = vst [vmem:[#allocation2 + $0xa4] sm:$0x1] %v1264_v42 }
  0xda   : > { %v3663_v45 = vrot.slane %v3661_v39, 5  ;;  %v1777_v6 = vshll.u32 %v9434_v31, 16  ;;  %v3649_v48 = vrot.slane %v3648_v16, 4  ;;  %v1781_v22 = vshrl.u32 %v9434_v31, 16 }
  0xdb   : > { %v1773_v19 = vrot.slane %v1771_v49, 5  ;;  %v1787_v7 = vshll.u32 %v1472_v46, 16  ;;  %v3658_v27 = vor.u32 %v3657_v36, %v3653_v40  ;;  %v748_v58 = vmax.f32 %v716_v4, 0.0 }
  0xdc   : > { %v1779_v56 = vrot.slane %v1777_v6, 5  ;;  %v3654_v26 = vsel %vm8996_vm11, %v3649_v48, %v3653_v40  ;;  %v1783_v32 = vrot.slane %v1781_v22, 4  ;;  %v749_v53 = vmax.f32 %v717_v57, 0.0  ;;  %v1266_v22 = vld [vmem:[#allocation2 + $0xa8] sm:$0xf] }
  0xdd   : > { %v1774_v61 = vor.u32 %v1773_v19, %v1770_v37  ;;  %v1789_v2 = vrot.slane %v1787_v7, 5  ;;  %v3659_v12 = vrot.slane %v3658_v27, 4  ;;  %v7246_v23 = vpack.c.bf16 %v748_v58, %v748_v58  ;;  %v1270_v58 = vld [vmem:[#allocation2 + $0xb0] sm:$0x1] }
  0xde   : > { %v572_v30 = vsel %vm8880_vm4, 0, %v571_v24  ;;  %v3365_v15 = vld [vmem:[#allocation2 + $0x9c] sm:$0xf]  ;;  %v1784_v63 = vor.u32 %v1783_v32, %v1779_v56  ;;  %v7347_v4 = vunpack.c.h.bf16 %v9442_v59  ;;  %v7247_v33 = vpack.c.bf16 %v749_v53, %v749_v53  ;;  %v574_v32 = vld [vmem:[#allocation2 + $0xc8] sm:$0x1] }
  0xdf   : > { %v1775_v3 = vrot.slane %v1774_v61, 4  ;;  %573 = vst [vmem:[#allocation2 + $0xbc] sm:$0x1] %v572_v30  ;;  %v3664_v38 = vsel %vm8996_vm11, %v3659_v12, %v3663_v45  ;;  %v9452_v5 = vld [vmem:[#allocation2 + $0xa0] sm:$0xf]  ;;  %v3666_v51 = vshrl.u32 %v3365_v15, 16 }
  0xe0   : > { %v3669_v0 = vshll.u32 %v3365_v15, 16  ;;  %v6976_v35 = vcombine.low %v3654_v26, %v3664_v38  ;;  %v9454_v14 = vld [vmem:[#allocation2 + $0xa4] sm:$0x1]  ;;  %v3675_v43 = vshll.u32 %v9452_v5, 16  ;;  %v3679_v9 = vshrl.u32 %v9452_v5, 16 }
  0xe1   : > { %v1780_v34 = vsel %vm8996_vm11, %v1775_v3, %v1779_v56  ;;  %v3668_v21 = vrot.slane %v3666_v51, 4  ;;  %v3685_v47 = vshll.u32 %v9454_v14, 16  ;;  %v1785_v1 = vrot.slane %v1784_v63, 4  ;;  %v9461_v20 = vld [vmem:[#allocation2 + $0x9c] sm:$0xf] }
  0xe2   : > { %v3671_v52 = vrot.slane %v3669_v0, 5  ;;  %7986 = vmatmul.mubr.bf16.gmra.mrb[20].mxu0 %v6976_v35  ;;  %v3677_v28 = vrot.slane %v3675_v43, 5  ;;  %v3681_v29 = vrot.slane %v3679_v9, 4  ;;  %v1074_v39 = vshrl.u32 %v7246_v23, 16  ;;  %v9463_v16 = vld [vmem:[#allocation2 + $0xa0] sm:$0xf] }
  0xe3   : > { %v1077_v55 = vshll.u32 %v7246_v23, 16  ;;  %v3687_v46 = vrot.slane %v3685_v47, 5  ;;  %v1790_v37 = vsel %vm8996_vm11, %v1785_v1, %v1789_v2  ;;  %v1082_v49 = vshrl.u32 %v7247_v33, 16  ;;  %v518_v61 = vld [vmem:[#allocation2 + $0xc0] sm:$0x1]  ;;  %v7455_v2 = vld [vmem:[%s8855_s11 + $0x78] sm:$0xff]  }
  0xe4   : > { %v3672_v42 = vor.u32 %v3671_v52, %v3668_v21  ;;  %v3682_v40 = vor.u32 %v3681_v29, %v3677_v28  ;;  %v6817_v36 = vcombine.low %v1780_v34, %v1790_v37  ;;  %v1076_v45 = vrot.slane %v1074_v39, 7  ;;  %v1473_v30 = vld [vmem:[#allocation2 + $0xa4] sm:$0x1]  ;;  %v9495_v37 = vld [vmem:[#allocation2 + $0x20] sm:$0x1] }
  0xe5   : > { %v1085_v6 = vshll.u32 %v7247_v33, 16  ;;  %v1084_v19 = vrot.slane %v1082_v49, 7  ;;  %v1792_v7 = vshrl.u32 %v9461_v20, 16  ;;  %v1795_v24 = vshll.u32 %v9461_v20, 16 }
  0xe6   : > { %v3673_v48 = vrot.slane %v3672_v42, 4  ;;  %v3683_v27 = vrot.slane %v3682_v40, 4  ;;  %7797 = vmatprep.mubr.bf16.mxu1 %v6817_v36  ;;  %v1079_v56 = vor.u32 %v1077_v55, %v1076_v45  ;;  %v1080_v57 = vrot.slane %v1076_v45, 4 }
  0xe7   : > { %v1801_v26 = vshll.u32 %v9463_v16, 16  ;;  %v1087_v53 = vor.u32 %v1085_v6, %v1084_v19  ;;  %v1089_v23 = vrot.slane %v1084_v19, 4  ;;  %v1794_v15 = vrot.slane %v1792_v7, 4 }
  0xe8   : > { %v3678_v12 = vsel %vm8996_vm11, %v3673_v48, %v3677_v28  ;;  %v3688_v3 = vsel %vm8996_vm11, %v3683_v27, %v3687_v46  ;;  %v1267_v63 = vsel %vm8943_vm8, %v1079_v56, %v1266_v22  ;;  %v1797_v38 = vrot.slane %v1795_v24, 5 }
  0xe9   : > { %v1803_v51 = vrot.slane %v1801_v26, 5  ;;  %v6977_v0 = vcombine.low %v3678_v12, %v3688_v3  ;;  %v1088_v33 = vsel %vm8935_vm7, %v1080_v57, %v1087_v53  ;;  %1268 = vst [vmem:[#allocation2 + $0xa8] sm:$0xf] %v1267_v63  ;;  %v1271_v35 = vsel %vm8866_vm3, %v1089_v23, %v1270_v58 }
  0xea   : > { %v1805_v43 = vshrl.u32 %v9463_v16, 16  ;;  %1269 = vst [vmem:[#allocation2 + $0xac] sm:$0xf] %v1088_v33  ;;  %1272 = vst [vmem:[#allocation2 + $0xb0] sm:$0x1] %v1271_v35  ;;  %v1798_v9 = vor.u32 %v1797_v38, %v1794_v15  ;;  %v1811_v34 = vshll.u32 %v1473_v30, 16  ;;  %v679_v21 = vmul.f32 %v9380_v54, %v7346_v8 }
  0xeb   : > { %v680_v52 = vmul.f32 %v9380_v54, %v7347_v4  ;;  %7989 = vmatprep.mubr.bf16.mxu0 %v6977_v0  ;;  %v519_v1 = vsel %vm8866_vm3, 0, %v518_v61  ;;  %v575_v28 = vsel %vm8880_vm4, 0, %v574_v32  ;;  %v7350_v29 = vunpack.c.l.bf16 %v7455_v2 }
  0xec   : > { %v1807_v47 = vrot.slane %v1805_v43, 4  ;;  %v1799_v39 = vrot.slane %v1798_v9, 4  ;;  %v718_v55 = vadd.f32 %v9418_v25, %v679_v21  ;;  %520 = vst [vmem:[#allocation2 + $0xc0] sm:$0x1] %v519_v1  ;;  %576 = vst [vmem:[#allocation2 + $0xc8] sm:$0x1] %v575_v28  ;;  %v7351_v46 = vunpack.c.h.bf16 %v7455_v2 }
  0xed   : > { %v719_v42 = vadd.f32 %v9418_v25, %v680_v52  ;;  %v1813_v59 = vrot.slane %v1811_v34, 5  ;;  %v681_v4 = vmul.f32 %v9380_v54, %v7350_v29  ;;  %v4159_v49 = vrot.slane %v9495_v37, 5 }
  0xee   : > { %v1808_v8 = vor.u32 %v1807_v47, %v1803_v51  ;;  %v750_v40 = vmax.f32 %v718_v55, 0.0  ;;  %v9500_v45 = vrot.slane %v4156_v41, 4  ;;  %v1804_v6 = vsel %vm8996_vm11, %v1799_v39, %v1803_v51  ;;  %v1273_v47 = vld [vmem:[#allocation2 + $0xb4] sm:$0xf] }
  0xef   : > { %v751_v36 = vmax.f32 %v719_v42, 0.0  ;;  %v682_v19 = vmul.f32 %v9380_v54, %v7351_v46  ;;  %v9506_v27 = vadd.f32 %v9418_v25, %v681_v4  ;;  %v1277_v42 = vld [vmem:[#allocation2 + $0xbc] sm:$0x1] }
  0xf0   : > { %v1809_v48 = vrot.slane %v1808_v8, 4  ;;  %v3368_v22 = vld [vmem:[#allocation2 + $0xa8] sm:$0xf]  ;;  %v7248_v7 = vpack.c.bf16 %v750_v40, %v750_v40 }
  0xf1   : > { %v7249_v24 = vpack.c.bf16 %v751_v36, %v751_v36  ;;  %v9508_v56 = vld [vmem:[#allocation2 + $0xac] sm:$0xf]  ;;  %v9510_v57 = vld [vmem:[#allocation2 + $0xb0] sm:$0x1]  ;;  %v3690_v58 = vshrl.u32 %v3368_v22, 16  ;;  %v3693_v26 = vshll.u32 %v3368_v22, 16  ;;  %v721_v32 = vadd.f32 %v9418_v25, %v682_v19 }
  0xf2   : > { %v1814_v61 = vsel %vm8996_vm11, %v1809_v48, %v1813_v59  ;;  %v3699_v54 = vshll.u32 %v9508_v56, 16  ;;  %v3703_v2 = vshrl.u32 %v9508_v56, 16  ;;  %v3709_v12 = vshll.u32 %v9510_v57, 16  ;;  %v9518_v23 = vld [vmem:[#allocation2 + $0xa8] sm:$0xf] }
  0xf3   : > { %v6818_v53 = vcombine.low %v1804_v6, %v1814_v61  ;;  %v3692_v30 = vrot.slane %v3690_v58, 4  ;;  %v3695_v15 = vrot.slane %v3693_v26, 5  ;;  %v1091_v3 = vshrl.u32 %v7248_v7, 16  ;;  %v9520_v38 = vld [vmem:[#allocation2 + $0xac] sm:$0xf] }
  0xf4   : > { %v1094_v63 = vshll.u32 %v7248_v7, 16  ;;  %v3701_v51 = vrot.slane %v3699_v54, 5  ;;  %v3705_v0 = vrot.slane %v3703_v2, 4  ;;  %v3711_v33 = vrot.slane %v3709_v12, 5  ;;  %v1474_v40 = vld [vmem:[#allocation2 + $0xb0] sm:$0x1] }
  0xf5   : > { %7798 = vmatmul.mubr.bf16.gmra.mrb[24].mxu1 %v6818_v53  ;;  %v1099_v25 = vshrl.u32 %v7249_v24, 16  ;;  %v3696_v35 = vor.u32 %v3695_v15, %v3692_v30  ;;  %v1093_v43 = vrot.slane %v1091_v3, 7  ;;  %v1102_v9 = vshll.u32 %v7249_v24, 16  ;;  %v4084_v6 = vld [vmem:[#allocation2 + $0x18] sm:$0xe] }
  0xf6   : > { %v1816_v34 = vshrl.u32 %v9518_v23, 16  ;;  %v3706_v21 = vor.u32 %v3705_v0, %v3701_v51  ;;  %v1819_v1 = vshll.u32 %v9518_v23, 16  ;;  %v1825_v28 = vshll.u32 %v9520_v38, 16 }
  0xf7   : > { %v1101_v52 = vrot.slane %v1099_v25, 7  ;;  %v3697_v29 = vrot.slane %v3696_v35, 4  ;;  %v1096_v39 = vor.u32 %v1094_v63, %v1093_v43  ;;  %v1097_v55 = vrot.slane %v1093_v43, 4 }
  0xf8   : > { %v1818_v8 = vrot.slane %v1816_v34, 4  ;;  %v3707_v59 = vrot.slane %v3706_v21, 4  ;;  %v1821_v36 = vrot.slane %v1819_v1, 5  ;;  %v1827_v22 = vrot.slane %v1825_v28, 5 }
  0xf9   : > { %v1104_v46 = vor.u32 %v1102_v9, %v1101_v52  ;;  %v1106_v4 = vrot.slane %v1101_v52, 4  ;;  %v3702_v48 = vsel %vm8996_vm11, %v3697_v29, %v3701_v51  ;;  %v1274_v19 = vsel %vm8943_vm8, %v1096_v39, %v1273_v47 }
  0xfa   : > { %v1829_v7 = vshrl.u32 %v9520_v38, 16  ;;  %v3712_v24 = vsel %vm8996_vm11, %v3707_v59, %v3711_v33  ;;  %1275 = vst [vmem:[#allocation2 + $0xb4] sm:$0xf] %v1274_v19  ;;  %v1822_v61 = vor.u32 %v1821_v36, %v1818_v8  ;;  %v1835_v12 = vshll.u32 %v1474_v40, 16 }
  0xfb   : > { %v1105_v58 = vsel %vm8935_vm7, %v1097_v55, %v1104_v46  ;;  %v1278_v26 = vsel %vm8866_vm3, %v1106_v4, %v1277_v42  ;;  %v6978_v54 = vcombine.low %v3702_v48, %v3712_v24  ;;  %v752_v53 = vmax.f32 %v9506_v27, 0.0 }
  0xfc   : > { %1276 = vst [vmem:[#allocation2 + $0xb8] sm:$0xf] %v1105_v58  ;;  %1279 = vst [vmem:[#allocation2 + $0xbc] sm:$0x1] %v1278_v26  ;;  %v1831_v2 = vrot.slane %v1829_v7, 4  ;;  %v1823_v15 = vrot.slane %v1822_v61, 4  ;;  %v9548_v27 = vsel %vm9539_vm14, %v9500_v45, %v4159_v49 }
  0xfd   : > { %v753_v3 = vmax.f32 %v721_v32, 0.0  ;;  %7990 = vmatmul.mubr.bf16.gmra.mrb[24].mxu0 %v6978_v54  ;;  %v1837_v51 = vrot.slane %v1835_v12, 5  ;;  %v7250_v0 = vpack.c.bf16 %v752_v53, %v752_v53  ;;  %v6990_v33 = vrot.slane %v4084_v6, 9  ;;  %v1280_v45 = vld [vmem:[#allocation2 + $0xc0] sm:$0xf] }
  0xfe   : > { %v1832_v63 = vor.u32 %v1831_v2, %v1827_v22  ;;  %v1828_v35 = vsel %vm8996_vm11, %v1823_v15, %v1827_v22  ;;  %v1284_v58 = vld [vmem:[#allocation2 + $0xc8] sm:$0x1] }
  0xff   : > { %v7251_v25 = vpack.c.bf16 %v753_v3, %v753_v3  ;;  %v1108_v9 = vshrl.u32 %v7250_v0, 16  ;;  %v1111_v34 = vshll.u32 %v7250_v0, 16  ;;  %v9556_v21 = vsel %vm9539_vm14, %v6990_v33, %v4156_v41 }
 0x100   : > { %v1833_v43 = vrot.slane %v1832_v63, 4  ;;  %v7022_v1 = vcombine.low %v9556_v21, %v9548_v27  ;;  %v8681_v27 = vld [vmem:[%s10887_s5 + $0x180] sm:$0xff]  }
 0x101   : > { %v1116_v32 = vshrl.u32 %v7251_v25, 16  ;;  %v3371_v52 = vld [vmem:[#allocation2 + $0xb4] sm:$0xf]  ;;  %v1110_v47 = vrot.slane %v1108_v9, 7  ;;  %v1119_v49 = vshll.u32 %v7251_v25, 16 }
 0x102   : > { %v1838_v37 = vsel %vm8996_vm11, %v1833_v43, %v1837_v51  ;;  %v3714_v39 = vshrl.u32 %v3371_v52, 16  ;;  %v3717_v62 = vshll.u32 %v3371_v52, 16  ;;  %v9569_v46 = vld [vmem:[#allocation2 + $0xb4] sm:$0xf] }
 0x103   : > { %v9562_v28 = vld [vmem:[#allocation2 + $0xb8] sm:$0xf]  ;;  %v9564_v29 = vld [vmem:[#allocation2 + $0xbc] sm:$0x1]  ;;  %v6819_v55 = vcombine.low %v1828_v35, %v1838_v37  ;;  %v1113_v59 = vor.u32 %v1111_v34, %v1110_v47  ;;  %v1114_v36 = vrot.slane %v1110_v47, 4  ;;  %v1118_v6 = vrot.slane %v1116_v32, 7 }
 0x104   : > { %v3723_v41 = vshll.u32 %v9562_v28, 16  ;;  %v3727_v42 = vshrl.u32 %v9562_v28, 16  ;;  %v3733_v8 = vshll.u32 %v9564_v29, 16  ;;  %v3716_v4 = vrot.slane %v3714_v39, 4  ;;  %v9571_v48 = vld [vmem:[#allocation2 + $0xb8] sm:$0xf] }
 0x105   : > { %v3719_v40 = vrot.slane %v3717_v62, 5  ;;  %7801 = vmatprep.mubr.bf16.mxu1 %v6819_v55  ;;  %v1281_v24 = vsel %vm8943_vm8, %v1113_v59, %v1280_v45  ;;  %v1121_v61 = vor.u32 %v1119_v49, %v1118_v6  ;;  %v1123_v54 = vrot.slane %v1118_v6, 4  ;;  %v9576_v53 = vld [vmem:[#allocation2 + $0xbc] sm:$0x1]  ;;  %v8660_v59 = vld [vmem:[#allocation2 + $0x10] sm:$0xf] }
 0x106   : > { %v3725_v19 = vrot.slane %v3723_v41, 5  ;;  %v3729_v22 = vrot.slane %v3727_v42, 4  ;;  %v3735_v7 = vrot.slane %v3733_v8, 5  ;;  %1282 = vst [vmem:[#allocation2 + $0xc0] sm:$0xf] %v1281_v24  ;;  %v1840_v2 = vshrl.u32 %v9569_v46, 16 }
 0x107   : > { %v3720_v26 = vor.u32 %v3719_v40, %v3716_v4  ;;  %v1843_v15 = vshll.u32 %v9569_v46, 16  ;;  %v1849_v3 = vshll.u32 %v9571_v48, 16  ;;  %v1853_v63 = vshrl.u32 %v9571_v48, 16  ;;  %v4083_v6 = vld [vmem:[#allocation2 + $0xc] sm:$0xe] }
 0x108   : > { %v3730_v12 = vor.u32 %v3729_v22, %v3725_v19  ;;  %v1122_v0 = vsel %vm8935_vm7, %v1114_v36, %v1121_v61  ;;  %v1285_v33 = vsel %vm8866_vm3, %v1123_v54, %v1284_v58  ;;  %v1842_v25 = vrot.slane %v1840_v2, 4  ;;  %v9594_v22 = vld [vmem:[#allocation2 + $0x4] sm:$0xf] }
 0x109   : > { %v3721_v51 = vrot.slane %v3720_v26, 4  ;;  %1283 = vst [vmem:[#allocation2 + $0xc4] sm:$0xf] %v1122_v0  ;;  %1286 = vst [vmem:[#allocation2 + $0xc8] sm:$0x1] %v1285_v33  ;;  %v1845_v43 = vrot.slane %v1843_v15, 5 }
 0x10a   : > { %v3731_v35 = vrot.slane %v3730_v12, 4  ;;  %v1851_v9 = vrot.slane %v1849_v3, 5  ;;  %v1855_v34 = vrot.slane %v1853_v63, 4  ;;  %v1859_v52 = vshll.u32 %v9576_v53, 16  ;;  %v8663_v3 = vld [vmem:[#allocation2 + $0x14] sm:$0x1] }
 0x10b   : > { %v3726_v32 = vsel %vm8996_vm11, %v3721_v51, %v3725_v19  ;;  %v1846_v47 = vor.u32 %v1845_v43, %v1842_v25  ;;  %v4149_v4 = vrot.slane %v8660_v59, 5  ;;  %v8661_v19 = vld [vmem:[#allocation2] sm:$0xf]  ;;  %v4152_v63 = vrot.slane %v8663_v3, 5 }
 0x10c   : > { %v3736_v37 = vsel %vm8996_vm11, %v3731_v35, %v3735_v7  ;;  %v1856_v49 = vor.u32 %v1855_v34, %v1851_v9  ;;  %v1861_v39 = vrot.slane %v1859_v52, 5  ;;  %v6829_v7 = vcombine.low %v8661_v19, %v9594_v22  ;;  %v8669_v19 = vld [vmem:[#allocation2 + $0x34] sm:$0xf] }
 0x10d   : > { %v6979_v45 = vcombine.low %v3726_v32, %v3736_v37  ;;  %v3374_v62 = vld [vmem:[#allocation2 + $0xc0] sm:$0xf]  ;;  %v1847_v55 = vrot.slane %v1846_v47, 4  ;;  %v6989_v0 = vrot.slane %v4083_v6, 9  ;;  %v4151_v33 = vrot.slane %v4149_v4, 4 }
 0x10e   : > { %v1857_v41 = vrot.slane %v1856_v49, 4  ;;  %v3738_v42 = vshrl.u32 %v3374_v62, 16  ;;  %v3741_v8 = vshll.u32 %v3374_v62, 16  ;;  %v8664_v37 = vld [vmem:[#allocation2 + $0xc] sm:$0xf] }
 0x10f   : > { %7993 = vmatprep.mubr.bf16.mxu0 %v6979_v45  ;;  %v1852_v40 = vsel %vm8996_vm11, %v1847_v55, %v1851_v9  ;;  %v4150_v32 = vsel %vm9539_vm14, %v6989_v0, %v4149_v4  ;;  %v4153_v52 = vsel %vm9539_vm14, %v4151_v33, %v4152_v63  ;;  %v9608_v47 = vld [vmem:[#allocation2 + $0x10] sm:$0xf]  ;;  %v8666_v45 = vld [vmem:[#allocation2 + $0x28] sm:$0xf]  ;;  %v4087_v63 = vld [vmem:[#allocation2 + $0x3c] sm:$0xe] }
 0x110   : > { %v1862_v36 = vsel %vm8996_vm11, %v1857_v41, %v1861_v39  ;;  %v9597_v24 = vld [vmem:[#allocation2 + $0xc4] sm:$0xf]  ;;  %v9599_v58 = vld [vmem:[#allocation2 + $0xc8] sm:$0x1]  ;;  %v3740_v26 = vrot.slane %v3738_v42, 4  ;;  %v3743_v61 = vrot.slane %v3741_v8, 5  ;;  %v6830_v49 = vcombine.low %v8664_v37, %v9608_v47 }
 0x111   : > { %v6820_v54 = vcombine.low %v1852_v40, %v1862_v36  ;;  %v3747_v2 = vshll.u32 %v9597_v24, 16  ;;  %v3751_v12 = vshrl.u32 %v9597_v24, 16  ;;  %v3757_v15 = vshll.u32 %v9599_v58, 16  ;;  %v4085_v41 = vld [vmem:[#allocation2 + $0x24] sm:$0xe]  ;;  %v8580_v4 = vld [vmem:[%s10887_s5 + $0x88] sm:$0xff]  }
 0x112   : > { %v3744_v51 = vor.u32 %v3743_v61, %v3740_v26  ;;  %v4163_v39 = vrot.slane %v8666_v45, 5  ;;  %v8667_v42 = vld [vmem:[#allocation2 + $0x18] sm:$0xf]  ;;  %v9613_v8 = vld [vmem:[#allocation2 + $0x1c] sm:$0xf]  ;;  %v7021_v36 = vcombine.low %v4150_v32, %v4153_v52  ;;  %v6991_v61 = vrot.slane %v4085_v41, 9 }
 0x113   : > { %7802 = vmatmul.mubr.bf16.gmra.mrb[28].mxu1 %v6820_v54  ;;  %v3749_v25 = vrot.slane %v3747_v2, 5  ;;  %v3753_v35 = vrot.slane %v3751_v12, 4  ;;  %v3759_v34 = vrot.slane %v3757_v15, 5  ;;  %v6831_v59 = vcombine.low %v8667_v42, %v9613_v8  ;;  %v4086_v6 = vld [vmem:[#allocation2 + $0x30] sm:$0xe] }
 0x114   : > { %7821 = vmatprep.mubr.bf16.mxu1 %v6829_v7  ;;  %v3745_v43 = vrot.slane %v3744_v51, 4  ;;  %v4170_v7 = vrot.slane %v8669_v19, 5  ;;  %v4165_v54 = vrot.slane %v4163_v39, 4  ;;  %v8670_v2 = vld [vmem:[#allocation2 + $0x2c] sm:$0x1]  ;;  %v8584_v51 = vld [vmem:[%s10887_s5 + $0x90] sm:$0xff]  }
 0x115   : > { %v3754_v9 = vor.u32 %v3753_v35, %v3749_v25  ;;  %v4166_v12 = vrot.slane %v8670_v2, 5  ;;  %v8671_v15 = vld [vmem:[#allocation2 + $0x40] sm:$0xf]  ;;  %v6992_v0 = vrot.slane %v4086_v6, 9  ;;  %v6993_v52 = vrot.slane %v4087_v63, 9 }
 0x116   : > { %v3750_v62 = vsel %vm8996_vm11, %v3745_v43, %v3749_v25  ;;  %v4177_v3 = vrot.slane %v8671_v15, 5  ;;  %v4172_v33 = vrot.slane %v4170_v7, 4  ;;  %v8672_v25 = vld [vmem:[#allocation2 + $0x38] sm:$0x1]  ;;  %v4164_v43 = vsel %vm9539_vm14, %v6991_v61, %v4163_v39  ;;  %v4096_v6 = vld [vmem:[#allocation2 + $0xa8] sm:$0xe] }
 0x117   : > { %v3755_v55 = vrot.slane %v3754_v9, 4  ;;  %v4173_v35 = vrot.slane %v8672_v25, 5  ;;  %v4167_v9 = vsel %vm9539_vm14, %v4165_v54, %v4166_v12  ;;  %v8586_v39 = vld [vmem:[%s10887_s5 + $0x98] sm:$0xff]   ;;  %v8678_v2 = vld [vmem:[#allocation2 + $0x4c] sm:$0xf]  ;;  %v8590_v15 = vld [vmem:[%s10887_s5 + $0xa0] sm:$0xff]  }
 0x118   : > { %v4179_v37 = vrot.slane %v4177_v3, 4  ;;  %v7023_v42 = vcombine.low %v4164_v43, %v4167_v9  ;;  %v9653_v19 = vsel %vm9539_vm14, %v6993_v52, %v4177_v3  ;;  %v4184_v12 = vrot.slane %v8678_v2, 5  ;;  %v4097_v3 = vld [vmem:[#allocation2 + $0xb4] sm:$0xe]  ;;  %v8679_v63 = vld [vmem:[#allocation2 + $0x50] sm:$0x1] }
 0x119   : > { %v3760_v40 = vsel %vm8996_vm11, %v3755_v55, %v3759_v34  ;;  %v8673_v34 = vld [vmem:[#allocation2 + $0x24] sm:$0xf]  ;;  %v9632_v55 = vld [vmem:[#allocation2 + $0x34] sm:$0xf]  ;;  %v7002_v21 = vrot.slane %v4096_v6, 9  ;;  %v4243_v52 = vrot.slane %v9510_v57, 5 }
 0x11a   : > { %v6980_v26 = vcombine.low %v3750_v62, %v3760_v40  ;;  %v8676_v62 = vld [vmem:[#allocation2 + $0x30] sm:$0xf]  ;;  %v9644_v40 = vsel %vm9539_vm14, %v4172_v33, %v4173_v35  ;;  %v8682_v35 = vld [vmem:[#allocation2 + $0x3c] sm:$0xf]  ;;  %v9676_v43 = vld [vmem:[#allocation2 + $0x40] sm:$0xf] }
 0x11b   : > { %7822 = vmatmul.mubr.bf16.vlgmr.msra.gmra.mrb[0].mxu1 %v6830_v49  ;;  %v8675_v49 = vld [vmem:[#allocation2 + $0x44] sm:$0x1]  ;;  %v6833_v41 = vcombine.low %v8676_v62, %v9632_v55  ;;  %v6834_v9 = vcombine.low %v8682_v35, %v9676_v43  ;;  %v8592_v57 = vld [vmem:[%s10887_s5 + $0xa8] sm:$0xff]   ;;  %v4247_v6 = vrot.slane %v9562_v28, 5  ;;  %v4254_v2 = vrot.slane %v9597_v24, 5 }
 0x11c   : > { %7825 = vmatprep.mubr.bf16.mxu1 %v6831_v59  ;;  %7854 = vmatpush3.bf16.msra.mxu1 %v9371_v50  ;;  %v9629_v50 = vld [vmem:[#allocation2 + $0x28] sm:$0xf]  ;;  %v4180_v45 = vrot.slane %v8675_v49, 5  ;;  %v9640_v59 = vsel %vm9539_vm14, %v6992_v0, %v4170_v7  ;;  %v8680_v0 = vld [vmem:[#allocation2 + $0x58] sm:$0xf] }
 0x11d   : > { %7994 = vmatmul.mubr.bf16.gmra.mrb[28].mxu0 %v6980_v26  ;;  %7855 = vmatprep.subr.bf16.mxu1 %v8580_v4  ;;  %v6832_v32 = vcombine.low %v8673_v34, %v9629_v50  ;;  %v9659_v26 = vld [vmem:[#allocation2 + $0x54] sm:$0xe]  ;;  %v7024_v61 = vcombine.low %v9640_v59, %v9644_v40  ;;  %v4191_v33 = vrot.slane %v8680_v0, 5  ;;  %v8684_v49 = vld [vmem:[#allocation2 + $0x48] sm:$0xf]  ;;  %v4186_v59 = vrot.slane %v4184_v12, 4 }
 0x11e   : > { %8013 = vmatprep.mubr.bf16.mxu0 %v7021_v36  ;;  %v9646_v36 = vld [vmem:[#allocation2 + $0x48] sm:$0xe]  ;;  %v9657_v7 = vsel %vm9539_vm14, %v4179_v37, %v4180_v45  ;;  %v6995_v34 = vrot.slane %v9659_v26, 9  ;;  %v4098_v37 = vld [vmem:[#allocation2 + $0xc0] sm:$0xe]  ;;  %v4256_v0 = vrot.slane %v4254_v2, 4 }
 0x11f   : > { %v6994_v54 = vrot.slane %v9646_v36, 9  ;;  %v7025_v25 = vcombine.low %v9653_v19, %v9657_v7  ;;  %v8686_v40 = vld [vmem:[#allocation2 + $0x5c] sm:$0x1]  ;;  %v4250_v19 = vrot.slane %v9564_v29, 5  ;;  %v4193_v7 = vrot.slane %v4191_v33, 4 }
 0x120   : > { %7856 = vmatpush3.bf16.msra.mxu1 %v8580_v4  ;;  %v8579_v4 = vld [vmem:[%s10887_s5 + $0x188] sm:$0xff]   ;;  %v4194_v36 = vrot.slane %v8686_v40, 5  ;;  %v7004_v26 = vrot.slane %v4098_v37, 9  ;;  %v9736_v37 = vld [vmem:[#allocation2 + $0x58] sm:$0xf] }
 0x121   : > { %7857 = vmatprep.subr.bf16.mxu1 %v8584_v51 }
 0x122   : > { %v9713_v24 = vsel %vm9539_vm14, %v7004_v26, %v4254_v2  ;;  %v8693_v26 = vld [vmem:[#allocation2 + $0x68] sm:$0x1] }
 0x123   : > { %7826 = vmatmul.mubr.bf16.gmra.mrb[4].mxu1 %v6832_v32  ;;  %v8582_v32 = vld [vmem:[%s10887_s5 + $0x190] sm:$0xff]   ;;  %v4201_v2 = vrot.slane %v8693_v26, 5 }
 0x124   : > { %7829 = vmatprep.mubr.bf16.mxu1 %v6833_v41  ;;  %7858 = vmatpush3.bf16.msra.mxu1 %v8584_v51  ;;  %v4187_v51 = vrot.slane %v8679_v63, 5  ;;  %v4257_v63 = vrot.slane %v9599_v58, 5  ;;  %v8596_v58 = vld [vmem:[%s10887_s5 + $0xb0] sm:$0xff]  }
 0x125   : > { %8014 = vmatmul.mubr.bf16.vlgmr.msra.gmra.mrb[0].mxu0 %v7022_v1  ;;  %7859 = vmatprep.subr.bf16.mxu1 %v8586_v39  ;;  %v4240_v1 = vrot.slane %v9508_v56, 5  ;;  %v9684_v56 = vld [vmem:[#allocation2 + $0x4c] sm:$0xf] }
 0x126   : > { %8017 = vmatprep.mubr.bf16.mxu0 %v7023_v42  ;;  %8046 = vmatpush3.bf16.msra.mxu0 %v8681_v27  ;;  %v6835_v45 = vcombine.low %v8684_v49, %v9684_v56  ;;  %v7003_v42 = vrot.slane %v4097_v3, 9  ;;  %v8585_v3 = vld [vmem:[%s10887_s5 + $0x198] sm:$0xff]   ;;  %v4185_v27 = vsel %vm9539_vm14, %v6994_v54, %v4184_v12  ;;  %v9732_v12 = vsel %vm9539_vm14, %v4256_v0, %v4257_v63  ;;  %v8694_v0 = vld [vmem:[#allocation2 + $0x74] sm:$0x1] }
 0x127   : > { %8047 = vmatprep.subr.bf16.mxu0 %v8579_v4  ;;  %v9689_v62 = vsel %vm9539_vm14, %v7002_v21, %v4240_v1  ;;  %v4242_v41 = vrot.slane %v4240_v1, 4  ;;  %v4188_v21 = vsel %vm9539_vm14, %v4186_v59, %v4187_v51  ;;  %v4195_v51 = vsel %vm9539_vm14, %v4193_v7, %v4194_v36  ;;  %v8598_v36 = vld [vmem:[%s10887_s5 + $0xb8] sm:$0xff]  }
 0x128   : > { %7860 = vmatpush3.bf16.msra.mxu1 %v8586_v39  ;;  %v9708_v29 = vsel %vm9539_vm14, %v7003_v42, %v4247_v6  ;;  %v7036_v49 = vcombine.low %v9713_v24, %v9732_v12  ;;  %v9744_v42 = vld [vmem:[#allocation2 + $0x64] sm:$0xf]  ;;  %v7026_v40 = vcombine.low %v4185_v27, %v4188_v21  ;;  %v8714_v24 = vld [vmem:[#allocation2 + $0x5c] sm:$0x1] }
 0x129   : > { %7861 = vmatprep.subr.bf16.mxu1 %v8590_v15  ;;  %v9698_v39 = vsel %vm9539_vm14, %v4242_v41, %v4243_v52  ;;  %v8688_v52 = vld [vmem:[#allocation2 + $0x54] sm:$0xf]  ;;  %v8691_v41 = vld [vmem:[#allocation2 + $0x60] sm:$0xf]  ;;  %v2563_v12 = vrot.slane %v8714_v24, 5  ;;  %v8603_v24 = vld [vmem:[#allocation2 + $0x48] sm:$0xff]  }
 0x12a   : > { %8048 = vmatpush3.bf16.msra.mxu0 %v8579_v4  ;;  %v7034_v28 = vcombine.low %v9689_v62, %v9698_v39  ;;  %v4249_v4 = vrot.slane %v4247_v6, 4  ;;  %v6837_v59 = vcombine.low %v8691_v41, %v9744_v42  ;;  %v9756_v27 = vld [vmem:[%s10887_s5 + $0xc0] sm:$0xff]   ;;  %v8698_v41 = vld [vmem:[#allocation2 + $0x88] sm:$0xf] }
 0x12b   : > { %7830 = vmatmul.mubr.bf16.gmra.mrb[8].mxu1 %v6834_v9  ;;  %8049 = vmatprep.subr.bf16.mxu0 %v8582_v32  ;;  %v4090_v9 = vld [vmem:[#allocation2 + $0x60] sm:$0xe] }
 0x12c   : > { %7833 = vmatprep.mubr.bf16.mxu1 %v6835_v45  ;;  %7862 = vmatpush3.bf16.msra.mxu1 %v8590_v15  ;;  %v9721_v1 = vsel %vm9539_vm14, %v4249_v4, %v4250_v19  ;;  %v4192_v15 = vsel %vm9539_vm14, %v6995_v34, %v4191_v33  ;;  %v8690_v33 = vld [vmem:[#allocation2 + $0x70] sm:$0xf]  ;;  %v4091_v45 = vld [vmem:[#allocation2 + $0x6c] sm:$0xe]  ;;  %v6996_v19 = vrot.slane %v4090_v9, 9 }
 0x12d   : > { %8018 = vmatmul.mubr.bf16.gmra.mrb[4].mxu0 %v7024_v61  ;;  %7863 = vmatprep.subr.bf16.mxu1 %v8592_v57  ;;  %v8687_v61 = vld [vmem:[#allocation2 + $0x64] sm:$0xf]  ;;  %v7035_v54 = vcombine.low %v9708_v29, %v9721_v1  ;;  %v4205_v34 = vrot.slane %v8690_v33, 5  ;;  %v7027_v6 = vcombine.low %v4192_v15, %v4195_v51  ;;  %v6997_v4 = vrot.slane %v4091_v45, 9  ;;  %v8695_v15 = vld [vmem:[#allocation2 + $0x7c] sm:$0xf] }
 0x12e   : > { %8021 = vmatprep.mubr.bf16.mxu0 %v7025_v25  ;;  %v4198_v35 = vrot.slane %v8687_v61, 5  ;;  %8050 = vmatpush3.bf16.msra.mxu0 %v8582_v32  ;;  %v6836_v25 = vcombine.low %v8688_v52, %v9736_v37  ;;  %v8588_v32 = vld [vmem:[%s10887_s5 + $0x1a0] sm:$0xff]   ;;  %v4208_v61 = vrot.slane %v8694_v0, 5  ;;  %v4212_v51 = vrot.slane %v8695_v15, 5  ;;  %v4092_v52 = vld [vmem:[#allocation2 + $0x78] sm:$0xe] }
 0x12f   : > { %8051 = vmatprep.subr.bf16.mxu0 %v8585_v3  ;;  %v4207_v63 = vrot.slane %v4205_v34, 4  ;;  %v9766_v33 = vld [vmem:[#allocation2 + $0x70] sm:$0xf]  ;;  %v6998_v26 = vrot.slane %v4092_v52, 9  ;;  %v8702_v15 = vld [vmem:[#allocation2 + $0x8c] sm:$0x1] }
 0x130   : > { %7864 = vmatpush3.bf16.msra.mxu1 %v8592_v57  ;;  %v4200_v7 = vrot.slane %v4198_v35, 4  ;;  %v8591_v57 = vld [vmem:[%s10887_s5 + $0x1a8] sm:$0xff]   ;;  %v8711_v29 = vld [vmem:[#allocation2 + $0x38] sm:$0x1] }
 0x131   : > { %7865 = vmatprep.subr.bf16.mxu1 %v8596_v58  ;;  %v4209_v9 = vsel %vm9539_vm14, %v4207_v63, %v4208_v61  ;;  %v2542_v1 = vrot.slane %v8711_v29, 5  ;;  %v4969_v29 = vld [vmem:[#allocation2 + $0x1c] sm:$0xf] }
 0x132   : > { %8052 = vmatpush3.bf16.msra.mxu0 %v8585_v3  ;;  %v4199_v3 = vsel %vm9539_vm14, %v6996_v19, %v4198_v35  ;;  %v4202_v21 = vsel %vm9539_vm14, %v4200_v7, %v4201_v2  ;;  %v4219_v35 = vrot.slane %v8698_v41, 5  ;;  %v4214_v2 = vrot.slane %v4212_v51, 4  ;;  %v9789_v41 = vld [vmem:[#allocation2 + $0x88] sm:$0xf] }
 0x133   : > { %7834 = vmatmul.mubr.bf16.gmra.mrb[12].mxu1 %v6836_v25  ;;  %8053 = vmatprep.subr.bf16.mxu0 %v8588_v32  ;;  %v8696_v25 = vld [vmem:[#allocation2 + $0x6c] sm:$0xf]  ;;  %v7028_v19 = vcombine.low %v4199_v3, %v4202_v21  ;;  %v4213_v3 = vsel %vm9539_vm14, %v6998_v26, %v4212_v51  ;;  %v4094_v21 = vld [vmem:[#allocation2 + $0x90] sm:$0xe]  ;;  %v4233_v51 = vrot.slane %v9452_v5, 5 }
 0x134   : > { %7837 = vmatprep.mubr.bf16.mxu1 %v6837_v59  ;;  %7866 = vmatpush3.bf16.msra.mxu1 %v8596_v58  ;;  %v4206_v58 = vsel %vm9539_vm14, %v6997_v4, %v4205_v34  ;;  %v6838_v45 = vcombine.low %v8696_v25, %v9766_v33  ;;  %v8594_v59 = vld [vmem:[%s10887_s5 + $0x1b0] sm:$0xff]   ;;  %v8701_v4 = vld [vmem:[#allocation2 + $0x80] sm:$0x1]  ;;  %v4221_v61 = vrot.slane %v4219_v35, 4  ;;  %v4222_v25 = vrot.slane %v8702_v15, 5 }
 0x135   : > { %8022 = vmatmul.mubr.bf16.gmra.mrb[8].mxu0 %v7026_v40  ;;  %7867 = vmatprep.subr.bf16.mxu1 %v8598_v36  ;;  %v8699_v40 = vld [vmem:[#allocation2 + $0x78] sm:$0xf]  ;;  %v7029_v7 = vcombine.low %v4206_v58, %v4209_v9  ;;  %v4215_v63 = vrot.slane %v8701_v4, 5  ;;  %v4226_v58 = vrot.slane %v9426_v11, 5  ;;  %v4095_v11 = vld [vmem:[#allocation2 + $0x9c] sm:$0xe] }
 0x136   : > { %8025 = vmatprep.mubr.bf16.mxu0 %v7027_v6  ;;  %8054 = vmatpush3.bf16.msra.mxu0 %v8588_v32  ;;  %v4093_v32 = vld [vmem:[#allocation2 + $0x84] sm:$0xe]  ;;  %v9772_v6 = vld [vmem:[#allocation2 + $0x7c] sm:$0xf]  ;;  %v4223_v52 = vsel %vm9539_vm14, %v4221_v61, %v4222_v25  ;;  %v7001_v4 = vrot.slane %v4095_v11, 9  ;;  %v2511_v15 = vrot.slane %v9594_v22, 5  ;;  %v6843_v11 = vcombine.low %v9518_v23, %v9520_v38 }
 0x137   : > { %8055 = vmatprep.subr.bf16.mxu0 %v8591_v57  ;;  %v6839_v34 = vcombine.low %v8699_v40, %v9772_v6  ;;  %v6999_v0 = vrot.slane %v4093_v32, 9  ;;  %v9796_v40 = vld [vmem:[%s10887_s5 + $0x1c0] sm:$0xff]   ;;  %v4228_v26 = vrot.slane %v4226_v58, 4  ;;  %v521_v61 = vld [vmem:[#allocation2 + $0xcc] sm:$0x1] }
 0x138   : > { %7868 = vmatpush3.bf16.msra.mxu1 %v8598_v36  ;;  %v8597_v36 = vld [vmem:[%s10887_s5 + $0x1b8] sm:$0xff]   ;;  %v8707_v25 = vld [vmem:[#allocation2 + $0x8] sm:$0x1]  ;;  %v2459_v23 = vld [vmem:[#allocation2 + $0xc] sm:$0xe] }
 0x139   : > { %7901 = vmatprep.subr.bf16.mxu1 %v9756_v27  ;;  %v4220_v9 = vsel %vm9539_vm14, %v6999_v0, %v4219_v35  ;;  %v4236_v0 = vrot.slane %v9454_v14, 5 }
 0x13a   : > { %8056 = vmatpush3.bf16.msra.mxu0 %v8591_v57  ;;  %v4216_v57 = vsel %vm9539_vm14, %v4214_v2, %v4215_v63  ;;  %v8706_v2 = vld [vmem:[#allocation2 + $0x98] sm:$0x1]  ;;  %v4235_v63 = vrot.slane %v4233_v51, 4 }
 0x13b   : > { %7838 = vmatmul.mubr.bf16.gmra.mrb[16].mxu1 %v6838_v45  ;;  %8057 = vmatprep.subr.bf16.mxu0 %v8594_v59  ;;  %v8703_v45 = vld [vmem:[#allocation2 + $0x84] sm:$0xf]  ;;  %v4229_v5 = vrot.slane %v8706_v2, 5 }
 0x13c   : > { %7841 = vmatprep.mubr.bf16.mxu1 %v6839_v34  ;;  %v6840_v32 = vcombine.low %v8703_v45, %v9789_v41  ;;  %v7030_v34 = vcombine.low %v4213_v3, %v4216_v57  ;;  %v2514_v3 = vrot.slane %v8707_v25, 5  ;;  %v4234_v45 = vsel %vm9539_vm14, %v7001_v4, %v4233_v51  ;;  %v2460_v25 = vld [vmem:[#allocation2 + $0x18] sm:$0xe] }
 0x13d   : > { %8026 = vmatmul.mubr.bf16.gmra.mrb[12].mxu0 %v7028_v19  ;;  %v7000_v19 = vrot.slane %v4094_v21, 9  ;;  %v2458_v21 = vld [vmem:[#allocation2] sm:$0xe]  ;;  %v4230_v14 = vsel %vm9539_vm14, %v4228_v26, %v4229_v5  ;;  %v2518_v4 = vrot.slane %v9608_v47, 5  ;;  %v6844_v47 = vcombine.low %v9569_v46, %v9571_v48 }
 0x13e   : > { %8029 = vmatprep.mubr.bf16.mxu0 %v7029_v7  ;;  %8058 = vmatpush3.bf16.msra.mxu0 %v8594_v59  ;;  %v8705_v59 = vld [vmem:[#allocation2 + $0x90] sm:$0xf]  ;;  %v7031_v7 = vcombine.low %v4220_v9, %v4223_v52  ;;  %v522_v9 = vsel %vm8866_vm3, 0, %v521_v61  ;;  %v8708_v61 = vld [vmem:[#allocation2 + $0x14] sm:$0x1]  ;;  %v2532_v46 = vrot.slane %v9629_v50, 5 }
 0x13f   : > { %8059 = vmatprep.subr.bf16.mxu0 %v8597_v36  ;;  %v6841_v35 = vcombine.low %v8705_v59, %v9434_v31  ;;  %v7357_v31 = vld [vmem:[%s443_s23] sm:$0xff]   ;;  %v4227_v57 = vsel %vm9539_vm14, %v7000_v19, %v4226_v58  ;;  %v4237_v58 = vsel %vm9539_vm14, %v4235_v63, %v4236_v0  ;;  %523 = vst [vmem:[#allocation2 + $0xcc] sm:$0x1] %v522_v9  ;;  %v2525_v0 = vrot.slane %v9613_v8, 5  ;;  %v2462_v50 = vld [vmem:[#allocation2 + $0x30] sm:$0xe]  ;;  %s465_s23 = scalar_lea.vmem %s10889_s7, %s6746_s21 }
 0x140   : > { %v7358_v52 = vunpack.c.l.bf16 %v7357_v31  ;;  %v7359_v22 = vunpack.c.h.bf16 %v7357_v31  ;;  %v6786_v59 = vld [vmem:[%s10886_s4] ss:$0 sm:$0xff]  ;;  %v7032_v26 = vcombine.low %v4227_v57, %v4230_v14  ;;  %v7033_v51 = vcombine.low %v4234_v45, %v4237_v58 }
 0x141   : > { %v2521_v31 = vrot.slane %v8708_v61, 5  ;;  %v2520_v14 = vrot.slane %v2518_v4, 4  ;;  %v6855_v45 = vrot.slane %v2460_v25, 9  ;;  %v2527_v58 = vrot.slane %v2525_v0, 4  ;;  %v8612_v25 = vld [vmem:[%s10887_s5 + $0xc8] sm:$0xff]  }
 0x142   : > { %8060 = vmatpush3.bf16.msra.mxu0 %v8597_v36  ;;  %v6785_v36 = vld [vmem:[%s10885_s3] ss:$0 sm:$0xff]  ;;  %v6857_v61 = vrot.slane %v2462_v50, 9  ;;  %v8715_v50 = vld [vmem:[#allocation2 + $0x68] sm:$0x1] }
 0x143   : > { %7842 = vmatmul.mubr.bf16.gmra.mrb[20].mxu1 %v6840_v32  ;;  %8093 = vmatprep.subr.bf16.mxu0 %v9796_v40  ;;  %v6842_v32 = vcombine.low %v9461_v20, %v9463_v16  ;;  %v1355_v19 = vmul.f32 %v7358_v52, %v6785_v36 }
 0x144   : > { %7845 = vmatprep.mubr.bf16.mxu1 %v6841_v35  ;;  %v6853_v35 = vrot.slane %v2458_v21, 9 }
 0x145   : > { %8030 = vmatmul.mubr.bf16.gmra.mrb[16].mxu0 %v7030_v34  ;;  %v2513_v34 = vrot.slane %v2511_v15, 4  ;;  %v1364_v2 = vadd.f32 %v6786_v59, %v1355_v19 }
 0x146   : > { %8033 = vmatprep.mubr.bf16.mxu0 %v7031_v7  ;;  %v1356_v7 = vmul.f32 %v7359_v22, %v6785_v36  ;;  %v2512_v20 = vsel %vm9539_vm14, %v6853_v35, %v2511_v15  ;;  %v6854_v15 = vrot.slane %v2459_v23, 9  ;;  %v1395_v19 = vld [vmem:[#allocation2 + $0xcc] sm:$0xf] }
 0x147   : > { %v2515_v16 = vsel %vm9539_vm14, %v2513_v34, %v2514_v3  ;;  %v1366_v38 = vmax.f32 %v1364_v2, 0.0  ;;  %v2461_v34 = vld [vmem:[#allocation2 + $0x24] sm:$0xe] }
 0x148   : > { %v1365_v5 = vadd.f32 %v6786_v59, %v1356_v7  ;;  %v6885_v36 = vcombine.low %v2512_v20, %v2515_v16  ;;  %v2519_v35 = vsel %vm9539_vm14, %v6854_v15, %v2518_v4  ;;  %v2522_v7 = vsel %vm9539_vm14, %v2520_v14, %v2521_v31  ;;  %v2463_v31 = vld [vmem:[#allocation2 + $0x3c] sm:$0xe]  ;;  %v8712_v14 = vld [vmem:[#allocation2 + $0x44] sm:$0x1] }
 0x149   : > { %v7254_v57 = vpack.c.bf16 %v1366_v38, %v1366_v38  ;;  %v2539_v20 = vrot.slane %v9632_v55, 5  ;;  %v6856_v16 = vrot.slane %v2461_v34, 9  ;;  %v6886_v39 = vcombine.low %v2519_v35, %v2522_v7  ;;  %v8710_v38 = vld [vmem:[#allocation2 + $0x2c] sm:$0x1] }
 0x14a   : > { %v1367_v63 = vmax.f32 %v1365_v5, 0.0  ;;  %v2526_v5 = vsel %vm9539_vm14, %v6855_v45, %v2525_v0  ;;  %v2546_v0 = vrot.slane %v9676_v43, 5  ;;  %v8599_v43 = vld [vmem:[#allocation2 + $0x18] sm:$0xff]   ;;  %v2567_v45 = vrot.slane %v9744_v42, 5  ;;  %v8616_v42 = vld [vmem:[%s10887_s5 + $0xd0] sm:$0xff]  }
 0x14b   : > { %7846 = vmatmul.mubr.bf16.gmra.mrb[24].mxu1 %v6842_v32  ;;  %v1375_v9 = vshrl.u32 %v7254_v57, 16  ;;  %v1378_v3 = vshll.u32 %v7254_v57, 16  ;;  %v8709_v32 = vld [vmem:[#allocation2 + $0x20] sm:$0x1]  ;;  %v2541_v10 = vrot.slane %v2539_v20, 4  ;;  %v2533_v57 = vsel %vm9539_vm14, %v6856_v16, %v2532_v46 }
 0x14c   : > { %7849 = vmatprep.mubr.bf16.mxu1 %v6843_v11  ;;  %v7255_v21 = vpack.c.bf16 %v1367_v63, %v1367_v63  ;;  %v2528_v8 = vrot.slane %v8709_v32, 5  ;;  %v2535_v63 = vrot.slane %v8710_v38, 5  ;;  %v2548_v15 = vrot.slane %v2546_v0, 4  ;;  %v8713_v32 = vld [vmem:[#allocation2 + $0x50] sm:$0x1] }
 0x14d   : > { %8034 = vmatmul.mubr.bf16.gmra.mrb[20].mxu0 %v7032_v26  ;;  %v1377_v11 = vrot.slane %v1375_v9, 7  ;;  %v2549_v9 = vrot.slane %v8712_v14, 5  ;;  %v2574_v35 = vrot.slane %v9766_v33, 5  ;;  %v2469_v16 = vld [vmem:[#allocation2 + $0x84] sm:$0xe] }
 0x14e   : > { %8037 = vmatprep.mubr.bf16.mxu0 %v7033_v51  ;;  %v1383_v52 = vshrl.u32 %v7255_v21, 16  ;;  %v1386_v22 = vshll.u32 %v7255_v21, 16  ;;  %v2529_v4 = vsel %vm9539_vm14, %v2527_v58, %v2528_v8  ;;  %v2560_v21 = vrot.slane %v9736_v37, 5 }
 0x14f   : > { %v1380_v26 = vor.u32 %v1378_v3, %v1377_v11  ;;  %v1381_v51 = vrot.slane %v1377_v11, 4  ;;  %v6887_v55 = vcombine.low %v2526_v5, %v2529_v4  ;;  %v2465_v3 = vld [vmem:[#allocation2 + $0x54] sm:$0xe]  ;;  %v2543_v37 = vsel %vm9539_vm14, %v2541_v10, %v2542_v1  ;;  %v2467_v11 = vld [vmem:[#allocation2 + $0x6c] sm:$0xe] }
 0x150   : > { %v9833_v59 = vrot.slane %v1383_v52, 7  ;;  %v6859_v52 = vrot.slane %v2464_v17, 9  ;;  %v2556_v8 = vrot.slane %v8713_v32, 5  ;;  %v6860_v34 = vrot.slane %v2465_v3, 9  ;;  %v8611_v17 = vld [vmem:[%s10887_s5 + $0x1c8] sm:$0xff]  }
 0x151   : > { %v1396_v62 = vsel %vm8943_vm8, %v1380_v26, %v1395_v19  ;;  %v9887_v7 = vsel %vm9539_vm14, %v2548_v15, %v2549_v9  ;;  %v2581_v26 = vrot.slane %v9772_v6, 5  ;;  %v2569_v4 = vrot.slane %v2567_v45, 4  ;;  %v8618_v6 = vld [vmem:[%s10887_s5 + $0xd8] sm:$0xff]  }
 0x152   : > { %v1388_v2 = vor.u32 %v1386_v22, %v9833_v59  ;;  %1397 = vst [vmem:[#allocation2 + $0xcc] sm:$0xf] %v1396_v62  ;;  %v2466_v22 = vld [vmem:[#allocation2 + $0x60] sm:$0xe]  ;;  %v6862_v62 = vrot.slane %v2467_v11, 9 }
 0x153   : > { %7850 = vmatmul.mubr.bf16.gmra.mrb[28].mxu1 %v6844_v47  ;;  %1409 = vst [vmem:[#allocation2 + $0xcc] sm:$0xf] %v10890_v60  ;;  %v6861_v33 = vrot.slane %v2466_v22, 9  ;;  %v8602_v11 = vld [vmem:[#allocation2 + $0x3c] sm:$0xff]  }
 0x154   : > { %7869 = vmatprep.mubr.bf16.mxu1 %v6885_v36  ;;  %v1389_v23 = vsel %vm8935_vm7, %v1381_v51, %v1388_v2  ;;  %v6858_v36 = vrot.slane %v2463_v31, 9  ;;  %v8600_v51 = vld [vmem:[#allocation2 + $0x24] sm:$0xff]   ;;  %v9927_v9 = vsel %vm9539_vm14, %v6862_v62, %v2574_v35 }
 0x155   : > { %8038 = vmatmul.mubr.bf16.gmra.mrb[24].mxu0 %v7034_v28  ;;  %v2534_v28 = vrot.slane %v2532_v46, 4  ;;  %1398 = vst [vmem:[#allocation2 + $0xd0] sm:$0xf] %v1389_v23  ;;  %v2562_v46 = vrot.slane %v2560_v21, 4  ;;  %v9913_v1 = vsel %vm9539_vm14, %v6861_v33, %v2567_v45  ;;  %v8624_v33 = vld [vmem:[%s10887_s5 + $0xe8] sm:$0xff]  }
 0x156   : > { %8041 = vmatprep.mubr.bf16.mxu0 %v7035_v54  ;;  %1410 = vst [vmem:[#allocation2 + $0xd0] sm:$0xf] %v10890_v60  ;;  %v2553_v54 = vrot.slane %v9684_v56, 5  ;;  %v2540_v56 = vsel %vm9539_vm14, %v6857_v61, %v2539_v20  ;;  %v9883_v19 = vsel %vm9539_vm14, %v6858_v36, %v2546_v0  ;;  %v2570_v20 = vrot.slane %v8715_v50, 5  ;;  %v8601_v0 = vld [vmem:[#allocation2 + $0x30] sm:$0xff]  }
 0x157   : > { %v2536_v47 = vsel %vm9539_vm14, %v2534_v28, %v2535_v63  ;;  %v6889_v2 = vcombine.low %v2540_v56, %v2543_v37  ;;  %v8716_v28 = vld [vmem:[#allocation2 + $0x74] sm:$0x1]  ;;  %v4968_v63 = vld [vmem:[#allocation2 + $0x18] sm:$0xf]  ;;  %v9905_v61 = vsel %vm9539_vm14, %v6860_v34, %v2560_v21  ;;  %v9909_v31 = vsel %vm9539_vm14, %v2562_v46, %v2563_v12  ;;  %v9923_v36 = vld [vmem:[#allocation2 + $0x90] sm:$0xe] }
 0x158   : > { %v2555_v58 = vrot.slane %v2553_v54, 4  ;;  %v9892_v5 = vsel %vm9539_vm14, %v6859_v52, %v2553_v54  ;;  %v2577_v38 = vrot.slane %v8716_v28, 5  ;;  %v2583_v54 = vrot.slane %v2581_v26, 4  ;;  %v2471_v46 = vld [vmem:[#allocation2 + $0x9c] sm:$0xe] }
 0x159   : > { %v9921_v21 = vsel %vm9539_vm14, %v2569_v4, %v2570_v20  ;;  %v5017_v15 = vshrl.u32 %v4968_v63, 16  ;;  %v5020_v14 = vshll.u32 %v4968_v63, 16  ;;  %v5026_v56 = vshll.u32 %v4969_v29, 16 }
 0x15a   : > { %v9896_v23 = vsel %vm9539_vm14, %v2555_v58, %v2556_v8  ;;  %v5030_v52 = vshrl.u32 %v4969_v29, 16  ;;  %v6892_v45 = vcombine.low %v9905_v61, %v9909_v31  ;;  %v8718_v58 = vld [vmem:[#allocation2 + $0x8c] sm:$0x1]  ;;  %v4971_v8 = vld [vmem:[#allocation2 + $0x24] sm:$0xf]  ;;  %v6865_v34 = vrot.slane %v9923_v36, 9 }
 0x15b   : > { %7870 = vmatmul.mubr.bf16.vlgmr.msra.gmra.mrb[0].mxu1 %v6886_v39  ;;  %v2576_v39 = vrot.slane %v2574_v35, 4  ;;  %v6891_v22 = vcombine.low %v9892_v5, %v9896_v23  ;;  %v2591_v32 = vrot.slane %v8718_v58, 5  ;;  %v6893_v35 = vcombine.low %v9913_v1, %v9921_v21  ;;  %v9964_v5 = vld [vmem:[#allocation2 + $0xa8] sm:$0xe]  ;;  %v8719_v23 = vld [vmem:[#allocation2 + $0x94] sm:$0xf] }
 0x15c   : > { %7873 = vmatprep.mubr.bf16.mxu1 %v6887_v55  ;;  %7902 = vmatpush3.bf16.msra.mxu1 %v9756_v27  ;;  %v6888_v27 = vcombine.low %v2533_v57, %v2536_v47  ;;  %v6890_v55 = vcombine.low %v9883_v19, %v9887_v7  ;;  %v2588_v57 = vrot.slane %v9789_v41, 5  ;;  %v6864_v47 = vrot.slane %v2469_v16, 9  ;;  %v8622_v41 = vld [vmem:[%s10887_s5 + $0xe0] sm:$0xff]   ;;  %v8617_v29 = vld [vmem:[%s10887_s5 + $0x1d8] sm:$0xff]   ;;  %v2473_v36 = vld [vmem:[#allocation2 + $0xb4] sm:$0xe] }
 0x15d   : > { %8042 = vmatmul.mubr.bf16.gmra.mrb[28].mxu0 %v7036_v49  ;;  %7903 = vmatprep.subr.bf16.mxu1 %v8612_v25  ;;  %v2468_v49 = vld [vmem:[#allocation2 + $0x78] sm:$0xe]  ;;  %v9931_v3 = vsel %vm9539_vm14, %v2576_v39, %v2577_v38  ;;  %v9966_v4 = vrot.slane %v5026_v56, 5  ;;  %v5032_v50 = vrot.slane %v5030_v52, 4  ;;  %v5041_v20 = vshrl.u32 %v4971_v8, 16  ;;  %v8621_v58 = vld [vmem:[%s10887_s5 + $0x1e0] sm:$0xff]  }
 0x15e   : > { %8061 = vmatprep.mubr.bf16.mxu0 %v8599_v43  ;;  %v6863_v10 = vrot.slane %v2468_v49, 9  ;;  %v6894_v12 = vcombine.low %v9927_v9, %v9931_v3  ;;  %v9959_v49 = vsel %vm9539_vm14, %v6864_v47, %v2588_v57  ;;  %v5044_v16 = vshll.u32 %v4971_v8, 16  ;;  %v8720_v39 = vld [vmem:[#allocation2 + $0x98] sm:$0x1] }
 0x15f   : > { %v2595_v62 = vrot.slane %v8719_v23, 5  ;;  %v2598_v28 = vrot.slane %v8720_v39, 5  ;;  %v6866_v38 = vrot.slane %v2471_v46, 9  ;;  %v6867_v19 = vrot.slane %v9964_v5, 9  ;;  %v8724_v46 = vld [vmem:[#allocation2 + $0xb0] sm:$0x1] }
 0x160   : > { %7904 = vmatpush3.bf16.msra.mxu1 %v8612_v25  ;;  %v8717_v25 = vld [vmem:[#allocation2 + $0x80] sm:$0x1]  ;;  %v9943_v37 = vsel %vm9539_vm14, %v6863_v10, %v2581_v26  ;;  %v5019_v26 = vrot.slane %v5017_v15, 4  ;;  %v2616_v7 = vrot.slane %v9571_v48, 5  ;;  %v8628_v15 = vld [vmem:[%s10887_s5 + $0xf0] sm:$0xff]   ;;  %v5043_v52 = vrot.slane %v5041_v20, 4 }
 0x161   : > { %7905 = vmatprep.subr.bf16.mxu1 %v8616_v42  ;;  %v2584_v43 = vrot.slane %v8717_v25, 5  ;;  %v2597_v48 = vrot.slane %v2595_v62, 4  ;;  %v2619_v5 = vrot.slane %v9576_v53, 5  ;;  %v10000_v20 = vld [vmem:[#allocation2 + $0x34] sm:$0xf]  ;;  %v8630_v23 = vld [vmem:[%s10887_s5 + $0xf8] sm:$0xff]  }
 0x162   : > { %v8623_v53 = vld [vmem:[%s10887_s5 + $0x1e8] sm:$0xff]  }
 0x163   : > { %7874 = vmatmul.mubr.bf16.gmra.mrb[4].mxu1 %v6888_v27  ;;  %v2590_v27 = vrot.slane %v2588_v57, 4  ;;  %v8723_v57 = vld [vmem:[#allocation2 + $0xa4] sm:$0x1] }
 0x164   : > { %7877 = vmatprep.mubr.bf16.mxu1 %v6889_v2  ;;  %7906 = vmatpush3.bf16.msra.mxu1 %v8616_v42  ;;  %v9949_v42 = vsel %vm9539_vm14, %v2583_v54, %v2584_v43  ;;  %v4972_v2 = vld [vmem:[#allocation2 + $0x28] sm:$0xf]  ;;  %v2605_v47 = vrot.slane %v8723_v57, 5  ;;  %v5074_v57 = vshll.u32 %v10000_v20, 16 }
 0x165   : > { %8062 = vmatmul.mubr.bf16.vlgmr.msra.gmra.mrb[0].mxu0 %v8600_v51  ;;  %7907 = vmatprep.subr.bf16.mxu1 %v8618_v6  ;;  %v5022_v51 = vrot.slane %v5020_v14, 5  ;;  %v9973_v10 = vsel %vm9539_vm14, %v2590_v27, %v2591_v32  ;;  %v5050_v25 = vshll.u32 %v4972_v2, 16  ;;  %v5054_v43 = vshrl.u32 %v4972_v2, 16 }
 0x166   : > { %8065 = vmatprep.mubr.bf16.mxu0 %v8601_v0  ;;  %8094 = vmatpush3.bf16.msra.mxu0 %v9796_v40  ;;  %v8615_v40 = vld [vmem:[%s10887_s5 + $0x1d0] sm:$0xff]   ;;  %v4970_v0 = vld [vmem:[#allocation2 + $0x20] sm:$0x1]  ;;  %v5033_v14 = vor.u32 %v5032_v50, %v9966_v4  ;;  %v2618_v2 = vrot.slane %v2616_v7, 4 }
 0x167   : > { %8095 = vmatprep.subr.bf16.mxu0 %v8611_v17  ;;  %v5036_v56 = vshll.u32 %v4970_v0, 16 }
 0x168   : > { %7908 = vmatpush3.bf16.msra.mxu1 %v8618_v6  ;;  %v8721_v6 = vld [vmem:[#allocation2 + $0xa0] sm:$0xf] }
 0x169   : > { %7909 = vmatprep.subr.bf16.mxu1 %v8622_v41  ;;  %v2602_v63 = vrot.slane %v8721_v6, 5  ;;  %v5038_v39 = vrot.slane %v5036_v56, 5 }
 0x16a   : > { %8096 = vmatpush3.bf16.msra.mxu0 %v8611_v17  ;;  %v8722_v17 = vld [vmem:[#allocation2 + $0xac] sm:$0xf] }
 0x16b   : > { %7878 = vmatmul.mubr.bf16.gmra.mrb[8].mxu1 %v6890_v55  ;;  %8097 = vmatprep.subr.bf16.mxu0 %v8615_v40  ;;  %v2609_v54 = vrot.slane %v8722_v17, 5  ;;  %v5023_v55 = vor.u32 %v5022_v51, %v5019_v26  ;;  %v9993_v32 = vsel %vm9539_vm14, %v6866_v38, %v2602_v63  ;;  %v2604_v8 = vrot.slane %v2602_v63, 4  ;;  %v8605_v63 = vld [vmem:[#allocation2 + $0x60] sm:$0xff]  }
 0x16c   : > { %7881 = vmatprep.mubr.bf16.mxu1 %v6891_v22  ;;  %7910 = vmatpush3.bf16.msra.mxu1 %v8622_v41  ;;  %v5046_v22 = vrot.slane %v5044_v16, 5  ;;  %v9986_v41 = vsel %vm9539_vm14, %v6865_v34, %v2595_v62  ;;  %v5056_v26 = vrot.slane %v5054_v43, 4  ;;  %v4974_v34 = vld [vmem:[#allocation2 + $0x30] sm:$0xf]  ;;  %v6868_v51 = vrot.slane %v2473_v36, 9  ;;  %v8604_v16 = vld [vmem:[#allocation2 + $0x54] sm:$0xff]  }
 0x16d   : > { %8066 = vmatmul.mubr.bf16.gmra.mrb[4].mxu0 %v8602_v11  ;;  %7911 = vmatprep.subr.bf16.mxu1 %v8624_v33  ;;  %v4973_v11 = vld [vmem:[#allocation2 + $0x2c] sm:$0x1]  ;;  %v2611_v27 = vrot.slane %v2609_v54, 4  ;;  %v9998_v50 = vrot.slane %v5023_v55, 4  ;;  %v5034_v62 = vrot.slane %v5033_v14, 4  ;;  %v10014_v0 = vsel %vm9539_vm14, %v6867_v19, %v2609_v54 }
 0x16e   : > { %8069 = vmatprep.mubr.bf16.mxu0 %v8603_v24  ;;  %8098 = vmatpush3.bf16.msra.mxu0 %v8615_v40  ;;  %v2612_v24 = vrot.slane %v8724_v46, 5  ;;  %v9995_v40 = vrot.slane %v5050_v25, 5  ;;  %v5047_v38 = vor.u32 %v5046_v22, %v5043_v52  ;;  %v5060_v6 = vshll.u32 %v4973_v11, 16  ;;  %v10024_v43 = vld [vmem:[#allocation2 + $0x38] sm:$0x1]  ;;  %v8606_v46 = vld [vmem:[#allocation2 + $0x6c] sm:$0xff]  }
 0x16f   : > { %8099 = vmatprep.subr.bf16.mxu0 %v8617_v29  ;;  %v5065_v17 = vshrl.u32 %v4974_v34, 16  ;;  %v5068_v25 = vshll.u32 %v4974_v34, 16  ;;  %v5078_v54 = vshrl.u32 %v10000_v20, 16  ;;  %v4977_v19 = vld [vmem:[#allocation2 + $0x3c] sm:$0xf]  ;;  %v10037_v31 = vsel %vm9539_vm14, %v6868_v51, %v2616_v7 }
 0x170   : > { %7912 = vmatpush3.bf16.msra.mxu1 %v8624_v33  ;;  %v10007_v33 = vsel %vm9539_vm14, %v2597_v48, %v2598_v28  ;;  %v5057_v28 = vor.u32 %v5056_v26, %v9995_v40  ;;  %v10033_v61 = vsel %vm9539_vm14, %v2611_v27, %v2612_v24  ;;  %v5029_v1 = vsel %vm8996_vm11, %v9998_v50, %v9966_v4  ;;  %v10053_v7 = vld [vmem:[#allocation2 + $0x40] sm:$0xf]  ;;  %v8627_v4 = vld [vmem:[%s10887_s5 + $0x1f0] sm:$0xff]   ;;  %v8607_v24 = vld [vmem:[#allocation2 + $0x78] sm:$0xff]  }
 0x171   : > { %7913 = vmatprep.subr.bf16.mxu1 %v8628_v15  ;;  %v5039_v21 = vsel %vm8996_vm11, %v5034_v62, %v5038_v39  ;;  %v5067_v55 = vrot.slane %v5065_v17, 4  ;;  %v5070_v36 = vrot.slane %v5068_v25, 5  ;;  %v5089_v14 = vshrl.u32 %v4977_v19, 16  ;;  %v10090_v62 = vld [vmem:[#allocation2 + $0x4c] sm:$0xf] }
 0x172   : > { %8100 = vmatpush3.bf16.msra.mxu0 %v8617_v29  ;;  %v10021_v29 = vsel %vm9539_vm14, %v2604_v8, %v2605_v47  ;;  %v10051_v47 = vrot.slane %v5060_v6, 5  ;;  %v10059_v56 = vrot.slane %v5057_v28, 4  ;;  %v10061_v52 = vrot.slane %v5074_v57, 5  ;;  %v4983_v39 = vld [vmem:[#allocation2 + $0x54] sm:$0xf] }
 0x173   : > { %7882 = vmatmul.mubr.bf16.gmra.mrb[12].mxu1 %v6892_v45  ;;  %8101 = vmatprep.subr.bf16.mxu0 %v8621_v58  ;;  %v10041_v45 = vsel %vm9539_vm14, %v2618_v2, %v2619_v5  ;;  %v10063_v22 = vrot.slane %v5078_v54, 4  ;;  %v5092_v48 = vshll.u32 %v4977_v19, 16  ;;  %v5098_v27 = vshll.u32 %v10053_v7, 16  ;;  %v8629_v2 = vld [vmem:[%s10887_s5 + $0x1f8] sm:$0xff]   ;;  %v4986_v25 = vld [vmem:[#allocation2 + $0x60] sm:$0xf] }
 0x174   : > { %7885 = vmatprep.mubr.bf16.mxu1 %v6893_v35  ;;  %7914 = vmatpush3.bf16.msra.mxu1 %v8628_v15  ;;  %v10049_v35 = vrot.slane %v5047_v38, 4  ;;  %v5084_v15 = vshll.u32 %v10024_v43, 16  ;;  %v10082_v5 = vcombine.low %v5029_v1, %v5039_v21  ;;  %v10101_v17 = vld [vmem:[#allocation2 + $0x58] sm:$0xf]  ;;  %v5102_v9 = vshrl.u32 %v10053_v7, 16 }
 0x175   : > { %8070 = vmatmul.mubr.bf16.gmra.mrb[8].mxu0 %v8604_v16  ;;  %7915 = vmatprep.subr.bf16.mxu1 %v8630_v23  ;;  %v5071_v16 = vor.u32 %v5070_v36, %v5067_v55  ;;  %v5081_v6 = vor.u32 %v10063_v22, %v10061_v52  ;;  %10923 = vst [vmem:[#allocation4_spill] sm:$0xff] %v10101_v17  ;;  %v10103_v28 = vrot.slane %v5098_v27, 5  ;;  %v10106_v57 = vld [vmem:[#allocation2 + $0x64] sm:$0xf]  ;;  %v5122_v19 = vshll.u32 %v10090_v62, 16 }
 0x176   : > { %8073 = vmatprep.mubr.bf16.mxu0 %v8605_v63  ;;  %8102 = vmatpush3.bf16.msra.mxu0 %v8621_v58  ;;  %v6895_v58 = vcombine.low %v9943_v37, %v9949_v42  ;;  %v4980_v42 = vld [vmem:[#allocation2 + $0x48] sm:$0xf]  ;;  %10922 = vst [vmem:[#allocation3_spill] sm:$0xff] %v10082_v5  ;;  %v5091_v63 = vrot.slane %v5089_v14, 4  ;;  %10924 = vst [vmem:[#allocation5_spill] sm:$0xff] %v10106_v57  ;;  %v5126_v1 = vshrl.u32 %v10090_v62, 16 }
 0x177   : > { %8103 = vmatprep.subr.bf16.mxu0 %v8623_v53  ;;  %v5113_v3 = vshrl.u32 %v4980_v42, 16  ;;  %v10108_v54 = vld [vmem:[#allocation2 + $0x44] sm:$0x1]  ;;  %v5137_v21 = vshrl.u32 %v4983_v39, 16  ;;  %v5140_v55 = vshll.u32 %v4983_v39, 16  ;;  %v5146_v36 = vshll.u32 %v10101_v17, 16 }
 0x178   : > { %7916 = vmatpush3.bf16.msra.mxu1 %v8630_v23  ;;  %v10088_v23 = vrot.slane %v5084_v15, 5  ;;  %v5150_v15 = vshrl.u32 %v10101_v17, 16  ;;  %v5161_v14 = vshrl.u32 %v4986_v25, 16  ;;  %v5164_v22 = vshll.u32 %v4986_v25, 16  ;;  %v4989_v37 = vld [vmem:[#allocation2 + $0x6c] sm:$0xf] }
 0x179   : > { %v5104_v39 = vrot.slane %v5102_v9, 4  ;;  %v5108_v60 = vshll.u32 %v10108_v54, 16  ;;  %v5115_v51 = vrot.slane %v5113_v3, 4  ;;  %v10124_v50 = vld [vmem:[#allocation2 + $0x50] sm:$0x1]  ;;  %v5142_v38 = vrot.slane %v5140_v55, 5 }
 0x17a   : > { %8104 = vmatpush3.bf16.msra.mxu0 %v8623_v53  ;;  %v5094_v53 = vrot.slane %v5092_v48, 5  ;;  %v8609_v48 = vld [vmem:[#allocation2 + $0x84] sm:$0xff]   ;;  %10926 = vst [vmem:[#allocation7_spill] sm:$0xff] %v10124_v50  ;;  %v10128_v34 = vld [vmem:[#allocation2 + $0x5c] sm:$0x1]  ;;  %v10130_v26 = vrot.slane %v5146_v36, 5  ;;  %v10928_v3 = vcombine.low %v9959_v49, %v9973_v10 }
 0x17b   : > { %7886 = vmatmul.mubr.bf16.gmra.mrb[16].mxu1 %v6894_v12  ;;  %8105 = vmatprep.subr.bf16.mxu0 %v8627_v4  ;;  %v5116_v12 = vshll.u32 %v4980_v42, 16  ;;  %v5174_v42 = vshrl.u32 %v10106_v57, 16  ;;  %10927 = vst [vmem:[#allocation8_spill] sm:$0xff] %v10128_v34  ;;  %v5152_v11 = vrot.slane %v5150_v15, 4  ;;  %v5163_v8 = vrot.slane %v5161_v14, 4 }
 0x17c   : > { %7889 = vmatprep.mubr.bf16.mxu1 %v6895_v58  ;;  %v10114_v58 = vrot.slane %v5071_v16, 4  ;;  %v5095_v27 = vor.u32 %v5094_v53, %v5091_v63  ;;  %v10126_v16 = vrot.slane %v5122_v19, 5  ;;  %v5128_v63 = vrot.slane %v5126_v1, 4  ;;  %v10152_v15 = vld [vmem:[#allocation2 + $0x70] sm:$0xf] }
 0x17d   : > { %8074 = vmatmul.mubr.bf16.gmra.mrb[12].mxu0 %v8606_v46  ;;  %v5170_v46 = vshll.u32 %v10106_v57, 16  ;;  %v5118_v25 = vrot.slane %v5116_v12, 5  ;;  %v5139_v53 = vrot.slane %v5137_v21, 4  ;;  %v5166_v9 = vrot.slane %v5164_v22, 5  ;;  %v10135_v12 = vld [vmem:[#allocation2 + $0x68] sm:$0x1] }
 0x17e   : > { %8077 = vmatprep.mubr.bf16.mxu0 %v8607_v24  ;;  %8106 = vmatpush3.bf16.msra.mxu0 %v8627_v4  ;;  %v10121_v24 = vld [vmem:[%s10887_s5 + $0x200] sm:$0xff]   ;;  %v8613_v4 = vld [vmem:[#allocation2 + $0x90] sm:$0xff]   ;;  %10929 = vst [vmem:[#allocation9_spill] sm:$0xff] %v10135_v12  ;;  %v5176_v19 = vrot.slane %v5174_v42, 4  ;;  %v5185_v1 = vshrl.u32 %v4989_v37, 16  ;;  %v5188_v21 = vshll.u32 %v4989_v37, 16  ;;  %v5105_v36 = vor.u32 %v5104_v39, %v10103_v28 }
 0x17f   : > { %8107 = vmatprep.subr.bf16.mxu0 %v8629_v2  ;;  %10925 = vst [vmem:[#allocation6_spill] sm:$0xff] %v10121_v24  ;;  %v10137_v5 = vrot.slane %v5170_v46, 5  ;;  %v10147_v49 = vrot.slane %v5081_v6, 4  ;;  %v10149_v10 = vrot.slane %v5095_v27, 4  ;;  %10931 = vst [vmem:[#allocation10_spill] sm:$0xff] %v10152_v15  ;;  %v5119_v37 = vor.u32 %v5118_v25, %v5115_v51  ;;  %v8619_v25 = vld [vmem:[#allocation2 + $0xa8] sm:$0xff]  }
 0x180   : > { %v5129_v14 = vor.u32 %v5128_v63, %v10126_v16  ;;  %v4992_v22 = vld [vmem:[#allocation2 + $0x78] sm:$0xf]  ;;  %v5143_v46 = vor.u32 %v5142_v38, %v5139_v53  ;;  %v5153_v6 = vor.u32 %v5152_v11, %v10130_v26  ;;  %v5167_v42 = vor.u32 %v5166_v9, %v5163_v8  ;;  %v577_v8 = vld [vmem:[#allocation2 + $0xd4] sm:$0x1] }
 0x181   : > { %v5180_v27 = vshll.u32 %v10135_v12, 16  ;;  %v5177_v39 = vor.u32 %v5176_v19, %v10137_v5  ;;  %v5194_v51 = vshll.u32 %v10152_v15, 16  ;;  %v5110_v63 = vrot.slane %v5108_v60, 5 }
 0x182   : > { %8108 = vmatpush3.bf16.msra.mxu0 %v8629_v2  ;;  %v10930_v2 = vcombine.low %v9986_v41, %v10007_v33  ;;  %v5132_v41 = vshll.u32 %v10124_v50, 16  ;;  %v5156_v33 = vshll.u32 %v10128_v34, 16  ;;  %v5198_v55 = vshrl.u32 %v10152_v15, 16 }
 0x183   : > { %7890 = vmatmul.mubr.bf16.gmra.mrb[20].mxu1 %v10928_v3  ;;  %8141 = vmatprep.subr.bf16.mxu0 %v10121_v24  ;;  %v5187_v3 = vrot.slane %v5185_v1, 4  ;;  %v5209_v24 = vshrl.u32 %v4992_v22, 16  ;;  %v5212_v57 = vshll.u32 %v4992_v22, 16  ;;  %v5120_v38 = vrot.slane %v5119_v37, 4  ;;  %v10162_v1 = vld [vmem:[#allocation2 + $0x7c] sm:$0xf] }
 0x184   : > { %7893 = vmatprep.mubr.bf16.mxu1 %v10930_v2  ;;  %v5190_v2 = vrot.slane %v5188_v21, 5  ;;  %v5130_v53 = vrot.slane %v5129_v14, 4  ;;  %v5134_v11 = vrot.slane %v5132_v41, 5  ;;  %v5144_v9 = vrot.slane %v5143_v46, 4  ;;  %v10172_v37 = vld [vmem:[#allocation2 + $0x74] sm:$0x1] }
 0x185   : > { %8078 = vmatmul.mubr.bf16.gmra.mrb[16].mxu0 %v8609_v48  ;;  %v8614_v48 = vld [vmem:[#allocation2 + $0x9c] sm:$0xff]   ;;  %v5154_v12 = vrot.slane %v5153_v6, 4  ;;  %v5158_v34 = vrot.slane %v5156_v33, 5  ;;  %v5182_v19 = vrot.slane %v5180_v27, 5  ;;  %v10932_v21 = vcombine.low %v9993_v32, %v10021_v29 }
 0x186   : > { %8081 = vmatprep.mubr.bf16.mxu0 %v8613_v4  ;;  %v5106_v4 = vrot.slane %v5105_v36, 4  ;;  %v5168_v60 = vrot.slane %v5167_v42, 4  ;;  %v5178_v17 = vrot.slane %v5177_v39, 4  ;;  %v5191_v15 = vor.u32 %v5190_v2, %v5187_v3  ;;  %v10184_v29 = vld [vmem:[#allocation2 + $0x80] sm:$0x1]  ;;  %v8620_v3 = vld [vmem:[#allocation2 + $0xb4] sm:$0xff]  }
 0x187   : > { %v10167_v50 = vrot.slane %v5194_v51, 5  ;;  %v10933_v36 = vcombine.low %v10014_v0, %v10033_v61  ;;  %v5200_v14 = vrot.slane %v5198_v55, 4  ;;  %v5211_v41 = vrot.slane %v5209_v24, 4  ;;  %v4995_v55 = vld [vmem:[#allocation2 + $0x84] sm:$0xf] }
 0x188   : > { %v5214_v33 = vrot.slane %v5212_v57, 5  ;;  %v578_v22 = vsel %vm8880_vm4, 0, %v577_v8  ;;  %v5087_v32 = vsel %vm8996_vm11, %v10147_v49, %v10088_v23  ;;  %v5101_v0 = vsel %vm8996_vm11, %v10149_v10, %v10103_v28  ;;  %v5724_v51 = vld [vmem:[#allocation2 + $0x30] sm:$0xe]  ;;  %v5726_v8 = vld [vmem:[#allocation2 + $0x48] sm:$0xe] }
 0x189   : > { %v5218_v61 = vshll.u32 %v10162_v1, 16  ;;  %v5222_v57 = vshrl.u32 %v10162_v1, 16  ;;  %579 = vst [vmem:[#allocation2 + $0xd4] sm:$0x1] %v578_v22  ;;  %v5111_v18 = vsel %vm8996_vm11, %v5106_v4, %v5110_v63  ;;  %v5125_v23 = vsel %vm8996_vm11, %v5120_v38, %v10126_v16  ;;  %v8631_v16 = vld [vmem:[#allocation2 + $0xc] sm:$0xff]  }
 0x18a   : > { %v5135_v24 = vsel %vm8996_vm11, %v5130_v53, %v5134_v11  ;;  %v5149_v28 = vsel %vm8996_vm11, %v5144_v9, %v10130_v26  ;;  %v5159_v49 = vsel %vm8996_vm11, %v5154_v12, %v5158_v34  ;;  %v5173_v10 = vsel %vm8996_vm11, %v5168_v60, %v10137_v5  ;;  %v5725_v11 = vld [vmem:[#allocation2 + $0x3c] sm:$0xe] }
 0x18b   : > { %7894 = vmatmul.mubr.bf16.gmra.mrb[24].mxu1 %v10932_v21  ;;  %v10203_v46 = vrot.slane %v5191_v15, 4  ;;  %v5204_v6 = vshll.u32 %v10172_v37, 16  ;;  %v5183_v42 = vsel %vm8996_vm11, %v5178_v17, %v5182_v19  ;;  %v5201_v27 = vor.u32 %v5200_v14, %v10167_v50 }
 0x18c   : > { %7897 = vmatprep.mubr.bf16.mxu1 %v10933_v36  ;;  %v5215_v39 = vor.u32 %v5214_v33, %v5211_v41  ;;  %v5228_v26 = vshll.u32 %v10184_v29, 16  ;;  %v10934_v34 = vsel %vm8996_vm11, %v10059_v56, %v10051_v47  ;;  %v10935_v5 = vsel %vm8996_vm11, %v10049_v35, %v9995_v40  ;;  %v10237_v40 = vld [vmem:[#allocation2 + $0x88] sm:$0xf] }
 0x18d   : > { %8082 = vmatmul.mubr.bf16.gmra.mrb[20].mxu0 %v8614_v48  ;;  %v10220_v12 = vcombine.low %v10935_v5, %v10934_v34  ;;  %v10222_v15 = vrot.slane %v5218_v61, 5  ;;  %v10224_v17 = vrot.slane %v5222_v57, 4  ;;  %v5233_v2 = vshrl.u32 %v4995_v55, 16  ;;  %v8625_v48 = vld [vmem:[#allocation2 + $0xc0] sm:$0xff]   ;;  %v5727_v57 = vld [vmem:[#allocation2 + $0x54] sm:$0xe] }
 0x18e   : > { %8085 = vmatprep.mubr.bf16.mxu0 %v8619_v25  ;;  %v10936_v25 = vsel %vm8996_vm11, %v10114_v58, %v10061_v52  ;;  %v10233_v56 = vcombine.low %v5101_v0, %v5111_v18  ;;  %v10235_v63 = vcombine.low %v5125_v23, %v5135_v24  ;;  %v5236_v35 = vshll.u32 %v4995_v55, 16  ;;  %v8632_v18 = vld [vmem:[#allocation2 + $0x18] sm:$0xff]   ;;  %v8633_v55 = vld [vmem:[#allocation2 + $0x24] sm:$0xff]  }
 0x18f   : > { %v10231_v47 = vcombine.low %v10936_v25, %v5087_v32  ;;  %v10937_v4 = vcombine.low %v10037_v31, %v10041_v45  ;;  %v10242_v38 = vcombine.low %v5149_v28, %v5159_v49  ;;  %v10244_v53 = vcombine.low %v5173_v10, %v5183_v42  ;;  %v10940_v10 = vld [vmem:[#allocation7_spill] sm:$0xff]  ;;  %v10942_v5 = vld [vmem:[#allocation8_spill] sm:$0xff] }
 0x190   : > { %v10250_v58 = vrot.slane %v5204_v6, 5  ;;  %v10252_v9 = vrot.slane %v5201_v27, 4  ;;  %v10254_v19 = vrot.slane %v5215_v39, 4  ;;  %v10256_v31 = vrot.slane %v5228_v26, 5  ;;  %v1399_v45 = vld [vmem:[#allocation2 + $0xd4] sm:$0x1] }
 0x191   : > { %v7127_v21 = vrot.slane %v5724_v51, 9  ;;  %v10260_v36 = vrot.slane %v5233_v2, 4  ;;  %v5242_v14 = vshll.u32 %v10237_v40, 16  ;;  %v10938_v41 = vrot.slane %v9833_v59, 4  ;;  %v10941_v39 = vld [vmem:[#allocation4_spill] sm:$0xff]  ;;  %v8637_v52 = vld [vmem:[#allocation2 + $0x54] sm:$0xff]  }
 0x192   : > { %v10267_v22 = vrot.slane %v5236_v35, 5  ;;  %v5802_v32 = vrot.slane %v10000_v20, 5  ;;  %v5805_v0 = vrot.slane %v10024_v43, 5  ;;  %v7128_v61 = vrot.slane %v5725_v11, 9  ;;  %v5728_v26 = vld [vmem:[#allocation2 + $0x60] sm:$0xe] }
 0x193   : > { %7898 = vmatmul.mubr.bf16.gmra.mrb[28].mxu1 %v10937_v4  ;;  %v1400_v33 = vsel %vm8866_vm3, %v10938_v41, %v1399_v45  ;;  %v5246_v23 = vshrl.u32 %v10237_v40, 16  ;;  %v10939_v24 = vmov 0   ;;  %v5809_v59 = vrot.slane %v10053_v7, 5  ;;  %v5729_v51 = vld [vmem:[#allocation2 + $0x6c] sm:$0xe] }
 0x194   : > { %7917 = vmatprep.mubr.bf16.mxu1 %v8631_v16  ;;  %1401 = vst [vmem:[#allocation2 + $0xd4] sm:$0x1] %v1400_v33  ;;  %v5812_v13 = vrot.slane %v10108_v54, 5  ;;  %v7129_v28 = vrot.slane %v5726_v8, 9  ;;  %v10277_v49 = vsel %vm9539_vm14, %v7127_v21, %v5802_v32  ;;  %v5804_v20 = vrot.slane %v5802_v32, 4  ;;  %v8626_v16 = vld [vmem:[#allocation2 + $0xcc] sm:$0xff]  }
 0x195   : > { %8086 = vmatmul.mubr.bf16.gmra.mrb[24].mxu0 %v8620_v3  ;;  %1411 = vst [vmem:[#allocation2 + $0xd4] sm:$0x1] %v10939_v24  ;;  %v5816_v43 = vrot.slane %v10090_v62, 5  ;;  %v5819_v6 = vrot.slane %v10940_v10, 5  ;;  %v10283_v42 = vsel %vm9539_vm14, %v7128_v61, %v5809_v59  ;;  %v5811_v27 = vrot.slane %v5809_v59, 4  ;;  %v10943_v41 = vld [vmem:[#allocation5_spill] sm:$0xff] }
 0x196   : > { %8089 = vmatprep.mubr.bf16.mxu0 %v8625_v48  ;;  %v7130_v7 = vrot.slane %v5727_v57, 9  ;;  %v5823_v54 = vrot.slane %v10941_v39, 5  ;;  %v10288_v3 = vsel %vm9539_vm14, %v5804_v20, %v5805_v0  ;;  %v5826_v2 = vrot.slane %v10942_v5, 5  ;;  %v10305_v11 = vld [vmem:[#allocation2 + $0x8c] sm:$0x1]  ;;  %v10945_v59 = vld [vmem:[#allocation3_spill] sm:$0xff] }
 0x197   : > { %v10292_v34 = vsel %vm9539_vm14, %v7129_v28, %v5816_v43  ;;  %v5818_v62 = vrot.slane %v5816_v43, 4  ;;  %v10299_v25 = vsel %vm9539_vm14, %v5811_v27, %v5812_v13  ;;  %v7131_v21 = vrot.slane %v5728_v26, 9  ;;  %v5730_v32 = vld [vmem:[#allocation2 + $0x78] sm:$0xe]  ;;  %v10944_v57 = vld [vmem:[#allocation9_spill] sm:$0xff]  ;;  %v8634_v13 = vld [vmem:[#allocation2 + $0x30] sm:$0xff]  }
 0x198   : > { %v10303_v35 = vsel %vm9539_vm14, %v7130_v7, %v5823_v54  ;;  %v5825_v4 = vrot.slane %v5823_v54, 4  ;;  %v5830_v33 = vrot.slane %v10943_v41, 5  ;;  %v7132_v24 = vrot.slane %v5729_v51, 9  ;;  %v10946_v43 = vld [vmem:[#allocation10_spill] sm:$0xff]  ;;  %v5731_v39 = vld [vmem:[#allocation2 + $0x84] sm:$0xe] }
 0x199   : > { %v10311_v45 = vsel %vm9539_vm14, %v5818_v62, %v5819_v6  ;;  %v5837_v10 = vrot.slane %v10946_v43, 5  ;;  %v7133_v27 = vrot.slane %v5730_v32, 9  ;;  %v5844_v7 = vrot.slane %v10162_v1, 5  ;;  %v8635_v54 = vld [vmem:[#allocation2 + $0x3c] sm:$0xff]   ;;  %v5732_v51 = vld [vmem:[#allocation2 + $0x90] sm:$0xe] }
 0x19a   : > { %v10318_v61 = vsel %vm9539_vm14, %v5825_v4, %v5826_v2  ;;  %v5832_v20 = vrot.slane %v5830_v33, 4  ;;  %v5847_v2 = vrot.slane %v10184_v29, 5  ;;  %v10345_v4 = vld [vmem:[#allocation2 + $0x90] sm:$0xf]  ;;  %v10355_v32 = vld [vmem:[#allocation2 + $0xa0] sm:$0xf] }
 0x19b   : > { %7918 = vmatmul.mubr.bf16.vlgmr.msra.gmra.mrb[0].mxu1 %v8632_v18  ;;  %v5833_v18 = vrot.slane %v10944_v57, 5  ;;  %v10338_v62 = vsel %vm9539_vm14, %v7132_v24, %v5837_v10  ;;  %v5839_v5 = vrot.slane %v5837_v10, 4  ;;  %v5846_v41 = vrot.slane %v5844_v7, 4  ;;  %v5733_v24 = vld [vmem:[#allocation2 + $0x9c] sm:$0xe]  ;;  %v8636_v1 = vld [vmem:[#allocation2 + $0x48] sm:$0xff]  }
 0x19c   : > { %7921 = vmatprep.mubr.bf16.mxu1 %v8633_v55  ;;  %v10326_v55 = vsel %vm9539_vm14, %v7131_v21, %v5830_v33  ;;  %v10351_v21 = vsel %vm9539_vm14, %v7133_v27, %v5844_v7  ;;  %v10353_v33 = vld [vmem:[#allocation2 + $0x94] sm:$0xf]  ;;  %v5851_v57 = vrot.slane %v10237_v40, 5  ;;  %v5734_v27 = vld [vmem:[#allocation2 + $0xa8] sm:$0xe]  ;;  %v5865_v43 = vrot.slane %v10355_v32, 5 }
 0x19d   : > { %8090 = vmatmul.mubr.bf16.gmra.mrb[28].mxu0 %v8626_v16  ;;  %v5840_v16 = vrot.slane %v10172_v37, 5  ;;  %v10334_v26 = vsel %vm9539_vm14, %v5832_v20, %v5833_v18  ;;  %v10343_v37 = vrot.slane %v5242_v14, 5  ;;  %10947 = vst [vmem:[#allocation7_spill] sm:$0xff] %v10351_v21  ;;  %v7134_v14 = vrot.slane %v5731_v39, 9  ;;  %v8642_v20 = vld [vmem:[%s10887_s5 + $0x208] sm:$0xff]  }
 0x19e   : > { %8109 = vmatprep.mubr.bf16.mxu0 %v10945_v59  ;;  %v5854_v18 = vrot.slane %v10305_v11, 5  ;;  %v10365_v59 = vrot.slane %v5246_v23, 4  ;;  %v10374_v10 = vsel %vm9539_vm14, %v5846_v41, %v5847_v2  ;;  %v10376_v7 = vld [vmem:[#allocation2 + $0x98] sm:$0x1]  ;;  %v10379_v23 = vld [vmem:[#allocation2 + $0xa4] sm:$0x1]  ;;  %v10968_v30 = vcombine.low %v10326_v55, %v10334_v26 }
 0x19f   : > { %v10359_v29 = vsel %vm9539_vm14, %v5839_v5, %v5840_v16  ;;  %10948 = vst [vmem:[#allocation4_spill] sm:$0xff] %v10374_v10  ;;  %v7135_v16 = vrot.slane %v5732_v51, 9  ;;  %v10385_v39 = vsel %vm9539_vm14, %v7134_v14, %v5851_v57  ;;  %v5853_v5 = vrot.slane %v5851_v57, 4  ;;  %v10388_v2 = vld [vmem:[#allocation2 + $0xac] sm:$0xf] }
 0x1a0   : > { %10949 = vst [vmem:[#allocation8_spill] sm:$0xff] %v10385_v39  ;;  %v5861_v51 = vrot.slane %v10376_v7, 5  ;;  %v7136_v41 = vrot.slane %v5733_v24, 9  ;;  %v10395_v28 = vld [vmem:[#allocation2 + $0xb8] sm:$0xf]  ;;  %v7137_v57 = vrot.slane %v5734_v27, 9 }
 0x1a1   : > { %v10399_v14 = vsel %vm9539_vm14, %v5853_v5, %v5854_v18  ;;  %v5872_v0 = vrot.slane %v10388_v2, 5  ;;  %v5735_v8 = vld [vmem:[#allocation2 + $0xb4] sm:$0xe]  ;;  %v10406_v24 = vld [vmem:[#allocation2 + $0xb0] sm:$0x1]  ;;  %v5867_v40 = vrot.slane %v5865_v43, 4 }
 0x1a2   : > { %10951 = vst [vmem:[#allocation5_spill] sm:$0xff] %v10399_v14  ;;  %v10416_v27 = vsel %vm9539_vm14, %v7136_v41, %v5865_v43  ;;  %v5736_v48 = vld [vmem:[#allocation2 + $0xc0] sm:$0xe]  ;;  %v10418_v6 = vld [vmem:[#allocation2 + $0xbc] sm:$0x1]  ;;  %v5879_v41 = vrot.slane %v10395_v28, 5 }
 0x1a3   : > { %7922 = vmatmul.mubr.bf16.gmra.mrb[4].mxu1 %v8634_v13  ;;  %v10950_v13 = vld [vmem:[#allocation6_spill] sm:$0xff]  ;;  %10953 = vst [vmem:[#allocation3_spill] sm:$0xff] %v10416_v27  ;;  %v10422_v60 = vsel %vm9539_vm14, %v7137_v57, %v5872_v0  ;;  %v5874_v10 = vrot.slane %v5872_v0, 4  ;;  %v5882_v14 = vrot.slane %v10418_v6, 5  ;;  %v5737_v39 = vld [vmem:[#allocation2 + $0xcc] sm:$0xe] }
 0x1a4   : > { %7925 = vmatprep.mubr.bf16.mxu1 %v8635_v54  ;;  %v5858_v54 = vrot.slane %v10353_v33, 5  ;;  %10954 = vst [vmem:[#allocation10_spill] sm:$0xff] %v10422_v60  ;;  %v10431_v21 = vld [vmem:[#allocation2 + $0xc4] sm:$0xf]  ;;  %v10446_v57 = vld [vmem:[#allocation2 + $0xc8] sm:$0x1] }
 0x1a5   : > { %8110 = vmatmul.mubr.bf16.vlgmr.msra.gmra.mrb[0].mxu0 %v10220_v12  ;;  %v5868_v12 = vrot.slane %v10379_v23, 5  ;;  %v5260_v43 = vshll.u32 %v10345_v4, 16  ;;  %v8638_v60 = vld [vmem:[#allocation2 + $0x60] sm:$0xff]  }
 0x1a6   : > { %8113 = vmatprep.mubr.bf16.mxu0 %v10231_v47  ;;  %8142 = vmatpush3.bf16.msra.mxu0 %v10950_v13  ;;  %v8644_v47 = vld [vmem:[%s10887_s5 + $0x210] sm:$0xff]   ;;  %v10412_v18 = vsel %vm9539_vm14, %v7135_v16, %v5858_v54  ;;  %v5860_v5 = vrot.slane %v5858_v54, 4  ;;  %v5875_v13 = vrot.slane %v10406_v24, 5  ;;  %v7138_v54 = vrot.slane %v5735_v8, 9 }
 0x1a7   : > { %8143 = vmatprep.subr.bf16.mxu0 %v8642_v20  ;;  %10952 = vst [vmem:[#allocation9_spill] sm:$0xff] %v10412_v18  ;;  %v10437_v0 = vsel %vm9539_vm14, %v5867_v40, %v5868_v12  ;;  %v7139_v8 = vrot.slane %v5736_v48, 9  ;;  %v5881_v48 = vrot.slane %v5879_v41, 4  ;;  %v5886_v12 = vrot.slane %v10431_v21, 5 }
 0x1a8   : > { %v10427_v16 = vsel %vm9539_vm14, %v5860_v5, %v5861_v51  ;;  %10956 = vst [vmem:[#allocation11_spill] sm:$0xff] %v10437_v0  ;;  %v10441_v51 = vsel %vm9539_vm14, %v5874_v10, %v5875_v13  ;;  %v10448_v5 = vld [vmem:[#allocation2 + $0xd0] sm:$0xf]  ;;  %v10456_v10 = vsel %vm9539_vm14, %v7138_v54, %v5879_v41  ;;  %v5889_v13 = vrot.slane %v10446_v57, 5  ;;  %v5001_v0 = vld [vmem:[#allocation2 + $0x9c] sm:$0xf] }
 0x1a9   : > { %10955 = vst [vmem:[#allocation6_spill] sm:$0xff] %v10427_v16  ;;  %10957 = vst [vmem:[#allocation12_spill] sm:$0xff] %v10441_v51  ;;  %v7140_v16 = vrot.slane %v5737_v39, 9  ;;  %v5893_v18 = vrot.slane %v10448_v5, 5  ;;  %v5266_v40 = vshll.u32 %v10353_v33, 16  ;;  %v10468_v54 = vsel %vm9539_vm14, %v5881_v48, %v5882_v14 }
 0x1aa   : > { %8144 = vmatpush3.bf16.msra.mxu0 %v8642_v20  ;;  %v8646_v20 = vld [vmem:[%s10887_s5 + $0x218] sm:$0xff]   ;;  %10958 = vst [vmem:[#allocation13_spill] sm:$0xff] %v10456_v10  ;;  %10959 = vst [vmem:[#allocation14_spill] sm:$0xff] %v10468_v54  ;;  %v5270_v41 = vshrl.u32 %v10353_v33, 16  ;;  %v5888_v51 = vrot.slane %v5886_v12, 4  ;;  %v5239_v14 = vor.u32 %v10267_v22, %v10260_v36  ;;  %v5249_v48 = vor.u32 %v10365_v59, %v10343_v37  ;;  %v8640_v59 = vld [vmem:[#allocation2 + $0x6c] sm:$0xff]  }
 0x1ab   : > { %7926 = vmatmul.mubr.bf16.gmra.mrb[8].mxu1 %v8636_v1  ;;  %8145 = vmatprep.subr.bf16.mxu0 %v8644_v47  ;;  %v10458_v1 = vld [vmem:[#allocation2 + $0xd4] sm:$0x1]  ;;  %v10488_v33 = vsel %vm9539_vm14, %v7140_v16, %v5893_v18  ;;  %v10960_v36 = vor.u32 %v10224_v17, %v10222_v15  ;;  %v5262_v16 = vrot.slane %v5260_v43, 5  ;;  %v10503_v10 = vrot.slane %v5266_v40, 5 }
 0x1ac   : > { %7929 = vmatprep.mubr.bf16.mxu1 %v8637_v52  ;;  %v5896_v52 = vrot.slane %v10458_v1, 5  ;;  %v10501_v54 = vsel %vm9539_vm14, %v5888_v51, %v5889_v13  ;;  %v5272_v17 = vrot.slane %v5270_v41, 4  ;;  %v5221_v43 = vsel %vm8996_vm11, %v10254_v19, %v10222_v15  ;;  %v10982_v26 = vld [vmem:[#allocation10_spill] sm:$0xff] }
 0x1ad   : > { %8114 = vmatmul.mubr.bf16.gmra.mrb[4].mxu0 %v10233_v56  ;;  %v10477_v56 = vsel %vm9539_vm14, %v7139_v8, %v5886_v12  ;;  %v5207_v8 = vsel %vm8996_vm11, %v10252_v9, %v10250_v58  ;;  %v5226_v22 = vrot.slane %v10960_v36, 4  ;;  %v10961_v12 = vshrl.u32 %v10345_v4, 16 }
 0x1ae   : > { %8117 = vmatprep.mubr.bf16.mxu0 %v10235_v63  ;;  %8146 = vmatpush3.bf16.msra.mxu0 %v8644_v47  ;;  %v8648_v63 = vld [vmem:[%s10887_s5 + $0x220] sm:$0xff]   ;;  %v5895_v47 = vrot.slane %v5893_v18, 4  ;;  %v5004_v18 = vld [vmem:[#allocation2 + $0xa8] sm:$0xf]  ;;  %v7171_v27 = vcombine.low %v10477_v56, %v10501_v54  ;;  %v5281_v9 = vshrl.u32 %v5001_v0, 16  ;;  %v5284_v36 = vshll.u32 %v5001_v0, 16 }
 0x1af   : > { %8147 = vmatprep.subr.bf16.mxu0 %v8646_v20  ;;  %v5259_v39 = vrot.slane %v10961_v12, 4  ;;  %v5240_v51 = vrot.slane %v5239_v14, 4  ;;  %v5250_v40 = vrot.slane %v5249_v48, 4  ;;  %v10962_v13 = vshll.u32 %v10305_v11, 16  ;;  %v8650_v0 = vld [vmem:[%s10887_s5 + $0x228] sm:$0xff]  }
 0x1b0   : > { %v10509_v58 = vsel %vm9539_vm14, %v5895_v47, %v5896_v52  ;;  %v5305_v52 = vshrl.u32 %v5004_v18, 16  ;;  %v5308_v41 = vshll.u32 %v5004_v18, 16  ;;  %v5231_v15 = vsel %vm8996_vm11, %v5226_v22, %v10256_v31 }
 0x1b1   : > { %v7172_v4 = vcombine.low %v10488_v33, %v10509_v58  ;;  %v5254_v12 = vrot.slane %v10962_v13, 5  ;;  %v5276_v19 = vshll.u32 %v10376_v7, 16  ;;  %v5314_v11 = vshll.u32 %v10388_v2, 16 }
 0x1b2   : > { %8148 = vmatpush3.bf16.msra.mxu0 %v8646_v20  ;;  %v5290_v20 = vshll.u32 %v10355_v32, 16  ;;  %v5318_v14 = vshrl.u32 %v10388_v2, 16  ;;  %v5263_v48 = vor.u32 %v5262_v16, %v5259_v39  ;;  %v5273_v47 = vor.u32 %v5272_v17, %v10503_v10  ;;  %v8652_v39 = vld [vmem:[%s10887_s5 + $0x230] sm:$0xff]  }
 0x1b3   : > { %7930 = vmatmul.mubr.bf16.gmra.mrb[12].mxu1 %v8638_v60  ;;  %8149 = vmatprep.subr.bf16.mxu0 %v8648_v63  ;;  %v5294_v60 = vshrl.u32 %v10355_v32, 16  ;;  %v5283_v32 = vrot.slane %v5281_v9, 4  ;;  %v5245_v7 = vsel %vm8996_vm11, %v5240_v51, %v10343_v37  ;;  %v5255_v2 = vsel %vm8996_vm11, %v5250_v40, %v5254_v12  ;;  %v5007_v9 = vld [vmem:[#allocation2 + $0xb4] sm:$0xf] }
 0x1b4   : > { %7933 = vmatprep.mubr.bf16.mxu1 %v8640_v59  ;;  %v5286_v59 = vrot.slane %v5284_v36, 5  ;;  %v10546_v22 = vrot.slane %v5290_v20, 5  ;;  %v5307_v18 = vrot.slane %v5305_v52, 4  ;;  %v10548_v17 = vrot.slane %v5314_v11, 5  ;;  %v8654_v20 = vld [vmem:[%s10887_s5 + $0x238] sm:$0xff]  }
 0x1b5   : > { %8118 = vmatmul.mubr.bf16.gmra.mrb[8].mxu0 %v10242_v38  ;;  %v10963_v38 = vsel %vm8996_vm11, %v10203_v46, %v10167_v50  ;;  %v5296_v16 = vrot.slane %v5294_v60, 4  ;;  %v5310_v50 = vrot.slane %v5308_v41, 5  ;;  %v7109_v46 = vcombine.low %v5221_v43, %v5231_v15  ;;  %v5010_v15 = vld [vmem:[#allocation2 + $0xc0] sm:$0xf] }
 0x1b6   : > { %8121 = vmatprep.mubr.bf16.mxu0 %v10244_v53  ;;  %8150 = vmatpush3.bf16.msra.mxu0 %v8648_v63  ;;  %v7108_v31 = vcombine.low %v10963_v38, %v5207_v8  ;;  %v8641_v53 = vld [vmem:[#allocation2 + $0x78] sm:$0xff]   ;;  %v8643_v63 = vld [vmem:[#allocation2 + $0x84] sm:$0xff]   ;;  %v5278_v8 = vrot.slane %v5276_v19, 5  ;;  %v5320_v37 = vrot.slane %v5318_v14, 4  ;;  %v5264_v36 = vrot.slane %v5263_v48, 4 }
 0x1b7   : > { %8151 = vmatprep.subr.bf16.mxu0 %v8650_v0  ;;  %v5274_v51 = vrot.slane %v5273_v47, 4  ;;  %v5287_v40 = vor.u32 %v5286_v59, %v5283_v32  ;;  %v5300_v13 = vshll.u32 %v10379_v23, 16  ;;  %v7110_v12 = vcombine.low %v5245_v7, %v5255_v2  ;;  %v8645_v32 = vld [vmem:[#allocation2 + $0x90] sm:$0xff]  }
 0x1b8   : > { %v5297_v43 = vor.u32 %v5296_v16, %v10546_v22  ;;  %v5311_v60 = vor.u32 %v5310_v50, %v5307_v18  ;;  %v5324_v52 = vshll.u32 %v10406_v24, 16  ;;  %v5329_v41 = vshrl.u32 %v5007_v9, 16 }
 0x1b9   : > { %v5321_v19 = vor.u32 %v5320_v37, %v10548_v17  ;;  %v5332_v23 = vshll.u32 %v5007_v9, 16  ;;  %v5342_v11 = vshrl.u32 %v10395_v28, 16  ;;  %v5269_v14 = vsel %vm8996_vm11, %v5264_v36, %v10503_v10 }
 0x1ba   : > { %8152 = vmatpush3.bf16.msra.mxu0 %v8650_v0  ;;  %v5338_v0 = vshll.u32 %v10395_v28, 16  ;;  %v5279_v48 = vsel %vm8996_vm11, %v5274_v51, %v5278_v8  ;;  %v5288_v47 = vrot.slane %v5287_v40, 4  ;;  %v5302_v24 = vrot.slane %v5300_v13, 5  ;;  %v5013_v51 = vld [vmem:[#allocation2 + $0xcc] sm:$0xf] }
 0x1bb   : > { %7934 = vmatmul.mubr.bf16.gmra.mrb[16].mxu1 %v8641_v53  ;;  %8153 = vmatprep.subr.bf16.mxu0 %v8652_v39  ;;  %v5353_v59 = vshrl.u32 %v5010_v15, 16  ;;  %v5356_v38 = vshll.u32 %v5010_v15, 16  ;;  %v5366_v7 = vshrl.u32 %v10431_v21, 16  ;;  %v5298_v28 = vrot.slane %v5297_v43, 4 }
 0x1bc   : > { %7937 = vmatprep.mubr.bf16.mxu1 %v8643_v63  ;;  %v5312_v2 = vrot.slane %v5311_v60, 4  ;;  %v5326_v53 = vrot.slane %v5324_v52, 5  ;;  %v8647_v63 = vld [vmem:[#allocation2 + $0x9c] sm:$0xff]   ;;  %v5331_v16 = vrot.slane %v5329_v41, 4  ;;  %v5322_v10 = vrot.slane %v5321_v19, 4 }
 0x1bd   : > { %8122 = vmatmul.mubr.bf16.gmra.mrb[12].mxu0 %v7108_v31  ;;  %v5362_v31 = vshll.u32 %v10431_v21, 16  ;;  %v5334_v18 = vrot.slane %v5332_v23, 5  ;;  %v5340_v50 = vrot.slane %v5338_v0, 5  ;;  %v7111_v8 = vcombine.low %v5269_v14, %v5279_v48  ;;  %v8649_v23 = vld [vmem:[#allocation2 + $0xa8] sm:$0xff]   ;;  %v8651_v14 = vld [vmem:[#allocation2 + $0xb4] sm:$0xff]  }
 0x1be   : > { %8125 = vmatprep.mubr.bf16.mxu0 %v7109_v46  ;;  %8154 = vmatpush3.bf16.msra.mxu0 %v8652_v39  ;;  %v5344_v46 = vrot.slane %v5342_v11, 4  ;;  %v5355_v39 = vrot.slane %v5353_v59, 4  ;;  %v5358_v37 = vrot.slane %v5356_v38, 5  ;;  %v5368_v36 = vrot.slane %v5366_v7, 4 }
 0x1bf   : > { %8155 = vmatprep.subr.bf16.mxu0 %v8654_v20  ;;  %v5364_v9 = vrot.slane %v5362_v31, 5  ;;  %v5293_v21 = vsel %vm8996_vm11, %v5288_v47, %v10546_v22  ;;  %v5303_v40 = vsel %vm8996_vm11, %v5298_v28, %v5302_v24  ;;  %v5348_v13 = vshll.u32 %v10418_v6, 16 }
 0x1c0   : > { %v5327_v43 = vsel %vm8996_vm11, %v5322_v10, %v5326_v53  ;;  %v5335_v60 = vor.u32 %v5334_v18, %v5331_v16  ;;  %v5345_v52 = vor.u32 %v5344_v46, %v5340_v50  ;;  %v5377_v41 = vshrl.u32 %v5013_v51, 16  ;;  %v8653_v46 = vld [vmem:[#allocation2 + $0xc0] sm:$0xff]  }
 0x1c1   : > { %v5380_v15 = vshll.u32 %v5013_v51, 16  ;;  %v5386_v22 = vshll.u32 %v10448_v5, 16  ;;  %v5390_v19 = vshrl.u32 %v10448_v5, 16  ;;  %v5359_v0 = vor.u32 %v5358_v37, %v5355_v39  ;;  %v5722_v37 = vld [vmem:[#allocation2 + $0x18] sm:$0xe] }
 0x1c2   : > { %8156 = vmatpush3.bf16.msra.mxu0 %v8654_v20  ;;  %v5317_v20 = vsel %vm8996_vm11, %v5312_v2, %v10548_v17  ;;  %v5369_v6 = vor.u32 %v5368_v36, %v5364_v9  ;;  %v7112_v11 = vcombine.low %v5293_v21, %v5303_v40  ;;  %v5336_v48 = vrot.slane %v5335_v60, 4 }
 0x1c3   : > { %7938 = vmatmul.mubr.bf16.gmra.mrb[20].mxu1 %v8645_v32  ;;  %v7113_v17 = vcombine.low %v5317_v20, %v5327_v43  ;;  %v5346_v47 = vrot.slane %v5345_v52, 4  ;;  %v5350_v24 = vrot.slane %v5348_v13, 5  ;;  %v5379_v32 = vrot.slane %v5377_v41, 4  ;;  %v8726_v43 = vld [vmem:[#allocation2 + $0x20] sm:$0x1] }
 0x1c4   : > { %7941 = vmatprep.mubr.bf16.mxu1 %v8647_v63  ;;  %v5382_v59 = vrot.slane %v5380_v15, 5  ;;  %v5388_v38 = vrot.slane %v5386_v22, 5  ;;  %v5392_v31 = vrot.slane %v5390_v19, 4  ;;  %v5360_v7 = vrot.slane %v5359_v0, 4  ;;  %v8727_v52 = vld [vmem:[#allocation2 + $0x28] sm:$0xf] }
 0x1c5   : > { %8126 = vmatmul.mubr.bf16.gmra.mrb[16].mxu0 %v7110_v12  ;;  %v5372_v12 = vshll.u32 %v10446_v57, 16  ;;  %v5370_v28 = vrot.slane %v5369_v6, 4  ;;  %v5341_v5 = vsel %vm8996_vm11, %v5336_v48, %v5340_v50  ;;  %v5351_v57 = vsel %vm8996_vm11, %v5346_v47, %v5350_v24  ;;  %v5723_v19 = vld [vmem:[#allocation2 + $0x24] sm:$0xe] }
 0x1c6   : > { %8129 = vmatprep.mubr.bf16.mxu0 %v7111_v8  ;;  %v5383_v53 = vor.u32 %v5382_v59, %v5379_v32  ;;  %v5393_v63 = vor.u32 %v5392_v31, %v5388_v38  ;;  %v5396_v16 = vshll.u32 %v10458_v1, 16  ;;  %v5365_v10 = vsel %vm8996_vm11, %v5360_v7, %v5364_v9  ;;  %v8725_v8 = vld [vmem:[#allocation2 + $0x1c] sm:$0xf]  ;;  %v10974_v31 = vld [vmem:[#allocation5_spill] sm:$0xff]  ;;  %v10977_v7 = vld [vmem:[#allocation6_spill] sm:$0xff] }
 0x1c7   : > { %v5374_v2 = vrot.slane %v5372_v12, 5  ;;  %v5788_v39 = vrot.slane %v8725_v8, 5  ;;  %v7114_v36 = vcombine.low %v5341_v5, %v5351_v57  ;;  %v7125_v13 = vrot.slane %v5722_v37, 9  ;;  %v10986_v5 = vld [vmem:[#allocation14_spill] sm:$0xff] }
 0x1c8   : > { %v5384_v51 = vrot.slane %v5383_v53, 4  ;;  %v5394_v21 = vrot.slane %v5393_v63, 4  ;;  %v5398_v40 = vrot.slane %v5396_v16, 5  ;;  %v5791_v1 = vrot.slane %v8726_v43, 5 }
 0x1c9   : > { %v5375_v18 = vsel %vm8996_vm11, %v5370_v28, %v5374_v2  ;;  %v5790_v20 = vrot.slane %v5788_v39, 4  ;;  %v5795_v41 = vrot.slane %v8727_v52, 5  ;;  %v5789_v15 = vsel %vm9539_vm14, %v7125_v13, %v5788_v39  ;;  %v10980_v28 = vld [vmem:[#allocation11_spill] sm:$0xff]  ;;  %v10983_v2 = vld [vmem:[#allocation12_spill] sm:$0xff] }
 0x1ca   : > { %v7115_v50 = vcombine.low %v5365_v10, %v5375_v18  ;;  %v5389_v9 = vsel %vm8996_vm11, %v5384_v51, %v5388_v38  ;;  %v5399_v60 = vsel %vm8996_vm11, %v5394_v21, %v5398_v40  ;;  %v7126_v6 = vrot.slane %v5723_v19, 9  ;;  %v10971_v38 = vld [vmem:[#allocation4_spill] sm:$0xff] }
 0x1cb   : > { %7942 = vmatmul.mubr.bf16.gmra.mrb[24].mxu1 %v8649_v23  ;;  %v5792_v22 = vsel %vm9539_vm14, %v5790_v20, %v5791_v1  ;;  %v7116_v23 = vcombine.low %v5389_v9, %v5399_v60  ;;  %v5797_v12 = vrot.slane %v5795_v41, 4  ;;  %v10964_v47 = vcombine.low %v10277_v49, %v10288_v3  ;;  %v10970_v3 = vld [vmem:[#allocation7_spill] sm:$0xff] }
 0x1cc   : > { %7945 = vmatprep.mubr.bf16.mxu1 %v8651_v14  ;;  %v7157_v0 = vcombine.low %v5789_v15, %v5792_v22  ;;  %v5796_v44 = vsel %vm9539_vm14, %v7126_v6, %v5795_v41  ;;  %v10965_v24 = vcombine.low %v10283_v42, %v10299_v25  ;;  %v10966_v32 = vcombine.low %v10292_v34, %v10311_v45  ;;  %v10973_v25 = vld [vmem:[#allocation8_spill] sm:$0xff]  ;;  %v10976_v45 = vld [vmem:[#allocation9_spill] sm:$0xff] }
 0x1cd   : > { %8130 = vmatmul.mubr.bf16.gmra.mrb[20].mxu0 %v7112_v11  ;;  %v8728_v11 = vld [vmem:[#allocation2 + $0x2c] sm:$0x1]  ;;  %v10967_v59 = vcombine.low %v10303_v35, %v10318_v61  ;;  %v10969_v49 = vcombine.low %v10338_v62, %v10359_v29  ;;  %v10972_v42 = vcombine.low %v10970_v3, %v10971_v38  ;;  %v10975_v34 = vcombine.low %v10973_v25, %v10974_v31  ;;  %v10979_v61 = vld [vmem:[#allocation3_spill] sm:$0xff] }
 0x1ce   : > { %8133 = vmatprep.mubr.bf16.mxu0 %v7113_v17  ;;  %v5798_v14 = vrot.slane %v8728_v11, 5  ;;  %v10978_v35 = vcombine.low %v10976_v45, %v10977_v7  ;;  %v10981_v55 = vcombine.low %v10979_v61, %v10980_v28  ;;  %v10984_v62 = vcombine.low %v10982_v26, %v10983_v2  ;;  %v10985_v29 = vld [vmem:[#allocation13_spill] sm:$0xff] }
 0x1cf   : > { %v10987_v57 = vcombine.low %v10985_v29, %v10986_v5 }
 0x1d0   : > { %v5799_v17 = vsel %vm9539_vm14, %v5797_v12, %v5798_v14 }
 0x1d1   : > { %v7158_v48 = vcombine.low %v5796_v44, %v5799_v17 }
 0x1d3   : > { %7946 = vmatmul.mubr.bf16.gmra.mrb[28].mxu1 %v8653_v46 }
 0x1d5   : > { %8134 = vmatmul.mubr.bf16.gmra.mrb[24].mxu0 %v7114_v36 }
 0x1d6   : > { %8137 = vmatprep.mubr.bf16.mxu0 %v7115_v50  ;;  %v8754_v50 = vmov 1.0  }
 0x1d7   : > { %6444 = vmatprep.mubr.f32.mxu1 %v8754_v50 }
 0x1dd   : > { %8138 = vmatmul.mubr.bf16.gmra.mrb[28].mxu0 %v7116_v23 }
 0x1de   : > { %8157 = vmatprep.mubr.bf16.mxu0 %v7157_v0 }
 0x1e5   : > { %8158 = vmatmul.mubr.bf16.vlgmr.msra.gmra.mrb[0].mxu0 %v7158_v48 }
 0x1e6   : > { %8161 = vmatprep.mubr.bf16.mxu0 %v10964_v47 }
 0x1ed   : > { %8162 = vmatmul.mubr.bf16.gmra.mrb[4].mxu0 %v10965_v24 }
 0x1ee   : > { %8165 = vmatprep.mubr.bf16.mxu0 %v10966_v32 }
 0x1f5   : > { %8166 = vmatmul.mubr.bf16.gmra.mrb[8].mxu0 %v10967_v59 }
 0x1f6   : > { %8169 = vmatprep.mubr.bf16.mxu0 %v10968_v30 }
 0x1fd   : > { %8170 = vmatmul.mubr.bf16.gmra.mrb[12].mxu0 %v10969_v49 }
 0x1fe   : > { %8173 = vmatprep.mubr.bf16.mxu0 %v10972_v42 }
 0x205   : > { %8174 = vmatmul.mubr.bf16.gmra.mrb[16].mxu0 %v10975_v34 }
 0x206   : > { %8177 = vmatprep.mubr.bf16.mxu0 %v10978_v35 }
 0x20d   : > { %8178 = vmatmul.mubr.bf16.gmra.mrb[20].mxu0 %v10981_v55 }
 0x20e   : > { %8181 = vmatprep.mubr.bf16.mxu0 %v10984_v62 }
 0x215   : > { %8182 = vmatmul.mubr.bf16.gmra.mrb[24].mxu0 %v10987_v57 }
 0x216   : > { %8185 = vmatprep.mubr.bf16.mxu0 %v7171_v27 }
 0x21d   : > { %8186 = vmatmul.mubr.bf16.gmra.mrb[28].mxu0 %v7172_v4 }
 0x26e   : > { %v7919_v53 = vpop.f32.mrb[0].mxu1 }
 0x26f   : > { %v3170_v63 = vpop.f32.mrb[1].mxu1 }
 0x270   : > { %v7920_v16 = vpop.f32.mrb[2].mxu1 }
 0x271   : > { %v3173_v10 = vpop.f32.mrb[3].mxu1 }
 0x276   : > { %v7923_v18 = vpop.f32.mrb[4].mxu1 }
 0x277   : > { %v3186_v46 = vpop.f32.mrb[5].mxu1 }
 0x278   : > { %v7924_v8 = vpop.f32.mrb[6].mxu1 }
 0x279   : > { %v3189_v39 = vpop.f32.mrb[7].mxu1 }
 0x27e   : > { %v10643_v37 = vpop.f32.mrb[8].mxu1 }
 0x27f   : > { %v10645_v36 = vpop.f32.mrb[9].mxu1 }
 0x280   : > { %v10648_v27 = vpop.f32.mrb[10].mxu1 }
 0x281   : > { %v10650_v54 = vpop.f32.mrb[11].mxu1 }
 0x286   : > { %v10652_v56 = vpop.f32.mrb[12].mxu1 }
 0x287   : > { %v10654_v33 = vpop.f32.mrb[13].mxu1 }
 0x288   : > { %v10656_v58 = vpop.f32.mrb[14].mxu1 }
 0x289   : > { %v10658_v4 = vpop.f32.mrb[15].mxu1 }
 0x28e   : > { %v10660_v51 = vpop.f32.mrb[16].mxu1 }
 0x28f   : > { %v10662_v21 = vpop.f32.mrb[17].mxu1 }
 0x290   : > { %v10664_v40 = vpop.f32.mrb[18].mxu1 }
 0x291   : > { %v10666_v13 = vpop.f32.mrb[19].mxu1 }
 0x296   : > { %v10668_v20 = vpop.f32.mrb[20].mxu1 }
 0x297   : > { %v10670_v43 = vpop.f32.mrb[21].mxu1 }
 0x298   : > { %v10672_v1 = vpop.f32.mrb[22].mxu1 }
 0x299   : > { %v10674_v9 = vpop.f32.mrb[23].mxu1 }
 0x29e   : > { %v10676_v60 = vpop.f32.mrb[24].mxu1 }
 0x29f   : > { %v10678_v52 = vpop.f32.mrb[25].mxu1 }
 0x2a0   : > { %v10680_v41 = vpop.f32.mrb[26].mxu1 }
 0x2a1   : > { %v10682_v15 = vpop.f32.mrb[27].mxu1 }
 0x2a6   : > { %v10684_v22 = vpop.f32.mrb[28].mxu1 }
 0x2a7   : > { %v10686_v19 = vpop.f32.mrb[29].mxu1 }
 0x2a8   : > { %v10688_v23 = vpop.f32.mrb[30].mxu1 }
 0x2a9   : > { %v10690_v0 = vpop.f32.mrb[31].mxu1 }
 0x2b8   : > { %v8159_v6 = vpop.f32.mrb[0].mxu0 }
 0x2b9   : > { %v8253_v12 = vadd.f32 %v8159_v6, %v7919_v53  ;;  %v6061_v11 = vpop.f32.mrb[1].mxu0 }
 0x2ba   : > { %v8254_v14 = vadd.f32 %v6061_v11, %v3170_v63  ;;  %v8160_v44 = vpop.f32.mrb[2].mxu0 }
 0x2bb   : > { %v8255_v17 = vadd.f32 %v8160_v44, %v7920_v16  ;;  %v6064_v48 = vpop.f32.mrb[3].mxu0  ;;  %v10698_v24 = vmul.f32 %v8253_v12, %v8253_v12 }
 0x2bc   : > { %v8256_v47 = vadd.f32 %v6064_v48, %v3173_v10  ;;  %v10704_v30 = vmul.f32 %v8254_v14, %v8254_v14 }
 0x2bd   : > { %v10700_v32 = vpack.c.bf16 %v8255_v17, %v8253_v12  ;;  %v10702_v59 = vmul.f32 %v8255_v17, %v8255_v17 }
 0x2be   : > { %v10706_v49 = vpack.c.bf16 %v8256_v47, %v8254_v14  ;;  %v10708_v3 = vmul.f32 %v8256_v47, %v8256_v47 }
 0x2bf   : > { %7456 = vst [vmem:[%s10696_s20 + $0x8] sm:$0xff] %v10700_v32   ;;  %v8227_v38 = vpack.c.bf16 %v10702_v59, %v10698_v24 }
 0x2c0   : > { %7364 = vst [vmem:[%s10696_s20] sm:$0xff] %v10706_v49   ;;  %v8223_v42 = vpack.c.bf16 %v10708_v3, %v10704_v30  ;;  %v8163_v25 = vpop.f32.mrb[4].mxu0 }
 0x2c1   : > { %v8257_v31 = vadd.f32 %v8163_v25, %v7923_v18  ;;  %v6077_v34 = vpop.f32.mrb[5].mxu0 }
 0x2c2   : > { %v8258_v45 = vadd.f32 %v6077_v34, %v3186_v46  ;;  %v8164_v7 = vpop.f32.mrb[6].mxu0 }
 0x2c3   : > { %v8259_v35 = vadd.f32 %v8164_v7, %v7924_v8  ;;  %v6080_v61 = vpop.f32.mrb[7].mxu0  ;;  %v10718_v55 = vmul.f32 %v8257_v31, %v8257_v31 }
 0x2c4   : > { %v8260_v28 = vadd.f32 %v6080_v61, %v3189_v39  ;;  %v10724_v62 = vmul.f32 %v8258_v45, %v8258_v45 }
 0x2c5   : > { %v10720_v26 = vpack.c.bf16 %v8259_v35, %v8257_v31  ;;  %v10722_v2 = vmul.f32 %v8259_v35, %v8259_v35 }
 0x2c6   : > { %v10726_v29 = vpack.c.bf16 %v8260_v28, %v8258_v45  ;;  %v10728_v5 = vmul.f32 %v8260_v28, %v8260_v28 }
 0x2c7   : > { %7458 = vst [vmem:[%s10696_s20 + $0x18] sm:$0xff] %v10720_v26   ;;  %v8235_v57 = vpack.c.bf16 %v10722_v2, %v10718_v55 }
 0x2c8   : > { %7457 = vst [vmem:[%s10696_s20 + $0x10] sm:$0xff] %v10726_v29   ;;  %v8231_v53 = vpack.c.bf16 %v10728_v5, %v10724_v62  ;;  %v8167_v63 = vpop.f32.mrb[8].mxu0 }
 0x2c9   : > { %v8261_v16 = vadd.f32 %v8167_v63, %v10643_v37  ;;  %v6093_v10 = vpop.f32.mrb[9].mxu0 }
 0x2ca   : > { %v8262_v18 = vadd.f32 %v6093_v10, %v10645_v36  ;;  %v8168_v46 = vpop.f32.mrb[10].mxu0 }
 0x2cb   : > { %v8263_v8 = vadd.f32 %v8168_v46, %v10648_v27  ;;  %v6096_v39 = vpop.f32.mrb[11].mxu0  ;;  %v10742_v12 = vmul.f32 %v8261_v16, %v8261_v16 }
 0x2cc   : > { %v8264_v6 = vadd.f32 %v6096_v39, %v10650_v54  ;;  %v10748_v44 = vmul.f32 %v8262_v18, %v8262_v18 }
 0x2cd   : > { %v10744_v11 = vpack.c.bf16 %v8263_v8, %v8261_v16  ;;  %v10746_v14 = vmul.f32 %v8263_v8, %v8263_v8 }
 0x2ce   : > { %v10750_v17 = vpack.c.bf16 %v8264_v6, %v8262_v18  ;;  %v10752_v37 = vmul.f32 %v8264_v6, %v8264_v6 }
 0x2cf   : > { %7460 = vst [vmem:[%s10696_s20 + $0x28] sm:$0xff] %v10744_v11   ;;  %v8243_v36 = vpack.c.bf16 %v10746_v14, %v10742_v12 }
 0x2d0   : > { %7459 = vst [vmem:[%s10696_s20 + $0x20] sm:$0xff] %v10750_v17   ;;  %v8239_v27 = vpack.c.bf16 %v10752_v37, %v10748_v44  ;;  %v8171_v54 = vpop.f32.mrb[12].mxu0 }
 0x2d1   : > { %v8265_v48 = vadd.f32 %v8171_v54, %v10652_v56  ;;  %v6109_v47 = vpop.f32.mrb[13].mxu0 }
 0x2d2   : > { %v8266_v25 = vadd.f32 %v6109_v47, %v10654_v33  ;;  %v8172_v31 = vpop.f32.mrb[14].mxu0 }
 0x2d3   : > { %v8267_v34 = vadd.f32 %v8172_v31, %v10656_v58  ;;  %v6112_v45 = vpop.f32.mrb[15].mxu0  ;;  %v10766_v35 = vmul.f32 %v8265_v48, %v8265_v48 }
 0x2d4   : > { %v8268_v7 = vadd.f32 %v6112_v45, %v10658_v4  ;;  %v10772_v63 = vmul.f32 %v8266_v25, %v8266_v25 }
 0x2d5   : > { %v10768_v61 = vpack.c.bf16 %v8267_v34, %v8265_v48  ;;  %v10770_v28 = vmul.f32 %v8267_v34, %v8267_v34 }
 0x2d6   : > { %v10774_v16 = vpack.c.bf16 %v8268_v7, %v8266_v25  ;;  %v10776_v56 = vmul.f32 %v8268_v7, %v8268_v7 }
 0x2d7   : > { %7462 = vst [vmem:[%s10696_s20 + $0x38] sm:$0xff] %v10768_v61   ;;  %v8251_v33 = vpack.c.bf16 %v10770_v28, %v10766_v35 }
 0x2d8   : > { %7461 = vst [vmem:[%s10696_s20 + $0x30] sm:$0xff] %v10774_v16   ;;  %v8247_v58 = vpack.c.bf16 %v10776_v56, %v10772_v63  ;;  %v8175_v4 = vpop.f32.mrb[16].mxu0 }
 0x2d9   : > { %v8269_v10 = vadd.f32 %v8175_v4, %v10660_v51  ;;  %v6125_v18 = vpop.f32.mrb[17].mxu0 }
 0x2da   : > { %v8270_v46 = vadd.f32 %v6125_v18, %v10662_v21  ;;  %v8176_v8 = vpop.f32.mrb[18].mxu0 }
 0x2db   : > { %v8271_v39 = vadd.f32 %v8176_v8, %v10664_v40  ;;  %v6128_v6 = vpop.f32.mrb[19].mxu0  ;;  %v10790_v48 = vmul.f32 %v8269_v10, %v8269_v10 }
 0x2dc   : > { %v8272_v54 = vadd.f32 %v6128_v6, %v10666_v13  ;;  %v10794_v31 = vmul.f32 %v8270_v46, %v8270_v46 }
 0x2dd   : > { %v7408_v47 = vpack.c.bf16 %v8271_v39, %v8269_v10  ;;  %v10792_v25 = vmul.f32 %v8271_v39, %v8271_v39 }
 0x2de   : > { %v7403_v34 = vpack.c.bf16 %v8272_v54, %v8270_v46  ;;  %v10796_v45 = vmul.f32 %v8272_v54, %v8272_v54 }
 0x2df   : > { %7464 = vst [vmem:[%s10696_s20 + $0x48] sm:$0xff] %v7408_v47   ;;  %v8225_v51 = vpack.c.bf16 %v10792_v25, %v10790_v48 }
 0x2e0   : > { %7463 = vst [vmem:[%s10696_s20 + $0x40] sm:$0xff] %v7403_v34   ;;  %v8179_v21 = vpop.f32.mrb[20].mxu0  ;;  %8190 = vmatprep.subr.bf16.mxu1 %v7403_v34  ;;  %v8221_v40 = vpack.c.bf16 %v10796_v45, %v10794_v31 }
 0x2e1   : > { %v8273_v13 = vadd.f32 %v8179_v21, %v10668_v20  ;;  %v6141_v7 = vpop.f32.mrb[21].mxu0  ;;  %8192 = vmatpush3.bf16.msra.mxu1 %v10706_v49 }
 0x2e2   : > { %v8274_v4 = vadd.f32 %v6141_v7, %v10670_v43  ;;  %v8180_v10 = vpop.f32.mrb[22].mxu0  ;;  %8194 = vmatprep.subr.bf16.mxu1 %v7408_v47 }
 0x2e3   : > { %v8275_v18 = vadd.f32 %v8180_v10, %v10672_v1  ;;  %v6144_v46 = vpop.f32.mrb[23].mxu0  ;;  %v10809_v39 = vmul.f32 %v8273_v13, %v8273_v13 }
 0x2e4   : > { %v8276_v8 = vadd.f32 %v6144_v46, %v10674_v9  ;;  %v6471_v20 = vmul.f32 %v8274_v4, %v8274_v4 }
 0x2e5   : > { %v7418_v6 = vpack.c.bf16 %v8275_v18, %v8273_v13  ;;  %v10811_v54 = vmul.f32 %v8275_v18, %v8275_v18  ;;  %8196 = vmatpush3.bf16.msra.mxu1 %v10700_v32 }
 0x2e6   : > { %v7413_v34 = vpack.c.bf16 %v8276_v8, %v8274_v4  ;;  %v6472_v49 = vmul.f32 %v8276_v8, %v8276_v8 }
 0x2e7   : > { %7466 = vst [vmem:[%s10696_s20 + $0x58] sm:$0xff] %v7418_v6   ;;  %v8233_v43 = vpack.c.bf16 %v10811_v54, %v10809_v39 }
 0x2e8   : > { %7465 = vst [vmem:[%s10696_s20 + $0x50] sm:$0xff] %v7413_v34   ;;  %v8183_v47 = vpop.f32.mrb[24].mxu0  ;;  %8198 = vmatprep.subr.bf16.mxu1 %v7413_v34  ;;  %v8229_v1 = vpack.c.bf16 %v6472_v49, %v6471_v20 }
 0x2e9   : > { %v8277_v9 = vadd.f32 %v8183_v47, %v10676_v60  ;;  %v6157_v21 = vpop.f32.mrb[25].mxu0  ;;  %8200 = vmatpush3.bf16.msra.mxu1 %v10726_v29 }
 0x2ea   : > { %v8278_v32 = vadd.f32 %v6157_v21, %v10678_v52  ;;  %v8184_v13 = vpop.f32.mrb[26].mxu0  ;;  %8202 = vmatprep.subr.bf16.mxu1 %v7418_v6 }
 0x2eb   : > { %v8279_v7 = vadd.f32 %v8184_v13, %v10680_v41  ;;  %v6160_v4 = vpop.f32.mrb[27].mxu0  ;;  %v6477_v18 = vmul.f32 %v8277_v9, %v8277_v9 }
 0x2ec   : > { %v8280_v10 = vadd.f32 %v6160_v4, %v10682_v15  ;;  %v6475_v60 = vmul.f32 %v8278_v32, %v8278_v32 }
 0x2ed   : > { %v7428_v46 = vpack.c.bf16 %v8279_v7, %v8277_v9  ;;  %v6478_v8 = vmul.f32 %v8279_v7, %v8279_v7  ;;  %8204 = vmatpush3.bf16.msra.mxu1 %v10720_v26 }
 0x2ee   : > { %v7423_v39 = vpack.c.bf16 %v8280_v10, %v8278_v32  ;;  %v6476_v54 = vmul.f32 %v8280_v10, %v8280_v10 }
 0x2ef   : > { %7468 = vst [vmem:[%s10696_s20 + $0x68] sm:$0xff] %v7428_v46   ;;  %v8241_v29 = vpack.c.bf16 %v6478_v8, %v6477_v18 }
 0x2f0   : > { %7467 = vst [vmem:[%s10696_s20 + $0x60] sm:$0xff] %v7423_v39   ;;  %v8187_v20 = vpop.f32.mrb[28].mxu0  ;;  %8206 = vmatprep.subr.bf16.mxu1 %v7423_v39  ;;  %v8237_v52 = vpack.c.bf16 %v6476_v54, %v6475_v60 }
 0x2f1   : > { %v8281_v6 = vadd.f32 %v8187_v20, %v10684_v22  ;;  %v6173_v41 = vpop.f32.mrb[29].mxu0  ;;  %8208 = vmatpush3.bf16.msra.mxu1 %v10750_v17 }
 0x2f2   : > { %v8282_v15 = vadd.f32 %v6173_v41, %v10686_v19  ;;  %v8188_v34 = vpop.f32.mrb[30].mxu0  ;;  %8210 = vmatprep.subr.bf16.mxu1 %v7428_v46 }
 0x2f3   : > { %v8283_v26 = vadd.f32 %v8188_v34, %v10688_v23  ;;  %v6176_v49 = vpop.f32.mrb[31].mxu0  ;;  %v6481_v9 = vmul.f32 %v8281_v6, %v8281_v6 }
 0x2f4   : > { %v8284_v47 = vadd.f32 %v6176_v49, %v10690_v0  ;;  %v6479_v22 = vmul.f32 %v8282_v15, %v8282_v15 }
 0x2f5   : > { %v7438_v21 = vpack.c.bf16 %v8283_v26, %v8281_v6  ;;  %v6482_v32 = vmul.f32 %v8283_v26, %v8283_v26  ;;  %8212 = vmatpush3.bf16.msra.mxu1 %v10744_v11 }
 0x2f6   : > { %v7433_v13 = vpack.c.bf16 %v8284_v47, %v8282_v15  ;;  %v6480_v7 = vmul.f32 %v8284_v47, %v8284_v47 }
 0x2f7   : > { %7470 = vst [vmem:[%s10696_s20 + $0x78] sm:$0xff] %v7438_v21   ;;  %v8249_v17 = vpack.c.bf16 %v6482_v32, %v6481_v9 }
 0x2f8   : > { %7469 = vst [vmem:[%s10696_s20 + $0x70] sm:$0xff] %v7433_v13   ;;  %8214 = vmatprep.subr.bf16.mxu1 %v7433_v13  ;;  %v8245_v19 = vpack.c.bf16 %v6480_v7, %v6479_v22 }
 0x2f9   : > { %8216 = vmatpush3.bf16.msra.mxu1 %v10774_v16 }
 0x2fa   : > { %8218 = vmatprep.subr.bf16.mxu1 %v7438_v21 }
 0x2fd   : > { %8220 = vmatpush3.bf16.msra.mxu1 %v10768_v61 }
 0x2fe   : > { %8222 = vmatprep.subr.bf16.mxu1 %v8221_v40 }
 0x300   : > { %6445 = vmatmul.mubr.f32.vlgmr.msra.gmra.mrb[32].mxu1 %v8754_v50 }
 0x301   : > { %8224 = vmatpush3.bf16.msra.mxu1 %v8223_v42  ;;  %6547 = vmatprep.mubr.f32.mxu1 %v8754_v50 }
 0x302   : > { %8226 = vmatprep.subr.bf16.mxu1 %v8225_v51 }
 0x305   : > { %8228 = vmatpush3.bf16.msra.mxu1 %v8227_v38 }
 0x306   : > { %8230 = vmatprep.subr.bf16.mxu1 %v8229_v1 }
 0x309   : > { %8232 = vmatpush3.bf16.msra.mxu1 %v8231_v53 }
 0x30a   : > { %8234 = vmatprep.subr.bf16.mxu1 %v8233_v43 }
 0x30d   : > { %8236 = vmatpush3.bf16.msra.mxu1 %v8235_v57 }
 0x30e   : > { %8238 = vmatprep.subr.bf16.mxu1 %v8237_v52 }
 0x311   : > { %8240 = vmatpush3.bf16.msra.mxu1 %v8239_v27 }
 0x312   : > { %8242 = vmatprep.subr.bf16.mxu1 %v8241_v29 }
 0x315   : > { %8244 = vmatpush3.bf16.msra.mxu1 %v8243_v36 }
 0x316   : > { %8246 = vmatprep.subr.bf16.mxu1 %v8245_v19 }
 0x319   : > { %8248 = vmatpush3.bf16.msra.mxu1 %v8247_v58 }
 0x31a   : > { %8250 = vmatprep.subr.bf16.mxu1 %v8249_v17 }
 0x31d   : > { %8252 = vmatpush3.bf16.msra.mxu1 %v8251_v33 }
 0x320   : > { %6548 = vmatmul.mubr.f32.vlgmr.msra.gmra.mrb[34].mxu1 %v8754_v50 }
 0x3d3   : > { %v7719_v23 = vpop.f32.mrb[32].mxu1 }
 0x3d4   : > { %v7720_v0 = vpop.f32.mrb[33].mxu1 }
 0x3d5   : > { %v7721_v24 = vadd.f32 %v7720_v0, %v7719_v23 }
 0x3d7   : > { %6450 = vst [vmem:[%s465_s23] sm:$0x1] %v7721_v24 }
 0x3f3   : > { %v7754_v59 = vpop.f32.mrb[34].mxu1 }
 0x3f4   : > { %v7755_v30 = vpop.f32.mrb[35].mxu1 }
 0x3f5   : > { %v7756_v3 = vadd.f32 %v7755_v30, %v7754_v59 }
 0x3f7   : > { %6553 = vst [vmem:[%s465_s23 + $0x1] sm:$0x1] %v7756_v3 }
 0x3f8 PF: > { %s18_s26 = sadd.s32 1, %s8751_s26   ;;  %s10988_s24 = smov %s8747_s25 }
 0x3f9   : > { %p15_p5 = scmp.ge.s32.totalorder %s18_s26, 4   ;;  %s10989_s25 = smov %s10991_s27 }
 0x3fb   :  { %17 = sbr.rel (!%p15_p5) target bundleno = 2 (0x2), region = 107 }

</bundles_post_ra>
